<compile_context>
chip_gen: v6e
topology: v6e:2x2x1
jax: 0.10.0
libtpu: 0.0.40
codegen_flags: <defaults>
</compile_context>

<pallas_src>
from functools import partial

import numpy as np
import jax
import jax.numpy as jnp
from jax.experimental import pallas as pl
from jax.experimental.pallas import tpu as pltpu

# ----------------------------------------------------------------------------
# Model geometry (from the PyTorch spec: MNIST 28x28, Cin=1)
# ----------------------------------------------------------------------------
IMG = 28                    # input H = W
KS = 5                      # conv kernel size
C1, C2 = 10, 20             # conv1 / conv2 output channels
F1, F2 = 50, 10             # fc1 / fc2 output features
CONV1 = IMG - KS + 1        # 24
P1 = CONV1 // 2             # 12
CONV2 = P1 - KS + 1         # 8
P2 = CONV2 // 2             # 4
FLAT = C2 * P2 * P2         # 320

# Flat-frame lane geometry: activations are (channels, flat_position) with
# flat_position = h*28 + w of the ORIGINAL 28x28 frame; pooled maps stay on
# the same (dilated) lattice so every conv tap / pool phase is a unit-stride
# lane slice.
ROW = IMG                   # +1 image row          -> +28 lanes
SU, SV = 2 * ROW, 2         # +1 pool-1 row / col   -> +56 / +2 lanes
SA, SE = 2 * SU, 2 * SV     # +1 pool-2 row / col   -> +112 / +4 lanes

N_P2L = SA * (P2 - 1) + SE * (P2 - 1) + 1      # 349 dilated pool-2 lanes
N_Y2 = N_P2L + SU + SV                         # 407 conv2-output lanes needed
MAX_OFF2 = (KS - 1) * (SU + SV)                # 232 largest conv2 tap shift
N_T2 = N_Y2 + MAX_OFF2                         # 639 pooled-1 lanes needed
N_Y1 = N_T2 + ROW + 1                          # 668 conv1-output lanes needed
MAX_OFF1 = (KS - 1) * (ROW + 1)                # 116 largest conv1 tap shift
assert N_Y1 + MAX_OFF1 == IMG * IMG            # 784: raw flat image, no padding


# ----------------------------------------------------------------------------
# Fused kernel: one batch block (BB samples) per grid step
# ----------------------------------------------------------------------------
def _net_kernel(x_ref, w1_ref, b1_ref, w2_ref, b2_ref, s2_ref, ssp_ref,
                mflat_ref, wf1_ref, bf1_ref, wf2_ref, bf2_ref,
                o_ref, p2s_ref):
    bb = x_ref.shape[0]
    w1 = w1_ref[...]          # (10, 25)   f32
    b1 = b1_ref[...]          # (10, 1)    f32
    w2 = w2_ref[...]          # (20, 250)  bf16  (column = tap*10 + cin)
    b2 = b2_ref[...]          # (20, 1)    f32
    s2 = s2_ref[...]          # (349, 16)  bf16  pool-2 lattice selection
    ssp = ssp_ref[...]        # (16, 320)  bf16  spread q -> lane c*16+q (all c)
    mflat = mflat_ref[...]    # (20, 320)  f32   keeps only the own-channel band

    # ---- per-sample conv stage; writes one flattened (1, 320) row each -----
    @pl.loop(0, bb)
    def _(b):
        xs = x_ref[pl.ds(b, 1), :]                       # (1, 784) f32

        # conv1 (Cin=1): 25 shifted broadcast-MACs on the VPU; init from tap 0.
        y1 = w1[:, 0:1] * xs[:, 0:N_Y1]                  # (10, 668)
        for i in range(KS):
            for j in range(KS):
                if i == 0 and j == 0:
                    continue
                tap = i * KS + j
                off = i * ROW + j
                y1 = y1 + w1[:, tap:tap + 1] * xs[:, off:off + N_Y1]

        # fused 2x2 max-pool + bias + ReLU (phase-max of 4 lane shifts)
        t2 = jnp.maximum(jnp.maximum(y1[:, 0:N_T2], y1[:, 1:N_T2 + 1]),
                         jnp.maximum(y1[:, ROW:ROW + N_T2],
                                     y1[:, ROW + 1:ROW + 1 + N_T2]))
        p1 = jnp.maximum(t2 + b1, 0.0)                   # (10, 639) f32

        # conv2: stack all 25 shifted windows on the contraction axis and do
        # ONE (20,250)x(250,407) bf16 MXU dot with f32 accumulation.
        stk = jnp.concatenate(
            [p1[:, i * SU + j * SV: i * SU + j * SV + N_Y2]
             for i in range(KS) for j in range(KS)], axis=0)      # (250, 407)
        y2 = jnp.dot(w2, stk.astype(jnp.bfloat16),
                     preferred_element_type=jnp.float32)          # (20, 407)

        # fused 2x2 max-pool + bias + ReLU on the dilated lattice
        # TODO(synk): Dropout2d / F.dropout implemented as identity (eval-mode
        # semantics); training-mode stochastic masking is omitted.
        m2 = jnp.maximum(jnp.maximum(y2[:, 0:N_P2L], y2[:, SV:SV + N_P2L]),
                         jnp.maximum(y2[:, SU:SU + N_P2L],
                                     y2[:, SU + SV:SU + SV + N_P2L]))
        p2d = jnp.maximum(m2 + b2, 0.0).astype(jnp.bfloat16)      # (20, 349)

        # compact the 16 pool-2 lattice lanes (bf16 0/1 selection), then
        # flatten (20,16) -> (1,320) in PyTorch order via spread + mask + sum
        # over the channel (sublane) axis -- no in-kernel reshape needed.
        p2 = jnp.dot(p2d, s2, preferred_element_type=jnp.float32)  # (20, 16)
        z = jnp.dot(p2.astype(jnp.bfloat16), ssp,
                    preferred_element_type=jnp.float32)            # (20, 320)
        flat = jnp.sum(z * mflat, axis=0, keepdims=True)           # (1, 320)
        p2s_ref[pl.ds(b, 1), :] = flat

    # ---- block-level fc stage: real (BB, K) MXU dots ------------------------
    p2all = p2s_ref[...].astype(jnp.bfloat16)            # (BB, 320) bf16
    h = jnp.dot(p2all, wf1_ref[...],
                preferred_element_type=jnp.float32) + bf1_ref[...]
    h = jnp.maximum(h, 0.0)                              # (BB, 50) f32

    logits = jnp.dot(h.astype(jnp.bfloat16), wf2_ref[...],
                     preferred_element_type=jnp.float32) + bf2_ref[...]
    logits = logits - jnp.max(logits, axis=-1, keepdims=True)
    out = logits - jnp.log(jnp.sum(jnp.exp(logits), axis=-1, keepdims=True))
    o_ref[...] = out.astype(o_ref.dtype)                 # (BB, 10)


# ----------------------------------------------------------------------------
# Host-side wrapper
# ----------------------------------------------------------------------------
@partial(jax.jit, static_argnames=("block_batch",))
def net_forward(x, prep, block_batch=128):
    """x: (N, 1, 28, 28) f32 NCHW -> (N, 10) log-probabilities."""
    n = x.shape[0]
    bb = min(block_batch, ((n + 7) // 8) * 8)
    bb = max(8, (bb // 8) * 8)
    n_pad = ((n + bb - 1) // bb) * bb

    xf = x.reshape(n, IMG * IMG).astype(jnp.float32)
    if n_pad != n:
        xf = jnp.pad(xf, ((0, n_pad - n), (0, 0)))

    flops_per = 2 * (C1 * KS * KS * N_Y1 + C2 * KS * KS * C1 * N_Y2
                     + C2 * N_P2L * P2 * P2 + C2 * P2 * P2 * FLAT
                     + FLAT * F1 + F1 * F2)
    ce = pl.CostEstimate(
        flops=n_pad * flops_per,
        transcendentals=n_pad * (F2 + 1),
        bytes_accessed=n_pad * (IMG * IMG + F2) * 4 + 262_144)

    out = pl.pallas_call(
        _net_kernel,
        out_shape=jax.ShapeDtypeStruct((n_pad, F2), jnp.float32),
        grid=(n_pad // bb,),
        in_specs=[
            pl.BlockSpec((bb, IMG * IMG), lambda g: (g, 0)),        # x block
            pl.BlockSpec((C1, KS * KS), lambda g: (0, 0)),          # conv1 w
            pl.BlockSpec((C1, 1), lambda g: (0, 0)),                # conv1 b
            pl.BlockSpec((C2, KS * KS * C1), lambda g: (0, 0)),     # conv2 w
            pl.BlockSpec((C2, 1), lambda g: (0, 0)),                # conv2 b
            pl.BlockSpec((N_P2L, P2 * P2), lambda g: (0, 0)),       # pool-2 sel
            pl.BlockSpec((P2 * P2, FLAT), lambda g: (0, 0)),        # spread
            pl.BlockSpec((C2, FLAT), lambda g: (0, 0)),             # flat mask
            pl.BlockSpec((FLAT, F1), lambda g: (0, 0)),             # fc1 w
            pl.BlockSpec((1, F1), lambda g: (0, 0)),                # fc1 b
            pl.BlockSpec((F1, F2), lambda g: (0, 0)),               # fc2 w
            pl.BlockSpec((1, F2), lambda g: (0, 0)),                # fc2 b
        ],
        out_specs=pl.BlockSpec((bb, F2), lambda g: (g, 0)),
        scratch_shapes=[pltpu.VMEM((bb, FLAT), jnp.float32)],       # flat rows
        compiler_params=pltpu.CompilerParams(
            dimension_semantics=("parallel",)),
        cost_estimate=ce,
    )(xf, prep["w1"], prep["b1"], prep["w2"], prep["b2"], prep["s2"],
      prep["ssp"], prep["mflat"], prep["wf1"], prep["bf1"],
      prep["wf2"], prep["bf2"])
    return out[:n]


# ----------------------------------------------------------------------------
# Parameters: PyTorch-layout init + ONE-TIME rearrangement into kernel layouts
# ----------------------------------------------------------------------------
def init_params(key):
    ks = jax.random.split(key, 8)

    def u(k, shape, fan_in):
        bound = 1.0 / float(np.sqrt(fan_in))
        return jax.random.uniform(k, shape, jnp.float32, -bound, bound)

    return {
        "conv1_w": u(ks[0], (C1, 1, KS, KS), 1 * KS * KS),
        "conv1_b": u(ks[1], (C1,), 1 * KS * KS),
        "conv2_w": u(ks[2], (C2, C1, KS, KS), C1 * KS * KS),
        "conv2_b": u(ks[3], (C2,), C1 * KS * KS),
        "fc1_w": u(ks[4], (F1, FLAT), FLAT),    # torch Linear layout (out, in)
        "fc1_b": u(ks[5], (F1,), FLAT),
        "fc2_w": u(ks[6], (F2, F1), F1),
        "fc2_b": u(ks[7], (F2,), F1),
    }


def prepare_params(params):
    """One-time prep: pre-transpose / pre-pack weights; MXU operands in bf16."""
    w1 = params["conv1_w"].reshape(C1, KS * KS)                     # (10, 25)
    b1 = params["conv1_b"].reshape(C1, 1)
    # conv2 packed so column (tap*10 + cin) matches the in-kernel K-stack.
    w2 = (params["conv2_w"].transpose(0, 2, 3, 1)                   # (d,i,j,c)
          .reshape(C2, KS * KS * C1).astype(jnp.bfloat16))          # (20, 250)
    b2 = params["conv2_b"].reshape(C2, 1)
    wf1 = params["fc1_w"].T.astype(jnp.bfloat16)                    # (320, 50)
    bf1 = params["fc1_b"].reshape(1, F1)
    wf2 = params["fc2_w"].T.astype(jnp.bfloat16)                    # (50, 10)
    bf2 = params["fc2_b"].reshape(1, F2)

    # 0/1 matrix compacting the dilated pool-2 lattice lane (112a + 4e) into
    # the PyTorch flatten column q = a*4 + e.
    s2 = np.zeros((N_P2L, P2 * P2), np.float32)
    for a in range(P2):
        for e in range(P2):
            s2[SA * a + SE * e, a * P2 + e] = 1.0
    # spread / mask pair implementing the (20,16) -> (1,320) flatten:
    # ssp copies q into lane c*16+q for every c; mflat keeps channel c's band.
    ssp = np.zeros((P2 * P2, FLAT), np.float32)
    mflat = np.zeros((C2, FLAT), np.float32)
    for c in range(C2):
        for q in range(P2 * P2):
            ssp[q, c * P2 * P2 + q] = 1.0
            mflat[c, c * P2 * P2 + q] = 1.0

    return {"w1": w1, "b1": b1, "w2": w2, "b2": b2,
            "s2": jnp.asarray(s2, jnp.bfloat16),
            "ssp": jnp.asarray(ssp, jnp.bfloat16),
            "mflat": jnp.asarray(mflat, jnp.float32),
            "wf1": wf1, "bf1": bf1, "wf2": wf2, "bf2": bf2}


# ----------------------------------------------------------------------------
# Pure-JAX f32 reference (mirrors the PyTorch forward in eval mode)
# ----------------------------------------------------------------------------
def net_reference(x, params):
    def conv(h, w, b):
        out = jax.lax.conv_general_dilated(
            h, w, (1, 1), "VALID",
            dimension_numbers=("NCHW", "OIHW", "NCHW"))
        return out + b.reshape(1, -1, 1, 1)

    def pool(h):
        return jax.lax.reduce_window(h, -jnp.inf, jax.lax.max,
                                     (1, 1, 2, 2), (1, 1, 2, 2), "VALID")

    h = jax.nn.relu(pool(conv(x, params["conv1_w"], params["conv1_b"])))
    h = jax.nn.relu(pool(conv(h, params["conv2_w"], params["conv2_b"])))
    h = h.reshape(h.shape[0], -1)
    h = jax.nn.relu(h @ params["fc1_w"].T + params["fc1_b"])
    h = h @ params["fc2_w"].T + params["fc2_b"]
    return jax.nn.log_softmax(h, axis=-1)


if __name__ == "__main__":
    key = jax.random.PRNGKey(0)
    pkey, xkey = jax.random.split(key)
    params = init_params(pkey)
    prep = prepare_params(params)          # one-time weight prep, not per-forward
    x = jax.random.normal(xkey, (2, 1, IMG, IMG), jnp.float32)

    out = jax.block_until_ready(net_forward(x, prep))

    assert out.shape == (2, F2), out.shape
    # rows are log-probabilities
    assert jnp.allclose(jnp.sum(jnp.exp(out), axis=-1), 1.0, atol=1e-4)
    # match the f32 XLA reference (bf16 MXU inputs -> loose tolerance)
    ref = net_reference(x, params)
    err = float(jnp.max(jnp.abs(out - ref)))
    assert err < 5e-2, f"max |kernel - reference| = {err}"
    print("KERNEL_OK")
</pallas_src>

<mosaic_0001>
module attributes {stable_mosaic.version = 11 : i64} {
  func.func @_net_kernel(%arg0: i32, %arg1: memref<8x784xf32, #tpu.memory_space<vmem>>, %arg2: memref<10x25xf32, #tpu.memory_space<vmem>>, %arg3: memref<10x1xf32, #tpu.memory_space<vmem>>, %arg4: memref<20x250xbf16, #tpu.memory_space<vmem>>, %arg5: memref<20x1xf32, #tpu.memory_space<vmem>>, %arg6: memref<349x16xbf16, #tpu.memory_space<vmem>>, %arg7: memref<16x320xbf16, #tpu.memory_space<vmem>>, %arg8: memref<20x320xf32, #tpu.memory_space<vmem>>, %arg9: memref<320x50xbf16, #tpu.memory_space<vmem>>, %arg10: memref<1x50xf32, #tpu.memory_space<vmem>>, %arg11: memref<50x10xbf16, #tpu.memory_space<vmem>>, %arg12: memref<1x10xf32, #tpu.memory_space<vmem>>, %arg13: memref<8x10xf32, #tpu.memory_space<vmem>>, %arg14: memref<8x320xf32, #tpu.memory_space<vmem>>) attributes {dimension_semantics = [#tpu.dimension_semantics<parallel>], iteration_bounds = array<i64: 1>, scalar_prefetch = 0 : i64, scratch_operands = 1 : i64, tpu.core_type = #tpu.core_type<tc>, window_params = [{transform_indices = @transform_0, window_bounds = array<i64: 8, 784>}, {pipeline_mode = #tpu.pipeline_mode<synchronous>, transform_indices = @transform_1, window_bounds = array<i64: 10, 25>}, {pipeline_mode = #tpu.pipeline_mode<synchronous>, transform_indices = @transform_2, window_bounds = array<i64: 10, 1>}, {pipeline_mode = #tpu.pipeline_mode<synchronous>, transform_indices = @transform_3, window_bounds = array<i64: 20, 250>}, {pipeline_mode = #tpu.pipeline_mode<synchronous>, transform_indices = @transform_4, window_bounds = array<i64: 20, 1>}, {pipeline_mode = #tpu.pipeline_mode<synchronous>, transform_indices = @transform_5, window_bounds = array<i64: 349, 16>}, {pipeline_mode = #tpu.pipeline_mode<synchronous>, transform_indices = @transform_6, window_bounds = array<i64: 16, 320>}, {pipeline_mode = #tpu.pipeline_mode<synchronous>, transform_indices = @transform_7, window_bounds = array<i64: 20, 320>}, {pipeline_mode = #tpu.pipeline_mode<synchronous>, transform_indices = @transform_8, window_bounds = array<i64: 320, 50>}, {pipeline_mode = #tpu.pipeline_mode<synchronous>, transform_indices = @transform_9, window_bounds = array<i64: 1, 50>}, {pipeline_mode = #tpu.pipeline_mode<synchronous>, transform_indices = @transform_10, window_bounds = array<i64: 50, 10>}, {pipeline_mode = #tpu.pipeline_mode<synchronous>, transform_indices = @transform_11, window_bounds = array<i64: 1, 10>}, {transform_indices = @transform_12, window_bounds = array<i64: 8, 10>}]} {
    %c0 = arith.constant 0 : index
    %c0_0 = arith.constant 0 : index
    %0 = vector.load %arg2[%c0, %c0_0] : memref<10x25xf32, #tpu.memory_space<vmem>>, vector<10x25xf32>
    %c0_1 = arith.constant 0 : index
    %c0_2 = arith.constant 0 : index
    %1 = vector.load %arg3[%c0_1, %c0_2] : memref<10x1xf32, #tpu.memory_space<vmem>>, vector<10x1xf32>
    %c0_3 = arith.constant 0 : index
    %c0_4 = arith.constant 0 : index
    %2 = vector.load %arg4[%c0_3, %c0_4] : memref<20x250xbf16, #tpu.memory_space<vmem>>, vector<20x250xbf16>
    %c0_5 = arith.constant 0 : index
    %c0_6 = arith.constant 0 : index
    %3 = vector.load %arg5[%c0_5, %c0_6] : memref<20x1xf32, #tpu.memory_space<vmem>>, vector<20x1xf32>
    %c0_7 = arith.constant 0 : index
    %c0_8 = arith.constant 0 : index
    %4 = vector.load %arg6[%c0_7, %c0_8] : memref<349x16xbf16, #tpu.memory_space<vmem>>, vector<349x16xbf16>
    %c0_9 = arith.constant 0 : index
    %c0_10 = arith.constant 0 : index
    %5 = vector.load %arg7[%c0_9, %c0_10] : memref<16x320xbf16, #tpu.memory_space<vmem>>, vector<16x320xbf16>
    %c0_11 = arith.constant 0 : index
    %c0_12 = arith.constant 0 : index
    %6 = vector.load %arg8[%c0_11, %c0_12] : memref<20x320xf32, #tpu.memory_space<vmem>>, vector<20x320xf32>
    %c0_i32 = arith.constant 0 : i32
    %c8_i32 = arith.constant 8 : i32
    %7 = arith.addi %c0_i32, %c8_i32 : i32
    %c1_i32 = arith.constant 1 : i32
    scf.for %arg15 = %c0_i32 to %7 step %c1_i32  : i32 {
      %c1_i32_30 = arith.constant 1 : i32
      %34 = arith.muli %arg15, %c1_i32_30 : i32
      %c0_i32_31 = arith.constant 0 : i32
      %35 = arith.addi %c0_i32_31, %34 : i32
      %36 = arith.index_cast %35 : i32 to index
      %c0_32 = arith.constant 0 : index
      %37 = vector.load %arg1[%36, %c0_32] : memref<8x784xf32, #tpu.memory_space<vmem>>, vector<1x784xf32>
      %38 = vector.extract_strided_slice %0 {offsets = [0, 0], sizes = [10, 1], strides = [1, 1]} : vector<10x25xf32> to vector<10x1xf32>
      %39 = vector.extract_strided_slice %37 {offsets = [0, 0], sizes = [1, 668], strides = [1, 1]} : vector<1x784xf32> to vector<1x668xf32>
      %40 = vector.broadcast %38 : vector<10x1xf32> to vector<10x668xf32>
      %41 = vector.broadcast %39 : vector<1x668xf32> to vector<10x668xf32>
      %42 = arith.mulf %40, %41 : vector<10x668xf32>
      %43 = vector.extract_strided_slice %0 {offsets = [0, 1], sizes = [10, 1], strides = [1, 1]} : vector<10x25xf32> to vector<10x1xf32>
      %44 = vector.extract_strided_slice %37 {offsets = [0, 1], sizes = [1, 668], strides = [1, 1]} : vector<1x784xf32> to vector<1x668xf32>
      %45 = vector.broadcast %43 : vector<10x1xf32> to vector<10x668xf32>
      %46 = vector.broadcast %44 : vector<1x668xf32> to vector<10x668xf32>
      %47 = arith.mulf %45, %46 : vector<10x668xf32>
      %48 = arith.addf %42, %47 : vector<10x668xf32>
      %49 = vector.extract_strided_slice %0 {offsets = [0, 2], sizes = [10, 1], strides = [1, 1]} : vector<10x25xf32> to vector<10x1xf32>
      %50 = vector.extract_strided_slice %37 {offsets = [0, 2], sizes = [1, 668], strides = [1, 1]} : vector<1x784xf32> to vector<1x668xf32>
      %51 = vector.broadcast %49 : vector<10x1xf32> to vector<10x668xf32>
      %52 = vector.broadcast %50 : vector<1x668xf32> to vector<10x668xf32>
      %53 = arith.mulf %51, %52 : vector<10x668xf32>
      %54 = arith.addf %48, %53 : vector<10x668xf32>
      %55 = vector.extract_strided_slice %0 {offsets = [0, 3], sizes = [10, 1], strides = [1, 1]} : vector<10x25xf32> to vector<10x1xf32>
      %56 = vector.extract_strided_slice %37 {offsets = [0, 3], sizes = [1, 668], strides = [1, 1]} : vector<1x784xf32> to vector<1x668xf32>
      %57 = vector.broadcast %55 : vector<10x1xf32> to vector<10x668xf32>
      %58 = vector.broadcast %56 : vector<1x668xf32> to vector<10x668xf32>
      %59 = arith.mulf %57, %58 : vector<10x668xf32>
      %60 = arith.addf %54, %59 : vector<10x668xf32>
      %61 = vector.extract_strided_slice %0 {offsets = [0, 4], sizes = [10, 1], strides = [1, 1]} : vector<10x25xf32> to vector<10x1xf32>
      %62 = vector.extract_strided_slice %37 {offsets = [0, 4], sizes = [1, 668], strides = [1, 1]} : vector<1x784xf32> to vector<1x668xf32>
      %63 = vector.broadcast %61 : vector<10x1xf32> to vector<10x668xf32>
      %64 = vector.broadcast %62 : vector<1x668xf32> to vector<10x668xf32>
      %65 = arith.mulf %63, %64 : vector<10x668xf32>
      %66 = arith.addf %60, %65 : vector<10x668xf32>
      %67 = vector.extract_strided_slice %0 {offsets = [0, 5], sizes = [10, 1], strides = [1, 1]} : vector<10x25xf32> to vector<10x1xf32>
      %68 = vector.extract_strided_slice %37 {offsets = [0, 28], sizes = [1, 668], strides = [1, 1]} : vector<1x784xf32> to vector<1x668xf32>
      %69 = vector.broadcast %67 : vector<10x1xf32> to vector<10x668xf32>
      %70 = vector.broadcast %68 : vector<1x668xf32> to vector<10x668xf32>
      %71 = arith.mulf %69, %70 : vector<10x668xf32>
      %72 = arith.addf %66, %71 : vector<10x668xf32>
      %73 = vector.extract_strided_slice %0 {offsets = [0, 6], sizes = [10, 1], strides = [1, 1]} : vector<10x25xf32> to vector<10x1xf32>
      %74 = vector.extract_strided_slice %37 {offsets = [0, 29], sizes = [1, 668], strides = [1, 1]} : vector<1x784xf32> to vector<1x668xf32>
      %75 = vector.broadcast %73 : vector<10x1xf32> to vector<10x668xf32>
      %76 = vector.broadcast %74 : vector<1x668xf32> to vector<10x668xf32>
      %77 = arith.mulf %75, %76 : vector<10x668xf32>
      %78 = arith.addf %72, %77 : vector<10x668xf32>
      %79 = vector.extract_strided_slice %0 {offsets = [0, 7], sizes = [10, 1], strides = [1, 1]} : vector<10x25xf32> to vector<10x1xf32>
      %80 = vector.extract_strided_slice %37 {offsets = [0, 30], sizes = [1, 668], strides = [1, 1]} : vector<1x784xf32> to vector<1x668xf32>
      %81 = vector.broadcast %79 : vector<10x1xf32> to vector<10x668xf32>
      %82 = vector.broadcast %80 : vector<1x668xf32> to vector<10x668xf32>
      %83 = arith.mulf %81, %82 : vector<10x668xf32>
      %84 = arith.addf %78, %83 : vector<10x668xf32>
      %85 = vector.extract_strided_slice %0 {offsets = [0, 8], sizes = [10, 1], strides = [1, 1]} : vector<10x25xf32> to vector<10x1xf32>
      %86 = vector.extract_strided_slice %37 {offsets = [0, 31], sizes = [1, 668], strides = [1, 1]} : vector<1x784xf32> to vector<1x668xf32>
      %87 = vector.broadcast %85 : vector<10x1xf32> to vector<10x668xf32>
      %88 = vector.broadcast %86 : vector<1x668xf32> to vector<10x668xf32>
      %89 = arith.mulf %87, %88 : vector<10x668xf32>
      %90 = arith.addf %84, %89 : vector<10x668xf32>
      %91 = vector.extract_strided_slice %0 {offsets = [0, 9], sizes = [10, 1], strides = [1, 1]} : vector<10x25xf32> to vector<10x1xf32>
      %92 = vector.extract_strided_slice %37 {offsets = [0, 32], sizes = [1, 668], strides = [1, 1]} : vector<1x784xf32> to vector<1x668xf32>
      %93 = vector.broadcast %91 : vector<10x1xf32> to vector<10x668xf32>
      %94 = vector.broadcast %92 : vector<1x668xf32> to vector<10x668xf32>
      %95 = arith.mulf %93, %94 : vector<10x668xf32>
      %96 = arith.addf %90, %95 : vector<10x668xf32>
      %97 = vector.extract_strided_slice %0 {offsets = [0, 10], sizes = [10, 1], strides = [1, 1]} : vector<10x25xf32> to vector<10x1xf32>
      %98 = vector.extract_strided_slice %37 {offsets = [0, 56], sizes = [1, 668], strides = [1, 1]} : vector<1x784xf32> to vector<1x668xf32>
      %99 = vector.broadcast %97 : vector<10x1xf32> to vector<10x668xf32>
      %100 = vector.broadcast %98 : vector<1x668xf32> to vector<10x668xf32>
      %101 = arith.mulf %99, %100 : vector<10x668xf32>
      %102 = arith.addf %96, %101 : vector<10x668xf32>
      %103 = vector.extract_strided_slice %0 {offsets = [0, 11], sizes = [10, 1], strides = [1, 1]} : vector<10x25xf32> to vector<10x1xf32>
      %104 = vector.extract_strided_slice %37 {offsets = [0, 57], sizes = [1, 668], strides = [1, 1]} : vector<1x784xf32> to vector<1x668xf32>
      %105 = vector.broadcast %103 : vector<10x1xf32> to vector<10x668xf32>
      %106 = vector.broadcast %104 : vector<1x668xf32> to vector<10x668xf32>
      %107 = arith.mulf %105, %106 : vector<10x668xf32>
      %108 = arith.addf %102, %107 : vector<10x668xf32>
      %109 = vector.extract_strided_slice %0 {offsets = [0, 12], sizes = [10, 1], strides = [1, 1]} : vector<10x25xf32> to vector<10x1xf32>
      %110 = vector.extract_strided_slice %37 {offsets = [0, 58], sizes = [1, 668], strides = [1, 1]} : vector<1x784xf32> to vector<1x668xf32>
      %111 = vector.broadcast %109 : vector<10x1xf32> to vector<10x668xf32>
      %112 = vector.broadcast %110 : vector<1x668xf32> to vector<10x668xf32>
      %113 = arith.mulf %111, %112 : vector<10x668xf32>
      %114 = arith.addf %108, %113 : vector<10x668xf32>
      %115 = vector.extract_strided_slice %0 {offsets = [0, 13], sizes = [10, 1], strides = [1, 1]} : vector<10x25xf32> to vector<10x1xf32>
      %116 = vector.extract_strided_slice %37 {offsets = [0, 59], sizes = [1, 668], strides = [1, 1]} : vector<1x784xf32> to vector<1x668xf32>
      %117 = vector.broadcast %115 : vector<10x1xf32> to vector<10x668xf32>
      %118 = vector.broadcast %116 : vector<1x668xf32> to vector<10x668xf32>
      %119 = arith.mulf %117, %118 : vector<10x668xf32>
      %120 = arith.addf %114, %119 : vector<10x668xf32>
      %121 = vector.extract_strided_slice %0 {offsets = [0, 14], sizes = [10, 1], strides = [1, 1]} : vector<10x25xf32> to vector<10x1xf32>
      %122 = vector.extract_strided_slice %37 {offsets = [0, 60], sizes = [1, 668], strides = [1, 1]} : vector<1x784xf32> to vector<1x668xf32>
      %123 = vector.broadcast %121 : vector<10x1xf32> to vector<10x668xf32>
      %124 = vector.broadcast %122 : vector<1x668xf32> to vector<10x668xf32>
      %125 = arith.mulf %123, %124 : vector<10x668xf32>
      %126 = arith.addf %120, %125 : vector<10x668xf32>
      %127 = vector.extract_strided_slice %0 {offsets = [0, 15], sizes = [10, 1], strides = [1, 1]} : vector<10x25xf32> to vector<10x1xf32>
      %128 = vector.extract_strided_slice %37 {offsets = [0, 84], sizes = [1, 668], strides = [1, 1]} : vector<1x784xf32> to vector<1x668xf32>
      %129 = vector.broadcast %127 : vector<10x1xf32> to vector<10x668xf32>
      %130 = vector.broadcast %128 : vector<1x668xf32> to vector<10x668xf32>
      %131 = arith.mulf %129, %130 : vector<10x668xf32>
      %132 = arith.addf %126, %131 : vector<10x668xf32>
      %133 = vector.extract_strided_slice %0 {offsets = [0, 16], sizes = [10, 1], strides = [1, 1]} : vector<10x25xf32> to vector<10x1xf32>
      %134 = vector.extract_strided_slice %37 {offsets = [0, 85], sizes = [1, 668], strides = [1, 1]} : vector<1x784xf32> to vector<1x668xf32>
      %135 = vector.broadcast %133 : vector<10x1xf32> to vector<10x668xf32>
      %136 = vector.broadcast %134 : vector<1x668xf32> to vector<10x668xf32>
      %137 = arith.mulf %135, %136 : vector<10x668xf32>
      %138 = arith.addf %132, %137 : vector<10x668xf32>
      %139 = vector.extract_strided_slice %0 {offsets = [0, 17], sizes = [10, 1], strides = [1, 1]} : vector<10x25xf32> to vector<10x1xf32>
      %140 = vector.extract_strided_slice %37 {offsets = [0, 86], sizes = [1, 668], strides = [1, 1]} : vector<1x784xf32> to vector<1x668xf32>
      %141 = vector.broadcast %139 : vector<10x1xf32> to vector<10x668xf32>
      %142 = vector.broadcast %140 : vector<1x668xf32> to vector<10x668xf32>
      %143 = arith.mulf %141, %142 : vector<10x668xf32>
      %144 = arith.addf %138, %143 : vector<10x668xf32>
      %145 = vector.extract_strided_slice %0 {offsets = [0, 18], sizes = [10, 1], strides = [1, 1]} : vector<10x25xf32> to vector<10x1xf32>
      %146 = vector.extract_strided_slice %37 {offsets = [0, 87], sizes = [1, 668], strides = [1, 1]} : vector<1x784xf32> to vector<1x668xf32>
      %147 = vector.broadcast %145 : vector<10x1xf32> to vector<10x668xf32>
      %148 = vector.broadcast %146 : vector<1x668xf32> to vector<10x668xf32>
      %149 = arith.mulf %147, %148 : vector<10x668xf32>
      %150 = arith.addf %144, %149 : vector<10x668xf32>
      %151 = vector.extract_strided_slice %0 {offsets = [0, 19], sizes = [10, 1], strides = [1, 1]} : vector<10x25xf32> to vector<10x1xf32>
      %152 = vector.extract_strided_slice %37 {offsets = [0, 88], sizes = [1, 668], strides = [1, 1]} : vector<1x784xf32> to vector<1x668xf32>
      %153 = vector.broadcast %151 : vector<10x1xf32> to vector<10x668xf32>
      %154 = vector.broadcast %152 : vector<1x668xf32> to vector<10x668xf32>
      %155 = arith.mulf %153, %154 : vector<10x668xf32>
      %156 = arith.addf %150, %155 : vector<10x668xf32>
      %157 = vector.extract_strided_slice %0 {offsets = [0, 20], sizes = [10, 1], strides = [1, 1]} : vector<10x25xf32> to vector<10x1xf32>
      %158 = vector.extract_strided_slice %37 {offsets = [0, 112], sizes = [1, 668], strides = [1, 1]} : vector<1x784xf32> to vector<1x668xf32>
      %159 = vector.broadcast %157 : vector<10x1xf32> to vector<10x668xf32>
      %160 = vector.broadcast %158 : vector<1x668xf32> to vector<10x668xf32>
      %161 = arith.mulf %159, %160 : vector<10x668xf32>
      %162 = arith.addf %156, %161 : vector<10x668xf32>
      %163 = vector.extract_strided_slice %0 {offsets = [0, 21], sizes = [10, 1], strides = [1, 1]} : vector<10x25xf32> to vector<10x1xf32>
      %164 = vector.extract_strided_slice %37 {offsets = [0, 113], sizes = [1, 668], strides = [1, 1]} : vector<1x784xf32> to vector<1x668xf32>
      %165 = vector.broadcast %163 : vector<10x1xf32> to vector<10x668xf32>
      %166 = vector.broadcast %164 : vector<1x668xf32> to vector<10x668xf32>
      %167 = arith.mulf %165, %166 : vector<10x668xf32>
      %168 = arith.addf %162, %167 : vector<10x668xf32>
      %169 = vector.extract_strided_slice %0 {offsets = [0, 22], sizes = [10, 1], strides = [1, 1]} : vector<10x25xf32> to vector<10x1xf32>
      %170 = vector.extract_strided_slice %37 {offsets = [0, 114], sizes = [1, 668], strides = [1, 1]} : vector<1x784xf32> to vector<1x668xf32>
      %171 = vector.broadcast %169 : vector<10x1xf32> to vector<10x668xf32>
      %172 = vector.broadcast %170 : vector<1x668xf32> to vector<10x668xf32>
      %173 = arith.mulf %171, %172 : vector<10x668xf32>
      %174 = arith.addf %168, %173 : vector<10x668xf32>
      %175 = vector.extract_strided_slice %0 {offsets = [0, 23], sizes = [10, 1], strides = [1, 1]} : vector<10x25xf32> to vector<10x1xf32>
      %176 = vector.extract_strided_slice %37 {offsets = [0, 115], sizes = [1, 668], strides = [1, 1]} : vector<1x784xf32> to vector<1x668xf32>
      %177 = vector.broadcast %175 : vector<10x1xf32> to vector<10x668xf32>
      %178 = vector.broadcast %176 : vector<1x668xf32> to vector<10x668xf32>
      %179 = arith.mulf %177, %178 : vector<10x668xf32>
      %180 = arith.addf %174, %179 : vector<10x668xf32>
      %181 = vector.extract_strided_slice %0 {offsets = [0, 24], sizes = [10, 1], strides = [1, 1]} : vector<10x25xf32> to vector<10x1xf32>
      %182 = vector.extract_strided_slice %37 {offsets = [0, 116], sizes = [1, 668], strides = [1, 1]} : vector<1x784xf32> to vector<1x668xf32>
      %183 = vector.broadcast %181 : vector<10x1xf32> to vector<10x668xf32>
      %184 = vector.broadcast %182 : vector<1x668xf32> to vector<10x668xf32>
      %185 = arith.mulf %183, %184 : vector<10x668xf32>
      %186 = arith.addf %180, %185 : vector<10x668xf32>
      %187 = vector.extract_strided_slice %186 {offsets = [0, 0], sizes = [10, 639], strides = [1, 1]} : vector<10x668xf32> to vector<10x639xf32>
      %188 = vector.extract_strided_slice %186 {offsets = [0, 1], sizes = [10, 639], strides = [1, 1]} : vector<10x668xf32> to vector<10x639xf32>
      %189 = arith.maximumf %187, %188 : vector<10x639xf32>
      %190 = vector.extract_strided_slice %186 {offsets = [0, 28], sizes = [10, 639], strides = [1, 1]} : vector<10x668xf32> to vector<10x639xf32>
      %191 = vector.extract_strided_slice %186 {offsets = [0, 29], sizes = [10, 639], strides = [1, 1]} : vector<10x668xf32> to vector<10x639xf32>
      %192 = arith.maximumf %190, %191 : vector<10x639xf32>
      %193 = arith.maximumf %189, %192 : vector<10x639xf32>
      %194 = vector.broadcast %1 : vector<10x1xf32> to vector<10x639xf32>
      %195 = arith.addf %193, %194 : vector<10x639xf32>
      %cst_33 = arith.constant 0.000000e+00 : f32
      %196 = vector.broadcast %cst_33 : f32 to vector<10x639xf32>
      %197 = arith.maximumf %195, %196 : vector<10x639xf32>
      %198 = vector.extract_strided_slice %197 {offsets = [0, 0], sizes = [10, 407], strides = [1, 1]} : vector<10x639xf32> to vector<10x407xf32>
      %199 = vector.extract_strided_slice %197 {offsets = [0, 2], sizes = [10, 407], strides = [1, 1]} : vector<10x639xf32> to vector<10x407xf32>
      %200 = vector.extract_strided_slice %197 {offsets = [0, 4], sizes = [10, 407], strides = [1, 1]} : vector<10x639xf32> to vector<10x407xf32>
      %201 = vector.extract_strided_slice %197 {offsets = [0, 6], sizes = [10, 407], strides = [1, 1]} : vector<10x639xf32> to vector<10x407xf32>
      %202 = vector.extract_strided_slice %197 {offsets = [0, 8], sizes = [10, 407], strides = [1, 1]} : vector<10x639xf32> to vector<10x407xf32>
      %203 = vector.extract_strided_slice %197 {offsets = [0, 56], sizes = [10, 407], strides = [1, 1]} : vector<10x639xf32> to vector<10x407xf32>
      %204 = vector.extract_strided_slice %197 {offsets = [0, 58], sizes = [10, 407], strides = [1, 1]} : vector<10x639xf32> to vector<10x407xf32>
      %205 = vector.extract_strided_slice %197 {offsets = [0, 60], sizes = [10, 407], strides = [1, 1]} : vector<10x639xf32> to vector<10x407xf32>
      %206 = vector.extract_strided_slice %197 {offsets = [0, 62], sizes = [10, 407], strides = [1, 1]} : vector<10x639xf32> to vector<10x407xf32>
      %207 = vector.extract_strided_slice %197 {offsets = [0, 64], sizes = [10, 407], strides = [1, 1]} : vector<10x639xf32> to vector<10x407xf32>
      %208 = vector.extract_strided_slice %197 {offsets = [0, 112], sizes = [10, 407], strides = [1, 1]} : vector<10x639xf32> to vector<10x407xf32>
      %209 = vector.extract_strided_slice %197 {offsets = [0, 114], sizes = [10, 407], strides = [1, 1]} : vector<10x639xf32> to vector<10x407xf32>
      %210 = vector.extract_strided_slice %197 {offsets = [0, 116], sizes = [10, 407], strides = [1, 1]} : vector<10x639xf32> to vector<10x407xf32>
      %211 = vector.extract_strided_slice %197 {offsets = [0, 118], sizes = [10, 407], strides = [1, 1]} : vector<10x639xf32> to vector<10x407xf32>
      %212 = vector.extract_strided_slice %197 {offsets = [0, 120], sizes = [10, 407], strides = [1, 1]} : vector<10x639xf32> to vector<10x407xf32>
      %213 = vector.extract_strided_slice %197 {offsets = [0, 168], sizes = [10, 407], strides = [1, 1]} : vector<10x639xf32> to vector<10x407xf32>
      %214 = vector.extract_strided_slice %197 {offsets = [0, 170], sizes = [10, 407], strides = [1, 1]} : vector<10x639xf32> to vector<10x407xf32>
      %215 = vector.extract_strided_slice %197 {offsets = [0, 172], sizes = [10, 407], strides = [1, 1]} : vector<10x639xf32> to vector<10x407xf32>
      %216 = vector.extract_strided_slice %197 {offsets = [0, 174], sizes = [10, 407], strides = [1, 1]} : vector<10x639xf32> to vector<10x407xf32>
      %217 = vector.extract_strided_slice %197 {offsets = [0, 176], sizes = [10, 407], strides = [1, 1]} : vector<10x639xf32> to vector<10x407xf32>
      %218 = vector.extract_strided_slice %197 {offsets = [0, 224], sizes = [10, 407], strides = [1, 1]} : vector<10x639xf32> to vector<10x407xf32>
      %219 = vector.extract_strided_slice %197 {offsets = [0, 226], sizes = [10, 407], strides = [1, 1]} : vector<10x639xf32> to vector<10x407xf32>
      %220 = vector.extract_strided_slice %197 {offsets = [0, 228], sizes = [10, 407], strides = [1, 1]} : vector<10x639xf32> to vector<10x407xf32>
      %221 = vector.extract_strided_slice %197 {offsets = [0, 230], sizes = [10, 407], strides = [1, 1]} : vector<10x639xf32> to vector<10x407xf32>
      %222 = vector.extract_strided_slice %197 {offsets = [0, 232], sizes = [10, 407], strides = [1, 1]} : vector<10x639xf32> to vector<10x407xf32>
      %223 = tpu.concatenate %198, %199, %200, %201, %202, %203, %204, %205, %206, %207, %208, %209, %210, %211, %212, %213 in 0 : vector<10x407xf32>, vector<10x407xf32>, vector<10x407xf32>, vector<10x407xf32>, vector<10x407xf32>, vector<10x407xf32>, vector<10x407xf32>, vector<10x407xf32>, vector<10x407xf32>, vector<10x407xf32>, vector<10x407xf32>, vector<10x407xf32>, vector<10x407xf32>, vector<10x407xf32>, vector<10x407xf32>, vector<10x407xf32> -> vector<160x407xf32>
      %224 = tpu.concatenate %214, %215, %216, %217, %218, %219, %220, %221, %222 in 0 : vector<10x407xf32>, vector<10x407xf32>, vector<10x407xf32>, vector<10x407xf32>, vector<10x407xf32>, vector<10x407xf32>, vector<10x407xf32>, vector<10x407xf32>, vector<10x407xf32> -> vector<90x407xf32>
      %225 = tpu.concatenate %223, %224 in 0 : vector<160x407xf32>, vector<90x407xf32> -> vector<250x407xf32>
      %226 = arith.truncf %225 : vector<250x407xf32> to vector<250x407xbf16>
      %cst_34 = arith.constant dense<0.000000e+00> : vector<20x407xf32>
      %227 = tpu.matmul %2, %226, %cst_34 {dimension_numbers = #tpu.dot_dimension_numbers<[1], [0], [0], [1], [0, 0, 1, 1], [], []>} : vector<20x250xbf16>, vector<250x407xbf16>, vector<20x407xf32> -> vector<20x407xf32>
      %228 = vector.extract_strided_slice %227 {offsets = [0, 0], sizes = [20, 349], strides = [1, 1]} : vector<20x407xf32> to vector<20x349xf32>
      %229 = vector.extract_strided_slice %227 {offsets = [0, 2], sizes = [20, 349], strides = [1, 1]} : vector<20x407xf32> to vector<20x349xf32>
      %230 = arith.maximumf %228, %229 : vector<20x349xf32>
      %231 = vector.extract_strided_slice %227 {offsets = [0, 56], sizes = [20, 349], strides = [1, 1]} : vector<20x407xf32> to vector<20x349xf32>
      %232 = vector.extract_strided_slice %227 {offsets = [0, 58], sizes = [20, 349], strides = [1, 1]} : vector<20x407xf32> to vector<20x349xf32>
      %233 = arith.maximumf %231, %232 : vector<20x349xf32>
      %234 = arith.maximumf %230, %233 : vector<20x349xf32>
      %235 = vector.broadcast %3 : vector<20x1xf32> to vector<20x349xf32>
      %236 = arith.addf %234, %235 : vector<20x349xf32>
      %cst_35 = arith.constant 0.000000e+00 : f32
      %237 = vector.broadcast %cst_35 : f32 to vector<20x349xf32>
      %238 = arith.maximumf %236, %237 : vector<20x349xf32>
      %239 = arith.truncf %238 : vector<20x349xf32> to vector<20x349xbf16>
      %cst_36 = arith.constant dense<0.000000e+00> : vector<20x16xf32>
      %240 = tpu.matmul %239, %4, %cst_36 {dimension_numbers = #tpu.dot_dimension_numbers<[1], [0], [0], [1], [0, 0, 1, 1], [], []>} : vector<20x349xbf16>, vector<349x16xbf16>, vector<20x16xf32> -> vector<20x16xf32>
      %241 = arith.truncf %240 : vector<20x16xf32> to vector<20x16xbf16>
      %cst_37 = arith.constant dense<0.000000e+00> : vector<20x320xf32>
      %242 = tpu.matmul %241, %5, %cst_37 {dimension_numbers = #tpu.dot_dimension_numbers<[1], [0], [0], [1], [0, 0, 1, 1], [], []>} : vector<20x16xbf16>, vector<16x320xbf16>, vector<20x320xf32> -> vector<20x320xf32>
      %243 = arith.mulf %242, %6 : vector<20x320xf32>
      %cst_38 = arith.constant dense<0.000000e+00> : vector<320xf32>
      %244 = vector.multi_reduction <add>, %243, %cst_38 [0] : vector<20x320xf32> to vector<320xf32>
      %245 = vector.shape_cast %244 : vector<320xf32> to vector<1x320xf32>
      %246 = arith.index_cast %35 : i32 to index
      %c0_39 = arith.constant 0 : index
      %247 = vector.load %arg14[%246, %c0_39] : memref<8x320xf32, #tpu.memory_space<vmem>>, vector<1x320xf32>
      tpu.vector_store %arg14[%246, %c0_39], %245 {strides = array<i32>} : memref<8x320xf32, #tpu.memory_space<vmem>>, vector<1x320xf32>,
    }
    %c8_i32_13 = arith.constant 8 : i32
    %c0_14 = arith.constant 0 : index
    %c0_15 = arith.constant 0 : index
    %8 = vector.load %arg14[%c0_14, %c0_15] : memref<8x320xf32, #tpu.memory_space<vmem>>, vector<8x320xf32>
    %9 = arith.truncf %8 : vector<8x320xf32> to vector<8x320xbf16>
    %c0_16 = arith.constant 0 : index
    %c0_17 = arith.constant 0 : index
    %10 = vector.load %arg9[%c0_16, %c0_17] : memref<320x50xbf16, #tpu.memory_space<vmem>>, vector<320x50xbf16>
    %cst = arith.constant dense<0.000000e+00> : vector<8x50xf32>
    %11 = tpu.matmul %9, %10, %cst {dimension_numbers = #tpu.dot_dimension_numbers<[1], [0], [0], [1], [0, 0, 1, 1], [], []>} : vector<8x320xbf16>, vector<320x50xbf16>, vector<8x50xf32> -> vector<8x50xf32>
    %c0_18 = arith.constant 0 : index
    %c0_19 = arith.constant 0 : index
    %12 = vector.load %arg10[%c0_18, %c0_19] : memref<1x50xf32, #tpu.memory_space<vmem>>, vector<1x50xf32>
    %13 = vector.broadcast %12 : vector<1x50xf32> to vector<8x50xf32>
    %14 = arith.addf %11, %13 : vector<8x50xf32>
    %cst_20 = arith.constant 0.000000e+00 : f32
    %15 = vector.broadcast %cst_20 : f32 to vector<8x50xf32>
    %16 = arith.maximumf %14, %15 : vector<8x50xf32>
    %17 = arith.truncf %16 : vector<8x50xf32> to vector<8x50xbf16>
    %c0_21 = arith.constant 0 : index
    %c0_22 = arith.constant 0 : index
    %18 = vector.load %arg11[%c0_21, %c0_22] : memref<50x10xbf16, #tpu.memory_space<vmem>>, vector<50x10xbf16>
    %cst_23 = arith.constant dense<0.000000e+00> : vector<8x10xf32>
    %19 = tpu.matmul %17, %18, %cst_23 {dimension_numbers = #tpu.dot_dimension_numbers<[1], [0], [0], [1], [0, 0, 1, 1], [], []>} : vector<8x50xbf16>, vector<50x10xbf16>, vector<8x10xf32> -> vector<8x10xf32>
    %c0_24 = arith.constant 0 : index
    %c0_25 = arith.constant 0 : index
    %20 = vector.load %arg12[%c0_24, %c0_25] : memref<1x10xf32, #tpu.memory_space<vmem>>, vector<1x10xf32>
    %21 = vector.broadcast %20 : vector<1x10xf32> to vector<8x10xf32>
    %22 = arith.addf %19, %21 : vector<8x10xf32>
    %cst_26 = arith.constant dense<0xFF800000> : vector<8xf32>
    %23 = vector.multi_reduction <maximumf>, %22, %cst_26 [1] : vector<8x10xf32> to vector<8xf32>
    %24 = vector.shape_cast %23 : vector<8xf32> to vector<8x1xf32>
    %25 = vector.broadcast %24 : vector<8x1xf32> to vector<8x10xf32>
    %26 = arith.subf %22, %25 : vector<8x10xf32>
    %27 = math.exp %26 : vector<8x10xf32>
    %cst_27 = arith.constant dense<0.000000e+00> : vector<8xf32>
    %28 = vector.multi_reduction <add>, %27, %cst_27 [1] : vector<8x10xf32> to vector<8xf32>
    %29 = vector.shape_cast %28 : vector<8xf32> to vector<8x1xf32>
    %30 = math.log %29 : vector<8x1xf32>
    %31 = vector.broadcast %30 : vector<8x1xf32> to vector<8x10xf32>
    %32 = arith.subf %26, %31 : vector<8x10xf32>
    %c0_28 = arith.constant 0 : index
    %c0_29 = arith.constant 0 : index
    %33 = vector.load %arg13[%c0_28, %c0_29] : memref<8x10xf32, #tpu.memory_space<vmem>>, vector<8x10xf32>
    tpu.vector_store %arg13[%c0_28, %c0_29], %32 {strides = array<i32>} : memref<8x10xf32, #tpu.memory_space<vmem>>, vector<8x10xf32>,
    return
  }
  func.func @transform_0(%arg0: i32) -> (i32, i32) {
    %c0_i32 = arith.constant 0 : i32
    %c0_i32_0 = arith.constant 0 : i32
    return %arg0, %c0_i32 : i32, i32
  }
  func.func @transform_1(%arg0: i32) -> (i32, i32) {
    %c0_i32 = arith.constant 0 : i32
    %c0_i32_0 = arith.constant 0 : i32
    %c0_i32_1 = arith.constant 0 : i32
    return %c0_i32, %c0_i32_0 : i32, i32
  }
  func.func @transform_2(%arg0: i32) -> (i32, i32) {
    %c0_i32 = arith.constant 0 : i32
    %c0_i32_0 = arith.constant 0 : i32
    %c0_i32_1 = arith.constant 0 : i32
    return %c0_i32, %c0_i32_0 : i32, i32
  }
  func.func @transform_3(%arg0: i32) -> (i32, i32) {
    %c0_i32 = arith.constant 0 : i32
    %c0_i32_0 = arith.constant 0 : i32
    %c0_i32_1 = arith.constant 0 : i32
    return %c0_i32, %c0_i32_0 : i32, i32
  }
  func.func @transform_4(%arg0: i32) -> (i32, i32) {
    %c0_i32 = arith.constant 0 : i32
    %c0_i32_0 = arith.constant 0 : i32
    %c0_i32_1 = arith.constant 0 : i32
    return %c0_i32, %c0_i32_0 : i32, i32
  }
  func.func @transform_5(%arg0: i32) -> (i32, i32) {
    %c0_i32 = arith.constant 0 : i32
    %c0_i32_0 = arith.constant 0 : i32
    %c0_i32_1 = arith.constant 0 : i32
    return %c0_i32, %c0_i32_0 : i32, i32
  }
  func.func @transform_6(%arg0: i32) -> (i32, i32) {
    %c0_i32 = arith.constant 0 : i32
    %c0_i32_0 = arith.constant 0 : i32
    %c0_i32_1 = arith.constant 0 : i32
    return %c0_i32, %c0_i32_0 : i32, i32
  }
  func.func @transform_7(%arg0: i32) -> (i32, i32) {
    %c0_i32 = arith.constant 0 : i32
    %c0_i32_0 = arith.constant 0 : i32
    %c0_i32_1 = arith.constant 0 : i32
    return %c0_i32, %c0_i32_0 : i32, i32
  }
  func.func @transform_8(%arg0: i32) -> (i32, i32) {
    %c0_i32 = arith.constant 0 : i32
    %c0_i32_0 = arith.constant 0 : i32
    %c0_i32_1 = arith.constant 0 : i32
    return %c0_i32, %c0_i32_0 : i32, i32
  }
  func.func @transform_9(%arg0: i32) -> (i32, i32) {
    %c0_i32 = arith.constant 0 : i32
    %c0_i32_0 = arith.constant 0 : i32
    %c0_i32_1 = arith.constant 0 : i32
    return %c0_i32, %c0_i32_0 : i32, i32
  }
  func.func @transform_10(%arg0: i32) -> (i32, i32) {
    %c0_i32 = arith.constant 0 : i32
    %c0_i32_0 = arith.constant 0 : i32
    %c0_i32_1 = arith.constant 0 : i32
    return %c0_i32, %c0_i32_0 : i32, i32
  }
  func.func @transform_11(%arg0: i32) -> (i32, i32) {
    %c0_i32 = arith.constant 0 : i32
    %c0_i32_0 = arith.constant 0 : i32
    %c0_i32_1 = arith.constant 0 : i32
    return %c0_i32, %c0_i32_0 : i32, i32
  }
  func.func @transform_12(%arg0: i32) -> (i32, i32) {
    %c0_i32 = arith.constant 0 : i32
    %c0_i32_0 = arith.constant 0 : i32
    return %arg0, %c0_i32 : i32, i32
  }
}

</mosaic_0001>

<bundles_post_ra>
// kernel: net_forward.1
= control target key start
LH: loop header
LB: loop body
LE: loop exit
PB: predicated region body
PF: predicated region fallthrough
CT: control target
= control target key end

     0   :  { %s9689_s0 = inlined_call_operand.vmem [shape: f32[8,784], index: 0, kind: input, shape index: {}]   ;;  %s9690_s1 = inlined_call_operand.vmem [shape: f32[10,25], index: 1, kind: input, shape index: {}]   ;;  %s9691_s2 = inlined_call_operand.vmem [shape: f32[10,1], index: 2, kind: input, shape index: {}]   ;;  %s9692_s3 = inlined_call_operand.vmem [shape: bf16[20,250], index: 3, kind: input, shape index: {}]   ;;  %s9693_s4 = inlined_call_operand.vmem [shape: f32[20,1], index: 4, kind: input, shape index: {}]   ;;  %s9694_s8 = inlined_call_operand.vmem [shape: bf16[320,50], index: 8, kind: input, shape index: {}]   ;;  %s9695_s9 = inlined_call_operand.vmem [shape: f32[1,50], index: 9, kind: input, shape index: {}]   ;;  %s9696_s10 = inlined_call_operand.vmem [shape: bf16[50,10], index: 10, kind: input, shape index: {}]   ;;  %s9697_s11 = inlined_call_operand.vmem [shape: f32[1,10], index: 11, kind: input, shape index: {}]   ;;  %s9698_s12 = inlined_call_operand.vmem [shape: f32[8,10], index: 12, kind: output, shape index: {}]   ;;  %s9699_s5 = inlined_call_operand.vmem [shape: bf16[349,16], index: 5, kind: input, shape index: {}]   ;;  %s9700_s6 = inlined_call_operand.vmem [shape: bf16[16,320], index: 6, kind: input, shape index: {}]   ;;  %s9701_s7 = inlined_call_operand.vmem [shape: f32[20,320], index: 7, kind: input, shape index: {}]  }
   0x1   :  { %v5637_v0 = vld [vmem:[%s9690_s1] sm:$0xff]  ;;  %v5642_v1 = vld [vmem:[%s9690_s1 + $0x8] sm:$0x3]  ;;  %v5667_v6 = vld [vmem:[%s9692_s3 + $0x10] sm:$0x33] }
   0x2   :  { %9983 = vst [vmem:[#allocation3_spill] sm:$0xff] %v5637_v0  ;;  %9984 = vst [vmem:[#allocation4_spill] sm:$0xff] %v5642_v1  ;;  %v5647_v2 = vld [vmem:[%s9691_s2] sm:$0xff]  ;;  %v5652_v3 = vld [vmem:[%s9691_s2 + $0x8] sm:$0x3] }
   0x3   :  { %9985 = vst [vmem:[#allocation5_spill] sm:$0xff] %v5647_v2  ;;  %9986 = vst [vmem:[#allocation6_spill] sm:$0xff] %v5652_v3  ;;  %v5657_v4 = vld [vmem:[%s9692_s3] sm:$0xff]  ;;  %v5662_v5 = vld [vmem:[%s9692_s3 + $0x8] sm:$0xff]  ;;  %s5969_s3 = smov 0  }
   0x4   :  { %9987 = vst [vmem:[#allocation7_spill] sm:$0xff] %v5657_v4  ;;  %9988 = vst [vmem:[#allocation8_spill] sm:$0xff] %v5662_v5  ;;  %v5672_v7 = vld [vmem:[%s9693_s4] sm:$0xff]  ;;  %v5677_v8 = vld [vmem:[%s9693_s4 + $0x8] sm:$0xff] }
   0x5   :  { %9989 = vst [vmem:[#allocation9_spill] sm:$0xff] %v5667_v6  ;;  %9990 = vst [vmem:[#allocation10_spill] sm:$0xff] %v5672_v7  ;;  %v5682_v9 = vld [vmem:[%s9693_s4 + $0x10] sm:$0xf]  ;;  %v5687_v10 = vld [vmem:[%s9699_s5] sm:$0xf] }
   0x6   :  { %9991 = vst [vmem:[#allocation11_spill] sm:$0xff] %v5677_v8  ;;  %9992 = vst [vmem:[#allocation12_spill] sm:$0xff] %v5682_v9  ;;  %v5692_v11 = vld [vmem:[%s9699_s5 + $0x4] sm:$0xf]  ;;  %v5697_v12 = vld [vmem:[%s9699_s5 + $0x8] sm:$0xf] }
   0x7   :  { %9993 = vst [vmem:[#allocation13_spill] sm:$0xff] %v5687_v10  ;;  %9994 = vst [vmem:[#allocation14_spill] sm:$0xff] %v5692_v11  ;;  %v5702_v13 = vld [vmem:[%s9699_s5 + $0xc] sm:$0xf]  ;;  %v5707_v14 = vld [vmem:[%s9699_s5 + $0x10] sm:$0xf] }
   0x8   :  { %9995 = vst [vmem:[#allocation15_spill] sm:$0xff] %v5697_v12  ;;  %9996 = vst [vmem:[#allocation16_spill] sm:$0xff] %v5702_v13  ;;  %v5712_v15 = vld [vmem:[%s9699_s5 + $0x14] sm:$0xf]  ;;  %v5717_v16 = vld [vmem:[%s9699_s5 + $0x18] sm:$0xf] }
   0x9   :  { %9997 = vst [vmem:[#allocation17_spill] sm:$0xff] %v5707_v14  ;;  %9998 = vst [vmem:[#allocation18_spill] sm:$0xff] %v5712_v15  ;;  %v5722_v17 = vld [vmem:[%s9699_s5 + $0x1c] sm:$0xf]  ;;  %v5727_v18 = vld [vmem:[%s9699_s5 + $0x20] sm:$0xf] }
   0xa   :  { %9999 = vst [vmem:[#allocation19_spill] sm:$0xff] %v5717_v16  ;;  %10000 = vst [vmem:[#allocation20_spill] sm:$0xff] %v5722_v17  ;;  %v5732_v19 = vld [vmem:[%s9699_s5 + $0x24] sm:$0xf]  ;;  %v5737_v20 = vld [vmem:[%s9699_s5 + $0x28] sm:$0xf] }
   0xb   :  { %10001 = vst [vmem:[#allocation21_spill] sm:$0xff] %v5727_v18  ;;  %10002 = vst [vmem:[#allocation22_spill] sm:$0xff] %v5732_v19  ;;  %v5742_v21 = vld [vmem:[%s9699_s5 + $0x2c] sm:$0xf]  ;;  %v5747_v22 = vld [vmem:[%s9699_s5 + $0x30] sm:$0xf] }
   0xc   :  { %10003 = vst [vmem:[#allocation23_spill] sm:$0xff] %v5737_v20  ;;  %10004 = vst [vmem:[#allocation24_spill] sm:$0xff] %v5742_v21  ;;  %v5752_v23 = vld [vmem:[%s9699_s5 + $0x34] sm:$0xf]  ;;  %v5757_v24 = vld [vmem:[%s9699_s5 + $0x38] sm:$0xf] }
   0xd   :  { %10005 = vst [vmem:[#allocation25_spill] sm:$0xff] %v5747_v22  ;;  %10006 = vst [vmem:[#allocation26_spill] sm:$0xff] %v5752_v23  ;;  %v5762_v25 = vld [vmem:[%s9699_s5 + $0x3c] sm:$0xf]  ;;  %v5767_v26 = vld [vmem:[%s9699_s5 + $0x40] sm:$0xf] }
   0xe   :  { %10007 = vst [vmem:[#allocation27_spill] sm:$0xff] %v5757_v24  ;;  %10008 = vst [vmem:[#allocation28_spill] sm:$0xff] %v5762_v25  ;;  %v5772_v27 = vld [vmem:[%s9699_s5 + $0x44] sm:$0xf]  ;;  %v5777_v28 = vld [vmem:[%s9699_s5 + $0x48] sm:$0xf] }
   0xf   :  { %10009 = vst [vmem:[#allocation29_spill] sm:$0xff] %v5767_v26  ;;  %10010 = vst [vmem:[#allocation30_spill] sm:$0xff] %v5772_v27  ;;  %v5782_v29 = vld [vmem:[%s9699_s5 + $0x4c] sm:$0xf]  ;;  %v5787_v30 = vld [vmem:[%s9699_s5 + $0x50] sm:$0xf] }
  0x10   :  { %10011 = vst [vmem:[#allocation31_spill] sm:$0xff] %v5777_v28  ;;  %10012 = vst [vmem:[#allocation32_spill] sm:$0xff] %v5782_v29  ;;  %v5792_v31 = vld [vmem:[%s9699_s5 + $0x54] sm:$0xf]  ;;  %v5797_v32 = vld [vmem:[%s9699_s5 + $0x58] sm:$0xf] }
  0x11   :  { %10013 = vst [vmem:[#allocation33_spill] sm:$0xff] %v5787_v30  ;;  %10014 = vst [vmem:[#allocation34_spill] sm:$0xff] %v5792_v31  ;;  %v5802_v33 = vld [vmem:[%s9699_s5 + $0x5c] sm:$0xf]  ;;  %v5807_v34 = vld [vmem:[%s9699_s5 + $0x60] sm:$0xf] }
  0x12   :  { %10015 = vst [vmem:[#allocation35_spill] sm:$0xff] %v5797_v32  ;;  %10016 = vst [vmem:[#allocation36_spill] sm:$0xff] %v5802_v33  ;;  %v5812_v35 = vld [vmem:[%s9699_s5 + $0x64] sm:$0xf]  ;;  %v5817_v36 = vld [vmem:[%s9699_s5 + $0x68] sm:$0xf] }
  0x13   :  { %10017 = vst [vmem:[#allocation37_spill] sm:$0xff] %v5807_v34  ;;  %10018 = vst [vmem:[#allocation38_spill] sm:$0xff] %v5812_v35  ;;  %v5822_v37 = vld [vmem:[%s9699_s5 + $0x6c] sm:$0xf]  ;;  %v5827_v38 = vld [vmem:[%s9699_s5 + $0x70] sm:$0xf] }
  0x14   :  { %10019 = vst [vmem:[#allocation39_spill] sm:$0xff] %v5817_v36  ;;  %10020 = vst [vmem:[#allocation40_spill] sm:$0xff] %v5822_v37  ;;  %v5832_v39 = vld [vmem:[%s9699_s5 + $0x74] sm:$0xf]  ;;  %v5837_v40 = vld [vmem:[%s9699_s5 + $0x78] sm:$0xf] }
  0x15   :  { %10021 = vst [vmem:[#allocation41_spill] sm:$0xff] %v5827_v38  ;;  %10022 = vst [vmem:[#allocation42_spill] sm:$0xff] %v5832_v39  ;;  %v5842_v41 = vld [vmem:[%s9699_s5 + $0x7c] sm:$0xf]  ;;  %v5847_v42 = vld [vmem:[%s9699_s5 + $0x80] sm:$0xf] }
  0x16   :  { %10023 = vst [vmem:[#allocation43_spill] sm:$0xff] %v5837_v40  ;;  %10024 = vst [vmem:[#allocation44_spill] sm:$0xff] %v5842_v41  ;;  %v5852_v43 = vld [vmem:[%s9699_s5 + $0x84] sm:$0xf]  ;;  %v5857_v44 = vld [vmem:[%s9699_s5 + $0x88] sm:$0xf] }
  0x17   :  { %10025 = vst [vmem:[#allocation45_spill] sm:$0xff] %v5847_v42  ;;  %10026 = vst [vmem:[#allocation46_spill] sm:$0xff] %v5852_v43  ;;  %v5862_v45 = vld [vmem:[%s9699_s5 + $0x8c] sm:$0xf]  ;;  %v5867_v46 = vld [vmem:[%s9699_s5 + $0x90] sm:$0xf] }
  0x18   :  { %10027 = vst [vmem:[#allocation47_spill] sm:$0xff] %v5857_v44  ;;  %10028 = vst [vmem:[#allocation48_spill] sm:$0xff] %v5862_v45  ;;  %v5872_v47 = vld [vmem:[%s9699_s5 + $0x94] sm:$0xf]  ;;  %v5877_v48 = vld [vmem:[%s9699_s5 + $0x98] sm:$0xf] }
  0x19   :  { %10029 = vst [vmem:[#allocation49_spill] sm:$0xff] %v5867_v46  ;;  %10030 = vst [vmem:[#allocation50_spill] sm:$0xff] %v5872_v47  ;;  %v5882_v49 = vld [vmem:[%s9699_s5 + $0x9c] sm:$0xf]  ;;  %v5887_v50 = vld [vmem:[%s9699_s5 + $0xa0] sm:$0xf] }
  0x1a   :  { %10031 = vst [vmem:[#allocation51_spill] sm:$0xff] %v5877_v48  ;;  %10032 = vst [vmem:[#allocation52_spill] sm:$0xff] %v5882_v49  ;;  %v5892_v51 = vld [vmem:[%s9699_s5 + $0xa4] sm:$0xf]  ;;  %v5897_v52 = vld [vmem:[%s9699_s5 + $0xa8] sm:$0xf] }
  0x1b   :  { %10033 = vst [vmem:[#allocation53_spill] sm:$0xff] %v5887_v50  ;;  %10034 = vst [vmem:[#allocation54_spill] sm:$0xff] %v5892_v51  ;;  %v5902_v53 = vld [vmem:[%s9699_s5 + $0xac] sm:$0x7]  ;;  %v5907_v54 = vld [vmem:[%s9700_s6] sm:$0xff] }
  0x1c   :  { %10035 = vst [vmem:[#allocation55_spill] sm:$0xff] %v5897_v52  ;;  %10036 = vst [vmem:[#allocation56_spill] sm:$0xff] %v5902_v53  ;;  %v5912_v55 = vld [vmem:[%s9700_s6 + $0x8] sm:$0xf]  ;;  %v5917_v56 = vld [vmem:[%s9700_s6 + $0xc] sm:$0xff] }
  0x1d   :  { %10037 = vst [vmem:[#allocation57_spill] sm:$0xff] %v5907_v54  ;;  %10038 = vst [vmem:[#allocation58_spill] sm:$0xff] %v5912_v55  ;;  %v5922_v57 = vld [vmem:[%s9700_s6 + $0x14] sm:$0xf]  ;;  %v5927_v58 = vld [vmem:[%s9701_s7] sm:$0xff] }
  0x1e   :  { %10039 = vst [vmem:[#allocation59_spill] sm:$0xff] %v5917_v56  ;;  %10040 = vst [vmem:[#allocation60_spill] sm:$0xff] %v5922_v57  ;;  %v5932_v59 = vld [vmem:[%s9701_s7 + $0x8] sm:$0xff]  ;;  %v5937_v60 = vld [vmem:[%s9701_s7 + $0x10] sm:$0xff] }
  0x1f   :  { %10041 = vst [vmem:[#allocation61_spill] sm:$0xff] %v5927_v58  ;;  %10042 = vst [vmem:[#allocation62_spill] sm:$0xff] %v5932_v59  ;;  %v5942_v61 = vld [vmem:[%s9701_s7 + $0x18] sm:$0xff]  ;;  %v5947_v62 = vld [vmem:[%s9701_s7 + $0x20] sm:$0xff] }
  0x20   :  { %10043 = vst [vmem:[#allocation63_spill] sm:$0xff] %v5937_v60  ;;  %10044 = vst [vmem:[#allocation64_spill] sm:$0xff] %v5942_v61  ;;  %v5952_v63 = vld [vmem:[%s9701_s7 + $0x28] sm:$0xff]  ;;  %v5957_v59 = vld [vmem:[%s9701_s7 + $0x30] sm:$0xf] }
  0x21   :  { %10045 = vst [vmem:[#allocation65_spill] sm:$0xff] %v5947_v62  ;;  %10046 = vst [vmem:[#allocation66_spill] sm:$0xff] %v5952_v63  ;;  %v5962_v60 = vld [vmem:[%s9701_s7 + $0x38] sm:$0xf]  ;;  %v5967_v58 = vld [vmem:[%s9701_s7 + $0x40] sm:$0xf] }
  0x22   :  { %10047 = vst [vmem:[#allocation67_spill] sm:$0xff] %v5957_v59  ;;  %10048 = vst [vmem:[#allocation68_spill] sm:$0xff] %v5962_v60 }
  0x23   :  { %10049 = vst [vmem:[#allocation69_spill] sm:$0xff] %v5967_v58 }
  0x24 LB: > { %v10050_v1 = vld [vmem:[#allocation4_spill] sm:$0xff]  ;;  %v10051_v0 = vld [vmem:[#allocation3_spill] sm:$0xff]  ;;  %v5507_v63 = vmov 1   ;;  %v5508_v59 = vmov 2   ;;  %v5509_v60 = vmov 3   ;;  %v5510_v58 = vmov 4   ;;  %s5505_s3 = sphi %s5969_s3, %s114_s3  }
  0x25   : > { %4934 = vset.pattern.permute.xlu1 %v5507_v63  ;;  %4935 = vset.pattern.permute.xlu0 %v5508_v59  ;;  %v5511_v63 = vmov 5   ;;  %v5512_v62 = vmov 7   ;;  %v5515_v61 = vmov 10   ;;  %s115_s7 = sshra.s32 %s5505_s3, 3  ;;  %s118_s24 = sand.u32 7, %s5505_s3  ;;  %v5526_v47 = vmov 19  }
  0x26   : > { %180 = vperm.xlu1 %4934, %v10051_v0   ;;  %271 = vperm.xlu0 %4935, %v10051_v0   ;;  %s4676_s23 = smul.u32 56, %s115_s7  ;;  %s5519_s4 = smov 127   ;;  %v5528_v14 = vmov 20   ;;  %v9705_v31 = vmov 0   ;;  %v5532_v16 = vmov 18   ;;  %v5536_v9 = vmov 24  }
  0x27   : > { %s5520_s28 = smov 126   ;;  %s5521_s29 = smov 125   ;;  %v10071_v7 = vmov 0   ;;  %vm9934_vm0 = vcmask 1039360   ;;  %vm9932_vm1 = vcmask 1031168   ;;  %vm9925_vm2 = vcmask 1022976  }
  0x28   : > { %s121_s25 = sadd.s32 %s4676_s23, %s118_s24  ;;  %s5533_s30 = smov 124   ;;  %vm9928_vm3 = vcmask 1014784   ;;  %vm9929_vm4 = vcmask 818176   ;;  %vm9930_vm5 = vcmask 809984   ;;  %vm9933_vm6 = vcmask 801792  }
  0x29   : > { %s122_s5 = scalar_lea.vmem %s9689_s0, %s121_s25  ;;  %s5535_s13 = smov 100   ;;  %vm9938_vm7 = vcmask 793600   ;;  %vm963_vm8 = vcmask 785408   ;;  %vm1054_vm9 = vcmask 588800   ;;  %vm1145_vm10 = vcmask 580608  }
  0x2a   : > { %184 = vperm.xlu1 %4934, %v10050_v1   ;;  %4938 = vset.pattern.permute.xlu0 %v5509_v60  ;;  %s5537_s14 = smov 99   ;;  %s5538_s1 = smov 98   ;;  %vm1236_vm11 = vcmask 572416   ;;  %vm1327_vm12 = vcmask 564224   ;;  %vm1418_vm13 = vcmask 556032   ;;  %vm1509_vm14 = vcmask 359424  }
  0x2b   : > { %366 = vperm.xlu0 %4938, %v10050_v1   ;;  %s5539_s6 = smov 97   ;;  %s5540_s15 = smov 96   ;;  %vm1600_vm15 = vcmask 351232  }
  0x2c   : > { %s5541_s16 = smov 72   ;;  %s5542_s17 = smov 71  }
  0x2d   : > { %s5543_s2 = smov 70   ;;  %s5544_s18 = smov 69  }
  0x2e   : > { %4936 = vset.pattern.permute.xlu1 %v5508_v59  ;;  %v5513_v59 = vmov 8   ;;  %s5545_s19 = smov 68   ;;  %s5546_s20 = smov 44  }
  0x2f   : > { %275 = vperm.xlu1 %4936, %v10050_v1   ;;  %4939 = vset.pattern.permute.xlu0 %v5510_v58  ;;  %s5547_s21 = smov 43   ;;  %s5548_s22 = smov 42  }
  0x30   : > { %453 = vperm.xlu0 %4939, %v10051_v0   ;;  %s5549_s23 = smov 41   ;;  %s5550_s25 = smov 40  }
  0x31   : > { %s5551_s26 = smov 16   ;;  %s5552_s27 = smov 15  }
  0x32   : > { %s114_s3 = sadd.s32 1, %s5505_s3  }
  0x33   : > { %4937 = vset.pattern.permute.xlu1 %v5509_v60  ;;  %v5514_v60 = vmov 6   ;;  %p111_p0 = scmp.ge.s32.totalorder %s114_s3, 8  }
  0x34   : > { %362 = vperm.xlu1 %4937, %v10051_v0   ;;  %4942 = vset.pattern.permute.xlu0 %v5511_v63 }
  0x35   : > { %548 = vperm.xlu0 %4942, %v10050_v1  }
  0x38   : > { %4940 = vset.pattern.permute.xlu1 %v5510_v58  ;;  %v5516_v58 = vmov 11  }
  0x39   : > { %457 = vperm.xlu1 %4940, %v10050_v1   ;;  %4944 = vset.pattern.permute.xlu0 %v5512_v62 }
  0x3a   : > { %726 = vperm.xlu0 %4944, %v10051_v0  }
  0x3d   : > { %4941 = vset.pattern.permute.xlu1 %v5511_v63  ;;  %v5517_v63 = vmov 9  }
  0x3e   : > { %544 = vperm.xlu1 %4941, %v10051_v0   ;;  %4947 = vset.pattern.permute.xlu0 %v5513_v59 }
  0x3f   : > { %821 = vperm.xlu0 %4947, %v10050_v1  }
  0x42   : > { %4943 = vset.pattern.permute.xlu1 %v5514_v60  ;;  %v123_v60 = vld [vmem:[%s122_s5] ss:$8 sm:$0xf] }
  0x43   : > { %635 = vperm.xlu1 %4943, %v10051_v0   ;;  %4949 = vset.pattern.permute.xlu0 %v5515_v61 }
  0x44   : > { %999 = vperm.xlu0 %4949, %v10051_v0  }
  0x47   : > { %639 = vperm.xlu1 %4943, %v10050_v1  }
  0x48   : > { %4952 = vset.pattern.permute.xlu0 %v5516_v58 }
  0x4b   : > { %4945 = vset.pattern.permute.xlu1 %v5512_v62  ;;  %v5518_v62 = vmov 12  }
  0x4c   : > { %730 = vperm.xlu1 %4945, %v10050_v1  }
  0x50   : > { %4946 = vset.pattern.permute.xlu1 %v5513_v59  ;;  %v9704_v59 = vlaneseq }
  0x51   : > { %817 = vperm.xlu1 %4946, %v10051_v0  }
  0x55   : > { %4948 = vset.pattern.permute.xlu1 %v5517_v63 }
  0x56   : > { %908 = vperm.xlu1 %4948, %v10051_v0  }
  0x5a   : > { %912 = vperm.xlu1 %4948, %v10050_v1  }
  0x5e   : > { %4950 = vset.pattern.permute.xlu1 %v5515_v61  ;;  %v6005_v61 = vshrl.u32 %v9704_v59, 7 }
  0x5f   : > { %1003 = vperm.xlu1 %4950, %v10050_v1  }
  0x60   : > { %10052 = vst [vmem:[#allocation70_spill] sm:$0xff] %v6005_v61  ;;  %v139_v54 = vsub.s32 0, %v6005_v61  ;;  %v151_v57 = vsub.s32 3, %v6005_v61  ;;  %v147_v42 = vsub.s32 2, %v6005_v61  ;;  %v159_v43 = vsub.s32 5, %v6005_v61 }
  0x63   : > { %4951 = vset.pattern.permute.xlu1 %v5516_v58  ;;  %v124_v58 = vld [vmem:[%s122_s5] ss:$8 sm:$0x70]  ;;  %s5553_s5 = smov 14  }
  0x64   : > { %1090 = vperm.xlu1 %4951, %v10051_v0   ;;  %v6007_v63 = vor.u32 %v124_v58, %v123_v60  ;;  %v155_v60 = vsub.s32 4, %v6005_v61 }
  0x66   : > { %v6015_v55 = vrot.slane %v6007_v63, %v139_v54  ;;  %v6024_v11 = vrot.slane %v6007_v63, %v151_v57  ;;  %v6034_v45 = vrot.slane %v6007_v63, %v159_v43  ;;  %v6037_v26 = vrot.slane %v6007_v63, %v155_v60 }
  0x68   : > { %4953 = vset.pattern.permute.xlu1 %v5518_v62  ;;  %v143_v62 = vsub.s32 1, %v6005_v61  ;;  %10053 = vst [vmem:[#allocation71_spill] sm:$0xff] %v6015_v55 }
  0x6a   : > { %v6012_v56 = vrot.slane %v6007_v63, %v143_v62  ;;  %v6027_v62 = vrot.slane %v6007_v63, %v147_v42 }
  0xa1   : > { %v181_v59 = vpop.permute.xlu1 %180 }
  0xa2   : > { %v188_v58 = vmul.f32 %v181_v59, %v6012_v56  ;;  %v187_v10 = vmul.f32 %v181_v59, %v6015_v55  ;;  %v190_v54 = vmul.f32 %v181_v59, %v6024_v11  ;;  %v189_v44 = vmul.f32 %v181_v59, %v6027_v62 }
  0xa3   : > { %v192_v42 = vmul.f32 %v181_v59, %v6034_v45  ;;  %v191_v57 = vmul.f32 %v181_v59, %v6037_v26  ;;  %v272_v59 = vpop.permute.xlu0 %271 }
  0xa4   : > { %213 = vrot.lane.b32.xlu1 %v188_v58, %s5519_s4  ;;  %211 = vrot.lane.b32.xlu0 %v187_v10, %s5519_s4 }
  0xa5   : > { %v185_v58 = vpop.permute.xlu1 %184 }
  0xa6   : > { %v194_v10 = vmul.f32 %v185_v58, %v6012_v56  ;;  %v193_v43 = vmul.f32 %v185_v58, %v6015_v55  ;;  %v196_v60 = vmul.f32 %v185_v58, %v6024_v11 }
  0xa8   : > { %217 = vrot.lane.b32.xlu1 %v190_v54, %s5519_s4  ;;  %215 = vrot.lane.b32.xlu0 %v189_v44, %s5519_s4  ;;  %v195_v44 = vmul.f32 %v185_v58, %v6027_v62  ;;  %v198_v54 = vmul.f32 %v185_v58, %v6034_v45 }
  0xac   : > { %221 = vrot.lane.b32.xlu1 %v192_v42, %s5519_s4  ;;  %219 = vrot.lane.b32.xlu0 %v191_v57, %s5519_s4  ;;  %v197_v42 = vmul.f32 %v185_v58, %v6037_v26  ;;  %v278_v57 = vmul.f32 %v272_v59, %v6015_v55  ;;  %v276_v58 = vpop.permute.xlu1 %275 }
  0xb0   : > { %225 = vrot.lane.b32.xlu1 %v194_v10, %s5519_s4  ;;  %223 = vrot.lane.b32.xlu0 %v193_v43, %s5519_s4  ;;  %v279_v10 = vmul.f32 %v272_v59, %v6012_v56  ;;  %v280_v43 = vmul.f32 %v272_v59, %v6027_v62 }
  0xb4   : > { %229 = vrot.lane.b32.xlu1 %v196_v60, %s5519_s4  ;;  %227 = vrot.lane.b32.xlu0 %v195_v44, %s5519_s4  ;;  %v281_v60 = vmul.f32 %v272_v59, %v6024_v11  ;;  %v282_v44 = vmul.f32 %v272_v59, %v6037_v26 }
  0xb8   : > { %233 = vrot.lane.b32.xlu1 %v198_v54, %s5519_s4  ;;  %231 = vrot.lane.b32.xlu0 %v197_v42, %s5519_s4  ;;  %v283_v54 = vmul.f32 %v272_v59, %v6034_v45  ;;  %v284_v42 = vmul.f32 %v276_v58, %v6015_v55  ;;  %v363_v59 = vpop.permute.xlu1 %362 }
  0xbc   : > { %302 = vrot.lane.b32.xlu1 %v278_v57, %s5520_s28  ;;  %304 = vrot.lane.b32.xlu0 %v279_v10, %s5520_s28  ;;  %v285_v57 = vmul.f32 %v276_v58, %v6012_v56  ;;  %v286_v10 = vmul.f32 %v276_v58, %v6027_v62  ;;  %v6087_v27 = vpop.permute.xlu1 %457 }
  0xbd   : > { %v468_v40 = vmul.f32 %v6087_v27, %v6027_v62 }
  0xc0   : > { %306 = vrot.lane.b32.xlu1 %v280_v43, %s5520_s28  ;;  %308 = vrot.lane.b32.xlu0 %v281_v60, %s5520_s28  ;;  %v287_v43 = vmul.f32 %v276_v58, %v6024_v11  ;;  %v288_v60 = vmul.f32 %v276_v58, %v6037_v26 }
  0xc4   : > { %310 = vrot.lane.b32.xlu1 %v282_v44, %s5520_s28  ;;  %312 = vrot.lane.b32.xlu0 %v283_v54, %s5520_s28  ;;  %v289_v44 = vmul.f32 %v276_v58, %v6034_v45  ;;  %v369_v54 = vmul.f32 %v363_v59, %v6015_v55 }
  0xc8   : > { %314 = vrot.lane.b32.xlu1 %v284_v42, %s5520_s28  ;;  %316 = vrot.lane.b32.xlu0 %v285_v57, %s5520_s28  ;;  %v371_v42 = vmul.f32 %v363_v59, %v6027_v62  ;;  %v367_v57 = vpop.permute.xlu0 %366 }
  0xc9   : > { %v375_v58 = vmul.f32 %v367_v57, %v6015_v55  ;;  %v379_v12 = vmul.f32 %v367_v57, %v6037_v26 }
  0xcc   : > { %318 = vrot.lane.b32.xlu1 %v286_v10, %s5520_s28  ;;  %320 = vrot.lane.b32.xlu0 %v287_v43, %s5520_s28  ;;  %v370_v10 = vmul.f32 %v363_v59, %v6012_v56  ;;  %v373_v43 = vmul.f32 %v363_v59, %v6037_v26 }
  0xd0   : > { %322 = vrot.lane.b32.xlu1 %v288_v60, %s5520_s28  ;;  %324 = vrot.lane.b32.xlu0 %v289_v44, %s5520_s28  ;;  %v372_v60 = vmul.f32 %v363_v59, %v6024_v11  ;;  %v377_v44 = vmul.f32 %v367_v57, %v6027_v62 }
  0xd4   : > { %393 = vrot.lane.b32.xlu1 %v369_v54, %s5521_s29  ;;  %397 = vrot.lane.b32.xlu0 %v371_v42, %s5521_s29  ;;  %v374_v54 = vmul.f32 %v363_v59, %v6034_v45  ;;  %v376_v42 = vmul.f32 %v367_v57, %v6012_v56  ;;  %v5522_v59 = vmov 13  }
  0xd8   : > { %395 = vrot.lane.b32.xlu1 %v370_v10, %s5521_s29  ;;  %401 = vrot.lane.b32.xlu0 %v373_v43, %s5521_s29  ;;  %v6093_v10 = vpop.permute.xlu1 %544  ;;  %v378_v43 = vmul.f32 %v367_v57, %v6024_v11 }
  0xd9   : > { %v555_v8 = vmul.f32 %v6093_v10, %v6037_v26  ;;  %v553_v3 = vmul.f32 %v6093_v10, %v6027_v62 }
  0xdc   : > { %399 = vrot.lane.b32.xlu1 %v372_v60, %s5521_s29  ;;  %405 = vrot.lane.b32.xlu0 %v375_v58, %s5521_s29  ;;  %v6096_v13 = vpop.permute.xlu1 %635  ;;  %v380_v58 = vmul.f32 %v367_v57, %v6034_v45  ;;  %v6109_v57 = vpop.permute.xlu0 %453 }
  0xdd   : > { %v463_v17 = vmul.f32 %v6109_v57, %v6024_v11  ;;  %v647_v39 = vmul.f32 %v6096_v13, %v6034_v45  ;;  %v462_v25 = vmul.f32 %v6109_v57, %v6027_v62 }
  0xe0   : > { %403 = vrot.lane.b32.xlu1 %v374_v54, %s5521_s29  ;;  %409 = vrot.lane.b32.xlu0 %v377_v44, %s5521_s29  ;;  %v6100_v60 = vpop.permute.xlu1 %639  ;;  %v5523_v44 = vmov 14   ;;  %v5524_v54 = vmov 16  }
  0xe4   : > { %407 = vrot.lane.b32.xlu1 %v376_v42, %s5521_s29  ;;  %413 = vrot.lane.b32.xlu0 %v379_v12, %s5521_s29  ;;  %v6105_v12 = vpop.permute.xlu1 %730 }
  0xe8   : > { %411 = vrot.lane.b32.xlu1 %v378_v43, %s5521_s29  ;;  %1094 = vperm.xlu0 %4952, %v10050_v1   ;;  %v6111_v42 = vpop.permute.xlu1 %817  ;;  %v5525_v43 = vmov 17  }
  0xec   : > { %415 = vrot.lane.b32.xlu1 %v380_v58, %s5521_s29  ;;  %4954 = vset.pattern.permute.xlu0 %v5522_v59  ;;  %v6116_v58 = vpop.permute.xlu0 %548  ;;  %v6118_v46 = vpop.permute.xlu1 %908  ;;  %s5554_s29 = smov 13  }
  0xed   : > { %1272 = vperm.xlu0 %4954, %v10051_v0   ;;  %v559_v2 = vmul.f32 %v6116_v58, %v6027_v62 }
  0xf0   : > { %1181 = vperm.xlu1 %4953, %v10051_v0   ;;  %v6122_v28 = vpop.permute.xlu0 %726  ;;  %v6124_v29 = vpop.permute.xlu1 %912 }
  0xf1   : > { %4957 = vset.pattern.permute.xlu0 %v5523_v44 }
  0xf2   : > { %1367 = vperm.xlu0 %4957, %v10050_v1  }
  0xf4   : > { %1185 = vperm.xlu1 %4953, %v10050_v1   ;;  %v6128_v15 = vpop.permute.xlu0 %821  ;;  %v6130_v48 = vpop.permute.xlu1 %1003 }
  0xf6   : > { %4959 = vset.pattern.permute.xlu0 %v5524_v54 }
  0xf7   : > { %1545 = vperm.xlu0 %4959, %v10051_v0  }
  0xf8   : > { %4955 = vset.pattern.permute.xlu1 %v5522_v59  ;;  %v5527_v59 = vmov 15   ;;  %v6135_v49 = vpop.permute.xlu0 %999  ;;  %v6137_v30 = vpop.permute.xlu1 %1090 }
  0xf9   : > { %1276 = vperm.xlu1 %4955, %v10050_v1  }
  0xfb   : > { %4962 = vset.pattern.permute.xlu0 %v5525_v43 }
  0xfc   : > { %1640 = vperm.xlu0 %4962, %v10050_v1  }
  0xfd   : > { %4956 = vset.pattern.permute.xlu1 %v5523_v44  ;;  %v5529_v44 = vmov 22  }
  0xfe   : > { %1363 = vperm.xlu1 %4956, %v10051_v0  }
 0x100   : > { %4964 = vset.pattern.permute.xlu0 %v5526_v47 }
 0x101   : > { %1818 = vperm.xlu0 %4964, %v10051_v0  }
 0x102   : > { %4958 = vset.pattern.permute.xlu1 %v5527_v59  ;;  %v5530_v59 = vmov 23  }
 0x103   : > { %1454 = vperm.xlu1 %4958, %v10051_v0  }
 0x105   : > { %4967 = vset.pattern.permute.xlu0 %v5528_v14 }
 0x106   : > { %1913 = vperm.xlu0 %4967, %v10050_v1  }
 0x107   : > { %1458 = vperm.xlu1 %4958, %v10050_v1  }
 0x10a   : > { %4969 = vset.pattern.permute.xlu0 %v5529_v44 }
 0x10b   : > { %4960 = vset.pattern.permute.xlu1 %v5524_v54  ;;  %2116 = vperm.xlu0 %4969, %v10051_v0  }
 0x10c   : > { %1549 = vperm.xlu1 %4960, %v10050_v1  }
 0x10f   : > { %4972 = vset.pattern.permute.xlu0 %v5530_v59 }
 0x110   : > { %4961 = vset.pattern.permute.xlu1 %v5525_v43  ;;  %2221 = vperm.xlu0 %4972, %v10050_v1  }
 0x111   : > { %1636 = vperm.xlu1 %4961, %v10051_v0  }
 0x114   : > { %4973 = vset.pattern.permute.xlu0 %v9705_v31 }
 0x115   : > { %4963 = vset.pattern.permute.xlu1 %v5532_v16  ;;  %128 = vperm.xlu0 %4973, %v10051_v0   ;;  %v465_v16 = vmul.f32 %v6109_v57, %v6034_v45 }
 0x116   : > { %v6142_v54 = vpop.permute.xlu1 %213  ;;  %1727 = vperm.xlu1 %4963, %v10051_v0   ;;  %v6145_v43 = vpop.permute.xlu0 %211 }
 0x119   : > { %133 = vperm.xlu0 %4973, %v10050_v1  }
 0x11a   : > { %v6150_v50 = vpop.permute.xlu1 %217  ;;  %1731 = vperm.xlu1 %4963, %v10050_v1   ;;  %v6153_v31 = vpop.permute.xlu0 %215 }
 0x11d   : > { %490 = vrot.lane.b32.xlu0 %v463_v17, %s5533_s30  ;;  %v470_v17 = vmul.f32 %v6087_v27, %v6037_v26 }
 0x11e   : > { %v6158_v51 = vpop.permute.xlu1 %221  ;;  %4965 = vset.pattern.permute.xlu1 %v5526_v47  ;;  %v6160_v32 = vpop.permute.xlu0 %219  ;;  %v461_v47 = vmul.f32 %v6109_v57, %v6012_v56 }
 0x11f   : > { %1822 = vperm.xlu1 %4965, %v10050_v1  }
 0x121   : > { %494 = vrot.lane.b32.xlu0 %v465_v16, %s5533_s30  ;;  %v5534_v16 = vmov 21  }
 0x122   : > { %v6164_v33 = vpop.permute.xlu1 %225  ;;  %v6166_v18 = vpop.permute.xlu0 %223 }
 0x123   : > { %10054 = vst [vmem:[#allocation72_spill] sm:$0xff] %v6164_v33  ;;  %10055 = vst [vmem:[#allocation73_spill] sm:$0xff] %v6166_v18  ;;  %4966 = vset.pattern.permute.xlu1 %v5528_v14 }
 0x124   : > { %1909 = vperm.xlu1 %4966, %v10051_v0  }
 0x125   : > { %504 = vrot.lane.b32.xlu0 %v470_v17, %s5533_s30  ;;  %v467_v17 = vmul.f32 %v6087_v27, %v6012_v56 }
 0x126   : > { %v6174_v19 = vpop.permute.xlu1 %229  ;;  %v6176_v52 = vpop.permute.xlu0 %227 }
 0x127   : > { %10056 = vst [vmem:[#allocation74_spill] sm:$0xff] %v6174_v19 }
 0x128   : > { %4968 = vset.pattern.permute.xlu1 %v5534_v16  ;;  %v554_v16 = vmul.f32 %v6093_v10, %v6024_v11 }
 0x129   : > { %2015 = vperm.xlu1 %4968, %v10051_v0   ;;  %486 = vrot.lane.b32.xlu0 %v461_v47, %s5533_s30 }
 0x12a   : > { %v6180_v14 = vpop.permute.xlu1 %233  ;;  %v6182_v53 = vpop.permute.xlu0 %231 }
 0x12b   : > { %10057 = vst [vmem:[#allocation75_spill] sm:$0xff] %v6180_v14  ;;  %10058 = vst [vmem:[#allocation76_spill] sm:$0xff] %v6182_v53 }
 0x12d   : > { %2019 = vperm.xlu1 %4968, %v10050_v1   ;;  %498 = vrot.lane.b32.xlu0 %v467_v17, %s5533_s30  ;;  %v556_v17 = vmul.f32 %v6093_v10, %v6034_v45 }
 0x12e   : > { %v6188_v34 = vpop.permute.xlu1 %302  ;;  %v6190_v35 = vpop.permute.xlu0 %304 }
 0x12f   : > { %10059 = vst [vmem:[#allocation77_spill] sm:$0xff] %v6188_v34  ;;  %10060 = vst [vmem:[#allocation78_spill] sm:$0xff] %v6190_v35 }
 0x131   : > { %4970 = vset.pattern.permute.xlu1 %v5529_v44  ;;  %581 = vrot.lane.b32.xlu0 %v554_v16, %s5535_s13  ;;  %v561_v44 = vmul.f32 %v6116_v58, %v6037_v26 }
 0x132   : > { %2120 = vperm.xlu1 %4970, %v10050_v1   ;;  %v6196_v47 = vpop.permute.xlu1 %306  ;;  %v6198_v20 = vpop.permute.xlu0 %308 }
 0x133   : > { %10061 = vst [vmem:[#allocation79_spill] sm:$0xff] %v6196_v47  ;;  %10062 = vst [vmem:[#allocation80_spill] sm:$0xff] %v6198_v20 }
 0x135   : > { %585 = vrot.lane.b32.xlu0 %v556_v17, %s5535_s13 }
 0x136   : > { %4971 = vset.pattern.permute.xlu1 %v5530_v59  ;;  %v6203_v21 = vpop.permute.xlu1 %310  ;;  %v6205_v36 = vpop.permute.xlu0 %312  ;;  %v552_v59 = vmul.f32 %v6093_v10, %v6012_v56 }
 0x137   : > { %10063 = vst [vmem:[#allocation81_spill] sm:$0xff] %v6203_v21  ;;  %10064 = vst [vmem:[#allocation82_spill] sm:$0xff] %v6205_v36  ;;  %2217 = vperm.xlu1 %4971, %v10051_v0  }
 0x139   : > { %595 = vrot.lane.b32.xlu0 %v561_v44, %s5535_s13  ;;  %v558_v44 = vmul.f32 %v6116_v58, %v6012_v56 }
 0x13a   : > { %v6211_v16 = vpop.permute.xlu1 %314  ;;  %v6213_v37 = vpop.permute.xlu0 %316 }
 0x13b   : > { %10065 = vst [vmem:[#allocation83_spill] sm:$0xff] %v6211_v16  ;;  %10066 = vst [vmem:[#allocation84_spill] sm:$0xff] %v6213_v37  ;;  %4974 = vset.pattern.permute.xlu1 %v5536_v9  ;;  %v646_v16 = vmul.f32 %v6096_v13, %v6037_v26 }
 0x13c   : > { %2318 = vperm.xlu1 %4974, %v10051_v0   ;;  %v464_v0 = vmul.f32 %v6109_v57, %v6037_v26 }
 0x13d   : > { %577 = vrot.lane.b32.xlu0 %v552_v59, %s5535_s13  ;;  %v645_v59 = vmul.f32 %v6096_v13, %v6024_v11 }
 0x13e   : > { %v6219_v17 = vpop.permute.xlu1 %318  ;;  %v6221_v22 = vpop.permute.xlu0 %320 }
 0x13f   : > { %10067 = vst [vmem:[#allocation85_spill] sm:$0xff] %v6219_v17  ;;  %10068 = vst [vmem:[#allocation86_spill] sm:$0xff] %v6221_v22  ;;  %v741_v22 = vmul.f32 %v6105_v12, %v6027_v62 }
 0x140   : > { %2322 = vperm.xlu1 %4974, %v10050_v1  }
 0x141   : > { %589 = vrot.lane.b32.xlu0 %v558_v44, %s5535_s13  ;;  %v469_v44 = vmul.f32 %v6087_v27, %v6024_v11 }
 0x142   : > { %v6227_v23 = vpop.permute.xlu1 %322  ;;  %v6229_v9 = vpop.permute.xlu0 %324 }
 0x143   : > { %10069 = vst [vmem:[#allocation87_spill] sm:$0xff] %v6227_v23  ;;  %10070 = vst [vmem:[#allocation88_spill] sm:$0xff] %v6229_v9  ;;  %v735_v9 = vmul.f32 %v6122_v28, %v6027_v62 }
 0x144   : > { %492 = vrot.lane.b32.xlu1 %v464_v0, %s5533_s30 }
 0x145   : > { %672 = vrot.lane.b32.xlu0 %v645_v59, %s5537_s14  ;;  %4975 = vset.pattern.permute.xlu1 %v10071_v7  ;;  %v471_v59 = vmul.f32 %v6087_v27, %v6034_v45  ;;  %v652_v7 = vmul.f32 %v6100_v60, %v6037_v26 }
 0x146   : > { %v6238_v1 = vpop.permute.xlu1 %393  ;;  %v6242_v38 = vpop.permute.xlu0 %397 }
 0x147   : > { %10072 = vst [vmem:[#allocation89_spill] sm:$0xff] %v6238_v1  ;;  %10073 = vst [vmem:[#allocation90_spill] sm:$0xff] %v6242_v38  ;;  %v920_v38 = vmul.f32 %v6118_v46, %v6034_v45 }
 0x148   : > { %502 = vrot.lane.b32.xlu1 %v469_v44, %s5533_s30 }
 0x149   : > { %676 = vrot.lane.b32.xlu0 %v647_v39, %s5537_s14  ;;  %v643_v39 = vmul.f32 %v6096_v13, %v6012_v56 }
 0x14a   : > { %v6248_v0 = vpop.permute.xlu1 %395  ;;  %v6255_v24 = vpop.permute.xlu0 %401 }
 0x14b   : > { %10074 = vst [vmem:[#allocation91_spill] sm:$0xff] %v6248_v0  ;;  %10075 = vst [vmem:[#allocation92_spill] sm:$0xff] %v6255_v24  ;;  %v925_v0 = vmul.f32 %v6124_v29, %v6037_v26 }
 0x14c   : > { %506 = vrot.lane.b32.xlu1 %v471_v59, %s5533_s30 }
 0x14d   : > { %686 = vrot.lane.b32.xlu0 %v652_v7, %s5537_s14  ;;  %v649_v7 = vmul.f32 %v6100_v60, %v6012_v56 }
 0x14e   : > { %v6260_v44 = vpop.permute.xlu1 %399  ;;  %v6268_v59 = vpop.permute.xlu0 %405 }
 0x14f   : > { %10076 = vst [vmem:[#allocation93_spill] sm:$0xff] %v6260_v44  ;;  %10077 = vst [vmem:[#allocation94_spill] sm:$0xff] %v6268_v59 }
 0x150   : > { %488 = vrot.lane.b32.xlu1 %v462_v25, %s5533_s30  ;;  %v736_v25 = vmul.f32 %v6122_v28, %v6024_v11 }
 0x151   : > { %668 = vrot.lane.b32.xlu0 %v643_v39, %s5537_s14 }
 0x152   : > { %v6273_v41 = vpop.permute.xlu1 %403  ;;  %v6281_v39 = vpop.permute.xlu0 %409 }
 0x153   : > { %10078 = vst [vmem:[#allocation95_spill] sm:$0xff] %v6273_v41  ;;  %10079 = vst [vmem:[#allocation96_spill] sm:$0xff] %v6281_v39 }
 0x154   : > { %500 = vrot.lane.b32.xlu1 %v468_v40, %s5533_s30  ;;  %v560_v40 = vmul.f32 %v6116_v58, %v6024_v11 }
 0x155   : > { %680 = vrot.lane.b32.xlu0 %v649_v7, %s5537_s14  ;;  %v738_v7 = vmul.f32 %v6122_v28, %v6034_v45 }
 0x156   : > { %v6286_v6 = vpop.permute.xlu1 %407  ;;  %v6294_v4 = vpop.permute.xlu0 %413 }
 0x157   : > { %10080 = vst [vmem:[#allocation97_spill] sm:$0xff] %v6286_v6  ;;  %10081 = vst [vmem:[#allocation98_spill] sm:$0xff] %v6294_v4  ;;  %v644_v6 = vmul.f32 %v6096_v13, %v6027_v62 }
 0x158   : > { %583 = vrot.lane.b32.xlu1 %v555_v8, %s5535_s13  ;;  %v562_v8 = vmul.f32 %v6116_v58, %v6034_v45 }
 0x159   : > { %763 = vrot.lane.b32.xlu0 %v736_v25, %s5538_s1  ;;  %v743_v25 = vmul.f32 %v6105_v12, %v6037_v26 }
 0x15a   : > { %v6299_v5 = vpop.permute.xlu1 %411 }
 0x15b   : > { %10082 = vst [vmem:[#allocation99_spill] sm:$0xff] %v6299_v5 }
 0x15c   : > { %593 = vrot.lane.b32.xlu1 %v560_v40, %s5535_s13  ;;  %v734_v40 = vmul.f32 %v6122_v28, %v6012_v56 }
 0x15d   : > { %767 = vrot.lane.b32.xlu0 %v738_v7, %s5538_s1 }
 0x160   : > { %597 = vrot.lane.b32.xlu1 %v562_v8, %s5535_s13  ;;  %v6312_v8 = vpop.permute.xlu1 %415 }
 0x161   : > { %777 = vrot.lane.b32.xlu0 %v743_v25, %s5538_s1  ;;  %10083 = vst [vmem:[#allocation100_spill] sm:$0xff] %v6312_v8  ;;  %v740_v25 = vmul.f32 %v6105_v12, %v6012_v56 }
 0x163   : > { %v6306_v7 = vpop.permute.xlu0 %1094 }
 0x164   : > { %579 = vrot.lane.b32.xlu1 %v553_v3, %s5535_s13 }
 0x165   : > { %759 = vrot.lane.b32.xlu0 %v734_v40, %s5538_s1  ;;  %v827_v40 = vmul.f32 %v6111_v42, %v6024_v11 }
 0x168   : > { %591 = vrot.lane.b32.xlu1 %v559_v2, %s5535_s13  ;;  %v6317_v59 = vpop.permute.xlu0 %1272  ;;  %v651_v2 = vmul.f32 %v6100_v60, %v6024_v11 }
 0x169   : > { %771 = vrot.lane.b32.xlu0 %v740_v25, %s5538_s1  ;;  %v829_v25 = vmul.f32 %v6111_v42, %v6034_v45 }
 0x16b   : > { %v6322_v3 = vpop.permute.xlu1 %1181 }
 0x16c   : > { %674 = vrot.lane.b32.xlu1 %v646_v16, %s5537_s14  ;;  %v653_v16 = vmul.f32 %v6100_v60, %v6034_v45 }
 0x16d   : > { %854 = vrot.lane.b32.xlu0 %v827_v40, %s5539_s6  ;;  %v6328_v18 = vpop.permute.xlu0 %1367  ;;  %v834_v40 = vmul.f32 %v6128_v15, %v6037_v26 }
 0x16f   : > { %v6332_v8 = vpop.permute.xlu1 %1185 }
 0x170   : > { %684 = vrot.lane.b32.xlu1 %v651_v2, %s5537_s14  ;;  %v825_v2 = vmul.f32 %v6111_v42, %v6012_v56 }
 0x171   : > { %858 = vrot.lane.b32.xlu0 %v829_v25, %s5539_s6 }
 0x172   : > { %v6340_v4 = vpop.permute.xlu0 %1545 }
 0x174   : > { %688 = vrot.lane.b32.xlu1 %v653_v16, %s5537_s14  ;;  %v6345_v5 = vpop.permute.xlu1 %1276  ;;  %v650_v16 = vmul.f32 %v6100_v60, %v6027_v62 }
 0x175   : > { %868 = vrot.lane.b32.xlu0 %v834_v40, %s5539_s6  ;;  %v831_v40 = vmul.f32 %v6128_v15, %v6012_v56 }
 0x177   : > { %v6352_v25 = vpop.permute.xlu0 %1640 }
 0x178   : > { %670 = vrot.lane.b32.xlu1 %v644_v6, %s5537_s14  ;;  %v737_v6 = vmul.f32 %v6122_v28, %v6037_v26 }
 0x179   : > { %v6355_v39 = vpop.permute.xlu1 %1363  ;;  %850 = vrot.lane.b32.xlu0 %v825_v2, %s5539_s6  ;;  %v918_v2 = vmul.f32 %v6118_v46, %v6024_v11 }
 0x17c   : > { %682 = vrot.lane.b32.xlu1 %v650_v16, %s5537_s14  ;;  %v6363_v41 = vpop.permute.xlu0 %1818 }
 0x17d   : > { %862 = vrot.lane.b32.xlu0 %v831_v40, %s5539_s6  ;;  %v742_v40 = vmul.f32 %v6105_v12, %v6024_v11 }
 0x17e   : > { %v6366_v24 = vpop.permute.xlu1 %1454 }
 0x180   : > { %765 = vrot.lane.b32.xlu1 %v737_v6, %s5538_s1  ;;  %v744_v6 = vmul.f32 %v6105_v12, %v6034_v45 }
 0x181   : > { %945 = vrot.lane.b32.xlu0 %v918_v2, %s5540_s15  ;;  %v6374_v44 = vpop.permute.xlu0 %1913 }
 0x182   : > { %v6376_v16 = vpop.permute.xlu1 %1458 }
 0x184   : > { %775 = vrot.lane.b32.xlu1 %v742_v40, %s5538_s1 }
 0x185   : > { %949 = vrot.lane.b32.xlu0 %v920_v38, %s5540_s15  ;;  %v916_v38 = vmul.f32 %v6118_v46, %v6012_v56 }
 0x186   : > { %v6386_v1 = vpop.permute.xlu0 %2116 }
 0x187   : > { %v6388_v2 = vpop.permute.xlu1 %1549 }
 0x188   : > { %779 = vrot.lane.b32.xlu1 %v744_v6, %s5538_s1 }
 0x189   : > { %959 = vrot.lane.b32.xlu0 %v925_v0, %s5540_s15  ;;  %v922_v0 = vmul.f32 %v6124_v29, %v6012_v56 }
 0x18b   : > { %v6396_v40 = vpop.permute.xlu0 %2221 }
 0x18c   : > { %761 = vrot.lane.b32.xlu1 %v735_v9, %s5538_s1  ;;  %v6401_v23 = vpop.permute.xlu1 %1636  ;;  %v828_v9 = vmul.f32 %v6111_v42, %v6037_v26 }
 0x18d   : > { %941 = vrot.lane.b32.xlu0 %v916_v38, %s5540_s15  ;;  %v1009_v38 = vmul.f32 %v6135_v49, %v6024_v11 }
 0x190   : > { %773 = vrot.lane.b32.xlu1 %v741_v22, %s5538_s1  ;;  %v6409_v6 = vpop.permute.xlu0 %128  ;;  %v833_v22 = vmul.f32 %v6128_v15, %v6024_v11 }
 0x191   : > { %10084 = vst [vmem:[#allocation101_spill] sm:$0xff] %v6409_v6  ;;  %v6411_v37 = vpop.permute.xlu1 %1727  ;;  %953 = vrot.lane.b32.xlu0 %v922_v0, %s5540_s15  ;;  %v1011_v0 = vmul.f32 %v6135_v49, %v6034_v45 }
 0x194   : > { %856 = vrot.lane.b32.xlu1 %v828_v9, %s5539_s6  ;;  %v6419_v17 = vpop.permute.xlu0 %133 }
 0x195   : > { %10085 = vst [vmem:[#allocation102_spill] sm:$0xff] %v6419_v17  ;;  %v6421_v36 = vpop.permute.xlu1 %1731  ;;  %1036 = vrot.lane.b32.xlu0 %v1009_v38, %s5541_s16  ;;  %v835_v17 = vmul.f32 %v6128_v15, %v6034_v45  ;;  %v1016_v38 = vmul.f32 %v6130_v48, %v6037_v26 }
 0x198   : > { %866 = vrot.lane.b32.xlu1 %v833_v22, %s5539_s6  ;;  %v6429_v6 = vpop.permute.xlu0 %490  ;;  %v826_v22 = vmul.f32 %v6111_v42, %v6027_v62 }
 0x199   : > { %10086 = vst [vmem:[#allocation103_spill] sm:$0xff] %v6429_v6  ;;  %1040 = vrot.lane.b32.xlu0 %v1011_v0, %s5541_s16  ;;  %v1007_v0 = vmul.f32 %v6135_v49, %v6012_v56 }
 0x19a   : > { %v6432_v9 = vpop.permute.xlu1 %1822 }
 0x19b   : > { %10087 = vst [vmem:[#allocation104_spill] sm:$0xff] %v6432_v9 }
 0x19c   : > { %870 = vrot.lane.b32.xlu1 %v835_v17, %s5539_s6  ;;  %v6439_v21 = vpop.permute.xlu0 %494  ;;  %v832_v17 = vmul.f32 %v6128_v15, %v6027_v62 }
 0x19d   : > { %10088 = vst [vmem:[#allocation105_spill] sm:$0xff] %v6439_v21  ;;  %1050 = vrot.lane.b32.xlu0 %v1016_v38, %s5541_s16  ;;  %v1013_v38 = vmul.f32 %v6130_v48, %v6012_v56 }
 0x19f   : > { %v6444_v6 = vpop.permute.xlu1 %1909 }
 0x1a0   : > { %852 = vrot.lane.b32.xlu1 %v826_v22, %s5539_s6  ;;  %v6449_v20 = vpop.permute.xlu0 %504  ;;  %v919_v22 = vmul.f32 %v6118_v46, %v6037_v26 }
 0x1a1   : > { %10089 = vst [vmem:[#allocation106_spill] sm:$0xff] %v6449_v20  ;;  %1032 = vrot.lane.b32.xlu0 %v1007_v0, %s5541_s16  ;;  %v1100_v0 = vmul.f32 %v6137_v30, %v6024_v11 }
 0x1a4   : > { %864 = vrot.lane.b32.xlu1 %v832_v17, %s5539_s6  ;;  %v6457_v21 = vpop.permute.xlu1 %2015  ;;  %v6459_v47 = vpop.permute.xlu0 %486  ;;  %v924_v17 = vmul.f32 %v6124_v29, %v6024_v11 }
 0x1a5   : > { %10090 = vst [vmem:[#allocation107_spill] sm:$0xff] %v6459_v47  ;;  %1044 = vrot.lane.b32.xlu0 %v1013_v38, %s5541_s16  ;;  %v1102_v38 = vmul.f32 %v6137_v30, %v6034_v45 }
 0x1a8   : > { %947 = vrot.lane.b32.xlu1 %v919_v22, %s5540_s15  ;;  %v6467_v20 = vpop.permute.xlu1 %2019  ;;  %v6469_v34 = vpop.permute.xlu0 %498  ;;  %v926_v22 = vmul.f32 %v6124_v29, %v6034_v45 }
 0x1a9   : > { %10091 = vst [vmem:[#allocation108_spill] sm:$0xff] %v6467_v20  ;;  %10092 = vst [vmem:[#allocation109_spill] sm:$0xff] %v6469_v34  ;;  %1127 = vrot.lane.b32.xlu0 %v1100_v0, %s5542_s17  ;;  %v1107_v0 = vmul.f32 %v6306_v7, %v6037_v26 }
 0x1ac   : > { %957 = vrot.lane.b32.xlu1 %v924_v17, %s5540_s15  ;;  %v6477_v47 = vpop.permute.xlu0 %581  ;;  %v917_v17 = vmul.f32 %v6118_v46, %v6027_v62 }
 0x1ad   : > { %10093 = vst [vmem:[#allocation110_spill] sm:$0xff] %v6477_v47  ;;  %v6479_v35 = vpop.permute.xlu1 %2120  ;;  %1131 = vrot.lane.b32.xlu0 %v1102_v38, %s5542_s17  ;;  %v1098_v38 = vmul.f32 %v6137_v30, %v6012_v56 }
 0x1ae   : > { %10094 = vst [vmem:[#allocation111_spill] sm:$0xff] %v6479_v35 }
 0x1b0   : > { %961 = vrot.lane.b32.xlu1 %v926_v22, %s5540_s15  ;;  %v6487_v34 = vpop.permute.xlu0 %585  ;;  %v923_v22 = vmul.f32 %v6124_v29, %v6027_v62 }
 0x1b1   : > { %10095 = vst [vmem:[#allocation112_spill] sm:$0xff] %v6487_v34  ;;  %1141 = vrot.lane.b32.xlu0 %v1107_v0, %s5542_s17  ;;  %v1104_v0 = vmul.f32 %v6306_v7, %v6012_v56 }
 0x1b2   : > { %v6490_v14 = vpop.permute.xlu1 %2217 }
 0x1b4   : > { %943 = vrot.lane.b32.xlu1 %v917_v17, %s5540_s15  ;;  %v6497_v47 = vpop.permute.xlu0 %595  ;;  %v1010_v17 = vmul.f32 %v6135_v49, %v6037_v26 }
 0x1b5   : > { %10096 = vst [vmem:[#allocation113_spill] sm:$0xff] %v6497_v47  ;;  %1123 = vrot.lane.b32.xlu0 %v1098_v38, %s5542_s17  ;;  %v1191_v38 = vmul.f32 %v6322_v3, %v6024_v11 }
 0x1b7   : > { %v6502_v34 = vpop.permute.xlu1 %2318 }
 0x1b8   : > { %955 = vrot.lane.b32.xlu1 %v923_v22, %s5540_s15  ;;  %v6507_v53 = vpop.permute.xlu0 %577  ;;  %v1015_v22 = vmul.f32 %v6130_v48, %v6024_v11 }
 0x1b9   : > { %10097 = vst [vmem:[#allocation114_spill] sm:$0xff] %v6507_v53  ;;  %1135 = vrot.lane.b32.xlu0 %v1104_v0, %s5542_s17  ;;  %v1193_v0 = vmul.f32 %v6322_v3, %v6034_v45 }
 0x1bb   : > { %v6512_v47 = vpop.permute.xlu1 %2322 }
 0x1bc   : > { %10098 = vst [vmem:[#allocation115_spill] sm:$0xff] %v6512_v47  ;;  %1038 = vrot.lane.b32.xlu1 %v1010_v17, %s5541_s16  ;;  %v6517_v19 = vpop.permute.xlu0 %589  ;;  %v1017_v17 = vmul.f32 %v6130_v48, %v6034_v45 }
 0x1bd   : > { %10099 = vst [vmem:[#allocation116_spill] sm:$0xff] %v6517_v19  ;;  %1218 = vrot.lane.b32.xlu0 %v1191_v38, %s5543_s2  ;;  %v1198_v38 = vmul.f32 %v6332_v8, %v6037_v26 }
 0x1bf   : > { %v6522_v53 = vpop.permute.xlu1 %492 }
 0x1c0   : > { %10100 = vst [vmem:[#allocation117_spill] sm:$0xff] %v6522_v53  ;;  %1048 = vrot.lane.b32.xlu1 %v1015_v22, %s5541_s16  ;;  %v6527_v33 = vpop.permute.xlu0 %672  ;;  %v1008_v22 = vmul.f32 %v6135_v49, %v6027_v62 }
 0x1c1   : > { %10101 = vst [vmem:[#allocation118_spill] sm:$0xff] %v6527_v33  ;;  %1222 = vrot.lane.b32.xlu0 %v1193_v0, %s5543_s2  ;;  %v1189_v0 = vmul.f32 %v6322_v3, %v6012_v56 }
 0x1c3   : > { %v6532_v19 = vpop.permute.xlu1 %502 }
 0x1c4   : > { %10102 = vst [vmem:[#allocation119_spill] sm:$0xff] %v6532_v19  ;;  %1052 = vrot.lane.b32.xlu1 %v1017_v17, %s5541_s16  ;;  %v6537_v53 = vpop.permute.xlu0 %676  ;;  %v1014_v17 = vmul.f32 %v6130_v48, %v6027_v62 }
 0x1c5   : > { %10103 = vst [vmem:[#allocation120_spill] sm:$0xff] %v6537_v53  ;;  %1232 = vrot.lane.b32.xlu0 %v1198_v38, %s5543_s2  ;;  %v1195_v38 = vmul.f32 %v6332_v8, %v6012_v56 }
 0x1c7   : > { %v6542_v33 = vpop.permute.xlu1 %506 }
 0x1c8   : > { %10104 = vst [vmem:[#allocation121_spill] sm:$0xff] %v6542_v33  ;;  %1034 = vrot.lane.b32.xlu1 %v1008_v22, %s5541_s16  ;;  %v6547_v19 = vpop.permute.xlu0 %686  ;;  %v1101_v22 = vmul.f32 %v6137_v30, %v6037_v26 }
 0x1c9   : > { %10105 = vst [vmem:[#allocation122_spill] sm:$0xff] %v6547_v19  ;;  %1214 = vrot.lane.b32.xlu0 %v1189_v0, %s5543_s2  ;;  %v1282_v0 = vmul.f32 %v6317_v59, %v6024_v11 }
 0x1cb   : > { %v6552_v53 = vpop.permute.xlu1 %488 }
 0x1cc   : > { %10106 = vst [vmem:[#allocation123_spill] sm:$0xff] %v6552_v53  ;;  %1046 = vrot.lane.b32.xlu1 %v1014_v17, %s5541_s16  ;;  %v6557_v33 = vpop.permute.xlu0 %668  ;;  %v1106_v17 = vmul.f32 %v6306_v7, %v6024_v11 }
 0x1cd   : > { %10107 = vst [vmem:[#allocation124_spill] sm:$0xff] %v6557_v33  ;;  %1226 = vrot.lane.b32.xlu0 %v1195_v38, %s5543_s2  ;;  %v1284_v38 = vmul.f32 %v6317_v59, %v6034_v45 }
 0x1cf   : > { %v6562_v19 = vpop.permute.xlu1 %500 }
 0x1d0   : > { %10108 = vst [vmem:[#allocation125_spill] sm:$0xff] %v6562_v19  ;;  %1129 = vrot.lane.b32.xlu1 %v1101_v22, %s5542_s17  ;;  %v6567_v53 = vpop.permute.xlu0 %680  ;;  %v1108_v22 = vmul.f32 %v6306_v7, %v6034_v45 }
 0x1d1   : > { %10109 = vst [vmem:[#allocation126_spill] sm:$0xff] %v6567_v53  ;;  %1309 = vrot.lane.b32.xlu0 %v1282_v0, %s5544_s18  ;;  %v1289_v0 = vmul.f32 %v6345_v5, %v6037_v26 }
 0x1d3   : > { %v6572_v33 = vpop.permute.xlu1 %583 }
 0x1d4   : > { %10110 = vst [vmem:[#allocation127_spill] sm:$0xff] %v6572_v33  ;;  %1139 = vrot.lane.b32.xlu1 %v1106_v17, %s5542_s17  ;;  %v6577_v19 = vpop.permute.xlu0 %763  ;;  %v1099_v17 = vmul.f32 %v6137_v30, %v6027_v62 }
 0x1d5   : > { %10111 = vst [vmem:[#allocation128_spill] sm:$0xff] %v6577_v19  ;;  %1313 = vrot.lane.b32.xlu0 %v1284_v38, %s5544_s18  ;;  %v1280_v38 = vmul.f32 %v6317_v59, %v6012_v56 }
 0x1d7   : > { %v6582_v53 = vpop.permute.xlu1 %593 }
 0x1d8   : > { %10112 = vst [vmem:[#allocation129_spill] sm:$0xff] %v6582_v53  ;;  %1143 = vrot.lane.b32.xlu1 %v1108_v22, %s5542_s17  ;;  %v6587_v33 = vpop.permute.xlu0 %767  ;;  %v1105_v22 = vmul.f32 %v6306_v7, %v6027_v62 }
 0x1d9   : > { %10113 = vst [vmem:[#allocation130_spill] sm:$0xff] %v6587_v33  ;;  %1323 = vrot.lane.b32.xlu0 %v1289_v0, %s5544_s18  ;;  %v1286_v0 = vmul.f32 %v6345_v5, %v6012_v56 }
 0x1db   : > { %v6592_v19 = vpop.permute.xlu1 %597 }
 0x1dc   : > { %10114 = vst [vmem:[#allocation131_spill] sm:$0xff] %v6592_v19  ;;  %1125 = vrot.lane.b32.xlu1 %v1099_v17, %s5542_s17  ;;  %v6597_v53 = vpop.permute.xlu0 %777  ;;  %v1192_v17 = vmul.f32 %v6322_v3, %v6037_v26 }
 0x1dd   : > { %10115 = vst [vmem:[#allocation132_spill] sm:$0xff] %v6597_v53  ;;  %1305 = vrot.lane.b32.xlu0 %v1280_v38, %s5544_s18  ;;  %v1373_v38 = vmul.f32 %v6355_v39, %v6024_v11 }
 0x1df   : > { %v6602_v33 = vpop.permute.xlu1 %579 }
 0x1e0   : > { %10116 = vst [vmem:[#allocation133_spill] sm:$0xff] %v6602_v33  ;;  %1137 = vrot.lane.b32.xlu1 %v1105_v22, %s5542_s17  ;;  %v6607_v19 = vpop.permute.xlu0 %759  ;;  %v1197_v22 = vmul.f32 %v6332_v8, %v6024_v11 }
 0x1e1   : > { %10117 = vst [vmem:[#allocation134_spill] sm:$0xff] %v6607_v19  ;;  %1317 = vrot.lane.b32.xlu0 %v1286_v0, %s5544_s18  ;;  %v1375_v0 = vmul.f32 %v6355_v39, %v6034_v45 }
 0x1e3   : > { %v6612_v53 = vpop.permute.xlu1 %591 }
 0x1e4   : > { %10118 = vst [vmem:[#allocation135_spill] sm:$0xff] %v6612_v53  ;;  %1220 = vrot.lane.b32.xlu1 %v1192_v17, %s5543_s2  ;;  %v6617_v33 = vpop.permute.xlu0 %771  ;;  %v1199_v17 = vmul.f32 %v6332_v8, %v6034_v45 }
 0x1e5   : > { %10119 = vst [vmem:[#allocation136_spill] sm:$0xff] %v6617_v33  ;;  %1400 = vrot.lane.b32.xlu0 %v1373_v38, %s5545_s19  ;;  %v1380_v38 = vmul.f32 %v6328_v18, %v6037_v26 }
 0x1e7   : > { %v6622_v19 = vpop.permute.xlu1 %674 }
 0x1e8   : > { %10120 = vst [vmem:[#allocation137_spill] sm:$0xff] %v6622_v19  ;;  %1230 = vrot.lane.b32.xlu1 %v1197_v22, %s5543_s2  ;;  %v6627_v53 = vpop.permute.xlu0 %854  ;;  %v1190_v22 = vmul.f32 %v6322_v3, %v6027_v62 }
 0x1e9   : > { %10121 = vst [vmem:[#allocation138_spill] sm:$0xff] %v6627_v53  ;;  %1404 = vrot.lane.b32.xlu0 %v1375_v0, %s5545_s19  ;;  %v1371_v0 = vmul.f32 %v6355_v39, %v6012_v56 }
 0x1eb   : > { %v6632_v33 = vpop.permute.xlu1 %684 }
 0x1ec   : > { %10122 = vst [vmem:[#allocation139_spill] sm:$0xff] %v6632_v33  ;;  %1234 = vrot.lane.b32.xlu1 %v1199_v17, %s5543_s2  ;;  %v6637_v19 = vpop.permute.xlu0 %858  ;;  %v1196_v17 = vmul.f32 %v6332_v8, %v6027_v62 }
 0x1ed   : > { %10123 = vst [vmem:[#allocation140_spill] sm:$0xff] %v6637_v19  ;;  %1414 = vrot.lane.b32.xlu0 %v1380_v38, %s5545_s19  ;;  %v1377_v38 = vmul.f32 %v6328_v18, %v6012_v56 }
 0x1ef   : > { %v6642_v53 = vpop.permute.xlu1 %688 }
 0x1f0   : > { %10124 = vst [vmem:[#allocation141_spill] sm:$0xff] %v6642_v53  ;;  %1216 = vrot.lane.b32.xlu1 %v1190_v22, %s5543_s2  ;;  %v6647_v33 = vpop.permute.xlu0 %868  ;;  %v1283_v22 = vmul.f32 %v6317_v59, %v6037_v26 }
 0x1f1   : > { %10125 = vst [vmem:[#allocation142_spill] sm:$0xff] %v6647_v33  ;;  %1396 = vrot.lane.b32.xlu0 %v1371_v0, %s5545_s19  ;;  %v1464_v0 = vmul.f32 %v6366_v24, %v6024_v11 }
 0x1f3   : > { %v6652_v19 = vpop.permute.xlu1 %670 }
 0x1f4   : > { %10126 = vst [vmem:[#allocation143_spill] sm:$0xff] %v6652_v19  ;;  %1228 = vrot.lane.b32.xlu1 %v1196_v17, %s5543_s2  ;;  %v6657_v53 = vpop.permute.xlu0 %850  ;;  %v1288_v17 = vmul.f32 %v6345_v5, %v6024_v11 }
 0x1f5   : > { %10127 = vst [vmem:[#allocation144_spill] sm:$0xff] %v6657_v53  ;;  %1408 = vrot.lane.b32.xlu0 %v1377_v38, %s5545_s19  ;;  %v1466_v38 = vmul.f32 %v6366_v24, %v6034_v45 }
 0x1f7   : > { %v6662_v33 = vpop.permute.xlu1 %682 }
 0x1f8   : > { %10128 = vst [vmem:[#allocation145_spill] sm:$0xff] %v6662_v33  ;;  %1311 = vrot.lane.b32.xlu1 %v1283_v22, %s5544_s18  ;;  %v6667_v19 = vpop.permute.xlu0 %862  ;;  %v1290_v22 = vmul.f32 %v6345_v5, %v6034_v45 }
 0x1f9   : > { %10129 = vst [vmem:[#allocation146_spill] sm:$0xff] %v6667_v19  ;;  %1491 = vrot.lane.b32.xlu0 %v1464_v0, %s5546_s20  ;;  %v1471_v0 = vmul.f32 %v6376_v16, %v6037_v26 }
 0x1fb   : > { %v6672_v53 = vpop.permute.xlu1 %765 }
 0x1fc   : > { %10130 = vst [vmem:[#allocation147_spill] sm:$0xff] %v6672_v53  ;;  %1321 = vrot.lane.b32.xlu1 %v1288_v17, %s5544_s18  ;;  %v6677_v33 = vpop.permute.xlu0 %945  ;;  %v1281_v17 = vmul.f32 %v6317_v59, %v6027_v62 }
 0x1fd   : > { %10131 = vst [vmem:[#allocation148_spill] sm:$0xff] %v6677_v33  ;;  %1495 = vrot.lane.b32.xlu0 %v1466_v38, %s5546_s20  ;;  %v1462_v38 = vmul.f32 %v6366_v24, %v6012_v56 }
 0x1ff   : > { %v6682_v19 = vpop.permute.xlu1 %775 }
 0x200   : > { %10132 = vst [vmem:[#allocation149_spill] sm:$0xff] %v6682_v19  ;;  %1325 = vrot.lane.b32.xlu1 %v1290_v22, %s5544_s18  ;;  %v6687_v53 = vpop.permute.xlu0 %949  ;;  %v1287_v22 = vmul.f32 %v6345_v5, %v6027_v62 }
 0x201   : > { %10133 = vst [vmem:[#allocation150_spill] sm:$0xff] %v6687_v53  ;;  %1505 = vrot.lane.b32.xlu0 %v1471_v0, %s5546_s20  ;;  %v1468_v0 = vmul.f32 %v6376_v16, %v6012_v56 }
 0x203   : > { %v6692_v33 = vpop.permute.xlu1 %779 }
 0x204   : > { %10134 = vst [vmem:[#allocation151_spill] sm:$0xff] %v6692_v33  ;;  %1307 = vrot.lane.b32.xlu1 %v1281_v17, %s5544_s18  ;;  %v6697_v19 = vpop.permute.xlu0 %959  ;;  %v1374_v17 = vmul.f32 %v6355_v39, %v6037_v26 }
 0x205   : > { %10135 = vst [vmem:[#allocation152_spill] sm:$0xff] %v6697_v19  ;;  %1487 = vrot.lane.b32.xlu0 %v1462_v38, %s5546_s20  ;;  %v1555_v38 = vmul.f32 %v6340_v4, %v6024_v11 }
 0x207   : > { %v6702_v53 = vpop.permute.xlu1 %761 }
 0x208   : > { %10136 = vst [vmem:[#allocation153_spill] sm:$0xff] %v6702_v53  ;;  %1319 = vrot.lane.b32.xlu1 %v1287_v22, %s5544_s18  ;;  %v6707_v33 = vpop.permute.xlu0 %941  ;;  %v1379_v22 = vmul.f32 %v6328_v18, %v6024_v11 }
 0x209   : > { %10137 = vst [vmem:[#allocation154_spill] sm:$0xff] %v6707_v33  ;;  %1499 = vrot.lane.b32.xlu0 %v1468_v0, %s5546_s20  ;;  %v1557_v0 = vmul.f32 %v6340_v4, %v6034_v45 }
 0x20b   : > { %v6712_v19 = vpop.permute.xlu1 %773 }
 0x20c   : > { %10138 = vst [vmem:[#allocation155_spill] sm:$0xff] %v6712_v19  ;;  %1402 = vrot.lane.b32.xlu1 %v1374_v17, %s5545_s19  ;;  %v6717_v53 = vpop.permute.xlu0 %953  ;;  %v1381_v17 = vmul.f32 %v6328_v18, %v6034_v45 }
 0x20d   : > { %10139 = vst [vmem:[#allocation156_spill] sm:$0xff] %v6717_v53  ;;  %1582 = vrot.lane.b32.xlu0 %v1555_v38, %s5547_s21  ;;  %v1562_v38 = vmul.f32 %v6388_v2, %v6037_v26 }
 0x20f   : > { %v6722_v33 = vpop.permute.xlu1 %856 }
 0x210   : > { %10140 = vst [vmem:[#allocation157_spill] sm:$0xff] %v6722_v33  ;;  %1412 = vrot.lane.b32.xlu1 %v1379_v22, %s5545_s19  ;;  %v6727_v19 = vpop.permute.xlu0 %1036  ;;  %v1372_v22 = vmul.f32 %v6355_v39, %v6027_v62 }
 0x211   : > { %10141 = vst [vmem:[#allocation158_spill] sm:$0xff] %v6727_v19  ;;  %1586 = vrot.lane.b32.xlu0 %v1557_v0, %s5547_s21  ;;  %v1553_v0 = vmul.f32 %v6340_v4, %v6012_v56 }
 0x213   : > { %v6732_v53 = vpop.permute.xlu1 %866 }
 0x214   : > { %10142 = vst [vmem:[#allocation159_spill] sm:$0xff] %v6732_v53  ;;  %1416 = vrot.lane.b32.xlu1 %v1381_v17, %s5545_s19  ;;  %v6737_v33 = vpop.permute.xlu0 %1040  ;;  %v1378_v17 = vmul.f32 %v6328_v18, %v6027_v62 }
 0x215   : > { %10143 = vst [vmem:[#allocation160_spill] sm:$0xff] %v6737_v33  ;;  %1596 = vrot.lane.b32.xlu0 %v1562_v38, %s5547_s21  ;;  %v1559_v38 = vmul.f32 %v6388_v2, %v6012_v56 }
 0x217   : > { %v6742_v19 = vpop.permute.xlu1 %870 }
 0x218   : > { %10144 = vst [vmem:[#allocation161_spill] sm:$0xff] %v6742_v19  ;;  %1398 = vrot.lane.b32.xlu1 %v1372_v22, %s5545_s19  ;;  %v6747_v53 = vpop.permute.xlu0 %1050  ;;  %v1465_v22 = vmul.f32 %v6366_v24, %v6037_v26 }
 0x219   : > { %10145 = vst [vmem:[#allocation162_spill] sm:$0xff] %v6747_v53  ;;  %1578 = vrot.lane.b32.xlu0 %v1553_v0, %s5547_s21  ;;  %v460_v0 = vmul.f32 %v6109_v57, %v6015_v55  ;;  %v1472_v57 = vmul.f32 %v6376_v16, %v6034_v45 }
 0x21b   : > { %v6752_v33 = vpop.permute.xlu1 %852 }
 0x21c   : > { %10146 = vst [vmem:[#allocation163_spill] sm:$0xff] %v6752_v33  ;;  %1410 = vrot.lane.b32.xlu1 %v1378_v17, %s5545_s19  ;;  %v6757_v19 = vpop.permute.xlu0 %1032  ;;  %v1470_v17 = vmul.f32 %v6376_v16, %v6024_v11 }
 0x21d   : > { %10147 = vst [vmem:[#allocation164_spill] sm:$0xff] %v6757_v19  ;;  %1590 = vrot.lane.b32.xlu0 %v1559_v38, %s5547_s21  ;;  %v1646_v38 = vmul.f32 %v6401_v23, %v6024_v11 }
 0x21f   : > { %v6762_v53 = vpop.permute.xlu1 %864 }
 0x220   : > { %10148 = vst [vmem:[#allocation165_spill] sm:$0xff] %v6762_v53  ;;  %1493 = vrot.lane.b32.xlu1 %v1465_v22, %s5546_s20  ;;  %v6767_v33 = vpop.permute.xlu0 %1044 }
 0x221   : > { %10149 = vst [vmem:[#allocation166_spill] sm:$0xff] %v6767_v33  ;;  %484 = vrot.lane.b32.xlu0 %v460_v0, %s5533_s30  ;;  %v1648_v0 = vmul.f32 %v6401_v23, %v6034_v45 }
 0x223   : > { %v6772_v19 = vpop.permute.xlu1 %947 }
 0x224   : > { %10150 = vst [vmem:[#allocation167_spill] sm:$0xff] %v6772_v19  ;;  %1503 = vrot.lane.b32.xlu1 %v1470_v17, %s5546_s20  ;;  %v6777_v53 = vpop.permute.xlu0 %1127  ;;  %v1463_v17 = vmul.f32 %v6366_v24, %v6027_v62 }
 0x225   : > { %10151 = vst [vmem:[#allocation168_spill] sm:$0xff] %v6777_v53  ;;  %1673 = vrot.lane.b32.xlu0 %v1646_v38, %s5548_s22  ;;  %v1653_v38 = vmul.f32 %v6352_v25, %v6037_v26 }
 0x227   : > { %v6782_v22 = vpop.permute.xlu1 %957 }
 0x228   : > { %10152 = vst [vmem:[#allocation169_spill] sm:$0xff] %v6782_v22  ;;  %1507 = vrot.lane.b32.xlu1 %v1472_v57, %s5546_s20  ;;  %v6787_v33 = vpop.permute.xlu0 %1131  ;;  %v1469_v57 = vmul.f32 %v6376_v16, %v6027_v62 }
 0x229   : > { %10153 = vst [vmem:[#allocation170_spill] sm:$0xff] %v6787_v33  ;;  %1677 = vrot.lane.b32.xlu0 %v1648_v0, %s5548_s22  ;;  %v1644_v0 = vmul.f32 %v6401_v23, %v6012_v56 }
 0x22b   : > { %v6792_v53 = vpop.permute.xlu1 %961 }
 0x22c   : > { %10154 = vst [vmem:[#allocation171_spill] sm:$0xff] %v6792_v53  ;;  %1489 = vrot.lane.b32.xlu1 %v1463_v17, %s5546_s20  ;;  %v6797_v22 = vpop.permute.xlu0 %1141  ;;  %v1556_v17 = vmul.f32 %v6340_v4, %v6037_v26 }
 0x22d   : > { %10155 = vst [vmem:[#allocation172_spill] sm:$0xff] %v6797_v22  ;;  %1687 = vrot.lane.b32.xlu0 %v1653_v38, %s5548_s22  ;;  %v1650_v38 = vmul.f32 %v6352_v25, %v6012_v56 }
 0x22f   : > { %v6802_v33 = vpop.permute.xlu1 %943 }
 0x230   : > { %10156 = vst [vmem:[#allocation173_spill] sm:$0xff] %v6802_v33  ;;  %1501 = vrot.lane.b32.xlu1 %v1469_v57, %s5546_s20  ;;  %v6807_v53 = vpop.permute.xlu0 %1123  ;;  %v1561_v57 = vmul.f32 %v6388_v2, %v6024_v11 }
 0x231   : > { %10157 = vst [vmem:[#allocation174_spill] sm:$0xff] %v6807_v53  ;;  %1669 = vrot.lane.b32.xlu0 %v1644_v0, %s5548_s22  ;;  %v551_v0 = vmul.f32 %v6093_v10, %v6015_v55  ;;  %v1554_v10 = vmul.f32 %v6340_v4, %v6027_v62 }
 0x233   : > { %v6812_v22 = vpop.permute.xlu1 %955 }
 0x234   : > { %10158 = vst [vmem:[#allocation175_spill] sm:$0xff] %v6812_v22  ;;  %1584 = vrot.lane.b32.xlu1 %v1556_v17, %s5547_s21  ;;  %v6817_v33 = vpop.permute.xlu0 %1135  ;;  %v1563_v17 = vmul.f32 %v6388_v2, %v6034_v45 }
 0x235   : > { %10159 = vst [vmem:[#allocation176_spill] sm:$0xff] %v6817_v33  ;;  %1681 = vrot.lane.b32.xlu0 %v1650_v38, %s5548_s22  ;;  %v1737_v38 = vmul.f32 %v6411_v37, %v6024_v11 }
 0x237   : > { %v6822_v53 = vpop.permute.xlu1 %1038 }
 0x238   : > { %10160 = vst [vmem:[#allocation177_spill] sm:$0xff] %v6822_v53  ;;  %1594 = vrot.lane.b32.xlu1 %v1561_v57, %s5547_s21  ;;  %v6827_v22 = vpop.permute.xlu0 %1218 }
 0x239   : > { %10161 = vst [vmem:[#allocation178_spill] sm:$0xff] %v6827_v22  ;;  %575 = vrot.lane.b32.xlu0 %v551_v0, %s5535_s13  ;;  %v1739_v0 = vmul.f32 %v6411_v37, %v6034_v45 }
 0x23b   : > { %v6832_v33 = vpop.permute.xlu1 %1048 }
 0x23c   : > { %10162 = vst [vmem:[#allocation179_spill] sm:$0xff] %v6832_v33  ;;  %1598 = vrot.lane.b32.xlu1 %v1563_v17, %s5547_s21  ;;  %v6837_v53 = vpop.permute.xlu0 %1222  ;;  %v1560_v17 = vmul.f32 %v6388_v2, %v6027_v62  ;;  %v10300_v33 = vld [vmem:[#allocation97_spill] sm:$0xff] }
 0x23d   : > { %10163 = vst [vmem:[#allocation180_spill] sm:$0xff] %v6837_v53  ;;  %1764 = vrot.lane.b32.xlu0 %v1737_v38, %s5549_s23  ;;  %v1744_v38 = vmul.f32 %v6421_v36, %v6037_v26 }
 0x23f   : > { %v6842_v57 = vpop.permute.xlu1 %1052 }
 0x240   : > { %10164 = vst [vmem:[#allocation181_spill] sm:$0xff] %v6842_v57  ;;  %1580 = vrot.lane.b32.xlu1 %v1554_v10, %s5547_s21  ;;  %v6847_v22 = vpop.permute.xlu0 %1232  ;;  %v466_v10 = vmul.f32 %v6087_v27, %v6015_v55 }
 0x241   : > { %10165 = vst [vmem:[#allocation182_spill] sm:$0xff] %v6847_v22  ;;  %1768 = vrot.lane.b32.xlu0 %v1739_v0, %s5549_s23  ;;  %v1735_v0 = vmul.f32 %v6411_v37, %v6012_v56 }
 0x243   : > { %v6852_v53 = vpop.permute.xlu1 %1034 }
 0x244   : > { %10166 = vst [vmem:[#allocation183_spill] sm:$0xff] %v6852_v53  ;;  %1592 = vrot.lane.b32.xlu1 %v1560_v17, %s5547_s21  ;;  %v6857_v57 = vpop.permute.xlu0 %1214  ;;  %v1647_v17 = vmul.f32 %v6401_v23, %v6037_v26 }
 0x245   : > { %10167 = vst [vmem:[#allocation184_spill] sm:$0xff] %v6857_v57  ;;  %1778 = vrot.lane.b32.xlu0 %v1744_v38, %s5549_s23  ;;  %v1741_v38 = vmul.f32 %v6421_v36, %v6012_v56 }
 0x247   : > { %v6862_v22 = vpop.permute.xlu1 %1046 }
 0x248   : > { %10168 = vst [vmem:[#allocation185_spill] sm:$0xff] %v6862_v22  ;;  %496 = vrot.lane.b32.xlu1 %v466_v10, %s5533_s30  ;;  %v6867_v53 = vpop.permute.xlu0 %1226  ;;  %v1652_v10 = vmul.f32 %v6352_v25, %v6024_v11  ;;  %v10298_v22 = vld [vmem:[#allocation95_spill] sm:$0xff] }
 0x249   : > { %10169 = vst [vmem:[#allocation186_spill] sm:$0xff] %v6867_v53  ;;  %1760 = vrot.lane.b32.xlu0 %v1735_v0, %s5549_s23  ;;  %v642_v0 = vmul.f32 %v6096_v13, %v6015_v55  ;;  %v1645_v13 = vmul.f32 %v6401_v23, %v6027_v62 }
 0x24b   : > { %v6872_v57 = vpop.permute.xlu1 %1129 }
 0x24c   : > { %10170 = vst [vmem:[#allocation187_spill] sm:$0xff] %v6872_v57  ;;  %1675 = vrot.lane.b32.xlu1 %v1647_v17, %s5548_s22  ;;  %v6877_v27 = vpop.permute.xlu0 %1309  ;;  %v1654_v17 = vmul.f32 %v6352_v25, %v6034_v45 }
 0x24d   : > { %10171 = vst [vmem:[#allocation188_spill] sm:$0xff] %v6877_v27  ;;  %1772 = vrot.lane.b32.xlu0 %v1741_v38, %s5549_s23  ;;  %v1828_v38 = vmul.f32 %v6363_v41, %v6024_v11 }
 0x24f   : > { %v6882_v53 = vpop.permute.xlu1 %1139 }
 0x250   : > { %10172 = vst [vmem:[#allocation189_spill] sm:$0xff] %v6882_v53  ;;  %1685 = vrot.lane.b32.xlu1 %v1652_v10, %s5548_s22  ;;  %v6887_v57 = vpop.permute.xlu0 %1313 }
 0x251   : > { %10173 = vst [vmem:[#allocation190_spill] sm:$0xff] %v6887_v57  ;;  %666 = vrot.lane.b32.xlu0 %v642_v0, %s5537_s14  ;;  %v1830_v0 = vmul.f32 %v6363_v41, %v6034_v45 }
 0x253   : > { %v6892_v27 = vpop.permute.xlu1 %1143 }
 0x254   : > { %10174 = vst [vmem:[#allocation191_spill] sm:$0xff] %v6892_v27  ;;  %1689 = vrot.lane.b32.xlu1 %v1654_v17, %s5548_s22  ;;  %v6897_v53 = vpop.permute.xlu0 %1323  ;;  %v1651_v17 = vmul.f32 %v6352_v25, %v6027_v62 }
 0x255   : > { %10175 = vst [vmem:[#allocation192_spill] sm:$0xff] %v6897_v53  ;;  %1855 = vrot.lane.b32.xlu0 %v1828_v38, %s5550_s25  ;;  %v1835_v38 = vmul.f32 %v6432_v9, %v6037_v26 }
 0x257   : > { %v6902_v10 = vpop.permute.xlu1 %1125 }
 0x258   : > { %10176 = vst [vmem:[#allocation193_spill] sm:$0xff] %v6902_v10  ;;  %1671 = vrot.lane.b32.xlu1 %v1645_v13, %s5548_s22  ;;  %v6907_v57 = vpop.permute.xlu0 %1305  ;;  %v557_v13 = vmul.f32 %v6116_v58, %v6015_v55 }
 0x259   : > { %10177 = vst [vmem:[#allocation194_spill] sm:$0xff] %v6907_v57  ;;  %1859 = vrot.lane.b32.xlu0 %v1830_v0, %s5550_s25  ;;  %v1826_v0 = vmul.f32 %v6363_v41, %v6012_v56 }
 0x25b   : > { %v6912_v53 = vpop.permute.xlu1 %1137 }
 0x25c   : > { %10178 = vst [vmem:[#allocation195_spill] sm:$0xff] %v6912_v53  ;;  %1683 = vrot.lane.b32.xlu1 %v1651_v17, %s5548_s22  ;;  %v6917_v10 = vpop.permute.xlu0 %1317  ;;  %v1738_v17 = vmul.f32 %v6411_v37, %v6037_v26 }
 0x25d   : > { %10179 = vst [vmem:[#allocation196_spill] sm:$0xff] %v6917_v10  ;;  %1869 = vrot.lane.b32.xlu0 %v1835_v38, %s5550_s25  ;;  %v1832_v38 = vmul.f32 %v6432_v9, %v6012_v56 }
 0x25f   : > { %v6922_v57 = vpop.permute.xlu1 %1220 }
 0x260   : > { %10180 = vst [vmem:[#allocation197_spill] sm:$0xff] %v6922_v57  ;;  %587 = vrot.lane.b32.xlu1 %v557_v13, %s5535_s13  ;;  %v6927_v53 = vpop.permute.xlu0 %1400  ;;  %v1743_v13 = vmul.f32 %v6421_v36, %v6024_v11 }
 0x261   : > { %10181 = vst [vmem:[#allocation198_spill] sm:$0xff] %v6927_v53  ;;  %1851 = vrot.lane.b32.xlu0 %v1826_v0, %s5550_s25  ;;  %v733_v0 = vmul.f32 %v6122_v28, %v6015_v55  ;;  %v1736_v28 = vmul.f32 %v6411_v37, %v6027_v62 }
 0x263   : > { %v6932_v10 = vpop.permute.xlu1 %1230 }
 0x264   : > { %10182 = vst [vmem:[#allocation199_spill] sm:$0xff] %v6932_v10  ;;  %1766 = vrot.lane.b32.xlu1 %v1738_v17, %s5549_s23  ;;  %v6937_v58 = vpop.permute.xlu0 %1404  ;;  %v1745_v17 = vmul.f32 %v6421_v36, %v6034_v45 }
 0x265   : > { %10183 = vst [vmem:[#allocation200_spill] sm:$0xff] %v6937_v58  ;;  %1863 = vrot.lane.b32.xlu0 %v1832_v38, %s5550_s25  ;;  %v1924_v38 = vmul.f32 %v6444_v6, %v6024_v11 }
 0x267   : > { %v6942_v53 = vpop.permute.xlu1 %1234 }
 0x268   : > { %10184 = vst [vmem:[#allocation201_spill] sm:$0xff] %v6942_v53  ;;  %1776 = vrot.lane.b32.xlu1 %v1743_v13, %s5549_s23  ;;  %v6947_v10 = vpop.permute.xlu0 %1414 }
 0x269   : > { %10185 = vst [vmem:[#allocation202_spill] sm:$0xff] %v6947_v10  ;;  %757 = vrot.lane.b32.xlu0 %v733_v0, %s5538_s1  ;;  %v1926_v0 = vmul.f32 %v6444_v6, %v6034_v45 }
 0x26b   : > { %v6952_v58 = vpop.permute.xlu1 %1216 }
 0x26c   : > { %10186 = vst [vmem:[#allocation203_spill] sm:$0xff] %v6952_v58  ;;  %1780 = vrot.lane.b32.xlu1 %v1745_v17, %s5549_s23  ;;  %v6957_v53 = vpop.permute.xlu0 %1396  ;;  %v1742_v17 = vmul.f32 %v6421_v36, %v6027_v62 }
 0x26d   : > { %10187 = vst [vmem:[#allocation204_spill] sm:$0xff] %v6957_v53  ;;  %1955 = vrot.lane.b32.xlu0 %v1924_v38, %s5551_s26  ;;  %v1931_v38 = vmul.f32 %v6374_v44, %v6024_v11 }
 0x26f   : > { %v6962_v13 = vpop.permute.xlu1 %1228 }
 0x270   : > { %10188 = vst [vmem:[#allocation205_spill] sm:$0xff] %v6962_v13  ;;  %1762 = vrot.lane.b32.xlu1 %v1736_v28, %s5549_s23  ;;  %v6967_v10 = vpop.permute.xlu0 %1408  ;;  %v648_v28 = vmul.f32 %v6100_v60, %v6015_v55 }
 0x271   : > { %10189 = vst [vmem:[#allocation206_spill] sm:$0xff] %v6967_v10  ;;  %1959 = vrot.lane.b32.xlu0 %v1926_v0, %s5551_s26  ;;  %v1933_v0 = vmul.f32 %v6374_v44, %v6034_v45 }
 0x273   : > { %v6972_v53 = vpop.permute.xlu1 %1311 }
 0x274   : > { %10190 = vst [vmem:[#allocation207_spill] sm:$0xff] %v6972_v53  ;;  %1774 = vrot.lane.b32.xlu1 %v1742_v17, %s5549_s23  ;;  %v6977_v13 = vpop.permute.xlu0 %1491  ;;  %v1829_v17 = vmul.f32 %v6363_v41, %v6037_v26 }
 0x275   : > { %10191 = vst [vmem:[#allocation208_spill] sm:$0xff] %v6977_v13  ;;  %1969 = vrot.lane.b32.xlu0 %v1931_v38, %s5551_s26  ;;  %v1922_v38 = vmul.f32 %v6444_v6, %v6012_v56 }
 0x277   : > { %v6982_v10 = vpop.permute.xlu1 %1321 }
 0x278   : > { %10192 = vst [vmem:[#allocation209_spill] sm:$0xff] %v6982_v10  ;;  %678 = vrot.lane.b32.xlu1 %v648_v28, %s5537_s14  ;;  %v6987_v53 = vpop.permute.xlu0 %1495  ;;  %v1834_v28 = vmul.f32 %v6432_v9, %v6024_v11  ;;  %s5555_s14 = smov 12  }
 0x279   : > { %10193 = vst [vmem:[#allocation210_spill] sm:$0xff] %v6987_v53  ;;  %1973 = vrot.lane.b32.xlu0 %v1933_v0, %s5551_s26  ;;  %v1929_v0 = vmul.f32 %v6374_v44, %v6012_v56 }
 0x27b   : > { %v6992_v13 = vpop.permute.xlu1 %1325 }
 0x27c   : > { %10194 = vst [vmem:[#allocation211_spill] sm:$0xff] %v6992_v13  ;;  %1857 = vrot.lane.b32.xlu1 %v1829_v17, %s5550_s25  ;;  %v6997_v60 = vpop.permute.xlu0 %1505  ;;  %v1836_v17 = vmul.f32 %v6432_v9, %v6034_v45 }
 0x27d   : > { %10195 = vst [vmem:[#allocation212_spill] sm:$0xff] %v6997_v60  ;;  %1951 = vrot.lane.b32.xlu0 %v1922_v38, %s5551_s26  ;;  %v824_v38 = vmul.f32 %v6111_v42, %v6015_v55  ;;  %v1833_v42 = vmul.f32 %v6432_v9, %v6027_v62  ;;  %v10301_v9 = vld [vmem:[#allocation99_spill] sm:$0xff] }
 0x27f   : > { %v7002_v53 = vpop.permute.xlu1 %1307 }
 0x280   : > { %10196 = vst [vmem:[#allocation213_spill] sm:$0xff] %v7002_v53  ;;  %1867 = vrot.lane.b32.xlu1 %v1834_v28, %s5550_s25  ;;  %v7007_v13 = vpop.permute.xlu0 %1487  ;;  %v1827_v28 = vmul.f32 %v6363_v41, %v6027_v62 }
 0x281   : > { %10197 = vst [vmem:[#allocation214_spill] sm:$0xff] %v7007_v13  ;;  %1965 = vrot.lane.b32.xlu0 %v1929_v0, %s5551_s26  ;;  %v2025_v0 = vmul.f32 %v6457_v21, %v6024_v11 }
 0x283   : > { %v7012_v60 = vpop.permute.xlu1 %1319 }
 0x284   : > { %10198 = vst [vmem:[#allocation215_spill] sm:$0xff] %v7012_v60  ;;  %1871 = vrot.lane.b32.xlu1 %v1836_v17, %s5550_s25  ;;  %v7017_v53 = vpop.permute.xlu0 %1499 }
 0x285   : > { %10199 = vst [vmem:[#allocation216_spill] sm:$0xff] %v7017_v53  ;;  %848 = vrot.lane.b32.xlu0 %v824_v38, %s5539_s6  ;;  %v2027_v38 = vmul.f32 %v6457_v21, %v6034_v45 }
 0x287   : > { %v7022_v13 = vpop.permute.xlu1 %1402 }
 0x288   : > { %10200 = vst [vmem:[#allocation217_spill] sm:$0xff] %v7022_v13  ;;  %1853 = vrot.lane.b32.xlu1 %v1827_v28, %s5550_s25  ;;  %v7027_v60 = vpop.permute.xlu0 %1582  ;;  %v739_v28 = vmul.f32 %v6105_v12, %v6015_v55  ;;  %v2032_v13 = vmul.f32 %v6467_v20, %v6024_v11 }
 0x289   : > { %10201 = vst [vmem:[#allocation218_spill] sm:$0xff] %v7027_v60  ;;  %2056 = vrot.lane.b32.xlu0 %v2025_v0, %s5552_s27  ;;  %v1918_v60 = vsub.s32 6, %v6005_v61  ;;  %v2034_v61 = vmul.f32 %v6467_v20, %v6034_v45 }
 0x28b   : > { %v7032_v17 = vpop.permute.xlu1 %1412 }
 0x28c   : > { %10202 = vst [vmem:[#allocation219_spill] sm:$0xff] %v7032_v17  ;;  %1865 = vrot.lane.b32.xlu1 %v1833_v42, %s5550_s25  ;;  %v7037_v53 = vpop.permute.xlu0 %1586  ;;  %v1925_v42 = vmul.f32 %v6444_v6, %v6037_v26 }
 0x28d   : > { %10203 = vst [vmem:[#allocation220_spill] sm:$0xff] %v7037_v53  ;;  %2060 = vrot.lane.b32.xlu0 %v2027_v38, %s5552_s27  ;;  %v7054_v38 = vrot.slane %v6007_v63, %v1918_v60  ;;  %v2023_v63 = vmul.f32 %v6457_v21, %v6012_v56 }
 0x28f   : > { %v7043_v0 = vpop.permute.xlu1 %1416 }
 0x290   : > { %10204 = vst [vmem:[#allocation221_spill] sm:$0xff] %v7043_v0  ;;  %769 = vrot.lane.b32.xlu1 %v739_v28, %s5538_s1  ;;  %v7048_v17 = vpop.permute.xlu0 %1596  ;;  %v10295_v0 = vld [vmem:[#allocation102_spill] sm:$0xff]  ;;  %s5558_s1 = smov 122  }
 0x291   : > { %10205 = vst [vmem:[#allocation222_spill] sm:$0xff] %v7048_v17  ;;  %2070 = vrot.lane.b32.xlu0 %v2032_v13, %s5552_s27  ;;  %v1927_v13 = vmul.f32 %v7054_v38, %v6444_v6  ;;  %v175_v27 = vmul.f32 %v6027_v62, %v10295_v0 }
 0x293   : > { %v7056_v12 = vpop.permute.xlu1 %1398 }
 0x294   : > { %10206 = vst [vmem:[#allocation223_spill] sm:$0xff] %v7056_v12  ;;  %1957 = vrot.lane.b32.xlu1 %v1925_v42, %s5551_s26  ;;  %v7061_v53 = vpop.permute.xlu0 %1578  ;;  %v1932_v42 = vmul.f32 %v6374_v44, %v6037_v26 }
 0x295   : > { %10207 = vst [vmem:[#allocation224_spill] sm:$0xff] %v7061_v53  ;;  %2074 = vrot.lane.b32.xlu0 %v2034_v61, %s5552_s27  ;;  %v2030_v61 = vmul.f32 %v6467_v20, %v6012_v56 }
 0x297   : > { %v7066_v28 = vpop.permute.xlu1 %1410 }
 0x298   : > { %10208 = vst [vmem:[#allocation225_spill] sm:$0xff] %v7066_v28  ;;  %1961 = vrot.lane.b32.xlu1 %v1927_v13, %s5551_s26  ;;  %v7071_v60 = vpop.permute.xlu0 %1590  ;;  %v1934_v13 = vmul.f32 %v7054_v38, %v6374_v44 }
 0x299   : > { %10209 = vst [vmem:[#allocation226_spill] sm:$0xff] %v7071_v60  ;;  %2052 = vrot.lane.b32.xlu0 %v2023_v63, %s5552_s27  ;;  %v915_v63 = vmul.f32 %v6118_v46, %v6015_v55  ;;  %v1930_v46 = vmul.f32 %v6374_v44, %v6027_v62 }
 0x29b   : > { %v7076_v53 = vpop.permute.xlu1 %1493 }
 0x29c   : > { %10210 = vst [vmem:[#allocation227_spill] sm:$0xff] %v7076_v53  ;;  %1971 = vrot.lane.b32.xlu1 %v1932_v42, %s5551_s26  ;;  %v7081_v17 = vpop.permute.xlu0 %484  ;;  %v1923_v42 = vmul.f32 %v6444_v6, %v6027_v62 }
 0x29d   : > { %10211 = vst [vmem:[#allocation228_spill] sm:$0xff] %v7081_v17  ;;  %2066 = vrot.lane.b32.xlu0 %v2030_v61, %s5552_s27  ;;  %v2126_v61 = vmul.f32 %v6386_v1, %v6024_v11 }
 0x29f   : > { %v7086_v60 = vpop.permute.xlu1 %1503 }
 0x2a0   : > { %10212 = vst [vmem:[#allocation229_spill] sm:$0xff] %v7086_v60  ;;  %1975 = vrot.lane.b32.xlu1 %v1934_v13, %s5551_s26  ;;  %v7091_v53 = vpop.permute.xlu0 %1673 }
 0x2a1   : > { %10213 = vst [vmem:[#allocation230_spill] sm:$0xff] %v7091_v53  ;;  %939 = vrot.lane.b32.xlu0 %v915_v63, %s5540_s15  ;;  %v2128_v63 = vmul.f32 %v6386_v1, %v6034_v45 }
 0x2a3   : > { %v7096_v17 = vpop.permute.xlu1 %1507 }
 0x2a4   : > { %10214 = vst [vmem:[#allocation231_spill] sm:$0xff] %v7096_v17  ;;  %1953 = vrot.lane.b32.xlu1 %v1923_v42, %s5551_s26  ;;  %v7101_v60 = vpop.permute.xlu0 %1677  ;;  %v830_v42 = vmul.f32 %v6128_v15, %v6015_v55  ;;  %v10293_v17 = vld [vmem:[#allocation101_spill] sm:$0xff] }
 0x2a5   : > { %10215 = vst [vmem:[#allocation232_spill] sm:$0xff] %v7101_v60  ;;  %2157 = vrot.lane.b32.xlu0 %v2126_v61, %s5553_s5  ;;  %v2133_v61 = vmul.f32 %v6479_v35, %v6024_v11  ;;  %v171_v28 = vmul.f32 %v6037_v26, %v10293_v17  ;;  %v168_v10 = vmul.f32 %v6012_v56, %v10293_v17 }
 0x2a6   : > { %v169_v58 = vmul.f32 %v6027_v62, %v10293_v17 }
 0x2a7   : > { %v7106_v13 = vpop.permute.xlu1 %1489 }
 0x2a8   : > { %10216 = vst [vmem:[#allocation233_spill] sm:$0xff] %v7106_v13  ;;  %1967 = vrot.lane.b32.xlu1 %v1930_v46, %s5551_s26  ;;  %v7111_v53 = vpop.permute.xlu0 %1687  ;;  %v2026_v46 = vmul.f32 %v6457_v21, %v6037_v26 }
 0x2a9   : > { %10217 = vst [vmem:[#allocation234_spill] sm:$0xff] %v7111_v53  ;;  %2161 = vrot.lane.b32.xlu0 %v2128_v63, %s5553_s5  ;;  %v2135_v63 = vmul.f32 %v6479_v35, %v6034_v45 }
 0x2ab   : > { %v7116_v60 = vpop.permute.xlu1 %1501 }
 0x2ac   : > { %10218 = vst [vmem:[#allocation235_spill] sm:$0xff] %v7116_v60  ;;  %860 = vrot.lane.b32.xlu1 %v830_v42, %s5539_s6  ;;  %v7121_v13 = vpop.permute.xlu0 %1669  ;;  %v2028_v42 = vmul.f32 %v6457_v21, %v7054_v38  ;;  %v10292_v60 = vld [vmem:[#allocation93_spill] sm:$0xff]  ;;  %s5559_s6 = smov 64  }
 0x2ad   : > { %10219 = vst [vmem:[#allocation236_spill] sm:$0xff] %v7121_v13  ;;  %2171 = vrot.lane.b32.xlu0 %v2133_v61, %s5553_s5  ;;  %v2124_v61 = vmul.f32 %v6386_v1, %v6012_v56 }
 0x2af   : > { %v7126_v53 = vpop.permute.xlu1 %1584 }
 0x2b0   : > { %10220 = vst [vmem:[#allocation237_spill] sm:$0xff] %v7126_v53  ;;  %2058 = vrot.lane.b32.xlu1 %v2026_v46, %s5552_s27  ;;  %v7131_v15 = vpop.permute.xlu0 %1681  ;;  %v2033_v46 = vmul.f32 %v6467_v20, %v6037_v26 }
 0x2b1   : > { %10221 = vst [vmem:[#allocation238_spill] sm:$0xff] %v7131_v15  ;;  %2175 = vrot.lane.b32.xlu0 %v2135_v63, %s5553_s5  ;;  %v2131_v63 = vmul.f32 %v6479_v35, %v6012_v56 }
 0x2b3   : > { %v7136_v13 = vpop.permute.xlu1 %1594 }
 0x2b4   : > { %10222 = vst [vmem:[#allocation239_spill] sm:$0xff] %v7136_v13  ;;  %2062 = vrot.lane.b32.xlu1 %v2028_v42, %s5552_s27  ;;  %v7141_v53 = vpop.permute.xlu0 %575  ;;  %v2035_v42 = vmul.f32 %v6467_v20, %v7054_v38 }
 0x2b5   : > { %10223 = vst [vmem:[#allocation240_spill] sm:$0xff] %v7141_v53  ;;  %2153 = vrot.lane.b32.xlu0 %v2124_v61, %s5553_s5  ;;  %v1006_v61 = vmul.f32 %v6135_v49, %v6015_v55  ;;  %v2031_v49 = vmul.f32 %v6467_v20, %v6027_v62 }
 0x2b7   : > { %v7146_v15 = vpop.permute.xlu1 %1598 }
 0x2b8   : > { %10224 = vst [vmem:[#allocation241_spill] sm:$0xff] %v7146_v15  ;;  %2072 = vrot.lane.b32.xlu1 %v2033_v46, %s5552_s27  ;;  %v7151_v13 = vpop.permute.xlu0 %1764  ;;  %v2024_v46 = vmul.f32 %v6457_v21, %v6027_v62 }
 0x2b9   : > { %10225 = vst [vmem:[#allocation242_spill] sm:$0xff] %v7151_v13  ;;  %2167 = vrot.lane.b32.xlu0 %v2131_v63, %s5553_s5  ;;  %v2227_v63 = vmul.f32 %v6490_v14, %v6024_v11 }
 0x2bb   : > { %v7156_v53 = vpop.permute.xlu1 %1580 }
 0x2bc   : > { %10226 = vst [vmem:[#allocation243_spill] sm:$0xff] %v7156_v53  ;;  %2076 = vrot.lane.b32.xlu1 %v2035_v42, %s5552_s27  ;;  %v7161_v15 = vpop.permute.xlu0 %1768 }
 0x2bd   : > { %10227 = vst [vmem:[#allocation244_spill] sm:$0xff] %v7161_v15  ;;  %1030 = vrot.lane.b32.xlu0 %v1006_v61, %s5541_s16  ;;  %v2229_v61 = vmul.f32 %v6490_v14, %v6034_v45 }
 0x2bf   : > { %v7166_v13 = vpop.permute.xlu1 %1592 }
 0x2c0   : > { %10228 = vst [vmem:[#allocation245_spill] sm:$0xff] %v7166_v13  ;;  %2054 = vrot.lane.b32.xlu1 %v2024_v46, %s5552_s27  ;;  %v7171_v53 = vpop.permute.xlu0 %1778  ;;  %v921_v46 = vmul.f32 %v6124_v29, %v6015_v55  ;;  %v10291_v13 = vld [vmem:[#allocation90_spill] sm:$0xff] }
 0x2c1   : > { %10229 = vst [vmem:[#allocation246_spill] sm:$0xff] %v7171_v53  ;;  %2258 = vrot.lane.b32.xlu0 %v2227_v63, %s5554_s29  ;;  %v2234_v63 = vmul.f32 %v6396_v40, %v6024_v11 }
 0x2c3   : > { %v7176_v42 = vpop.permute.xlu1 %496 }
 0x2c4   : > { %10230 = vst [vmem:[#allocation247_spill] sm:$0xff] %v7176_v42  ;;  %2068 = vrot.lane.b32.xlu1 %v2031_v49, %s5552_s27  ;;  %v7181_v15 = vpop.permute.xlu0 %1760  ;;  %v2127_v49 = vmul.f32 %v6386_v1, %v6037_v26 }
 0x2c5   : > { %10231 = vst [vmem:[#allocation248_spill] sm:$0xff] %v7181_v15  ;;  %2262 = vrot.lane.b32.xlu0 %v2229_v61, %s5554_s29  ;;  %v2236_v61 = vmul.f32 %v6396_v40, %v6034_v45 }
 0x2c7   : > { %v7186_v53 = vpop.permute.xlu1 %1675 }
 0x2c8   : > { %10232 = vst [vmem:[#allocation249_spill] sm:$0xff] %v7186_v53  ;;  %951 = vrot.lane.b32.xlu1 %v921_v46, %s5540_s15  ;;  %v7191_v42 = vpop.permute.xlu0 %1772  ;;  %v2129_v46 = vmul.f32 %v6386_v1, %v7054_v38  ;;  %v10288_v53 = vld [vmem:[#allocation88_spill] sm:$0xff]  ;;  %s5560_s15 = smov 120  }
 0x2c9   : > { %10233 = vst [vmem:[#allocation250_spill] sm:$0xff] %v7191_v42  ;;  %2272 = vrot.lane.b32.xlu0 %v2234_v63, %s5554_s29  ;;  %v2225_v63 = vmul.f32 %v6490_v14, %v6012_v56 }
 0x2cb   : > { %v7196_v15 = vpop.permute.xlu1 %1685 }
 0x2cc   : > { %10234 = vst [vmem:[#allocation251_spill] sm:$0xff] %v7196_v15  ;;  %2159 = vrot.lane.b32.xlu1 %v2127_v49, %s5553_s5  ;;  %v7201_v29 = vpop.permute.xlu0 %666  ;;  %v2134_v49 = vmul.f32 %v6479_v35, %v6037_v26 }
 0x2cd   : > { %10235 = vst [vmem:[#allocation252_spill] sm:$0xff] %v7201_v29  ;;  %2276 = vrot.lane.b32.xlu0 %v2236_v61, %s5554_s29  ;;  %v2232_v61 = vmul.f32 %v6396_v40, %v6012_v56 }
 0x2cf   : > { %v7206_v42 = vpop.permute.xlu1 %1689 }
 0x2d0   : > { %10236 = vst [vmem:[#allocation253_spill] sm:$0xff] %v7206_v42  ;;  %2163 = vrot.lane.b32.xlu1 %v2129_v46, %s5553_s5  ;;  %v7211_v15 = vpop.permute.xlu0 %1855  ;;  %v2136_v46 = vmul.f32 %v6479_v35, %v7054_v38 }
 0x2d1   : > { %10237 = vst [vmem:[#allocation254_spill] sm:$0xff] %v7211_v15  ;;  %2254 = vrot.lane.b32.xlu0 %v2225_v63, %s5554_s29  ;;  %v1097_v63 = vmul.f32 %v6137_v30, %v6015_v55  ;;  %v2132_v30 = vmul.f32 %v6479_v35, %v6027_v62 }
 0x2d3   : > { %v7216_v29 = vpop.permute.xlu1 %1671 }
 0x2d4   : > { %10238 = vst [vmem:[#allocation255_spill] sm:$0xff] %v7216_v29  ;;  %2173 = vrot.lane.b32.xlu1 %v2134_v49, %s5553_s5  ;;  %v7221_v42 = vpop.permute.xlu0 %1859  ;;  %v2125_v49 = vmul.f32 %v6386_v1, %v6027_v62 }
 0x2d5   : > { %10239 = vst [vmem:[#allocation256_spill] sm:$0xff] %v7221_v42  ;;  %2268 = vrot.lane.b32.xlu0 %v2232_v61, %s5554_s29  ;;  %v2328_v61 = vmul.f32 %v6502_v34, %v6024_v11 }
 0x2d7   : > { %v7226_v15 = vpop.permute.xlu1 %1683 }
 0x2d8   : > { %10240 = vst [vmem:[#allocation257_spill] sm:$0xff] %v7226_v15  ;;  %2177 = vrot.lane.b32.xlu1 %v2136_v46, %s5553_s5  ;;  %v7231_v29 = vpop.permute.xlu0 %1869 }
 0x2d9   : > { %10241 = vst [vmem:[#allocation258_spill] sm:$0xff] %v7231_v29  ;;  %1121 = vrot.lane.b32.xlu0 %v1097_v63, %s5542_s17  ;;  %v2330_v63 = vmul.f32 %v6502_v34, %v6034_v45 }
 0x2db   : > { %v7236_v42 = vpop.permute.xlu1 %587 }
 0x2dc   : > { %10242 = vst [vmem:[#allocation259_spill] sm:$0xff] %v7236_v42  ;;  %2155 = vrot.lane.b32.xlu1 %v2125_v49, %s5553_s5  ;;  %v7241_v15 = vpop.permute.xlu0 %1851  ;;  %v1012_v49 = vmul.f32 %v6130_v48, %v6015_v55 }
 0x2dd   : > { %10243 = vst [vmem:[#allocation260_spill] sm:$0xff] %v7241_v15  ;;  %2359 = vrot.lane.b32.xlu0 %v2328_v61, %s5555_s14  ;;  %v2335_v61 = vmul.f32 %v6512_v47, %v6024_v11 }
 0x2df   : > { %v7246_v46 = vpop.permute.xlu1 %1766 }
 0x2e0   : > { %10244 = vst [vmem:[#allocation261_spill] sm:$0xff] %v7246_v46  ;;  %2169 = vrot.lane.b32.xlu1 %v2132_v30, %s5553_s5  ;;  %v7251_v42 = vpop.permute.xlu0 %1863  ;;  %v2228_v30 = vmul.f32 %v6490_v14, %v6037_v26  ;;  %v10287_v46 = vld [vmem:[#allocation87_spill] sm:$0xff] }
 0x2e1   : > { %10245 = vst [vmem:[#allocation262_spill] sm:$0xff] %v7251_v42  ;;  %2363 = vrot.lane.b32.xlu0 %v2330_v63, %s5555_s14  ;;  %v2337_v63 = vmul.f32 %v6512_v47, %v6034_v45 }
 0x2e3   : > { %v7256_v15 = vpop.permute.xlu1 %1776 }
 0x2e4   : > { %10246 = vst [vmem:[#allocation263_spill] sm:$0xff] %v7256_v15  ;;  %1042 = vrot.lane.b32.xlu1 %v1012_v49, %s5541_s16  ;;  %v7261_v29 = vpop.permute.xlu0 %757  ;;  %v2230_v49 = vmul.f32 %v6490_v14, %v7054_v38  ;;  %v10286_v15 = vld [vmem:[#allocation86_spill] sm:$0xff] }
 0x2e5   : > { %10247 = vst [vmem:[#allocation264_spill] sm:$0xff] %v7261_v29  ;;  %2373 = vrot.lane.b32.xlu0 %v2335_v61, %s5555_s14  ;;  %v2326_v61 = vmul.f32 %v6502_v34, %v6012_v56 }
 0x2e7   : > { %v7266_v42 = vpop.permute.xlu1 %1780 }
 0x2e8   : > { %10248 = vst [vmem:[#allocation265_spill] sm:$0xff] %v7266_v42  ;;  %2260 = vrot.lane.b32.xlu1 %v2228_v30, %s5554_s29  ;;  %v7271_v48 = vpop.permute.xlu0 %1955  ;;  %v2235_v30 = vmul.f32 %v6396_v40, %v6037_v26 }
 0x2e9   : > { %10249 = vst [vmem:[#allocation266_spill] sm:$0xff] %v7271_v48  ;;  %2377 = vrot.lane.b32.xlu0 %v2337_v63, %s5555_s14  ;;  %v2333_v63 = vmul.f32 %v6512_v47, %v6012_v56 }
 0x2eb   : > { %v7276_v29 = vpop.permute.xlu1 %1762 }
 0x2ec   : > { %10250 = vst [vmem:[#allocation267_spill] sm:$0xff] %v7276_v29  ;;  %2264 = vrot.lane.b32.xlu1 %v2230_v49, %s5554_s29  ;;  %v7281_v42 = vpop.permute.xlu0 %1959  ;;  %v2237_v49 = vmul.f32 %v6396_v40, %v7054_v38 }
 0x2ed   : > { %10251 = vst [vmem:[#allocation268_spill] sm:$0xff] %v7281_v42  ;;  %2355 = vrot.lane.b32.xlu0 %v2326_v61, %s5555_s14  ;;  %v1188_v61 = vmul.f32 %v6322_v3, %v6015_v55  ;;  %v2233_v3 = vmul.f32 %v6396_v40, %v6027_v62 }
 0x2ef   : > { %v7286_v48 = vpop.permute.xlu1 %1774 }
 0x2f0   : > { %10252 = vst [vmem:[#allocation269_spill] sm:$0xff] %v7286_v48  ;;  %2274 = vrot.lane.b32.xlu1 %v2235_v30, %s5554_s29  ;;  %v7291_v29 = vpop.permute.xlu0 %1969  ;;  %v2226_v30 = vmul.f32 %v6490_v14, %v6027_v62 }
 0x2f1   : > { %10253 = vst [vmem:[#allocation270_spill] sm:$0xff] %v7291_v29  ;;  %2369 = vrot.lane.b32.xlu0 %v2333_v63, %s5555_s14  ;;  %v1279_v63 = vmul.f32 %v6317_v59, %v6015_v55  ;;  %v1103_v59 = vmul.f32 %v6306_v7, %v6015_v55 }
 0x2f3   : > { %v7296_v42 = vpop.permute.xlu1 %678 }
 0x2f4   : > { %10254 = vst [vmem:[#allocation271_spill] sm:$0xff] %v7296_v42  ;;  %2278 = vrot.lane.b32.xlu1 %v2237_v49, %s5554_s29  ;;  %v7301_v48 = vpop.permute.xlu0 %1973 }
 0x2f5   : > { %10255 = vst [vmem:[#allocation272_spill] sm:$0xff] %v7301_v48  ;;  %1212 = vrot.lane.b32.xlu0 %v1188_v61, %s5543_s2  ;;  %v1370_v61 = vmul.f32 %v6355_v39, %v6015_v55  ;;  %v2329_v39 = vmul.f32 %v6502_v34, %v6037_v26 }
 0x2f7   : > { %v7306_v29 = vpop.permute.xlu1 %1857 }
 0x2f8   : > { %10256 = vst [vmem:[#allocation273_spill] sm:$0xff] %v7306_v29  ;;  %2256 = vrot.lane.b32.xlu1 %v2226_v30, %s5554_s29  ;;  %v7311_v42 = vpop.permute.xlu0 %1951 }
 0x2f9   : > { %10257 = vst [vmem:[#allocation274_spill] sm:$0xff] %v7311_v42  ;;  %1303 = vrot.lane.b32.xlu0 %v1279_v63, %s5544_s18  ;;  %v1461_v63 = vmul.f32 %v6366_v24, %v6015_v55  ;;  %v2331_v24 = vmul.f32 %v6502_v34, %v7054_v38 }
 0x2fb   : > { %v7316_v49 = vpop.permute.xlu1 %1867 }
 0x2fc   : > { %10258 = vst [vmem:[#allocation275_spill] sm:$0xff] %v7316_v49  ;;  %2270 = vrot.lane.b32.xlu1 %v2233_v3, %s5554_s29  ;;  %v7321_v48 = vpop.permute.xlu0 %1965  ;;  %v10284_v49 = vld [vmem:[#allocation85_spill] sm:$0xff] }
 0x2fd   : > { %10259 = vst [vmem:[#allocation276_spill] sm:$0xff] %v7321_v48  ;;  %1394 = vrot.lane.b32.xlu0 %v1370_v61, %s5545_s19  ;;  %v1552_v61 = vmul.f32 %v6340_v4, %v6015_v55  ;;  %v2336_v4 = vmul.f32 %v6512_v47, %v6037_v26 }
 0x2ff   : > { %v7326_v30 = vpop.permute.xlu1 %1871 }
 0x300   : > { %10260 = vst [vmem:[#allocation277_spill] sm:$0xff] %v7326_v30  ;;  %1133 = vrot.lane.b32.xlu1 %v1103_v59, %s5542_s17  ;;  %v7331_v42 = vpop.permute.xlu0 %848  ;;  %v10282_v30 = vld [vmem:[#allocation82_spill] sm:$0xff]  ;;  %s5561_s17 = smov 86  }
 0x301   : > { %10261 = vst [vmem:[#allocation278_spill] sm:$0xff] %v7331_v42  ;;  %1485 = vrot.lane.b32.xlu0 %v1461_v63, %s5546_s20  ;;  %v1643_v63 = vmul.f32 %v6401_v23, %v6015_v55  ;;  %v2338_v23 = vmul.f32 %v6512_v47, %v7054_v38  ;;  %v1921_v38 = vmul.f32 %v6444_v6, %v6015_v55 }
 0x302   : > { %v239_v6 = vsel %vm9934_vm0, %v6150_v50, %v6160_v32 }
 0x303   : > { %v7336_v3 = vpop.permute.xlu1 %1853 }
 0x304   : > { %10262 = vst [vmem:[#allocation279_spill] sm:$0xff] %v7336_v3  ;;  %2361 = vrot.lane.b32.xlu1 %v2329_v39, %s5555_s14  ;;  %v7341_v7 = vpop.permute.xlu0 %2056 }
 0x305   : > { %10263 = vst [vmem:[#allocation280_spill] sm:$0xff] %v7341_v7  ;;  %1576 = vrot.lane.b32.xlu0 %v1552_v61, %s5547_s21  ;;  %v1734_v61 = vmul.f32 %v6411_v37, %v6015_v55  ;;  %v2327_v37 = vmul.f32 %v6502_v34, %v6027_v62 }
 0x307   : > { %v7346_v59 = vpop.permute.xlu1 %1865 }
 0x308   : > { %10264 = vst [vmem:[#allocation281_spill] sm:$0xff] %v7346_v59  ;;  %2365 = vrot.lane.b32.xlu1 %v2331_v24, %s5555_s14  ;;  %v7351_v48 = vpop.permute.xlu0 %2060  ;;  %v10279_v59 = vld [vmem:[#allocation79_spill] sm:$0xff] }
 0x309   : > { %10265 = vst [vmem:[#allocation282_spill] sm:$0xff] %v7351_v48  ;;  %1667 = vrot.lane.b32.xlu0 %v1643_v63, %s5548_s22  ;;  %v1825_v63 = vmul.f32 %v6363_v41, %v6015_v55 }
 0x30b   : > { %v7356_v39 = vpop.permute.xlu1 %769 }
 0x30c   : > { %10266 = vst [vmem:[#allocation283_spill] sm:$0xff] %v7356_v39  ;;  %2375 = vrot.lane.b32.xlu1 %v2336_v4, %s5555_s14  ;;  %v7361_v7 = vpop.permute.xlu0 %2070 }
 0x30d   : > { %10267 = vst [vmem:[#allocation284_spill] sm:$0xff] %v7361_v7  ;;  %1758 = vrot.lane.b32.xlu0 %v1734_v61, %s5549_s23  ;;  %v7386_v61 = vsel %vm9934_vm0, %v6145_v43, %v6142_v54  ;;  %v10272_v43 = vld [vmem:[#allocation72_spill] sm:$0xff] }
 0x30e   : > { %v10274_v7 = vld [vmem:[#allocation76_spill] sm:$0xff] }
 0x30f   : > { %v7366_v24 = vpop.permute.xlu1 %1957 }
 0x310   : > { %10268 = vst [vmem:[#allocation285_spill] sm:$0xff] %v7366_v24  ;;  %2379 = vrot.lane.b32.xlu1 %v2338_v23, %s5555_s14  ;;  %v7371_v39 = vpop.permute.xlu0 %2074  ;;  %v237_v23 = vsel %vm9934_vm0, %v6142_v54, %v6153_v31 }
 0x311   : > { %10269 = vst [vmem:[#allocation286_spill] sm:$0xff] %v7371_v39  ;;  %1849 = vrot.lane.b32.xlu0 %v1825_v63, %s5550_s25  ;;  %v238_v63 = vsel %vm9934_vm0, %v6153_v31, %v6150_v50  ;;  %v10273_v39 = vld [vmem:[#allocation74_spill] sm:$0xff]  ;;  %v2334_v31 = vmul.f32 %v6512_v47, %v6027_v62  ;;  %v259_v20 = vadd.f32 %v237_v23, %v168_v10  ;;  %v10303_v10 = vld [vmem:[#allocation100_spill] sm:$0xff] }
 0x312   : > { %v243_v54 = vsel %vm9934_vm0, %v6176_v52, %v10273_v39  ;;  %v244_v50 = vsel %vm9934_vm0, %v10273_v39, %v10274_v7  ;;  %v10280_v39 = vld [vmem:[#allocation80_spill] sm:$0xff]  ;;  %v1376_v23 = vmul.f32 %v6328_v18, %v6015_v55 }
 0x313   : > { %v7376_v4 = vpop.permute.xlu1 %1961  ;;  %v7432_v42 = vsel %vm9932_vm1, %v10279_v59, %v10280_v39 }
 0x314   : > { %10270 = vst [vmem:[#allocation287_spill] sm:$0xff] %v7376_v4  ;;  %2357 = vrot.lane.b32.xlu1 %v2327_v37, %s5555_s14  ;;  %v7381_v41 = vpop.permute.xlu0 %2052  ;;  %v240_v37 = vsel %vm9934_vm0, %v6160_v32, %v6158_v51  ;;  %v10276_v32 = vld [vmem:[#allocation78_spill] sm:$0xff]  ;;  %v10277_v4 = vld [vmem:[#allocation77_spill] sm:$0xff] }
 0x315   : > { %10271 = vst [vmem:[#allocation288_spill] sm:$0xff] %v7381_v41  ;;  %1949 = vrot.lane.b32.xlu0 %v1921_v38, %s5551_s26  ;;  %v242_v41 = vsel %vm9934_vm0, %v10272_v43, %v6176_v52  ;;  %v10275_v38 = vld [vmem:[#allocation75_spill] sm:$0xff]  ;;  %v7418_v24 = vsel %vm9932_vm1, %v10277_v4, %v10276_v32  ;;  %v2022_v52 = vmul.f32 %v6457_v21, %v6015_v55 }
 0x316   : > { %v245_v48 = vsel %vm9934_vm0, %v10274_v7, %v10275_v38  ;;  %v7427_v3 = vsel %vm9932_vm1, %v10276_v32, %v10279_v59  ;;  %v10281_v7 = vld [vmem:[#allocation81_spill] sm:$0xff]  ;;  %v10285_v32 = vld [vmem:[#allocation84_spill] sm:$0xff]  ;;  %v7451_v59 = vsel %vm9932_vm1, %v10284_v49, %v10286_v15  ;;  %vm2280_vm0 = vcmask 105472  }
 0x317   : > { %v7420_v43 = vpop.permute.xlu1 %1971  ;;  %v330_v4 = vsel %vm9932_vm1, %v10280_v39, %v10281_v7  ;;  %v7446_v29 = vsel %vm9932_vm1, %v10285_v32, %v10284_v49  ;;  %v335_v39 = vsel %vm9932_vm1, %v10286_v15, %v10287_v46  ;;  %v7473_v15 = vsel %vm9925_vm2, %v10291_v13, %v10292_v60 }
 0x318   : > { %10278 = vst [vmem:[#allocation74_spill] sm:$0xff] %v7420_v43  ;;  %v331_v43 = vsel %vm9932_vm1, %v10281_v7, %v10282_v30  ;;  %2371 = vrot.lane.b32.xlu1 %v2334_v31, %s5555_s14  ;;  %v7441_v21 = vpop.permute.xlu0 %2066  ;;  %v336_v31 = vsel %vm9932_vm1, %v10287_v46, %v10288_v53  ;;  %v10289_v7 = vld [vmem:[#allocation91_spill] sm:$0xff]  ;;  %v1194_v46 = vmul.f32 %v6332_v8, %v6015_v55  ;;  %vm9942_vm1 = vcmask 121856  }
 0x319   : > { %10283 = vst [vmem:[#allocation76_spill] sm:$0xff] %v7441_v21  ;;  %2050 = vrot.lane.b32.xlu0 %v2022_v52, %s5552_s27  ;;  %v10290_v21 = vld [vmem:[#allocation89_spill] sm:$0xff]  ;;  %v7468_v49 = vsel %vm9925_vm2, %v10289_v7, %v10291_v13  ;;  %v172_v52 = vmul.f32 %v6034_v45, %v10293_v17  ;;  %v176_v13 = vmul.f32 %v6024_v11, %v10295_v0 }
 0x31a   : > { %v7463_v32 = vsel %vm9925_vm2, %v10290_v21, %v10289_v7  ;;  %v170_v21 = vmul.f32 %v6024_v11, %v10293_v17  ;;  %v2123_v7 = vmul.f32 %v6386_v1, %v6015_v55  ;;  %v177_v8 = vmul.f32 %v6037_v26, %v10295_v0 }
 0x31b   : > { %v7483_v12 = vpop.permute.xlu1 %1975  ;;  %v178_v11 = vmul.f32 %v6034_v45, %v10295_v0  ;;  %v174_v26 = vmul.f32 %v6012_v56, %v10295_v0  ;;  %v1285_v45 = vmul.f32 %v6345_v5, %v6015_v55  ;;  %v263_v56 = vadd.f32 %v6158_v51, %v172_v52 }
 0x31c   : > { %10294 = vst [vmem:[#allocation75_spill] sm:$0xff] %v7483_v12  ;;  %1224 = vrot.lane.b32.xlu1 %v1194_v46, %s5543_s2  ;;  %v7496_v57 = vpop.permute.xlu0 %939  ;;  %v10297_v12 = vld [vmem:[#allocation92_spill] sm:$0xff]  ;;  %v261_v62 = vadd.f32 %v239_v6, %v170_v21  ;;  %v262_v0 = vadd.f32 %v240_v37, %v171_v28  ;;  %v267_v47 = vadd.f32 %v244_v50, %v176_v13  ;;  %v10302_v37 = vld [vmem:[#allocation98_spill] sm:$0xff]  ;;  %v10306_v21 = vld [vmem:[#allocation117_spill] sm:$0xff] }
 0x31d   : > { %10296 = vst [vmem:[#allocation78_spill] sm:$0xff] %v7496_v57  ;;  %v421_v1 = vsel %vm9925_vm2, %v10292_v60, %v10297_v12  ;;  %2151 = vrot.lane.b32.xlu0 %v2123_v7, %s5553_s5  ;;  %v422_v46 = vsel %vm9925_vm2, %v10297_v12, %v10298_v22  ;;  %v10299_v57 = vld [vmem:[#allocation96_spill] sm:$0xff]  ;;  %v167_v60 = vmul.f32 %v6015_v55, %v10293_v17  ;;  %v10307_v13 = vld [vmem:[#allocation103_spill] sm:$0xff] }
 0x31e   : > { %v424_v19 = vsel %vm9925_vm2, %v10300_v33, %v10299_v57  ;;  %v2224_v12 = vmul.f32 %v6490_v14, %v6015_v55  ;;  %v268_v35 = vadd.f32 %v245_v48, %v177_v8  ;;  %v260_v33 = vadd.f32 %v238_v63, %v169_v58 }
 0x31f   : > { %v7519_v7 = vpop.permute.xlu1 %1953  ;;  %v425_v5 = vsel %vm9925_vm2, %v10299_v57, %v10301_v9  ;;  %v269_v51 = vadd.f32 %v10275_v38, %v178_v11  ;;  %v265_v28 = vadd.f32 %v242_v41, %v174_v26  ;;  %v266_v6 = vadd.f32 %v243_v54, %v175_v27  ;;  %v10310_v26 = vld [vmem:[#allocation119_spill] sm:$0xff] }
 0x320   : > { %1315 = vrot.lane.b32.xlu1 %v1285_v45, %s5544_s18  ;;  %v7524_v17 = vpop.permute.xlu0 %2157  ;;  %v426_v14 = vsel %vm9925_vm2, %v10301_v9, %v10302_v37  ;;  %v427_v58 = vsel %vm9925_vm2, %v10302_v37, %v10303_v10  ;;  %v258_v48 = vadd.f32 %v7386_v61, %v167_v60  ;;  %v354_v57 = vadd.f32 %v10282_v30, %v263_v56  ;;  %s5564_s18 = smov 10  }
 0x321   : > { %2252 = vrot.lane.b32.xlu0 %v2224_v12, %s5554_s29  ;;  %v352_v63 = vadd.f32 %v330_v4, %v261_v62  ;;  %v353_v41 = vadd.f32 %v331_v43, %v262_v0  ;;  %v2325_v54 = vmul.f32 %v6502_v34, %v6015_v55  ;;  %v358_v9 = vadd.f32 %v335_v39, %v267_v47  ;;  %v10313_v62 = vld [vmem:[#allocation112_spill] sm:$0xff] }
 0x322   : > { %v359_v50 = vadd.f32 %v336_v31, %v268_v35  ;;  %v350_v38 = vadd.f32 %v7427_v3, %v259_v20  ;;  %v351_v52 = vadd.f32 %v7432_v42, %v260_v33  ;;  %v360_v18 = vadd.f32 %v10288_v53, %v269_v51 }
 0x323   : > { %v7541_v27 = vpop.permute.xlu1 %1967  ;;  %v356_v0 = vadd.f32 %v7446_v29, %v265_v28  ;;  %v357_v30 = vadd.f32 %v7451_v59, %v266_v6  ;;  %v1649_v34 = vmul.f32 %v6352_v25, %v6015_v55  ;;  %v349_v35 = vadd.f32 %v7418_v24, %v258_v48  ;;  %v10315_v28 = vld [vmem:[#allocation123_spill] sm:$0xff] }
 0x324   : > { %1406 = vrot.lane.b32.xlu1 %v1376_v23, %s5545_s19  ;;  %v7548_v61 = vpop.permute.xlu0 %2161  ;;  %v1467_v20 = vmul.f32 %v6376_v16, %v6015_v55  ;;  %v1558_v33 = vmul.f32 %v6388_v2, %v6015_v55  ;;  %v7563_v53 = vmul.f32 %v6374_v44, %v6015_v55  ;;  %v445_v47 = vadd.f32 %v10298_v22, %v354_v57  ;;  %v10305_v22 = vld [vmem:[#allocation105_spill] sm:$0xff]  ;;  %v10316_v6 = vld [vmem:[#allocation107_spill] sm:$0xff] }
 0x325   : > { %2353 = vrot.lane.b32.xlu0 %v2325_v54, %s5555_s14  ;;  %v443_v42 = vadd.f32 %v421_v1, %v352_v63  ;;  %v444_v29 = vadd.f32 %v422_v46, %v353_v41  ;;  %v7570_v25 = vmul.f32 %v6396_v40, %v6015_v55  ;;  %v449_v24 = vadd.f32 %v426_v14, %v358_v9  ;;  %v10318_v57 = vld [vmem:[#allocation125_spill] sm:$0xff] }
 0x326   : > { %v450_v16 = vadd.f32 %v427_v58, %v359_v50  ;;  %v441_v43 = vadd.f32 %v7468_v49, %v350_v38  ;;  %v442_v2 = vadd.f32 %v7473_v15, %v351_v52  ;;  %v536_v4 = vadd.f32 %v10305_v22, %v445_v47  ;;  %v10308_v15 = vld [vmem:[#allocation104_spill] sm:$0xff]  ;;  %v10319_v63 = vld [vmem:[#allocation109_spill] sm:$0xff] }
 0x327   : > { %v7566_v3 = vpop.permute.xlu1 %860  ;;  %v451_v59 = vadd.f32 %v10303_v10, %v360_v18  ;;  %v447_v39 = vadd.f32 %v424_v19, %v356_v0  ;;  %v448_v31 = vadd.f32 %v425_v5, %v357_v30  ;;  %v512_v40 = vsel %vm9928_vm3, %v10307_v13, %v10306_v21  ;;  %v10309_v19 = vld [vmem:[#allocation106_spill] sm:$0xff]  ;;  %v10314_v5 = vld [vmem:[#allocation121_spill] sm:$0xff]  ;;  %v10317_v10 = vld [vmem:[#allocation115_spill] sm:$0xff] }
 0x328   : > { %10304 = vst [vmem:[#allocation77_spill] sm:$0xff] %v7566_v3  ;;  %1497 = vrot.lane.b32.xlu1 %v1467_v20, %s5546_s20  ;;  %v7575_v44 = vpop.permute.xlu0 %2171  ;;  %v7583_v8 = vadd.f32 %v7463_v32, %v349_v35  ;;  %v1740_v49 = vmul.f32 %v6421_v36, %v6015_v55  ;;  %v7589_v1 = vmul.f32 %v10308_v15, %v6015_v55  ;;  %v10311_v32 = vld [vmem:[#allocation108_spill] sm:$0xff]  ;;  %v10312_v36 = vld [vmem:[#allocation111_spill] sm:$0xff]  ;;  %v10322_v0 = vld [vmem:[#allocation110_spill] sm:$0xff]  ;;  %vm1691_vm2 = vcmask 343040  }
 0x329   : > { %v513_v11 = vsel %vm9928_vm3, %v10306_v21, %v10305_v22  ;;  %v517_v46 = vsel %vm9928_vm3, %v10310_v26, %v10309_v19  ;;  %v7601_v45 = vmul.f32 %v10311_v32, %v6015_v55  ;;  %v7605_v56 = vmul.f32 %v10312_v36, %v6015_v55  ;;  %v10320_v38 = vld [vmem:[#allocation120_spill] sm:$0xff]  ;;  %v10321_v18 = vld [vmem:[#allocation127_spill] sm:$0xff]  ;;  %v10324_v21 = vld [vmem:[#allocation129_spill] sm:$0xff] }
 0x32a   : > { %v627_v12 = vadd.f32 %v10313_v62, %v536_v4  ;;  %v518_v51 = vsel %vm9928_vm3, %v10309_v19, %v10314_v5  ;;  %v510_v37 = vsel %vm9928_vm3, %v10316_v6, %v10315_v28  ;;  %v7619_v58 = vmul.f32 %v10317_v10, %v6015_v55  ;;  %v10327_v15 = vld [vmem:[#allocation133_spill] sm:$0xff]  ;;  %v10332_v36 = vld [vmem:[#allocation118_spill] sm:$0xff] }
 0x32b   : > { %v7597_v60 = vpop.permute.xlu1 %2058  ;;  %v534_v48 = vadd.f32 %v512_v40, %v443_v42  ;;  %v511_v23 = vsel %vm9928_vm3, %v10315_v28, %v10307_v13  ;;  %v515_v41 = vsel %vm9928_vm3, %v10319_v63, %v10318_v57  ;;  %v516_v54 = vsel %vm9928_vm3, %v10318_v57, %v10310_v26  ;;  %v10330_v26 = vld [vmem:[#allocation116_spill] sm:$0xff]  ;;  %v10331_v32 = vld [vmem:[#allocation137_spill] sm:$0xff] }
 0x32c   : > { %1588 = vrot.lane.b32.xlu1 %v1558_v33, %s5547_s21  ;;  %v7615_v14 = vpop.permute.xlu0 %2175  ;;  %v535_v9 = vadd.f32 %v513_v11, %v444_v29  ;;  %v540_v50 = vadd.f32 %v517_v46, %v449_v24  ;;  %v718_v52 = vadd.f32 %v10320_v38, %v627_v12  ;;  %v603_v30 = vsel %vm9929_vm4, %v10322_v0, %v10321_v18  ;;  %v10323_v24 = vld [vmem:[#allocation113_spill] sm:$0xff]  ;;  %v10328_v11 = vld [vmem:[#allocation114_spill] sm:$0xff] }
 0x32d   : > { %v541_v35 = vadd.f32 %v518_v51, %v450_v16  ;;  %v542_v20 = vadd.f32 %v10314_v5, %v451_v59  ;;  %v532_v33 = vadd.f32 %v510_v37, %v441_v43  ;;  %v604_v47 = vsel %vm9929_vm4, %v10321_v18, %v10313_v62  ;;  %v10326_v59 = vld [vmem:[#allocation131_spill] sm:$0xff]  ;;  %v10333_v5 = vld [vmem:[#allocation130_spill] sm:$0xff]  ;;  %v10379_v63 = vld [vmem:[#allocation181_spill] sm:$0xff] }
 0x32e   : > { %v533_v22 = vadd.f32 %v511_v23, %v442_v2  ;;  %v538_v4 = vadd.f32 %v515_v41, %v447_v39  ;;  %v539_v29 = vadd.f32 %v516_v54, %v448_v31  ;;  %v608_v13 = vsel %vm9929_vm4, %v10324_v21, %v10323_v24  ;;  %v10329_v31 = vld [vmem:[#allocation135_spill] sm:$0xff]  ;;  %v10334_v41 = vld [vmem:[#allocation122_spill] sm:$0xff] }
 0x32f   : > { %v7638_v42 = vpop.permute.xlu1 %2062  ;;  %v625_v16 = vadd.f32 %v603_v30, %v534_v48  ;;  %v609_v43 = vsel %vm9929_vm4, %v10323_v24, %v10326_v59  ;;  %v601_v19 = vsel %vm9929_vm4, %v10328_v11, %v10327_v15  ;;  %v602_v2 = vsel %vm9929_vm4, %v10327_v15, %v10322_v0  ;;  %v10335_v54 = vld [vmem:[#allocation139_spill] sm:$0xff]  ;;  %v10337_v30 = vld [vmem:[#allocation141_spill] sm:$0xff]  ;;  %v10341_v24 = vld [vmem:[#allocation126_spill] sm:$0xff] }
 0x330   : > { %1679 = vrot.lane.b32.xlu1 %v1649_v34, %s5548_s22  ;;  %v7644_v40 = vpop.permute.xlu0 %2153  ;;  %v626_v39 = vadd.f32 %v604_v47, %v535_v9  ;;  %v606_v34 = vsel %vm9929_vm4, %v10330_v26, %v10329_v31  ;;  %v607_v46 = vsel %vm9929_vm4, %v10329_v31, %v10324_v21  ;;  %v694_v62 = vsel %vm9930_vm5, %v10332_v36, %v10331_v32  ;;  %v10342_v21 = vld [vmem:[#allocation140_spill] sm:$0xff] }
 0x331   : > { %10325 = vst [vmem:[#allocation79_spill] sm:$0xff] %v7644_v40  ;;  %v631_v12 = vadd.f32 %v608_v13, %v540_v50  ;;  %v809_v51 = vadd.f32 %v10333_v5, %v718_v52  ;;  %v633_v28 = vadd.f32 %v10326_v59, %v542_v20  ;;  %v695_v37 = vsel %vm9930_vm5, %v10331_v32, %v10320_v38  ;;  %v10343_v59 = vld [vmem:[#allocation147_spill] sm:$0xff] }
 0x332   : > { %v632_v48 = vadd.f32 %v609_v43, %v541_v35  ;;  %v623_v23 = vadd.f32 %v601_v19, %v532_v33  ;;  %v624_v57 = vadd.f32 %v602_v2, %v533_v22  ;;  %v699_v9 = vsel %vm9930_vm5, %v10335_v54, %v10334_v41  ;;  %v10338_v35 = vld [vmem:[#allocation143_spill] sm:$0xff]  ;;  %v10339_v33 = vld [vmem:[#allocation124_spill] sm:$0xff] }
 0x333   : > { %v7669_v10 = vpop.permute.xlu1 %2072  ;;  %v629_v52 = vadd.f32 %v606_v34, %v538_v4  ;;  %v630_v18 = vadd.f32 %v607_v46, %v539_v29  ;;  %v716_v0 = vadd.f32 %v694_v62, %v625_v16  ;;  %v700_v38 = vsel %vm9930_vm5, %v10334_v41, %v10337_v30  ;;  %v10344_v43 = vld [vmem:[#allocation128_spill] sm:$0xff]  ;;  %v10346_v46 = vld [vmem:[#allocation149_spill] sm:$0xff]  ;;  %v10408_v40 = vld [vmem:[#allocation207_spill] sm:$0xff] }
 0x334   : > { %1770 = vrot.lane.b32.xlu1 %v1740_v49, %s5549_s23  ;;  %v7675_v50 = vpop.permute.xlu0 %2167  ;;  %v717_v20 = vadd.f32 %v695_v37, %v626_v39  ;;  %v692_v47 = vsel %vm9930_vm5, %v10339_v33, %v10338_v35  ;;  %v693_v22 = vsel %vm9930_vm5, %v10338_v35, %v10332_v36  ;;  %v10340_v49 = vld [vmem:[#allocation145_spill] sm:$0xff]  ;;  %v722_v29 = vadd.f32 %v699_v9, %v631_v12  ;;  %v10345_v34 = vld [vmem:[#allocation132_spill] sm:$0xff]  ;;  %v10347_v37 = vld [vmem:[#allocation151_spill] sm:$0xff] }
 0x335   : > { %10336 = vst [vmem:[#allocation80_spill] sm:$0xff] %v7675_v50  ;;  %v697_v4 = vsel %vm9930_vm5, %v10341_v24, %v10340_v49  ;;  %v900_v13 = vadd.f32 %v10342_v21, %v809_v51  ;;  %v698_v16 = vsel %vm9930_vm5, %v10340_v49, %v10335_v54  ;;  %v785_v15 = vsel %vm9933_vm6, %v10344_v43, %v10343_v59  ;;  %v10349_v54 = vld [vmem:[#allocation134_spill] sm:$0xff] }
 0x336   : > { %v723_v2 = vadd.f32 %v700_v38, %v632_v48  ;;  %v724_v39 = vadd.f32 %v10337_v30, %v633_v28  ;;  %v786_v31 = vsel %vm9933_vm6, %v10343_v59, %v10333_v5  ;;  %v790_v32 = vsel %vm9933_vm6, %v10346_v46, %v10345_v34  ;;  %v10348_v5 = vld [vmem:[#allocation153_spill] sm:$0xff] }
 0x337   : > { %v7696_v19 = vpop.permute.xlu1 %2076  ;;  %v714_v62 = vadd.f32 %v692_v47, %v623_v23  ;;  %v715_v12 = vadd.f32 %v693_v22, %v624_v57  ;;  %v720_v51 = vadd.f32 %v697_v4, %v629_v52  ;;  %v791_v28 = vsel %vm9933_vm6, %v10345_v34, %v10347_v37  ;;  %v10350_v23 = vld [vmem:[#allocation155_spill] sm:$0xff]  ;;  %v10351_v57 = vld [vmem:[#allocation136_spill] sm:$0xff]  ;;  %v10353_v4 = vld [vmem:[#allocation157_spill] sm:$0xff] }
 0x338   : > { %1861 = vrot.lane.b32.xlu1 %v7589_v1, %s5550_s25  ;;  %v7707_v36 = vpop.permute.xlu0 %1030  ;;  %v721_v48 = vadd.f32 %v698_v16, %v630_v18  ;;  %v807_v41 = vadd.f32 %v785_v15, %v716_v0  ;;  %v783_v9 = vsel %vm9933_vm6, %v10349_v54, %v10348_v5  ;;  %v784_v1 = vsel %vm9933_vm6, %v10348_v5, %v10344_v43  ;;  %v10352_v0 = vld [vmem:[#allocation150_spill] sm:$0xff] }
 0x339   : > { %v808_v30 = vadd.f32 %v786_v31, %v717_v20  ;;  %v813_v38 = vadd.f32 %v790_v32, %v722_v29  ;;  %v788_v52 = vsel %vm9933_vm6, %v10351_v57, %v10350_v23  ;;  %v789_v35 = vsel %vm9933_vm6, %v10350_v23, %v10346_v46  ;;  %v10354_v16 = vld [vmem:[#allocation138_spill] sm:$0xff]  ;;  %v10357_v46 = vld [vmem:[#allocation161_spill] sm:$0xff]  ;;  %v10367_v57 = vld [vmem:[#allocation171_spill] sm:$0xff] }
 0x33a   : > { %v991_v47 = vadd.f32 %v10352_v0, %v900_v13  ;;  %v814_v22 = vadd.f32 %v791_v28, %v723_v2  ;;  %v815_v49 = vadd.f32 %v10347_v37, %v724_v39  ;;  %v876_v20 = vsel %vm9938_vm7, %v10354_v16, %v10353_v4  ;;  %v10355_v31 = vld [vmem:[#allocation142_spill] sm:$0xff]  ;;  %v10356_v13 = vld [vmem:[#allocation159_spill] sm:$0xff] }
 0x33b   : > { %v7724_v18 = vpop.permute.xlu1 %2054  ;;  %v805_v59 = vadd.f32 %v783_v9, %v714_v62  ;;  %v806_v43 = vadd.f32 %v784_v1, %v715_v12  ;;  %v877_v15 = vsel %vm9938_vm7, %v10353_v4, %v10342_v21  ;;  %v881_v2 = vsel %vm9938_vm7, %v10356_v13, %v10355_v31  ;;  %v10358_v37 = vld [vmem:[#allocation163_spill] sm:$0xff]  ;;  %v10360_v12 = vld [vmem:[#allocation165_spill] sm:$0xff]  ;;  %v10361_v5 = vld [vmem:[#allocation146_spill] sm:$0xff] }
 0x33c   : > { %1963 = vrot.lane.b32.xlu1 %v7563_v53, %s5551_s26  ;;  %v7733_v29 = vpop.permute.xlu0 %2258  ;;  %v811_v39 = vadd.f32 %v788_v52, %v720_v51  ;;  %v812_v34 = vadd.f32 %v789_v35, %v721_v48  ;;  %v882_v32 = vsel %vm9938_vm7, %v10355_v31, %v10357_v46  ;;  %v10359_v53 = vld [vmem:[#allocation144_spill] sm:$0xff]  ;;  %v898_v62 = vadd.f32 %v876_v20, %v807_v41  ;;  %v10363_v4 = vld [vmem:[#allocation167_spill] sm:$0xff] }
 0x33d   : > { %v874_v28 = vsel %vm9938_vm7, %v10359_v53, %v10358_v37  ;;  %v875_v21 = vsel %vm9938_vm7, %v10358_v37, %v10354_v16  ;;  %v879_v9 = vsel %vm9938_vm7, %v10361_v5, %v10360_v12  ;;  %v880_v51 = vsel %vm9938_vm7, %v10360_v12, %v10356_v13  ;;  %v10362_v52 = vld [vmem:[#allocation160_spill] sm:$0xff] }
 0x33e   : > { %v899_v1 = vadd.f32 %v877_v15, %v808_v30  ;;  %v904_v23 = vadd.f32 %v881_v2, %v813_v38  ;;  %v1082_v35 = vadd.f32 %v10362_v52, %v991_v47  ;;  %v10364_v41 = vld [vmem:[#allocation148_spill] sm:$0xff]  ;;  %v905_v31 = vadd.f32 %v882_v32, %v814_v22  ;;  %v10366_v2 = vld [vmem:[#allocation169_spill] sm:$0xff]  ;;  %v10369_v32 = vld [vmem:[#allocation154_spill] sm:$0xff] }
 0x33f   : > { %v7756_v48 = vpop.permute.xlu1 %2068  ;;  %v967_v20 = vsel %vm963_vm8, %v10364_v41, %v10363_v4  ;;  %v906_v37 = vadd.f32 %v10357_v46, %v815_v49  ;;  %v896_v3 = vadd.f32 %v874_v28, %v805_v59  ;;  %v968_v30 = vsel %vm963_vm8, %v10363_v4, %v10352_v0  ;;  %v10365_v13 = vld [vmem:[#allocation152_spill] sm:$0xff]  ;;  %v10368_v22 = vld [vmem:[#allocation173_spill] sm:$0xff] }
 0x340   : > { %2064 = vrot.lane.b32.xlu1 %v7601_v45, %s5552_s27  ;;  %v7764_v16 = vpop.permute.xlu0 %2262  ;;  %v897_v38 = vadd.f32 %v875_v21, %v806_v43  ;;  %v902_v15 = vadd.f32 %v879_v9, %v811_v39  ;;  %v903_v47 = vadd.f32 %v880_v51, %v812_v34  ;;  %v972_v12 = vsel %vm963_vm8, %v10366_v2, %v10365_v13  ;;  %v10371_v39 = vld [vmem:[#allocation175_spill] sm:$0xff]  ;;  %v10372_v34 = vld [vmem:[#allocation156_spill] sm:$0xff]  ;;  %v10374_v21 = vld [vmem:[#allocation158_spill] sm:$0xff] }
 0x341   : > { %v989_v5 = vadd.f32 %v967_v20, %v898_v62  ;;  %v973_v45 = vsel %vm963_vm8, %v10365_v13, %v10367_v57  ;;  %v965_v49 = vsel %vm963_vm8, %v10369_v32, %v10368_v22  ;;  %v966_v0 = vsel %vm963_vm8, %v10368_v22, %v10364_v41  ;;  %v10373_v62 = vld [vmem:[#allocation177_spill] sm:$0xff]  ;;  %v10376_v41 = vld [vmem:[#allocation170_spill] sm:$0xff] }
 0x342   : > { %v990_v43 = vadd.f32 %v968_v30, %v899_v1  ;;  %v970_v46 = vsel %vm963_vm8, %v10372_v34, %v10371_v39  ;;  %v971_v28 = vsel %vm963_vm8, %v10371_v39, %v10366_v2  ;;  %v1058_v9 = vsel %vm1054_vm9, %v10374_v21, %v10373_v62  ;;  %v10377_v39 = vld [vmem:[#allocation162_spill] sm:$0xff] }
 0x343   : > { %v7782_v59 = vpop.permute.xlu1 %951  ;;  %v995_v4 = vadd.f32 %v972_v12, %v904_v23  ;;  %v1173_v1 = vadd.f32 %v10376_v41, %v1082_v35  ;;  %v997_v20 = vadd.f32 %v10367_v57, %v906_v37  ;;  %v1059_v30 = vsel %vm1054_vm9, %v10373_v62, %v10362_v52  ;;  %v10380_v37 = vld [vmem:[#allocation183_spill] sm:$0xff]  ;;  %v10381_v52 = vld [vmem:[#allocation164_spill] sm:$0xff] }
 0x344   : > { %10370 = vst [vmem:[#allocation81_spill] sm:$0xff] %v7782_v59  ;;  %2165 = vrot.lane.b32.xlu1 %v7605_v56, %s5553_s5  ;;  %v7795_v51 = vpop.permute.xlu0 %2272  ;;  %v996_v13 = vadd.f32 %v973_v45, %v905_v31  ;;  %v987_v2 = vadd.f32 %v965_v49, %v896_v3  ;;  %v988_v22 = vadd.f32 %v966_v0, %v897_v38  ;;  %v10378_v59 = vld [vmem:[#allocation179_spill] sm:$0xff]  ;;  %v10382_v38 = vld [vmem:[#allocation185_spill] sm:$0xff]  ;;  %v10385_v45 = vld [vmem:[#allocation180_spill] sm:$0xff] }
 0x345   : > { %10375 = vst [vmem:[#allocation82_spill] sm:$0xff] %v7795_v51  ;;  %v1063_v34 = vsel %vm1054_vm9, %v10378_v59, %v10377_v39  ;;  %v993_v24 = vadd.f32 %v970_v46, %v902_v15  ;;  %v994_v56 = vadd.f32 %v971_v28, %v903_v47  ;;  %v1080_v26 = vadd.f32 %v1058_v9, %v989_v5  ;;  %v10383_v15 = vld [vmem:[#allocation166_spill] sm:$0xff]  ;;  %v10387_v46 = vld [vmem:[#allocation168_spill] sm:$0xff] }
 0x346   : > { %v1064_v23 = vsel %vm1054_vm9, %v10377_v39, %v10379_v63  ;;  %v1081_v35 = vadd.f32 %v1059_v30, %v990_v43  ;;  %v1056_v3 = vsel %vm1054_vm9, %v10381_v52, %v10380_v37  ;;  %v1057_v31 = vsel %vm1054_vm9, %v10380_v37, %v10374_v21  ;;  %v10386_v43 = vld [vmem:[#allocation187_spill] sm:$0xff]  ;;  %v10388_v9 = vld [vmem:[#allocation172_spill] sm:$0xff]  ;;  %v10389_v30 = vld [vmem:[#allocation189_spill] sm:$0xff] }
 0x347   : > { %v7808_v57 = vpop.permute.xlu1 %2159  ;;  %v1061_v5 = vsel %vm1054_vm9, %v10383_v15, %v10382_v38  ;;  %v1086_v12 = vadd.f32 %v1063_v34, %v995_v4  ;;  %v1264_v49 = vadd.f32 %v10385_v45, %v1173_v1  ;;  %v1062_v0 = vsel %vm1054_vm9, %v10382_v38, %v10378_v59  ;;  %v10390_v37 = vld [vmem:[#allocation191_spill] sm:$0xff] }
 0x348   : > { %2266 = vrot.lane.b32.xlu1 %v7570_v25, %s5554_s29  ;;  %v7821_v47 = vpop.permute.xlu0 %2276  ;;  %v1149_v28 = vsel %vm1145_vm10, %v10387_v46, %v10386_v43  ;;  %v1087_v62 = vadd.f32 %v1064_v23, %v996_v13  ;;  %v1088_v21 = vadd.f32 %v10379_v63, %v997_v20  ;;  %v1150_v25 = vsel %vm1145_vm10, %v10386_v43, %v10376_v41  ;;  %v10391_v20 = vld [vmem:[#allocation193_spill] sm:$0xff]  ;;  %v10392_v23 = vld [vmem:[#allocation174_spill] sm:$0xff] }
 0x349   : > { %10384 = vst [vmem:[#allocation85_spill] sm:$0xff] %v7821_v47  ;;  %v1154_v34 = vsel %vm1145_vm10, %v10389_v30, %v10388_v9  ;;  %v1078_v4 = vadd.f32 %v1056_v3, %v987_v2  ;;  %v1079_v1 = vadd.f32 %v1057_v31, %v988_v22  ;;  %v1084_v39 = vadd.f32 %v1061_v5, %v993_v24  ;;  %v10394_v3 = vld [vmem:[#allocation190_spill] sm:$0xff]  ;;  %v10395_v5 = vld [vmem:[#allocation195_spill] sm:$0xff] }
 0x34a   : > { %v1155_v59 = vsel %vm1145_vm10, %v10388_v9, %v10390_v37  ;;  %v1085_v13 = vadd.f32 %v1062_v0, %v994_v56  ;;  %v1171_v63 = vadd.f32 %v1149_v28, %v1080_v26  ;;  %v1147_v41 = vsel %vm1145_vm10, %v10392_v23, %v10391_v20  ;;  %v10396_v56 = vld [vmem:[#allocation176_spill] sm:$0xff]  ;;  %v10397_v9 = vld [vmem:[#allocation197_spill] sm:$0xff] }
 0x34b   : > { %v7840_v38 = vpop.permute.xlu1 %2163  ;;  %v1148_v43 = vsel %vm1145_vm10, %v10391_v20, %v10387_v46  ;;  %v1172_v2 = vadd.f32 %v1150_v25, %v1081_v35  ;;  %v1177_v22 = vadd.f32 %v1154_v34, %v1086_v12  ;;  %v1355_v31 = vadd.f32 %v10394_v3, %v1264_v49  ;;  %v10398_v20 = vld [vmem:[#allocation178_spill] sm:$0xff]  ;;  %v10400_v25 = vld [vmem:[#allocation199_spill] sm:$0xff] }
 0x34c   : > { %2367 = vrot.lane.b32.xlu1 %v7619_v58, %s5555_s14  ;;  %v7850_v24 = vpop.permute.xlu0 %2254  ;;  %v1152_v26 = vsel %vm1145_vm10, %v10396_v56, %v10395_v5  ;;  %v1178_v0 = vadd.f32 %v1155_v59, %v1087_v62  ;;  %v1179_v28 = vadd.f32 %v10390_v37, %v1088_v21  ;;  %v1153_v46 = vsel %vm1145_vm10, %v10395_v5, %v10389_v30  ;;  %v10399_v49 = vld [vmem:[#allocation182_spill] sm:$0xff]  ;;  %v10401_v37 = vld [vmem:[#allocation201_spill] sm:$0xff]  ;;  %v10402_v59 = vld [vmem:[#allocation203_spill] sm:$0xff] }
 0x34d   : > { %10393 = vst [vmem:[#allocation86_spill] sm:$0xff] %v7850_v24  ;;  %v1240_v58 = vsel %vm1236_vm11, %v10398_v20, %v10397_v9  ;;  %v1169_v15 = vadd.f32 %v1147_v41, %v1078_v4  ;;  %v1170_v35 = vadd.f32 %v1148_v43, %v1079_v1  ;;  %v1241_v12 = vsel %vm1236_vm11, %v10397_v9, %v10385_v45  ;;  %v10403_v5 = vld [vmem:[#allocation184_spill] sm:$0xff]  ;;  %v10405_v9 = vld [vmem:[#allocation205_spill] sm:$0xff]  ;;  %v10406_v56 = vld [vmem:[#allocation186_spill] sm:$0xff] }
 0x34e   : > { %v1245_v62 = vsel %vm1236_vm11, %v10400_v25, %v10399_v49  ;;  %v1175_v21 = vadd.f32 %v1152_v26, %v1084_v39  ;;  %v1246_v30 = vsel %vm1236_vm11, %v10399_v49, %v10401_v37  ;;  %v1238_v4 = vsel %vm1236_vm11, %v10403_v5, %v10402_v59  ;;  %v10407_v24 = vld [vmem:[#allocation200_spill] sm:$0xff] }
 0x34f   : > { %v7869_v34 = vpop.permute.xlu1 %2173  ;;  %v1239_v1 = vsel %vm1236_vm11, %v10402_v59, %v10398_v20  ;;  %v1176_v41 = vadd.f32 %v1153_v46, %v1085_v13  ;;  %v1262_v43 = vadd.f32 %v1240_v58, %v1171_v63  ;;  %v1243_v39 = vsel %vm1236_vm11, %v10406_v56, %v10405_v9  ;;  %v10409_v5 = vld [vmem:[#allocation188_spill] sm:$0xff] }
 0x350   : > { %v7880_v45 = vpop.permute.xlu0 %2268  ;;  %v1244_v26 = vsel %vm1236_vm11, %v10405_v9, %v10400_v25  ;;  %v1263_v49 = vadd.f32 %v1241_v12, %v1172_v2  ;;  %v1268_v55 = vadd.f32 %v1245_v62, %v1177_v22  ;;  %v1446_v50 = vadd.f32 %v10407_v24, %v1355_v31  ;;  %v10411_v22 = vld [vmem:[#allocation192_spill] sm:$0xff]  ;;  %v10412_v12 = vld [vmem:[#allocation209_spill] sm:$0xff] }
 0x351   : > { %10404 = vst [vmem:[#allocation87_spill] sm:$0xff] %v7880_v45  ;;  %v1331_v20 = vsel %vm1327_vm12, %v10409_v5, %v10408_v40  ;;  %v1269_v59 = vadd.f32 %v1246_v30, %v1178_v0  ;;  %v1270_v13 = vadd.f32 %v10401_v37, %v1179_v28  ;;  %v1260_v63 = vadd.f32 %v1238_v4, %v1169_v15  ;;  %v10414_v0 = vld [vmem:[#allocation211_spill] sm:$0xff]  ;;  %v10415_v28 = vld [vmem:[#allocation213_spill] sm:$0xff] }
 0x352   : > { %v1261_v46 = vadd.f32 %v1239_v1, %v1170_v35  ;;  %v1266_v56 = vadd.f32 %v1243_v39, %v1175_v21  ;;  %v1267_v45 = vadd.f32 %v1244_v26, %v1176_v41  ;;  %v1332_v2 = vsel %vm1327_vm12, %v10408_v40, %v10394_v3  ;;  %v10416_v35 = vld [vmem:[#allocation194_spill] sm:$0xff]  ;;  %v10417_v40 = vld [vmem:[#allocation215_spill] sm:$0xff]  ;;  %v10418_v3 = vld [vmem:[#allocation196_spill] sm:$0xff] }
 0x353   : > { %v7893_v58 = vpop.permute.xlu1 %2177  ;;  %v1336_v31 = vsel %vm1327_vm12, %v10412_v12, %v10411_v22  ;;  %v1353_v62 = vadd.f32 %v1331_v20, %v1262_v43  ;;  %v1337_v15 = vsel %vm1327_vm12, %v10411_v22, %v10414_v0  ;;  %v1329_v21 = vsel %vm1327_vm12, %v10416_v35, %v10415_v28  ;;  %v10419_v1 = vld [vmem:[#allocation217_spill] sm:$0xff]  ;;  %v10420_v41 = vld [vmem:[#allocation198_spill] sm:$0xff] }
 0x354   : > { %10410 = vst [vmem:[#allocation88_spill] sm:$0xff] %v7893_v58  ;;  %v7901_v25 = vpop.permute.xlu0 %1121  ;;  %v1330_v37 = vsel %vm1327_vm12, %v10415_v28, %v10409_v5  ;;  %v1334_v30 = vsel %vm1327_vm12, %v10418_v3, %v10417_v40  ;;  %v1335_v4 = vsel %vm1327_vm12, %v10417_v40, %v10412_v12  ;;  %v1422_v43 = vsel %vm1418_vm13, %v10420_v41, %v10419_v1  ;;  %v10421_v5 = vld [vmem:[#allocation210_spill] sm:$0xff]  ;;  %v10424_v40 = vld [vmem:[#allocation219_spill] sm:$0xff] }
 0x355   : > { %10413 = vst [vmem:[#allocation91_spill] sm:$0xff] %v7901_v25  ;;  %v1423_v9 = vsel %vm1418_vm13, %v10419_v1, %v10407_v24  ;;  %v1354_v39 = vadd.f32 %v1332_v2, %v1263_v49  ;;  %v1359_v26 = vadd.f32 %v1336_v31, %v1268_v55  ;;  %v1537_v20 = vadd.f32 %v10421_v5, %v1446_v50  ;;  %v10423_v12 = vld [vmem:[#allocation202_spill] sm:$0xff]  ;;  %v10425_v55 = vld [vmem:[#allocation221_spill] sm:$0xff]  ;;  %v10427_v2 = vld [vmem:[#allocation204_spill] sm:$0xff] }
 0x356   : > { %v1361_v22 = vadd.f32 %v10414_v0, %v1270_v13  ;;  %v1360_v3 = vadd.f32 %v1337_v15, %v1269_v59  ;;  %v1351_v35 = vadd.f32 %v1329_v21, %v1260_v63  ;;  %v1352_v47 = vadd.f32 %v1330_v37, %v1261_v46  ;;  %v10426_v13 = vld [vmem:[#allocation223_spill] sm:$0xff]  ;;  %v10428_v46 = vld [vmem:[#allocation225_spill] sm:$0xff]  ;;  %v10429_v31 = vld [vmem:[#allocation206_spill] sm:$0xff] }
 0x357   : > { %v7926_v28 = vpop.permute.xlu1 %2155  ;;  %v1427_v51 = vsel %vm1418_vm13, %v10424_v40, %v10423_v12  ;;  %v1357_v23 = vadd.f32 %v1334_v30, %v1266_v56  ;;  %v1358_v58 = vadd.f32 %v1335_v4, %v1267_v45  ;;  %v1444_v24 = vadd.f32 %v1422_v43, %v1353_v62  ;;  %v10430_v62 = vld [vmem:[#allocation227_spill] sm:$0xff]  ;;  %v10431_v15 = vld [vmem:[#allocation208_spill] sm:$0xff] }
 0x358   : > { %10422 = vst [vmem:[#allocation89_spill] sm:$0xff] %v7926_v28  ;;  %v7931_v25 = vpop.permute.xlu0 %2359  ;;  %v1445_v49 = vadd.f32 %v1423_v9, %v1354_v39  ;;  %v1428_v50 = vsel %vm1418_vm13, %v10423_v12, %v10425_v55  ;;  %v1420_v59 = vsel %vm1418_vm13, %v10427_v2, %v10426_v13  ;;  %v1421_v63 = vsel %vm1418_vm13, %v10426_v13, %v10420_v41  ;;  %v10433_v4 = vld [vmem:[#allocation220_spill] sm:$0xff]  ;;  %v10436_v39 = vld [vmem:[#allocation229_spill] sm:$0xff] }
 0x359   : > { %v1425_v0 = vsel %vm1418_vm13, %v10429_v31, %v10428_v46  ;;  %v1450_v56 = vadd.f32 %v1427_v51, %v1359_v26  ;;  %v1426_v45 = vsel %vm1418_vm13, %v10428_v46, %v10424_v40  ;;  %v1513_v21 = vsel %vm1509_vm14, %v10431_v15, %v10430_v62  ;;  %v10434_v51 = vld [vmem:[#allocation228_spill] sm:$0xff] }
 0x35a   : > { %v1514_v37 = vsel %vm1509_vm14, %v10430_v62, %v10421_v5  ;;  %v1628_v1 = vadd.f32 %v10433_v4, %v1537_v20  ;;  %v1452_v41 = vadd.f32 %v10425_v55, %v1361_v22  ;;  %v509_v43 = vsel %vm9928_vm3, %v10434_v51, %v10316_v6  ;;  %v10435_v9 = vld [vmem:[#allocation212_spill] sm:$0xff]  ;;  %v10437_v20 = vld [vmem:[#allocation231_spill] sm:$0xff]  ;;  %v10438_v51 = vld [vmem:[#allocation233_spill] sm:$0xff] }
 0x35b   : > { %v7954_v30 = vpop.permute.xlu1 %2169  ;;  %v1518_v26 = vsel %vm1509_vm14, %v10436_v39, %v10435_v9  ;;  %v1451_v40 = vadd.f32 %v1428_v50, %v1360_v3  ;;  %v1442_v13 = vadd.f32 %v1420_v59, %v1351_v35  ;;  %v1443_v5 = vadd.f32 %v1421_v63, %v1352_v47  ;;  %v10442_v3 = vld [vmem:[#allocation216_spill] sm:$0xff]  ;;  %v10444_v50 = vld [vmem:[#allocation218_spill] sm:$0xff] }
 0x35c   : > { %10432 = vst [vmem:[#allocation90_spill] sm:$0xff] %v7954_v30  ;;  %v7964_v12 = vpop.permute.xlu0 %2363  ;;  %v1448_v46 = vadd.f32 %v1425_v0, %v1357_v23  ;;  %v1449_v62 = vadd.f32 %v1426_v45, %v1358_v58  ;;  %v1535_v31 = vadd.f32 %v1513_v21, %v1444_v24  ;;  %v1536_v2 = vadd.f32 %v1514_v37, %v1445_v49  ;;  %v10439_v30 = vld [vmem:[#allocation214_spill] sm:$0xff]  ;;  %v10441_v58 = vld [vmem:[#allocation235_spill] sm:$0xff]  ;;  %v10443_v49 = vld [vmem:[#allocation237_spill] sm:$0xff] }
 0x35d   : > { %v1519_v22 = vsel %vm1509_vm14, %v10435_v9, %v10437_v20  ;;  %v531_v55 = vadd.f32 %v509_v43, %v7583_v8  ;;  %v1541_v6 = vadd.f32 %v1518_v26, %v1450_v56  ;;  %v1511_v28 = vsel %vm1509_vm14, %v10439_v30, %v10438_v51  ;;  %v10446_v56 = vld [vmem:[#allocation232_spill] sm:$0xff]  ;;  %v10447_v21 = vld [vmem:[#allocation222_spill] sm:$0xff]  ;;  %v10448_v37 = vld [vmem:[#allocation239_spill] sm:$0xff] }
 0x35e   : > { %v1512_v35 = vsel %vm1509_vm14, %v10438_v51, %v10431_v15  ;;  %vm9940_vm3 = vcmask 334848   ;;  %v1543_v23 = vadd.f32 %v10437_v20, %v1452_v41  ;;  %v1516_v24 = vsel %vm1509_vm14, %v10442_v3, %v10441_v58  ;;  %v10450_v20 = vld [vmem:[#allocation241_spill] sm:$0xff]  ;;  %v10452_v3 = vld [vmem:[#allocation224_spill] sm:$0xff] }
 0x35f   : > { %v7976_v47 = vpop.permute.xlu1 %1042  ;;  %v1517_v8 = vsel %vm1509_vm14, %v10441_v58, %v10436_v39  ;;  %v1604_v59 = vsel %vm1600_vm15, %v10444_v50, %v10443_v49  ;;  %v1542_v0 = vadd.f32 %v1519_v22, %v1451_v40  ;;  %v1719_v45 = vadd.f32 %v10446_v56, %v1628_v1  ;;  %v10449_v39 = vld [vmem:[#allocation240_spill] sm:$0xff]  ;;  %v10451_v58 = vld [vmem:[#allocation243_spill] sm:$0xff] }
 0x360   : > { %10440 = vst [vmem:[#allocation93_spill] sm:$0xff] %v7976_v47  ;;  %v7988_v63 = vpop.permute.xlu0 %2373  ;;  %v1605_v15 = vsel %vm1600_vm15, %v10443_v49, %v10433_v4  ;;  %v1609_v41 = vsel %vm1600_vm15, %v10448_v37, %v10447_v21  ;;  %v1533_v43 = vadd.f32 %v1511_v28, %v1442_v13  ;;  %v1534_v9 = vadd.f32 %v1512_v35, %v1443_v5  ;;  %v10454_v5 = vld [vmem:[#allocation226_spill] sm:$0xff] }
 0x361   : > { %10445 = vst [vmem:[#allocation101_spill] sm:$0xff] %v7988_v63  ;;  %v600_v26 = vsel %vm9929_vm4, %v10449_v39, %v10328_v11  ;;  %v1610_v40 = vsel %vm1600_vm15, %v10447_v21, %v10450_v20  ;;  %v1539_v22 = vadd.f32 %v1516_v24, %v1448_v46  ;;  %v1540_v1 = vadd.f32 %v1517_v8, %v1449_v62  ;;  %v10453_v11 = vld [vmem:[#allocation245_spill] sm:$0xff]  ;;  %v10458_v21 = vld [vmem:[#allocation234_spill] sm:$0xff]  ;;  %v10460_v39 = vld [vmem:[#allocation244_spill] sm:$0xff] }
 0x362   : > { %v1626_v51 = vadd.f32 %v1604_v59, %v1535_v31  ;;  %v1602_v4 = vsel %vm1600_vm15, %v10452_v3, %v10451_v58  ;;  %v1627_v47 = vadd.f32 %v1605_v15, %v1536_v2  ;;  %v1632_v28 = vadd.f32 %v1609_v41, %v1541_v6  ;;  %v10456_v8 = vld [vmem:[#allocation249_spill] sm:$0xff]  ;;  %v10457_v59 = vld [vmem:[#allocation230_spill] sm:$0xff]  ;;  %v10459_v41 = vld [vmem:[#allocation251_spill] sm:$0xff] }
 0x363   : > { %v8006_v49 = vpop.permute.xlu1 %2260  ;;  %v1603_v13 = vsel %vm1600_vm15, %v10451_v58, %v10444_v50  ;;  %v1607_v35 = vsel %vm1600_vm15, %v10454_v5, %v10453_v11  ;;  %vm1873_vm4 = vcmask 326656   ;;  %v622_v31 = vadd.f32 %v600_v26, %v531_v55  ;;  %v10462_v58 = vld [vmem:[#allocation253_spill] sm:$0xff] }
 0x364   : > { %v8014_v46 = vpop.permute.xlu0 %2377  ;;  %v1633_v62 = vadd.f32 %v1610_v40, %v1542_v0  ;;  %v1634_v24 = vadd.f32 %v10450_v20, %v1543_v23  ;;  %v1608_v2 = vsel %vm1600_vm15, %v10453_v11, %v10448_v37  ;;  %v1624_v6 = vadd.f32 %v1602_v4, %v1533_v43  ;;  %v10461_v20 = vld [vmem:[#allocation252_spill] sm:$0xff]  ;;  %v10468_v5 = vld [vmem:[#allocation261_spill] sm:$0xff] }
 0x365   : > { %10455 = vst [vmem:[#allocation92_spill] sm:$0xff] %v8014_v46  ;;  %v1695_v50 = vsel %vm1691_vm2, %v10457_v59, %v10456_v8  ;;  %v1696_v15 = vsel %vm1691_vm2, %v10456_v8, %v10446_v56  ;;  %v1700_v55 = vsel %vm1691_vm2, %v10459_v41, %v10458_v21  ;;  %v1625_v0 = vadd.f32 %v1603_v13, %v1534_v9  ;;  %v10463_v56 = vld [vmem:[#allocation255_spill] sm:$0xff]  ;;  %v10464_v11 = vld [vmem:[#allocation236_spill] sm:$0xff] }
 0x366   : > { %v1810_v23 = vadd.f32 %v10460_v39, %v1719_v45  ;;  %v1630_v26 = vadd.f32 %v1607_v35, %v1539_v22  ;;  %v691_v37 = vsel %vm9930_vm5, %v10461_v20, %v10339_v33  ;;  %v1631_v40 = vadd.f32 %v1608_v2, %v1540_v1  ;;  %v10466_v35 = vld [vmem:[#allocation257_spill] sm:$0xff]  ;;  %v10467_v20 = vld [vmem:[#allocation238_spill] sm:$0xff] }
 0x367   : > { %v8033_v43 = vpop.permute.xlu1 %2264  ;;  %v1701_v4 = vsel %vm1691_vm2, %v10458_v21, %v10462_v58  ;;  %v1693_v8 = vsel %vm1691_vm2, %v10464_v11, %v10463_v56  ;;  %v1694_v45 = vsel %vm1691_vm2, %v10463_v56, %v10457_v59  ;;  %v1717_v22 = vadd.f32 %v1695_v50, %v1626_v51  ;;  %v10469_v11 = vld [vmem:[#allocation242_spill] sm:$0xff] }
 0x368   : > { %v8044_v9 = vpop.permute.xlu0 %2355  ;;  %v1718_v13 = vadd.f32 %v1696_v15, %v1627_v47  ;;  %v1723_v33 = vadd.f32 %v1700_v55, %v1632_v28  ;;  %v1698_v1 = vsel %vm1691_vm2, %v10467_v20, %v10466_v35  ;;  %vm9941_vm5 = vcmask 130048   ;;  %v10471_v56 = vld [vmem:[#allocation246_spill] sm:$0xff]  ;;  %v10473_v20 = vld [vmem:[#allocation264_spill] sm:$0xff] }
 0x369   : > { %10465 = vst [vmem:[#allocation95_spill] sm:$0xff] %v8044_v9  ;;  %v713_v2 = vadd.f32 %v691_v37, %v622_v31  ;;  %v1699_v21 = vsel %vm1691_vm2, %v10466_v35, %v10459_v41  ;;  %v1786_v3 = vsel %vm9940_vm3, %v10469_v11, %v10468_v5  ;;  %v1787_v51 = vsel %vm9940_vm3, %v10468_v5, %v10460_v39  ;;  %v10470_v31 = vld [vmem:[#allocation256_spill] sm:$0xff]  ;;  %v10472_v41 = vld [vmem:[#allocation263_spill] sm:$0xff] }
 0x36a   : > { %v1724_v47 = vadd.f32 %v1701_v4, %v1633_v62  ;;  %v1725_v28 = vadd.f32 %v10462_v58, %v1634_v24  ;;  %v1715_v59 = vadd.f32 %v1693_v8, %v1624_v6  ;;  %v1716_v50 = vadd.f32 %v1694_v45, %v1625_v0  ;;  %v10475_v6 = vld [vmem:[#allocation265_spill] sm:$0xff]  ;;  %v10476_v39 = vld [vmem:[#allocation267_spill] sm:$0xff] }
 0x36b   : > { %v8059_v15 = vpop.permute.xlu1 %2274  ;;  %v1901_v55 = vadd.f32 %v10470_v31, %v1810_v23  ;;  %v1721_v37 = vadd.f32 %v1698_v1, %v1630_v26  ;;  %v1791_v35 = vsel %vm9940_vm3, %v10472_v41, %v10471_v56  ;;  %v782_v9 = vsel %vm9933_vm6, %v10473_v20, %v10349_v54  ;;  %v10477_v23 = vld [vmem:[#allocation248_spill] sm:$0xff]  ;;  %v10478_v4 = vld [vmem:[#allocation269_spill] sm:$0xff]  ;;  %v10479_v54 = vld [vmem:[#allocation250_spill] sm:$0xff] }
 0x36c   : > { %v8068_v30 = vpop.permute.xlu0 %2369  ;;  %v1722_v5 = vadd.f32 %v1699_v21, %v1631_v40  ;;  %v1808_v62 = vadd.f32 %v1786_v3, %v1717_v22  ;;  %v1809_v24 = vadd.f32 %v1787_v51, %v1718_v13  ;;  %v1792_v0 = vsel %vm9940_vm3, %v10471_v56, %v10475_v6  ;;  %v10480_v22 = vld [vmem:[#allocation273_spill] sm:$0xff]  ;;  %v10481_v13 = vld [vmem:[#allocation254_spill] sm:$0xff] }
 0x36d   : > { %10474 = vst [vmem:[#allocation96_spill] sm:$0xff] %v8068_v30  ;;  %v1784_v26 = vsel %vm9940_vm3, %v10477_v23, %v10476_v39  ;;  %v1785_v58 = vsel %vm9940_vm3, %v10476_v39, %v10469_v11  ;;  %v1789_v8 = vsel %vm9940_vm3, %v10479_v54, %v10478_v4  ;;  %v1790_v3 = vsel %vm9940_vm3, %v10478_v4, %v10472_v41  ;;  %v10482_v56 = vld [vmem:[#allocation258_spill] sm:$0xff]  ;;  %v10483_v39 = vld [vmem:[#allocation275_spill] sm:$0xff] }
 0x36e   : > { %v1814_v40 = vadd.f32 %v1791_v35, %v1723_v33  ;;  %v804_v45 = vadd.f32 %v782_v9, %v713_v2  ;;  %v1877_v20 = vsel %vm1873_vm4, %v10481_v13, %v10480_v22  ;;  %v1878_v1 = vsel %vm1873_vm4, %v10480_v22, %v10470_v31  ;;  %v10484_v33 = vld [vmem:[#allocation277_spill] sm:$0xff] }
 0x36f   : > { %vm2179_vm6 = vcmask 113664   ;;  %v8091_v11 = vpop.permute.xlu1 %2278  ;;  %v1815_v21 = vadd.f32 %v1792_v0, %v1724_v47  ;;  %v1816_v51 = vadd.f32 %v10475_v6, %v1725_v28  ;;  %v1882_v41 = vsel %vm1873_vm4, %v10483_v39, %v10482_v56  ;;  %v10485_v47 = vld [vmem:[#allocation278_spill] sm:$0xff]  ;;  %v10486_v6 = vld [vmem:[#allocation279_spill] sm:$0xff]  ;;  %v10487_v0 = vld [vmem:[#allocation260_spill] sm:$0xff] }
 0x370   : > { %v1883_v9 = vsel %vm1873_vm4, %v10482_v56, %v10484_v33  ;;  %v8100_v2 = vpop.permute.xlu0 %1212  ;;  %v1806_v35 = vadd.f32 %v1784_v26, %v1715_v59  ;;  %v1807_v4 = vadd.f32 %v1785_v58, %v1716_v50  ;;  %v1812_v54 = vadd.f32 %v1789_v8, %v1721_v37  ;;  %v10489_v37 = vld [vmem:[#allocation281_spill] sm:$0xff]  ;;  %v10492_v26 = vld [vmem:[#allocation266_spill] sm:$0xff]  ;;  %v10493_v8 = vld [vmem:[#allocation268_spill] sm:$0xff] }
 0x371   : > { %v1813_v31 = vadd.f32 %v1790_v3, %v1722_v5  ;;  %v1899_v22 = vadd.f32 %v1877_v20, %v1808_v62  ;;  %v1900_v30 = vadd.f32 %v1878_v1, %v1809_v24  ;;  %v873_v28 = vsel %vm9938_vm7, %v10485_v47, %v10359_v53  ;;  %v10490_v5 = vld [vmem:[#allocation262_spill] sm:$0xff]  ;;  %v10491_v24 = vld [vmem:[#allocation285_spill] sm:$0xff]  ;;  %v10494_v1 = vld [vmem:[#allocation287_spill] sm:$0xff] }
 0x372   : > { %v1875_v23 = vsel %vm1873_vm4, %v10487_v0, %v10486_v6  ;;  %v1905_v46 = vadd.f32 %v1882_v41, %v1814_v40  ;;  %v1906_v63 = vadd.f32 %v1883_v9, %v1815_v21  ;;  %v1907_v56 = vadd.f32 %v10484_v33, %v1816_v51  ;;  %v10495_v51 = vld [vmem:[#allocation74_spill] sm:$0xff]  ;;  %v10497_v9 = vld [vmem:[#allocation272_spill] sm:$0xff] }
 0x373   : > { %v1876_v59 = vsel %vm1873_vm4, %v10486_v6, %v10481_v13  ;;  %v8112_v50 = vpop.permute.xlu1 %2256  ;;  %v1880_v62 = vsel %vm1873_vm4, %v10490_v5, %v10489_v37  ;;  %v1881_v53 = vsel %vm1873_vm4, %v10489_v37, %v10483_v39  ;;  %v1981_v58 = vsel %vm9941_vm5, %v10492_v26, %v10491_v24  ;;  %v10496_v41 = vld [vmem:[#allocation270_spill] sm:$0xff]  ;;  %v10498_v6 = vld [vmem:[#allocation75_spill] sm:$0xff] }
 0x374   : > { %10488 = vst [vmem:[#allocation99_spill] sm:$0xff] %v8112_v50  ;;  %v1982_v3 = vsel %vm9941_vm5, %v10491_v24, %v10493_v8  ;;  %v8126_v40 = vpop.permute.xlu0 %1303  ;;  %v895_v13 = vadd.f32 %v873_v28, %v804_v45  ;;  %v1897_v20 = vadd.f32 %v1875_v23, %v1806_v35  ;;  %v1983_v21 = vsel %vm9941_vm5, %v10493_v8, %v10494_v1  ;;  %v10499_v23 = vld [vmem:[#allocation78_spill] sm:$0xff] }
 0x375   : > { %v1987_v39 = vsel %vm9941_vm5, %v10496_v41, %v10495_v51  ;;  %vm2381_vm7 = vcmask 97280   ;;  %v1898_v33 = vadd.f32 %v1876_v59, %v1807_v4  ;;  %v1988_v47 = vsel %vm9941_vm5, %v10495_v51, %v10497_v9  ;;  %v10500_v59 = vld [vmem:[#allocation280_spill] sm:$0xff]  ;;  %v10501_v0 = vld [vmem:[#allocation282_spill] sm:$0xff] }
 0x376   : > { %v1989_v37 = vsel %vm9941_vm5, %v10497_v9, %v10498_v6  ;;  %v964_v45 = vsel %vm963_vm8, %v10499_v23, %v10369_v32  ;;  %v1903_v35 = vadd.f32 %v1880_v62, %v1812_v54  ;;  %v1904_v28 = vadd.f32 %v1881_v53, %v1813_v31  ;;  %v10502_v31 = vld [vmem:[#allocation274_spill] sm:$0xff] }
 0x377   : > { %v2005_v24 = vadd.f32 %v1981_v58, %v1899_v22  ;;  %v2006_v8 = vadd.f32 %v1982_v3, %v1900_v30  ;;  %v8143_v1 = vpop.permute.xlu1 %2270  ;;  %v2007_v5 = vadd.f32 %v1983_v21, %v1901_v55  ;;  %v2011_v4 = vadd.f32 %v1987_v39, %v1905_v46  ;;  %v10503_v55 = vld [vmem:[#allocation276_spill] sm:$0xff] }
 0x378   : > { %v2082_v51 = vsel %vm9942_vm1, %v10500_v59, %v7597_v60  ;;  %v2083_v9 = vsel %vm9942_vm1, %v7597_v60, %v10501_v0  ;;  %v8151_v6 = vpop.permute.xlu0 %1394  ;;  %v2012_v50 = vadd.f32 %v1988_v47, %v1906_v63  ;;  %v2013_v32 = vadd.f32 %v1989_v37, %v1907_v56  ;;  %v10505_v58 = vld [vmem:[#allocation284_spill] sm:$0xff] }
 0x379   : > { %v986_v54 = vadd.f32 %v964_v45, %v895_v13  ;;  %v1979_v30 = vsel %vm9941_vm5, %v10502_v31, %v7519_v7  ;;  %v1980_v46 = vsel %vm9941_vm5, %v7519_v7, %v10492_v26  ;;  %v1985_v22 = vsel %vm9941_vm5, %v10503_v55, %v7541_v27  ;;  %v10506_v13 = vld [vmem:[#allocation286_spill] sm:$0xff] }
 0x37a   : > { %v2183_v60 = vsel %vm2179_vm6, %v7524_v17, %v7808_v57  ;;  %v2184_v63 = vsel %vm2179_vm6, %v7808_v57, %v7548_v61  ;;  %v1986_v56 = vsel %vm9941_vm5, %v7541_v27, %v10496_v41  ;;  %v2106_v62 = vadd.f32 %v2082_v51, %v2005_v24 }
 0x37b   : > { %v2107_v53 = vadd.f32 %v2083_v9, %v2006_v8  ;;  %v2084_v7 = vsel %vm9942_vm1, %v10501_v0, %v7638_v42  ;;  %v8174_v26 = vpop.permute.xlu1 %1133  ;;  %v2088_v3 = vsel %vm9942_vm1, %v10505_v58, %v7669_v10  ;;  %v2089_v57 = vsel %vm9942_vm1, %v7669_v10, %v10506_v13 }
 0x37c   : > { %10504 = vst [vmem:[#allocation98_spill] sm:$0xff] %v8174_v26  ;;  %v2284_v27 = vsel %vm2280_vm0, %v7733_v29, %v8006_v49  ;;  %v2285_v21 = vsel %vm2280_vm0, %v8006_v49, %v7764_v16  ;;  %v8188_v41 = vpop.permute.xlu0 %1485  ;;  %v2003_v42 = vadd.f32 %v1979_v30, %v1897_v20  ;;  %v2090_v0 = vsel %vm9942_vm1, %v10506_v13, %v7696_v19 }
 0x37d   : > { %v2207_v39 = vadd.f32 %v2183_v60, %v2106_v62  ;;  %v2208_v47 = vadd.f32 %v2184_v63, %v2107_v53  ;;  %v2004_v37 = vadd.f32 %v1980_v46, %v1898_v33  ;;  %v2009_v23 = vadd.f32 %v1985_v22, %v1903_v35  ;;  %v10509_v46 = vld [vmem:[#allocation88_spill] sm:$0xff]  ;;  %v10510_v22 = vld [vmem:[#allocation174_spill] sm:$0xff]  ;;  %v10511_v60 = vld [vmem:[#allocation91_spill] sm:$0xff] }
 0x37e   : > { %v2010_v10 = vadd.f32 %v1986_v56, %v1904_v28  ;;  %v2108_v45 = vadd.f32 %v2084_v7, %v2007_v5  ;;  %v2112_v24 = vadd.f32 %v2088_v3, %v2011_v4  ;;  %v2113_v8 = vadd.f32 %v2089_v57, %v2012_v50  ;;  %v10507_v5 = vld [vmem:[#allocation288_spill] sm:$0xff]  ;;  %v10512_v62 = vld [vmem:[#allocation82_spill] sm:$0xff] }
 0x37f   : > { %v2308_v51 = vadd.f32 %v2284_v27, %v2207_v39  ;;  %v2309_v9 = vadd.f32 %v2285_v21, %v2208_v47  ;;  %v2362_v55 = vpop.permute.xlu1 %2361  ;;  %v2114_v26 = vadd.f32 %v2090_v0, %v2013_v32  ;;  %v1055_v49 = vsel %vm1054_vm9, %v7707_v36, %v10381_v52  ;;  %v10508_v36 = vld [vmem:[#allocation76_spill] sm:$0xff] }
 0x380   : > { %v2385_v20 = vsel %vm2381_vm7, %v7931_v25, %v2362_v55  ;;  %v2386_v19 = vsel %vm2381_vm7, %v2362_v55, %v7964_v12  ;;  %v8200_v33 = vpop.permute.xlu0 %1576  ;;  %v2080_v50 = vsel %vm9942_vm1, %v10507_v5, %v7724_v18  ;;  %v2081_v35 = vsel %vm9942_vm1, %v7724_v18, %v10500_v59  ;;  %v10514_v47 = vld [vmem:[#allocation184_spill] sm:$0xff] }
 0x381   : > { %v8208_v28 = vadd.f32 %v2385_v20, %v2308_v51  ;;  %v8210_v4 = vadd.f32 %v2386_v19, %v2309_v9  ;;  %v2086_v52 = vsel %vm9942_vm1, %v10508_v36, %v7756_v48  ;;  %v2087_v32 = vsel %vm9942_vm1, %v7756_v48, %v10505_v58  ;;  %v10515_v9 = vld [vmem:[#allocation89_spill] sm:$0xff] }
 0x382   : > { %v2189_v30 = vsel %vm2179_vm6, %v7575_v44, %v7869_v34  ;;  %v2190_v18 = vsel %vm2179_vm6, %v7869_v34, %v7615_v14  ;;  %v2185_v59 = vsel %vm2179_vm6, %v7548_v61, %v7840_v38  ;;  %v2191_v55 = vsel %vm2179_vm6, %v7615_v14, %v10509_v46  ;;  %v10513_v38 = vld [vmem:[#allocation85_spill] sm:$0xff] }
 0x383   : > { %v1146_v48 = vsel %vm1145_vm10, %v10511_v60, %v10510_v22  ;;  %v2366_v63 = vpop.permute.xlu1 %2365  ;;  %2434 = vrot.lane.b32.xlu0 %v8208_v28, %s5519_s4  ;;  %2436 = vrot.lane.b32.xlu1 %v8210_v4, %s5519_s4  ;;  %v1077_v34 = vadd.f32 %v1055_v49, %v986_v54  ;;  %v2104_v56 = vadd.f32 %v2080_v50, %v2003_v42  ;;  %v10521_v50 = vld [vmem:[#allocation80_spill] sm:$0xff] }
 0x384   : > { %v2290_v61 = vsel %vm2280_vm0, %v10512_v62, %v8059_v15  ;;  %v2291_v14 = vsel %vm2280_vm0, %v8059_v15, %v10513_v38  ;;  %v1668_v53 = vpop.permute.xlu0 %1667  ;;  %v2105_v7 = vadd.f32 %v2081_v35, %v2004_v37  ;;  %v2110_v58 = vadd.f32 %v2086_v52, %v2009_v23  ;;  %v10516_v37 = vld [vmem:[#allocation79_spill] sm:$0xff] }
 0x385   : > { %v2213_v3 = vadd.f32 %v2189_v30, %v2112_v24  ;;  %v2214_v13 = vadd.f32 %v2190_v18, %v2113_v8  ;;  %v2111_v57 = vadd.f32 %v2087_v32, %v2010_v10  ;;  %v2209_v27 = vadd.f32 %v2185_v59, %v2108_v45  ;;  %v10517_v10 = vld [vmem:[#allocation101_spill] sm:$0xff]  ;;  %v10518_v24 = vld [vmem:[#allocation92_spill] sm:$0xff]  ;;  %v10519_v8 = vld [vmem:[#allocation194_spill] sm:$0xff] }
 0x386   : > { %v2215_v21 = vadd.f32 %v2191_v55, %v2114_v26  ;;  %v1168_v0 = vadd.f32 %v1146_v48, %v1077_v34  ;;  %v2286_v54 = vsel %vm2280_vm0, %v7764_v16, %v8033_v43  ;;  %v1237_v51 = vsel %vm1236_vm11, %v8100_v2, %v10514_v47  ;;  %v10522_v59 = vld [vmem:[#allocation99_spill] sm:$0xff]  ;;  %v10524_v55 = vld [vmem:[#allocation204_spill] sm:$0xff] }
 0x387   : > { %v2314_v42 = vadd.f32 %v2290_v61, %v2213_v3  ;;  %v2315_v39 = vadd.f32 %v2291_v14, %v2214_v13  ;;  %v2376_v15 = vpop.permute.xlu1 %2375  ;;  %v2181_v23 = vsel %vm2179_vm6, %v10516_v37, %v10515_v9  ;;  %v2292_v26 = vsel %vm2280_vm0, %v10513_v38, %v8091_v11  ;;  %v10520_v11 = vld [vmem:[#allocation90_spill] sm:$0xff] }
 0x388   : > { %v2391_v45 = vsel %vm2381_vm7, %v10517_v10, %v2376_v15  ;;  %v2392_v16 = vsel %vm2381_vm7, %v2376_v15, %v10518_v24  ;;  %v1759_v43 = vpop.permute.xlu0 %1758  ;;  %v2182_v2 = vsel %vm2179_vm6, %v10515_v9, %v7524_v17  ;;  %v1328_v49 = vsel %vm1327_vm12, %v8126_v40, %v10519_v8  ;;  %v10523_v17 = vld [vmem:[#allocation86_spill] sm:$0xff]  ;;  %v10529_v9 = vld [vmem:[#allocation236_spill] sm:$0xff] }
 0x389   : > { %v8265_v20 = vadd.f32 %v2391_v45, %v2314_v42  ;;  %v8267_v19 = vadd.f32 %v2392_v16, %v2315_v39  ;;  %v2187_v35 = vsel %vm2179_vm6, %v10521_v50, %v10520_v11  ;;  %v2310_v52 = vadd.f32 %v2286_v54, %v2209_v27  ;;  %v10525_v38 = vld [vmem:[#allocation214_spill] sm:$0xff]  ;;  %v10527_v54 = vld [vmem:[#allocation224_spill] sm:$0xff]  ;;  %v10528_v39 = vld [vmem:[#allocation95_spill] sm:$0xff] }
 0x38a   : > { %v1259_v32 = vadd.f32 %v1237_v51, %v1168_v0  ;;  %v2387_v30 = vsel %vm2381_vm7, %v7964_v12, %v2366_v63  ;;  %v2316_v18 = vadd.f32 %v2292_v26, %v2215_v21  ;;  %v2282_v46 = vsel %vm2280_vm0, %v10523_v17, %v10522_v59  ;;  %v10526_v0 = vld [vmem:[#allocation87_spill] sm:$0xff] }
 0x38b   : > { %v1419_v40 = vsel %vm1418_vm13, %v8151_v6, %v10524_v55  ;;  %v2380_v22 = vpop.permute.xlu1 %2379  ;;  %2444 = vrot.lane.b32.xlu0 %v8265_v20, %s5519_s4  ;;  %2446 = vrot.lane.b32.xlu1 %v8267_v19, %s5519_s4  ;;  %v2205_v60 = vadd.f32 %v2181_v23, %v2104_v56  ;;  %v2283_v12 = vsel %vm2280_vm0, %v10522_v59, %v7733_v29  ;;  %v10531_v16 = vld [vmem:[#allocation71_spill] sm:$0xff]  ;;  %v10536_v55 = vld [vmem:[#allocation73_spill] sm:$0xff] }
 0x38c   : > { %v1350_v48 = vadd.f32 %v1328_v49, %v1259_v32  ;;  %v2393_v63 = vsel %vm2381_vm7, %v10518_v24, %v2380_v22  ;;  %v1850_v34 = vpop.permute.xlu0 %1849  ;;  %v2206_v61 = vadd.f32 %v2182_v2, %v2105_v7  ;;  %v1510_v6 = vsel %vm1509_vm14, %v8188_v41, %v10525_v38  ;;  %v10530_v24 = vld [vmem:[#allocation102_spill] sm:$0xff]  ;;  %v10532_v49 = vld [vmem:[#allocation248_spill] sm:$0xff]  ;;  %v10539_v38 = vld [vmem:[#allocation83_spill] sm:$0xff] }
 0x38d   : > { %v8292_v14 = vadd.f32 %v2387_v30, %v2310_v52  ;;  %v8294_v3 = vadd.f32 %v2393_v63, %v2316_v18  ;;  %v2188_v56 = vsel %vm2179_vm6, %v10520_v11, %v7575_v44  ;;  %v2211_v13 = vadd.f32 %v2187_v35, %v2110_v58  ;;  %v10534_v30 = vld [vmem:[#allocation260_spill] sm:$0xff] }
 0x38e   : > { %v2306_v29 = vadd.f32 %v2282_v46, %v2205_v60  ;;  %v1441_v27 = vadd.f32 %v1419_v40, %v1350_v48  ;;  %v2307_v21 = vadd.f32 %v2283_v12, %v2206_v61  ;;  %v2288_v7 = vsel %vm2280_vm0, %v10526_v0, %v8143_v1  ;;  %v10535_v46 = vld [vmem:[#allocation72_spill] sm:$0xff] }
 0x38f   : > { %v1601_v41 = vsel %vm1600_vm15, %v8200_v33, %v10527_v54  ;;  %v2358_v42 = vpop.permute.xlu1 %2357  ;;  %2478 = vrot.lane.b32.xlu0 %v8292_v14, %s5519_s4  ;;  %2480 = vrot.lane.b32.xlu1 %v8294_v3, %s5519_s4  ;;  %v2289_v44 = vsel %vm2280_vm0, %v8143_v1, %v10512_v62  ;;  %v2212_v33 = vadd.f32 %v2188_v56, %v2111_v57  ;;  %v10538_v61 = vld [vmem:[#allocation84_spill] sm:$0xff]  ;;  %v10541_v54 = vld [vmem:[#allocation97_spill] sm:$0xff] }
 0x390   : > { %v1532_v58 = vadd.f32 %v1510_v6, %v1441_v27  ;;  %v2383_v47 = vsel %vm2381_vm7, %v10528_v39, %v2358_v42  ;;  %v2384_v51 = vsel %vm2381_vm7, %v2358_v42, %v7931_v25  ;;  %v1950_v15 = vpop.permute.xlu0 %1949  ;;  %v1692_v23 = vsel %vm1691_vm2, %v1668_v53, %v10529_v9  ;;  %v10533_v53 = vld [vmem:[#allocation96_spill] sm:$0xff]  ;;  %v10548_v9 = vld [vmem:[#allocation259_spill] sm:$0xff] }
 0x391   : > { %v8318_v26 = vadd.f32 %v2383_v47, %v2306_v29  ;;  %v8320_v45 = vadd.f32 %v2384_v51, %v2307_v21  ;;  %v173_v2 = vmul.f32 %v10531_v16, %v10530_v24  ;;  %v2312_v62 = vadd.f32 %v2288_v7, %v2211_v13 }
 0x392   : > { %v1623_v1 = vadd.f32 %v1601_v41, %v1532_v58  ;;  %v2313_v8 = vadd.f32 %v2289_v44, %v2212_v33  ;;  %v1783_v11 = vsel %vm9940_vm3, %v1759_v43, %v10532_v49  ;;  %v1874_v18 = vsel %vm1873_vm4, %v1850_v34, %v10534_v30  ;;  %v10542_v41 = vld [vmem:[#allocation94_spill] sm:$0xff]  ;;  %v10545_v44 = vld [vmem:[#allocation247_spill] sm:$0xff]  ;;  %v10547_v33 = vld [vmem:[#allocation116_spill] sm:$0xff] }
 0x393   : > { %v2372_v35 = vpop.permute.xlu1 %2371  ;;  %2432 = vrot.lane.b32.xlu1 %v8320_v45, %s5519_s4  ;;  %2430 = vrot.lane.b32.xlu0 %v8318_v26, %s5519_s4  ;;  %vm10537_vm3 = vcmask 1039360   ;;  %v1978_v12 = vsel %vm9941_vm5, %v1950_v15, %v10502_v31  ;;  %vm10543_vm5 = vcmask 1022976   ;;  %v10557_v30 = vld [vmem:[#allocation77_spill] sm:$0xff] }
 0x394   : > { %v1714_v25 = vadd.f32 %v1692_v23, %v1623_v1  ;;  %v2389_v57 = vsel %vm2381_vm7, %v10533_v53, %v2372_v35  ;;  %v2390_v52 = vsel %vm2381_vm7, %v2372_v35, %v10517_v10  ;;  %v2051_v32 = vpop.permute.xlu0 %2050  ;;  %v241_v40 = vsel %vm10537_vm3, %v10536_v55, %v10535_v46  ;;  %v10551_v1 = vld [vmem:[#allocation271_spill] sm:$0xff]  ;;  %v10553_v35 = vld [vmem:[#allocation136_spill] sm:$0xff] }
 0x395   : > { %v8336_v59 = vadd.f32 %v2389_v57, %v2312_v62  ;;  %v8338_v43 = vadd.f32 %v2390_v52, %v2313_v8  ;;  %v264_v60 = vadd.f32 %v241_v40, %v173_v2  ;;  %v2079_v34 = vsel %vm9942_vm1, %v2051_v32, %v10507_v5  ;;  %v10544_v5 = vld [vmem:[#allocation109_spill] sm:$0xff]  ;;  %v10550_v2 = vld [vmem:[#allocation126_spill] sm:$0xff]  ;;  %v10559_v55 = vld [vmem:[#allocation156_spill] sm:$0xff] }
 0x396   : > { %v1805_v22 = vadd.f32 %v1783_v11, %v1714_v25  ;;  %vm10540_vm3 = vcmask 1031168   ;;  %v423_v42 = vsel %vm10543_vm5, %v10542_v41, %v10541_v54  ;;  %vm10546_vm1 = vcmask 1014784   ;;  %v10554_v25 = vld [vmem:[#allocation283_spill] sm:$0xff]  ;;  %v10556_v32 = vld [vmem:[#allocation146_spill] sm:$0xff]  ;;  %v10560_v40 = vld [vmem:[#allocation81_spill] sm:$0xff] }
 0x397   : > { %v1225_v48 = vpop.permute.xlu1 %1224  ;;  %2442 = vrot.lane.b32.xlu1 %v8338_v43, %s5519_s4  ;;  %2440 = vrot.lane.b32.xlu0 %v8336_v59, %s5519_s4  ;;  %v332_v6 = vsel %vm10540_vm3, %v10539_v38, %v10538_v61  ;;  %v514_v58 = vsel %vm10546_vm1, %v10545_v44, %v10544_v5  ;;  %vm10549_vm3 = vcmask 818176   ;;  %vm10552_vm5 = vcmask 809984   ;;  %v10567_v41 = vld [vmem:[#allocation196_spill] sm:$0xff]  ;;  %v10568_v44 = vld [vmem:[#allocation206_spill] sm:$0xff] }
 0x398   : > { %v1896_v10 = vadd.f32 %v1874_v18, %v1805_v22  ;;  %v2152_v63 = vpop.permute.xlu0 %2151  ;;  %v355_v13 = vadd.f32 %v332_v6, %v264_v60  ;;  %v696_v62 = vsel %vm10552_vm5, %v10551_v1, %v10550_v2  ;;  %vm10555_vm1 = vcmask 801792   ;;  %v10561_v60 = vld [vmem:[#allocation5_spill] sm:$0xff]  ;;  %v10564_v6 = vld [vmem:[#allocation176_spill] sm:$0xff] }
 0x399   : > { %v2180_v31 = vsel %vm2179_vm6, %v2152_v63, %v10516_v37  ;;  %v605_v37 = vsel %vm10549_vm3, %v10548_v9, %v10547_v33  ;;  %v787_v57 = vsel %vm10555_vm1, %v10554_v25, %v10553_v35  ;;  %vm10558_vm3 = vcmask 793600   ;;  %v10563_v63 = vld [vmem:[#allocation93_spill] sm:$0xff]  ;;  %v10569_v33 = vld [vmem:[#allocation216_spill] sm:$0xff]  ;;  %v10574_v35 = vld [vmem:[#allocation262_spill] sm:$0xff] }
 0x39a   : > { %v2002_v56 = vadd.f32 %v1978_v12, %v1896_v10  ;;  %v446_v51 = vadd.f32 %v423_v42, %v355_v13  ;;  %v969_v22 = vsel %vm963_vm8, %v10560_v40, %v10559_v55  ;;  %v10562_v10 = vld [vmem:[#allocation166_spill] sm:$0xff]  ;;  %vm10573_vm8 = vcmask 334848  }
 0x39b   : > { %v1316_v29 = vpop.permute.xlu1 %1315 }
 0x39c   : > { %v2103_v27 = vadd.f32 %v2079_v34, %v2002_v56  ;;  %v2253_v21 = vpop.permute.xlu0 %2252  ;;  %v537_v16 = vadd.f32 %v514_v58, %v446_v51  ;;  %v1060_v34 = vsel %vm1054_vm9, %v10563_v63, %v10562_v10  ;;  %v10565_v56 = vld [vmem:[#allocation98_spill] sm:$0xff]  ;;  %v1333_v42 = vsel %vm1327_vm12, %v1316_v29, %v10567_v41 }
 0x39d   : > { %v2281_v7 = vsel %vm2280_vm0, %v2253_v21, %v10523_v17  ;;  %v1151_v13 = vsel %vm1145_vm10, %v10565_v56, %v10564_v6  ;;  %v10572_v29 = vld [vmem:[#allocation250_spill] sm:$0xff]  ;;  %vm10576_vm10 = vcmask 130048   ;;  %vm10577_vm12 = vcmask 121856  }
 0x39e   : > { %v2204_v47 = vadd.f32 %v2180_v31, %v2103_v27  ;;  %v628_v49 = vadd.f32 %v605_v37, %v537_v16  ;;  %v10566_v27 = vld [vmem:[#allocation186_spill] sm:$0xff] }
 0x39f   : > { %v1407_v15 = vpop.permute.xlu1 %1406  ;;  %v1242_v21 = vsel %vm1236_vm11, %v1225_v48, %v10566_v27 }
 0x3a0   : > { %v2305_v23 = vadd.f32 %v2281_v7, %v2204_v47  ;;  %v2354_v24 = vpop.permute.xlu0 %2353  ;;  %v719_v52 = vadd.f32 %v696_v62, %v628_v49  ;;  %v1424_v58 = vsel %vm1418_vm13, %v1407_v15, %v10568_v44 }
 0x3a1   : > { %v2382_v17 = vsel %vm2381_vm7, %v2354_v24, %v10528_v39  ;;  %v878_v39 = vsel %vm10558_vm3, %v10557_v30, %v10556_v32 }
 0x3a2   : > { %v8372_v8 = vadd.f32 %v2382_v17, %v2305_v23  ;;  %v810_v18 = vadd.f32 %v787_v57, %v719_v52  ;;  %v10570_v23 = vld [vmem:[#allocation226_spill] sm:$0xff] }
 0x3a3   : > { %v1498_v11 = vpop.permute.xlu1 %1497  ;;  %v10571_v17 = vld [vmem:[#allocation238_spill] sm:$0xff] }
 0x3a4   : > { %2428 = vrot.lane.b32.xlu0 %v8372_v8, %s5519_s4  ;;  %v901_v12 = vadd.f32 %v878_v39, %v810_v18  ;;  %v1515_v9 = vsel %vm1509_vm14, %v1498_v11, %v10569_v33  ;;  %v10575_v11 = vld [vmem:[#allocation276_spill] sm:$0xff] }
 0x3a6   : > { %v992_v61 = vadd.f32 %v969_v22, %v901_v12 }
 0x3a7   : > { %v1589_v46 = vpop.permute.xlu1 %1588 }
 0x3a8   : > { %2560 = vperm.xlu0 %4973, %v10561_v60   ;;  %v1083_v31 = vadd.f32 %v1060_v34, %v992_v61  ;;  %v1606_v24 = vsel %vm1600_vm15, %v1589_v46, %v10570_v23  ;;  %v10578_v61 = vld [vmem:[#allocation6_spill] sm:$0xff] }
 0x3aa   : > { %v1174_v7 = vadd.f32 %v1151_v13, %v1083_v31 }
 0x3ab   : > { %v1680_v38 = vpop.permute.xlu1 %1679 }
 0x3ac   : > { %v1265_v5 = vadd.f32 %v1242_v21, %v1174_v7  ;;  %v1697_v2 = vsel %vm1691_vm2, %v1680_v38, %v10571_v17  ;;  %vm10579_vm2 = vcmask 1039360  }
 0x3ae   : > { %v1356_v47 = vadd.f32 %v1333_v42, %v1265_v5 }
 0x3af   : > { %v1771_v54 = vpop.permute.xlu1 %1770 }
 0x3b0   : > { %v1447_v37 = vadd.f32 %v1424_v58, %v1356_v47  ;;  %v1788_v62 = vsel %vm10573_vm8, %v1771_v54, %v10572_v29 }
 0x3b2   : > { %v1538_v16 = vadd.f32 %v1515_v9, %v1447_v37 }
 0x3b3   : > { %v1862_v51 = vpop.permute.xlu1 %1861 }
 0x3b4   : > { %v1629_v1 = vadd.f32 %v1606_v24, %v1538_v16  ;;  %v1879_v25 = vsel %vm1873_vm4, %v1862_v51, %v10574_v35 }
 0x3b6   : > { %v1720_v49 = vadd.f32 %v1697_v2, %v1629_v1 }
 0x3b7   : > { %v1964_v48 = vpop.permute.xlu1 %1963 }
 0x3b8   : > { %v1811_v57 = vadd.f32 %v1788_v62, %v1720_v49  ;;  %v1984_v52 = vsel %vm10576_vm10, %v1964_v48, %v10575_v11 }
 0x3ba   : > { %v1902_v32 = vadd.f32 %v1879_v25, %v1811_v57 }
 0x3bb   : > { %v2065_v15 = vpop.permute.xlu1 %2064 }
 0x3bc   : > { %v2085_v39 = vsel %vm10577_vm12, %v2065_v15, %v10508_v36  ;;  %v2008_v18 = vadd.f32 %v1984_v52, %v1902_v32  ;;  %vm10589_vm12 = vcmask 818176  }
 0x3be   : > { %v2109_v55 = vadd.f32 %v2085_v39, %v2008_v18 }
 0x3bf   : > { %v2166_v30 = vpop.permute.xlu1 %2165 }
 0x3c0   : > { %v2186_v46 = vsel %vm2179_vm6, %v2166_v30, %v10521_v50 }
 0x3c1   : > { %v2210_v60 = vadd.f32 %v2186_v46, %v2109_v55 }
 0x3c3   : > { %v2267_v40 = vpop.permute.xlu1 %2266 }
 0x3c4   : > { %v2287_v22 = vsel %vm2280_vm0, %v2267_v40, %v10526_v0  ;;  %vm10580_vm0 = vmmov %vm10579_vm2 }
 0x3c5   : > { %v2311_v12 = vadd.f32 %v2287_v22, %v2210_v60  ;;  %vm10581_vm4 = vmmov %vm10580_vm0 }
 0x3c6   : > { %vm10582_vm14 = vmmov %vm10580_vm0 }
 0x3c7   : > { %v2368_v10 = vpop.permute.xlu1 %2367  ;;  %vm10583_vm15 = vmmov %vm10580_vm0 }
 0x3c8   : > { %v2388_v63 = vsel %vm2381_vm7, %v2368_v10, %v10533_v53  ;;  %vm10584_vm5 = vmmov %vm10580_vm0 }
 0x3c9   : > { %v2412_v34 = vadd.f32 %v2388_v63, %v2311_v12  ;;  %vm10585_vm1 = vmmov %vm10580_vm0 }
 0x3ca   : > { %vm10586_vm3 = vmmov %vm10580_vm0 }
 0x3cb   : > { %2438 = vrot.lane.b32.xlu1 %v2412_v34, %s5519_s4  ;;  %vm10587_vm8 = vmmov %vm10580_vm0  ;;  %s5556_s4 = smov 66  }
 0x3cc   : > { %vm10588_vm10 = vmmov %vm10580_vm0 }
 0x3cf   : > { %2565 = vperm.xlu1 %4975, %v10578_v61  }
 0x3f5   : > { %v2437_v36 = vpop.permute.xlu1 %2436  ;;  %v2435_v38 = vpop.permute.xlu0 %2434 }
 0x3f6   : > { %v2451_v50 = vsel %vm10579_vm2, %v2435_v38, %v2437_v36  ;;  %vm10590_vm2 = vmmov %vm10589_vm12 }
 0x3f7   : > { %v2469_v6 = vmax.f32 %v8208_v28, %v2451_v50 }
 0x3f9   : > { %2510 = vrot.lane.b32.xlu1 %v2469_v6, %s5535_s13 }
 0x3fd   : > { %v8423_v0 = vpop.permute.xlu1 %2446  ;;  %v2445_v56 = vpop.permute.xlu0 %2444 }
 0x3fe   : > { %v2455_v54 = vsel %vm10582_vm14, %v2445_v56, %v8423_v0  ;;  %v2475_v46 = vmax.f32 %v8267_v19, %v8423_v0 }
 0x3ff   : > { %v2474_v5 = vmax.f32 %v8265_v20, %v2455_v54 }
 0x401   : > { %v2481_v13 = vpop.permute.xlu1 %2480  ;;  %v2479_v31 = vpop.permute.xlu0 %2478 }
 0x402   : > { %v2482_v53 = vsel %vm10580_vm0, %v2437_v36, %v2479_v31  ;;  %v2489_v27 = vmax.f32 %v8292_v14, %v2479_v31  ;;  %v2483_v21 = vsel %vm10581_vm4, %v8423_v0, %v2481_v13  ;;  %v2491_v51 = vmax.f32 %v8294_v3, %v2481_v13  ;;  %vm10591_vm0 = vmmov %vm10590_vm2 }
 0x403   : > { %v2488_v7 = vmax.f32 %v8210_v4, %v2482_v53  ;;  %v2490_v42 = vmax.f32 %v8267_v19, %v2483_v21  ;;  %vm10593_vm4 = vmmov %vm10591_vm0 }
 0x404   : > { %2514 = vrot.lane.b32.xlu1 %v2489_v27, %s5535_s13  ;;  %vm10594_vm14 = vmmov %vm10591_vm0 }
 0x405   : > { %v2433_v28 = vpop.permute.xlu1 %2432  ;;  %2512 = vrot.lane.b32.xlu0 %v2488_v7, %s5535_s13  ;;  %v2431_v41 = vpop.permute.xlu0 %2430 }
 0x406   : > { %v2449_v14 = vsel %vm10583_vm15, %v2431_v41, %v2433_v28  ;;  %v2450_v9 = vsel %vm10585_vm1, %v2433_v28, %v2435_v38  ;;  %vm10595_vm15 = vmmov %vm10591_vm0 }
 0x407   : > { %v8440_v47 = vmax.f32 %v8318_v26, %v2449_v14  ;;  %v2468_v37 = vmax.f32 %v8320_v45, %v2450_v9  ;;  %vm10597_vm1 = vmmov %vm10591_vm0 }
 0x408   : > { %2524 = vrot.lane.b32.xlu1 %v2490_v42, %s5535_s13 }
 0x409   : > { %v2443_v44 = vpop.permute.xlu1 %2442  ;;  %2522 = vrot.lane.b32.xlu0 %v2474_v5, %s5535_s13  ;;  %v2441_v58 = vpop.permute.xlu0 %2440 }
 0x40a   : > { %v2453_v33 = vsel %vm10584_vm5, %v2441_v58, %v2443_v44  ;;  %v2454_v23 = vsel %vm10586_vm3, %v2443_v44, %v2445_v56  ;;  %vm10596_vm5 = vmmov %vm10591_vm0 }
 0x40b   : > { %v8449_v20 = vmax.f32 %v8336_v59, %v2453_v33  ;;  %v8457_v3 = vmax.f32 %v8338_v43, %v2454_v23  ;;  %vm10599_vm3 = vmmov %vm10591_vm0 }
 0x40c   : > { %2506 = vrot.lane.b32.xlu1 %v8440_v47, %s5535_s13 }
 0x40d   : > { %2526 = vrot.lane.b32.xlu0 %v2491_v51, %s5535_s13 }
 0x410   : > { %2518 = vrot.lane.b32.xlu1 %v8449_v20, %s5535_s13 }
 0x411   : > { %2508 = vrot.lane.b32.xlu0 %v2468_v37, %s5535_s13 }
 0x415   : > { %2520 = vrot.lane.b32.xlu0 %v8457_v3, %s5535_s13 }
 0x416   : > { %v2429_v26 = vpop.permute.xlu0 %2428 }
 0x417   : > { %v2448_v24 = vsel %vm10587_vm8, %v2429_v26, %v2431_v41  ;;  %vm2639_vm8 = vcmask 1043456  }
 0x418   : > { %v8463_v59 = vmax.f32 %v8372_v8, %v2448_v24  ;;  %v2470_v8 = vmax.f32 %v8210_v4, %v2437_v36 }
 0x41a   : > { %2504 = vrot.lane.b32.xlu1 %v8463_v59, %s5535_s13 }
 0x423   : > { %v8474_v2 = vpop.permute.xlu0 %2560 }
 0x43d   : > { %v2439_v45 = vpop.permute.xlu1 %2438 }
 0x43e   : > { %v2452_v16 = vsel %vm10588_vm10, %v2439_v45, %v2441_v58  ;;  %vm2682_vm10 = vcmask 1045504  }
 0x43f   : > { %v8468_v48 = vmax.f32 %v2412_v34, %v2452_v16 }
 0x441   : > { %2516 = vrot.lane.b32.xlu0 %v8468_v48, %s5535_s13  ;;  %s5557_s13 = smov 74  }
 0x44a   : > { %v8472_v43 = vpop.permute.xlu1 %2565 }
 0x46b   : > { %v2511_v17 = vpop.permute.xlu1 %2510 }
 0x476   : > { %v2515_v1 = vpop.permute.xlu1 %2514 }
 0x477   : > { %v2513_v29 = vpop.permute.xlu0 %2512 }
 0x478   : > { %v2531_v62 = vsel %vm10589_vm12, %v2511_v17, %v2513_v29  ;;  %v2532_v49 = vsel %vm10590_vm2, %v2513_v29, %v2515_v1  ;;  %vm2596_vm12 = vcmask 1041408   ;;  %vm10602_vm2 = vmmov %vm10591_vm0 }
 0x479   : > { %v2551_v15 = vmax.f32 %v2469_v6, %v2531_v62  ;;  %v2552_v35 = vmax.f32 %v2470_v8, %v2532_v49 }
 0x47a   : > { %v2525_v25 = vpop.permute.xlu1 %2524 }
 0x47b   : > { %v2571_v57 = vadd.f32 %v8474_v2, %v2551_v15  ;;  %v2572_v11 = vadd.f32 %v8474_v2, %v2552_v35  ;;  %v2523_v52 = vpop.permute.xlu0 %2522 }
 0x47c   : > { %v2536_v32 = vsel %vm10591_vm0, %v2523_v52, %v2525_v25  ;;  %vm2863_vm0 = vcmask 539648  }
 0x47d   : > { %v8482_v30 = vmax.f32 %v2571_v57, 0.0  ;;  %v8484_v39 = vmax.f32 %v2572_v11, 0.0  ;;  %v2556_v4 = vmax.f32 %v2474_v5, %v2536_v32 }
 0x47e   : > { %v2507_v34 = vpop.permute.xlu1 %2506 }
 0x47f   : > { %10592 = vst [vmem:[#allocation100_spill] sm:$0xff] %v8482_v30  ;;  %v2576_v18 = vadd.f32 %v8472_v43, %v2556_v4  ;;  %v2527_v55 = vpop.permute.xlu0 %2526  ;;  %v8490_v40 = vrot.slane %v8482_v30, 4  ;;  %v8493_v22 = vrot.slane %v8484_v39, 4  ;;  %v8497_v12 = vrot.slane %v8482_v30, 6 }
 0x480   : > { %v2537_v60 = vsel %vm10593_vm4, %v2525_v25, %v2527_v55  ;;  %v8500_v10 = vrot.slane %v8484_v39, 6  ;;  %v8561_v8 = vrot.slane %v8482_v30, 2  ;;  %vm3225_vm4 = vcmask 605184  }
 0x481   : > { %v8502_v63 = vmax.f32 %v2576_v18, 0.0  ;;  %v2557_v61 = vmax.f32 %v2475_v46, %v2537_v60  ;;  %v5161_v19 = vpack.i.bf16 %v8493_v22, %v8490_v40  ;;  %v2950_v18 = vrot.slane %v8484_v39, 2 }
 0x482   : > { %v8517_v27 = vpop.permute.xlu1 %2518 }
 0x483   : > { %v2577_v38 = vadd.f32 %v8472_v43, %v2557_v61  ;;  %v2509_v50 = vpop.permute.xlu0 %2508  ;;  %v4976_v6 = vpack.i.bf16 %v8502_v63, %v8482_v30  ;;  %v2693_v46 = vrot.slane %v8502_v63, 2 }
 0x484   : > { %v2529_v0 = vsel %vm10594_vm14, %v2507_v34, %v2509_v50  ;;  %v2530_v56 = vsel %vm10595_vm15, %v2509_v50, %v2511_v17  ;;  %vm2711_vm14 = vcmask 998400   ;;  %vm10621_vm15 = vcmask 1031168  }
 0x485   : > { %v8513_v13 = vmax.f32 %v2577_v38, 0.0  ;;  %v2549_v31 = vmax.f32 %v8440_v47, %v2529_v0  ;;  %v2550_v53 = vmax.f32 %v2468_v37, %v2530_v56  ;;  %4977 = vrot.lane.b32.xlu1 %v4976_v6, %s5556_s4  ;;  %v8618_v0 = vsel %vm2682_vm10, %v8561_v8, %v2693_v46 }
 0x487   : > { %v2569_v21 = vadd.f32 %v8474_v2, %v2549_v31  ;;  %v2570_v7 = vadd.f32 %v8474_v2, %v2550_v53  ;;  %v2521_v54 = vpop.permute.xlu0 %2520  ;;  %v4981_v28 = vpack.i.bf16 %v8513_v13, %v8484_v39  ;;  %v2912_v15 = vrot.slane %v8513_v13, 4 }
 0x488   : > { %v2534_v41 = vsel %vm10596_vm5, %v8517_v27, %v2521_v54  ;;  %v2535_v42 = vsel %vm10597_vm1, %v2521_v54, %v2523_v52  ;;  %v3026_v6 = vrot.slane %v8513_v13, 6  ;;  %v2607_v31 = vrot.slane %v8502_v63, 6 }
 0x489   : > { %v8526_v5 = vmax.f32 %v2569_v21, 0.0  ;;  %v8528_v14 = vmax.f32 %v2570_v7, 0.0  ;;  %v2554_v44 = vmax.f32 %v8449_v20, %v2534_v41  ;;  %v2555_v58 = vmax.f32 %v8457_v3, %v2535_v42  ;;  %4982 = vrot.lane.b32.xlu0 %v4981_v28, %s5556_s4 }
 0x48a   : > { %v2650_v20 = vrot.slane %v8502_v63, 4  ;;  %v8593_v4 = vsel %vm2639_vm8, %v8493_v22, %v2912_v15  ;;  %vm10622_vm5 = vcmask 1014784  }
 0x48b   : > { %10598 = vst [vmem:[#allocation105_spill] sm:$0xff] %v8528_v14  ;;  %v2574_v47 = vadd.f32 %v8472_v43, %v2554_v44  ;;  %v2575_v51 = vadd.f32 %v8472_v43, %v2555_v58  ;;  %v8537_v33 = vpack.i.bf16 %v8528_v14, %v8526_v5  ;;  %v8548_v3 = vrot.slane %v8528_v14, 4  ;;  %vm10623_vm1 = vmmov %vm10622_vm5 }
 0x48c   : > { %v2505_v9 = vpop.permute.xlu1 %2504  ;;  %v8556_v16 = vrot.slane %v8528_v14, 2  ;;  %v2651_v62 = vsel %vm2639_vm8, %v8490_v40, %v2650_v20  ;;  %v8570_v49 = vrot.slane %v8526_v5, 4  ;;  %v2684_v57 = vrot.slane %v8526_v5, 2 }
 0x48d   : > { %v8539_v37 = vmax.f32 %v2574_v47, 0.0  ;;  %v8541_v23 = vmax.f32 %v2575_v51, 0.0  ;;  %v2528_v26 = vsel %vm10599_vm3, %v2505_v9, %v2507_v34  ;;  %4987 = vrot.lane.b32.xlu1 %v8537_v33, %s5556_s4  ;;  %10600 = vst [vmem:[#allocation117_spill] sm:$0xff] %v8548_v3  ;;  %v2599_v56 = vrot.slane %v8528_v14, 6  ;;  %vm10624_vm3 = vmmov %vm10621_vm15 }
 0x48e   : > { %v2548_v1 = vmax.f32 %v8463_v59, %v2528_v26  ;;  %v8577_v59 = vpack.i.bf16 %v8561_v8, %v8556_v16  ;;  %v8600_v60 = vpack.i.bf16 %v2684_v57, %v2950_v18  ;;  %v8631_v54 = vpack.i.bf16 %v8593_v4, %v2651_v62 }
 0x48f   : > { %v8552_v24 = vpack.i.bf16 %v8541_v23, %v8539_v37  ;;  %v2648_v45 = vrot.slane %v8541_v23, 4  ;;  %v2646_v17 = vrot.slane %v8539_v37, 4  ;;  %v2691_v11 = vrot.slane %v8541_v23, 2 }
 0x490   : > { %v2568_v52 = vadd.f32 %v8474_v2, %v2548_v1  ;;  %v2689_v32 = vrot.slane %v8539_v37, 2  ;;  %v2951_v2 = vrot.slane %v8513_v13, 2  ;;  %v2605_v50 = vrot.slane %v8541_v23, 6 }
 0x491   : > { %4992 = vrot.lane.b32.xlu0 %v8552_v24, %s5556_s4  ;;  %v2649_v29 = vsel %vm2639_vm8, %v8548_v3, %v2648_v45  ;;  %v8581_v25 = vsel %vm2639_vm8, %v8570_v49, %v2646_v17  ;;  %v8604_v34 = vsel %vm2682_vm10, %v8556_v16, %v2691_v11  ;;  %v2603_v53 = vrot.slane %v8539_v37, 6 }
 0x492   : > { %v8573_v35 = vpack.i.bf16 %v2651_v62, %v2649_v29  ;;  %v5006_v55 = vpack.i.bf16 %v8581_v25, %v8593_v4  ;;  %v8606_v61 = vmax.f32 %v2568_v52, 0.0  ;;  %v8610_v38 = vsel %vm2682_vm10, %v2684_v57, %v2689_v32 }
 0x493   : > { %v8625_v21 = vpack.i.bf16 %v8618_v0, %v8604_v34  ;;  %v8628_v7 = vsel %vm2682_vm10, %v2950_v18, %v2951_v2  ;;  %v8638_v41 = vrot.slane %v8526_v5, 6  ;;  %v5186_v42 = vpack.i.bf16 %v8548_v3, %v8570_v49 }
 0x494   : > { %4997 = vrot.lane.b32.xlu1 %v8573_v35, %s5543_s2  ;;  %10601 = vst [vmem:[#allocation103_spill] sm:$0xff] %v8606_v61  ;;  %v8635_v28 = vpack.i.bf16 %v8610_v38, %v8628_v7  ;;  %v8643_v44 = vpack.i.bf16 %v2649_v29, %v8581_v25  ;;  %v2606_v58 = vsel %vm2596_vm12, %v2599_v56, %v2605_v50  ;;  %v8653_v51 = vrot.slane %v8606_v61, 4 }
 0x495   : > { %5002 = vrot.lane.b32.xlu0 %v8577_v59, %s5545_s19  ;;  %v8650_v47 = vsel %vm2596_vm12, %v8500_v10, %v3026_v6  ;;  %v5026_v9 = vpack.i.bf16 %v8497_v12, %v2599_v56  ;;  %v8660_v26 = vsel %vm2596_vm12, %v8497_v12, %v2607_v31  ;;  %v2604_v20 = vsel %vm2596_vm12, %v8638_v41, %v2603_v53 }
 0x496   : > { %v5031_v45 = vpack.i.bf16 %v8660_v26, %v2606_v58  ;;  %v8669_v1 = vpack.i.bf16 %v8570_v49, %v8493_v22  ;;  %v8672_v29 = vpack.i.bf16 %v2606_v58, %v2604_v20  ;;  %v8675_v62 = vpack.i.bf16 %v2599_v56, %v8638_v41 }
 0x497   : > { %v5036_v57 = vpack.i.bf16 %v8490_v40, %v8548_v3  ;;  %v5041_v11 = vpack.i.bf16 %v8502_v63, %v8541_v23  ;;  %v5046_v52 = vpack.i.bf16 %v8539_v37, %v8513_v13  ;;  %v5051_v32 = vpack.i.bf16 %v8650_v47, %v8500_v10 }
 0x498   : > { %5007 = vrot.lane.b32.xlu1 %v5006_v55, %s5543_s2  ;;  %v5061_v18 = vpack.i.bf16 %v2604_v20, %v8638_v41  ;;  %v8700_v46 = vpack.i.bf16 %v8482_v30, %v8528_v14  ;;  %v5081_v2 = vpack.i.bf16 %v8526_v5, %v8484_v39  ;;  %v8714_v53 = vrot.slane %v8606_v61, 6 }
 0x499   : > { %5012 = vrot.lane.b32.xlu0 %v8600_v60, %s5545_s19 }
 0x49c   : > { %5017 = vrot.lane.b32.xlu1 %v8625_v21, %s5545_s19 }
 0x49d   : > { %5022 = vrot.lane.b32.xlu0 %v8635_v28, %s5545_s19 }
 0x4a0   : > { %5027 = vrot.lane.b32.xlu1 %v5026_v9, %s5541_s16 }
 0x4a1   : > { %5032 = vrot.lane.b32.xlu0 %v5031_v45, %s5541_s16 }
 0x4a4   : > { %5037 = vrot.lane.b32.xlu1 %v5036_v57, %s5543_s2 }
 0x4a5   : > { %5042 = vrot.lane.b32.xlu0 %v5041_v11, %s5557_s13 }
 0x4a8   : > { %5047 = vrot.lane.b32.xlu1 %v5046_v52, %s5557_s13  ;;  %v5121_v52 = vpack.i.bf16 %v8581_v25, %v8570_v49 }
 0x4a9   : > { %5052 = vrot.lane.b32.xlu0 %v5051_v32, %s5541_s16  ;;  %v5141_v32 = vpack.i.bf16 %v8484_v39, %v8482_v30 }
 0x4ac   : > { %5057 = vrot.lane.b32.xlu1 %v8669_v1, %s5543_s2 }
 0x4ad   : > { %5062 = vrot.lane.b32.xlu0 %v5061_v18, %s5541_s16  ;;  %v2683_v18 = vrot.slane %v8606_v61, 2 }
 0x4b0   : > { %5067 = vrot.lane.b32.xlu1 %v8625_v21, %s5558_s1 }
 0x4b1   : > { %5072 = vrot.lane.b32.xlu0 %v8635_v28, %s5558_s1 }
 0x4b3   : > { %v2517_v55 = vpop.permute.xlu0 %2516 }
 0x4b4   : > { %v2533_v50 = vsel %vm10602_vm2, %v2517_v55, %v8517_v27  ;;  %5077 = vrot.lane.b32.xlu1 %v8700_v46, %s5557_s13  ;;  %v5251_v55 = vpack.i.bf16 %v8606_v61, %v8482_v30  ;;  %vm10625_vm2 = vmmov %vm10623_vm1 }
 0x4b5   : > { %v2553_v6 = vmax.f32 %v8468_v48, %v2533_v50  ;;  %5082 = vrot.lane.b32.xlu0 %v5081_v2, %s5557_s13 }
 0x4b7   : > { %v2573_v56 = vadd.f32 %v8472_v43, %v2553_v6 }
 0x4b8   : > { %5087 = vrot.lane.b32.xlu1 %v5031_v45, %s5520_s28  ;;  %v5106_v45 = vpack.i.bf16 %v2604_v20, %v8650_v47  ;;  %v5136_v20 = vpack.i.bf16 %v8628_v7, %v8618_v0 }
 0x4b9   : > { %v8710_v31 = vmax.f32 %v2573_v56, 0.0  ;;  %5092 = vrot.lane.b32.xlu0 %v5036_v57, %s5533_s30  ;;  %v5111_v57 = vpack.i.bf16 %v8593_v4, %v8493_v22  ;;  %v5131_v4 = vpack.i.bf16 %v8638_v41, %v8500_v10  ;;  %v5146_v41 = vpack.i.bf16 %v8604_v34, %v8610_v38 }
 0x4ba   : > { %v5196_v22 = vpack.i.bf16 %v2683_v18, %v8556_v16  ;;  %v5211_v34 = vpack.i.bf16 %v8714_v53, %v8497_v12 }
 0x4bb   : > { %v2601_v58 = vrot.slane %v8710_v31, 6  ;;  %v2644_v27 = vrot.slane %v8710_v31, 4  ;;  %v2687_v25 = vrot.slane %v8710_v31, 2  ;;  %v5216_v49 = vpack.i.bf16 %v8606_v61, %v8710_v31 }
 0x4bc   : > { %5097 = vrot.lane.b32.xlu1 %v8573_v35, %s5533_s30  ;;  %v5236_v7 = vpack.i.bf16 %v8710_v31, %v8502_v63 }
 0x4bd   : > { %5102 = vrot.lane.b32.xlu0 %v8577_v59, %s5558_s1  ;;  %v8724_v48 = vsel %vm2596_vm12, %v8714_v53, %v2601_v58  ;;  %v8728_v43 = vsel %vm2639_vm8, %v8653_v51, %v2644_v27 }
 0x4be   : > { %v8738_v11 = vpack.i.bf16 %v8724_v48, %v8714_v53  ;;  %v5221_v16 = vpack.i.bf16 %v8653_v51, %v8728_v43 }
 0x4c0   : > { %5107 = vrot.lane.b32.xlu1 %v5106_v45, %s5520_s28  ;;  %10603 = vst [vmem:[#allocation104_spill] sm:$0xff] %v8738_v11  ;;  %v5261_v45 = vpack.i.bf16 %v8714_v53, %v8724_v48 }
 0x4c1   : > { %5112 = vrot.lane.b32.xlu0 %v5111_v57, %s5533_s30 }
 0x4c4   : > { %5117 = vrot.lane.b32.xlu1 %v8600_v60, %s5558_s1 }
 0x4c5   : > { %5122 = vrot.lane.b32.xlu0 %v5121_v52, %s5533_s30 }
 0x4c8   : > { %5127 = vrot.lane.b32.xlu1 %v5026_v9, %s5520_s28  ;;  %v2688_v9 = vsel %vm2682_vm10, %v2683_v18, %v2687_v25 }
 0x4c9   : > { %5132 = vrot.lane.b32.xlu0 %v5131_v4, %s5520_s28  ;;  %v5156_v0 = vpack.i.bf16 %v8561_v8, %v2688_v9  ;;  %v5181_v8 = vpack.i.bf16 %v8724_v48, %v8660_v26  ;;  %v5226_v38 = vpack.i.bf16 %v2688_v9, %v2683_v18  ;;  %v5256_v50 = vpack.i.bf16 %v2683_v18, %v2688_v9 }
 0x4cc   : > { %5137 = vrot.lane.b32.xlu1 %v5136_v20, %s5553_s5 }
 0x4cd   : > { %5142 = vrot.lane.b32.xlu0 %v5141_v32, %s5555_s14 }
 0x4d0   : > { %5147 = vrot.lane.b32.xlu1 %v5146_v41, %s5553_s5 }
 0x4d1   : > { %5152 = vrot.lane.b32.xlu0 %v8537_v33, %s5555_s14 }
 0x4d4   : > { %5157 = vrot.lane.b32.xlu1 %v5156_v0, %s5553_s5 }
 0x4d5   : > { %2989 = vrot.lane.b32.xlu0 %v8606_v61, %s5555_s14 }
 0x4d8   : > { %5162 = vrot.lane.b32.xlu1 %v5161_v19, %s5551_s26  ;;  %v5201_v19 = vpack.i.bf16 %v8728_v43, %v8653_v51 }
 0x4d9   : > { %5167 = vrot.lane.b32.xlu0 %v8631_v54, %s5551_s26 }
 0x4dc   : > { %5172 = vrot.lane.b32.xlu1 %v8600_v60, %s5553_s5 }
 0x4dd   : > { %5177 = vrot.lane.b32.xlu0 %v8672_v29, %s5559_s6 }
 0x4e0   : > { %5182 = vrot.lane.b32.xlu1 %v5181_v8, %s5559_s6 }
 0x4e1   : > { %5187 = vrot.lane.b32.xlu0 %v5186_v42, %s5551_s26 }
 0x4e4   : > { %5192 = vrot.lane.b32.xlu1 %v8643_v44, %s5551_s26 }
 0x4e5   : > { %5197 = vrot.lane.b32.xlu0 %v5196_v22, %s5553_s5 }
 0x4e8   : > { %5202 = vrot.lane.b32.xlu1 %v5201_v19, %s5551_s26 }
 0x4e9   : > { %5207 = vrot.lane.b32.xlu0 %v8675_v62, %s5559_s6 }
 0x4ec   : > { %5212 = vrot.lane.b32.xlu1 %v5211_v34, %s5559_s6 }
 0x4ed   : > { %5217 = vrot.lane.b32.xlu0 %v5216_v49, %s5556_s4 }
 0x4f0   : > { %5222 = vrot.lane.b32.xlu1 %v5221_v16, %s5543_s2  ;;  %s5563_s2 = smov 88  }
 0x4f1   : > { %5227 = vrot.lane.b32.xlu0 %v5226_v38, %s5545_s19 }
 0x4f4   : > { %5232 = vrot.lane.b32.xlu1 %v8552_v24, %s5560_s15 }
 0x4f5   : > { %5237 = vrot.lane.b32.xlu0 %v5236_v7, %s5560_s15 }
 0x4f7   : > { %v4978_v42 = vpop.permute.xlu1 %4977 }
 0x4f8   : > { %5242 = vrot.lane.b32.xlu1 %v8738_v11, %s5541_s16  ;;  %v8808_v58 = vunpack.i.l.bf16 %v4978_v42  ;;  %v8811_v27 = vunpack.i.h.bf16 %v4978_v42 }
 0x4f9   : > { %5247 = vrot.lane.b32.xlu0 %v8537_v33, %s5560_s15 }
 0x4fb   : > { %v4983_v2 = vpop.permute.xlu0 %4982 }
 0x4fc   : > { %v4985_v6 = vunpack.i.h.bf16 %v4983_v2  ;;  %v4984_v56 = vunpack.i.l.bf16 %v4983_v2  ;;  %5252 = vrot.lane.b32.xlu1 %v5251_v55, %s5560_s15 }
 0x4fd   : > { %5257 = vrot.lane.b32.xlu0 %v5256_v50, %s5558_s1 }
 0x4fe   : > { %v3268_v33 = vsel %vm2863_vm0, %v8808_v58, %v4984_v56  ;;  %v3269_v52 = vsel %vm2863_vm0, %v8811_v27, %v4985_v6 }
 0x4ff   : > { %v8817_v57 = vpop.permute.xlu1 %4987  ;;  %v5271_v32 = vpack.i.bf16 %v4984_v56, %v3268_v33  ;;  %v5276_v25 = vpack.i.bf16 %v4985_v6, %v3269_v52 }
 0x500   : > { %v4990_v4 = vunpack.i.h.bf16 %v8817_v57  ;;  %v9943_v20 = vunpack.i.l.bf16 %v8817_v57  ;;  %5262 = vrot.lane.b32.xlu1 %v5261_v45, %s5520_s28 }
 0x501   : > { %5267 = vrot.lane.b32.xlu0 %v5201_v19, %s5533_s30  ;;  %s5562_s30 = smov 8  }
 0x502   : > { %v8827_v53 = vsel %vm2863_vm0, %v4990_v4, %v8808_v58  ;;  %v8832_v48 = vsel %vm2863_vm0, %v9943_v20, %v4990_v4 }
 0x503   : > { %v8834_v18 = vpop.permute.xlu0 %4992  ;;  %v5281_v19 = vpack.i.bf16 %v8827_v53, %v8832_v48 }
 0x504   : > { %v4995_v41 = vunpack.i.h.bf16 %v8834_v18  ;;  %v9944_v9 = vunpack.i.l.bf16 %v8834_v18  ;;  %5272 = vrot.lane.b32.xlu1 %v5271_v32, %s5561_s17 }
 0x505   : > { %5277 = vrot.lane.b32.xlu0 %v5276_v25, %s5561_s17 }
 0x506   : > { %v8842_v0 = vsel %vm2863_vm0, %v4995_v41, %v8811_v27  ;;  %v8847_v8 = vsel %vm2863_vm0, %v9944_v9, %v4995_v41  ;;  %v4998_v22 = vpop.permute.xlu1 %4997 }
 0x507   : > { %v5000_v34 = vunpack.i.h.bf16 %v4998_v22  ;;  %v4999_v49 = vunpack.i.l.bf16 %v4998_v22  ;;  %v5003_v16 = vpop.permute.xlu0 %5002  ;;  %v5286_v38 = vpack.i.bf16 %v8842_v0, %v8847_v8 }
 0x508   : > { %v5005_v7 = vunpack.i.h.bf16 %v5003_v16  ;;  %v5004_v42 = vunpack.i.l.bf16 %v5003_v16  ;;  %5282 = vrot.lane.b32.xlu1 %v5281_v19, %s5561_s17 }
 0x509   : > { %5287 = vrot.lane.b32.xlu0 %v5286_v38, %s5561_s17  ;;  %v2808_v50 = vsel %vm1236_vm11, %v4999_v49, %v5000_v34 }
 0x50a   : > { %v8855_v55 = vpop.permute.xlu1 %5007  ;;  %v8858_v2 = vsel %vm2682_vm10, %v5000_v34, %v5005_v7  ;;  %v2835_v6 = vsel %vm1418_vm13, %v5004_v42, %v5005_v7 }
 0x50b   : > { %v9947_v56 = vunpack.i.h.bf16 %v8855_v55  ;;  %v5009_v45 = vunpack.i.l.bf16 %v8855_v55  ;;  %v8864_v33 = vpop.permute.xlu0 %5012  ;;  %v8871_v22 = vsel %vm2682_vm10, %v2808_v50, %v2835_v6 }
 0x50c   : > { %v9945_v52 = vunpack.i.h.bf16 %v8864_v33  ;;  %v5014_v4 = vunpack.i.l.bf16 %v8864_v33  ;;  %10604 = vst [vmem:[#allocation106_spill] sm:$0xff] %v8871_v22 }
 0x50d   : > { %v3251_v32 = vsel %vm1236_vm11, %v5000_v34, %v5009_v45  ;;  %v2807_v19 = vsel %vm1236_vm11, %v9947_v56, %v4999_v49 }
 0x50e   : > { %v3260_v25 = vsel %vm1418_vm13, %v5005_v7, %v5014_v4  ;;  %v5018_v41 = vpop.permute.xlu1 %5017  ;;  %v2834_v34 = vsel %vm1418_vm13, %v9945_v52, %v5004_v42  ;;  %v3283_v9 = vsel %vm2682_vm10, %v5009_v45, %v5014_v4 }
 0x50f   : > { %v8876_v16 = vunpack.i.h.bf16 %v5018_v41  ;;  %v5019_v38 = vunpack.i.l.bf16 %v5018_v41  ;;  %v8878_v15 = vpop.permute.xlu0 %5022  ;;  %v3282_v20 = vsel %vm2682_vm10, %v3251_v32, %v3260_v25  ;;  %v8906_v41 = vsel %vm2682_vm10, %v2807_v19, %v2834_v34 }
 0x510   : > { %v9946_v7 = vunpack.i.h.bf16 %v8878_v15  ;;  %v5024_v50 = vunpack.i.l.bf16 %v8878_v15  ;;  %v5291_v6 = vpack.i.bf16 %v3282_v20, %v8871_v22  ;;  %10607 = vst [vmem:[#allocation111_spill] sm:$0xff] %v8906_v41 }
 0x511   : > { %v8890_v49 = vsel %vm1418_vm13, %v5019_v38, %v8876_v16 }
 0x512   : > { %10605 = vst [vmem:[#allocation119_spill] sm:$0xff] %v8890_v49  ;;  %v8897_v32 = vsel %vm1418_vm13, %v9946_v7, %v5019_v38  ;;  %v3261_v42 = vsel %vm1418_vm13, %v8876_v16, %v5024_v50  ;;  %v5028_v25 = vpop.permute.xlu1 %5027  ;;  %5292 = vrot.lane.b32.xlu1 %v5291_v6, %s5561_s17  ;;  %v5296_v20 = vpack.i.bf16 %v8890_v49, %v3283_v9 }
 0x513   : > { %10606 = vst [vmem:[#allocation108_spill] sm:$0xff] %v8897_v32  ;;  %v5301_v4 = vpack.i.bf16 %v5024_v50, %v3261_v42  ;;  %v5033_v52 = vpop.permute.xlu0 %5032  ;;  %v5306_v6 = vpack.i.bf16 %v8897_v32, %v8906_v41  ;;  %v8915_v34 = vunpack.i.h.bf16 %v5028_v25 }
 0x514   : > { %5297 = vrot.lane.b32.xlu0 %v5296_v20, %s5561_s17  ;;  %v5035_v9 = vunpack.i.h.bf16 %v5033_v52  ;;  %v5034_v50 = vunpack.i.l.bf16 %v5033_v52  ;;  %v5029_v20 = vunpack.i.l.bf16 %v5028_v25 }
 0x515   : > { %10608 = vst [vmem:[#allocation112_spill] sm:$0xff] %v8915_v34 }
 0x516   : > { %v5038_v7 = vpop.permute.xlu1 %5037  ;;  %5302 = vrot.lane.b32.xlu1 %v5301_v4, %s5561_s17  ;;  %v2778_v52 = vsel %vm1054_vm9, %v5034_v50, %v5035_v9 }
 0x517   : > { %v5040_v56 = vunpack.i.h.bf16 %v5038_v7  ;;  %v5039_v36 = vunpack.i.l.bf16 %v5038_v7  ;;  %v5043_v45 = vpop.permute.xlu0 %5042 }
 0x518   : > { %v5045_v42 = vunpack.i.h.bf16 %v5043_v45  ;;  %v5044_v19 = vunpack.i.l.bf16 %v5043_v45  ;;  %5307 = vrot.lane.b32.xlu0 %v5306_v6, %s5561_s17  ;;  %v8925_v45 = vsel %vm1054_vm9, %v5029_v20, %v8915_v34 }
 0x519   : > { %v8918_v38 = vsel %vm2639_vm8, %v5035_v9, %v5040_v56  ;;  %v2805_v4 = vsel %vm1236_vm11, %v5039_v36, %v5040_v56  ;;  %10610 = vst [vmem:[#allocation123_spill] sm:$0xff] %v8925_v45 }
 0x51a   : > { %10609 = vst [vmem:[#allocation121_spill] sm:$0xff] %v8918_v38  ;;  %v5048_v17 = vpop.permute.xlu1 %5047  ;;  %v3230_v35 = vsel %vm3225_vm4, %v5044_v19, %v5045_v42  ;;  %v8929_v30 = vsel %vm2639_vm8, %v2778_v52, %v2805_v4 }
 0x51b   : > { %v5049_v61 = vunpack.i.l.bf16 %v5048_v17  ;;  %v5053_v7 = vpop.permute.xlu0 %5052  ;;  %10611 = vst [vmem:[#allocation107_spill] sm:$0xff] %v8929_v30  ;;  %v5050_v38 = vunpack.i.h.bf16 %v5048_v17  ;;  %v3277_v41 = vsel %vm2596_vm12, %v3230_v35, %v8925_v45 }
 0x51c   : > { %v5054_v14 = vunpack.i.l.bf16 %v5053_v7  ;;  %v5055_v25 = vunpack.i.h.bf16 %v5053_v7 }
 0x51d   : > { %v3231_v6 = vsel %vm3225_vm4, %v5045_v42, %v5049_v61 }
 0x51e   : > { %v3240_v11 = vsel %vm1054_vm9, %v8915_v34, %v5054_v14  ;;  %v3279_v22 = vsel %vm2596_vm12, %v5049_v61, %v5054_v14  ;;  %v8934_v49 = vpop.permute.xlu1 %5057  ;;  %v3241_v61 = vsel %vm1054_vm9, %v5035_v9, %v5055_v25 }
 0x51f   : > { %v9961_v32 = vunpack.i.h.bf16 %v8934_v49  ;;  %v5059_v3 = vunpack.i.l.bf16 %v8934_v49  ;;  %v8940_v42 = vpop.permute.xlu0 %5062  ;;  %v5316_v4 = vpack.i.bf16 %v8929_v30, %v3279_v22  ;;  %v3278_v17 = vsel %vm2596_vm12, %v3231_v6, %v3240_v11 }
 0x520   : > { %10612 = vst [vmem:[#allocation115_spill] sm:$0xff] %v8940_v42  ;;  %v9959_v7 = vunpack.i.h.bf16 %v8940_v42  ;;  %v9960_v52 = vunpack.i.l.bf16 %v8940_v42  ;;  %v5311_v14 = vpack.i.bf16 %v3278_v17, %v3277_v41  ;;  %v3229_v11 = vsel %vm3225_vm4, %v5050_v38, %v5044_v19 }
 0x521   : > { %v2804_v35 = vsel %vm1236_vm11, %v9961_v32, %v5039_v36  ;;  %v3250_v45 = vsel %vm1236_vm11, %v5040_v56, %v5059_v3  ;;  %v3281_v34 = vsel %vm2639_vm8, %v5055_v25, %v5059_v3  ;;  %5317 = vrot.lane.b32.xlu0 %v5316_v4, %s5561_s17 }
 0x522   : > { %v8957_v22 = vsel %vm1054_vm9, %v9960_v52, %v5029_v20  ;;  %v2777_v41 = vsel %vm1054_vm9, %v9959_v7, %v5034_v50  ;;  %v5068_v9 = vpop.permute.xlu1 %5067  ;;  %5312 = vrot.lane.b32.xlu1 %v5311_v14, %s5561_s17  ;;  %v3280_v36 = vsel %vm2639_vm8, %v3241_v61, %v3250_v45 }
 0x523   : > { %10613 = vst [vmem:[#allocation125_spill] sm:$0xff] %v8957_v22  ;;  %v8964_v56 = vunpack.i.h.bf16 %v5068_v9  ;;  %v5069_v3 = vunpack.i.l.bf16 %v5068_v9  ;;  %v8966_v6 = vpop.permute.xlu0 %5072  ;;  %v8969_v38 = vsel %vm2639_vm8, %v2777_v41, %v2804_v35  ;;  %v3276_v19 = vsel %vm2596_vm12, %v3229_v11, %v8957_v22 }
 0x524   : > { %10615 = vst [vmem:[#allocation127_spill] sm:$0xff] %v8966_v6  ;;  %10616 = vst [vmem:[#allocation110_spill] sm:$0xff] %v8969_v38  ;;  %v5074_v20 = vunpack.i.l.bf16 %v8966_v6  ;;  %v5326_v50 = vpack.i.bf16 %v8969_v38, %v3276_v19  ;;  %v5321_v25 = vpack.i.bf16 %v3281_v34, %v3280_v36  ;;  %v9964_v34 = vunpack.i.h.bf16 %v8966_v6 }
 0x525   : > { %10614 = vst [vmem:[#allocation120_spill] sm:$0xff] %v8964_v56  ;;  %v8977_v4 = vsel %vm2711_vm14, %v5069_v3, %v8964_v56 }
 0x526   : > { %10617 = vst [vmem:[#allocation113_spill] sm:$0xff] %v8977_v4  ;;  %v3206_v45 = vsel %vm2711_vm14, %v8964_v56, %v5074_v20  ;;  %v5078_v17 = vpop.permute.xlu1 %5077  ;;  %5327 = vrot.lane.b32.xlu0 %v5326_v50, %s5561_s17  ;;  %5322 = vrot.lane.b32.xlu1 %v5321_v25, %s5561_s17 }
 0x527   : > { %v5080_v14 = vunpack.i.h.bf16 %v5078_v17  ;;  %v5079_v61 = vunpack.i.l.bf16 %v5078_v17  ;;  %v5083_v35 = vpop.permute.xlu0 %5082  ;;  %v5331_v11 = vpack.i.bf16 %v3206_v45, %v8977_v4  ;;  %v8993_v45 = vsel %vm2711_vm14, %v9964_v34, %v5069_v3 }
 0x528   : > { %v5085_v41 = vunpack.i.h.bf16 %v5083_v35  ;;  %v5084_v9 = vunpack.i.l.bf16 %v5083_v35  ;;  %10618 = vst [vmem:[#allocation129_spill] sm:$0xff] %v8993_v45 }
 0x529   : > { %v3227_v36 = vsel %vm3225_vm4, %v5079_v61, %v5080_v14 }
 0x52a   : > { %v3228_v19 = vsel %vm3225_vm4, %v5080_v14, %v5084_v9  ;;  %v5088_v7 = vpop.permute.xlu1 %5087  ;;  %5332 = vrot.lane.b32.xlu1 %v5331_v11, %s5561_s17  ;;  %v5336_v52 = vpack.i.bf16 %v3227_v36, %v5074_v20  ;;  %v3226_v50 = vsel %vm3225_vm4, %v5085_v41, %v5079_v61  ;;  %vm10628_vm4 = vmmov %vm10623_vm1 }
 0x52b   : > { %v5341_v25 = vpack.i.bf16 %v5084_v9, %v3228_v19  ;;  %v5093_v32 = vpop.permute.xlu0 %5092  ;;  %v8995_v17 = vunpack.i.h.bf16 %v5088_v7  ;;  %v5089_v35 = vunpack.i.l.bf16 %v5088_v7  ;;  %v5346_v20 = vpack.i.bf16 %v3226_v50, %v8993_v45 }
 0x52c   : > { %5337 = vrot.lane.b32.xlu0 %v5336_v52, %s5561_s17  ;;  %v8997_v4 = vunpack.i.h.bf16 %v5093_v32  ;;  %v5094_v14 = vunpack.i.l.bf16 %v5093_v32 }
 0x52d   : > { %10619 = vst [vmem:[#allocation131_spill] sm:$0xff] %v8995_v17  ;;  %v2630_v7 = vsel %vm10621_vm15, %v5089_v35, %v8995_v17  ;;  %vm10630_vm15 = vmmov %vm10624_vm3 }
 0x52e   : > { %10620 = vst [vmem:[#allocation133_spill] sm:$0xff] %v8997_v4  ;;  %v5098_v56 = vpop.permute.xlu1 %5097  ;;  %5342 = vrot.lane.b32.xlu1 %v5341_v25, %s5561_s17  ;;  %v2670_v32 = vsel %vm10622_vm5, %v5094_v14, %v8997_v4  ;;  %vm10631_vm5 = vmmov %vm10623_vm1 }
 0x52f   : > { %v9001_v61 = vunpack.i.h.bf16 %v5098_v56  ;;  %v5099_v11 = vunpack.i.l.bf16 %v5098_v56  ;;  %v5103_v52 = vpop.permute.xlu0 %5102  ;;  %v9020_v34 = vsel %vm2639_vm8, %v2630_v7, %v2670_v32 }
 0x530   : > { %v9003_v41 = vunpack.i.h.bf16 %v5103_v52  ;;  %v5104_v9 = vunpack.i.l.bf16 %v5103_v52  ;;  %5347 = vrot.lane.b32.xlu0 %v5346_v20, %s5561_s17 }
 0x531   : > { %v2673_v36 = vsel %vm10623_vm1, %v5099_v11, %v9001_v61 }
 0x532   : > { %v9010_v3 = vpop.permute.xlu1 %5107  ;;  %v2714_v56 = vsel %vm2711_vm14, %v5104_v9, %v9003_v41 }
 0x533   : > { %v5109_v19 = vunpack.i.l.bf16 %v9010_v3  ;;  %v5113_v50 = vpop.permute.xlu0 %5112  ;;  %v9029_v38 = vsel %vm2682_vm10, %v2673_v36, %v2714_v56 }
 0x534   : > { %v5114_v25 = vunpack.i.l.bf16 %v5113_v50  ;;  %v5115_v52 = vunpack.i.h.bf16 %v5113_v50 }
 0x535   : > { %v3186_v20 = vsel %vm10624_vm3, %v8995_v17, %v5109_v19 }
 0x536   : > { %v3195_v45 = vsel %vm10625_vm2, %v8997_v4, %v5114_v25  ;;  %v3273_v30 = vsel %vm2639_vm8, %v5109_v19, %v5114_v25  ;;  %v9026_v42 = vpop.permute.xlu1 %5117  ;;  %v3196_v36 = vsel %vm10628_vm4, %v9001_v61, %v5115_v52  ;;  %vm10633_vm2 = vmmov %vm10624_vm3 }
 0x537   : > { %10626 = vst [vmem:[#allocation114_spill] sm:$0xff] %v9026_v42  ;;  %v9975_v22 = vunpack.i.h.bf16 %v9026_v42  ;;  %v5119_v17 = vunpack.i.l.bf16 %v9026_v42  ;;  %v9033_v50 = vpop.permute.xlu0 %5122  ;;  %v5356_v7 = vpack.i.bf16 %v9029_v38, %v3273_v30  ;;  %v3272_v32 = vsel %vm2639_vm8, %v3186_v20, %v3195_v45  ;;  %vm10634_vm4 = vmmov %vm10633_vm2 }
 0x538   : > { %10627 = vst [vmem:[#allocation135_spill] sm:$0xff] %v9033_v50  ;;  %v9976_v6 = vunpack.i.h.bf16 %v9033_v50  ;;  %v9977_v4 = vunpack.i.l.bf16 %v9033_v50  ;;  %v5351_v19 = vpack.i.bf16 %v3272_v32, %v9020_v34  ;;  %v10629_v45 = vunpack.i.h.bf16 %v9010_v3 }
 0x539   : > { %v2713_v56 = vsel %vm2711_vm14, %v9975_v22, %v5104_v9  ;;  %v3205_v25 = vsel %vm2711_vm14, %v9003_v41, %v5119_v17  ;;  %v3275_v30 = vsel %vm2682_vm10, %v5115_v52, %v5119_v17  ;;  %5357 = vrot.lane.b32.xlu0 %v5356_v7, %s5561_s17 }
 0x53a   : > { %v2629_v20 = vsel %vm10630_vm15, %v10629_v45, %v5089_v35  ;;  %v2672_v32 = vsel %vm10631_vm5, %v9976_v6, %v5099_v11  ;;  %v2669_v42 = vsel %vm10623_vm1, %v9977_v4, %v5094_v14  ;;  %v5128_v9 = vpop.permute.xlu1 %5127  ;;  %5352 = vrot.lane.b32.xlu1 %v5351_v19, %s5561_s17  ;;  %v3274_v22 = vsel %vm2682_vm10, %v3196_v36, %v3205_v25 }
 0x53b   : > { %v9060_v17 = vunpack.i.h.bf16 %v5128_v9  ;;  %v5129_v52 = vunpack.i.l.bf16 %v5128_v9  ;;  %v9062_v7 = vpop.permute.xlu0 %5132  ;;  %v9065_v35 = vsel %vm2639_vm8, %v2629_v20, %v2669_v42  ;;  %v9068_v45 = vsel %vm2682_vm10, %v2672_v32, %v2713_v56 }
 0x53c   : > { %10632 = vst [vmem:[#allocation137_spill] sm:$0xff] %v9062_v7  ;;  %v9978_v11 = vunpack.i.h.bf16 %v9062_v7  ;;  %v5134_v14 = vunpack.i.l.bf16 %v9062_v7  ;;  %v5366_v19 = vpack.i.bf16 %v9068_v45, %v9065_v35  ;;  %v5361_v6 = vpack.i.bf16 %v3275_v30, %v3274_v22 }
 0x53d   : > { %v2627_v36 = vsel %vm10624_vm3, %v5129_v52, %v9060_v17  ;;  %vm10637_vm15 = vcmask 130048   ;;  %vm2894_vm1 = vcmask 523264  }
 0x53e   : > { %v2626_v25 = vsel %vm10633_vm2, %v9978_v11, %v5129_v52  ;;  %v3185_v42 = vsel %vm10634_vm4, %v9060_v17, %v5134_v14  ;;  %v5138_v56 = vpop.permute.xlu1 %5137  ;;  %5367 = vrot.lane.b32.xlu0 %v5366_v19, %s5561_s17  ;;  %5362 = vrot.lane.b32.xlu1 %v5361_v6, %s5561_s17  ;;  %v9085_v22 = vsel %vm2596_vm12, %v8541_v23, %v2627_v36  ;;  %vm10638_vm5 = vmmov %vm10637_vm15 }
 0x53f   : > { %v5140_v20 = vunpack.i.h.bf16 %v5138_v56  ;;  %v5139_v32 = vunpack.i.l.bf16 %v5138_v56  ;;  %v5143_v9 = vpop.permute.xlu0 %5142  ;;  %10635 = vst [vmem:[#allocation118_spill] sm:$0xff] %v9085_v22  ;;  %v5376_v52 = vpack.i.bf16 %v9085_v22, %v8484_v39  ;;  %v3270_v11 = vsel %vm2596_vm12, %v8502_v63, %v3185_v42  ;;  %vm10639_vm3 = vmmov %vm10638_vm5 }
 0x540   : > { %v5145_v30 = vunpack.i.h.bf16 %v5143_v9  ;;  %v5144_v4 = vunpack.i.l.bf16 %v5143_v9  ;;  %v3271_v19 = vsel %vm2596_vm12, %v8513_v13, %v5134_v14  ;;  %v9096_v56 = vsel %vm2596_vm12, %v8539_v37, %v2626_v25  ;;  %vm10640_vm2 = vmmov %vm10639_vm3 }
 0x541   : > { %v2980_v6 = vsel %vm2179_vm6, %v5139_v32, %v5140_v20  ;;  %v5381_v22 = vpack.i.bf16 %v3271_v19, %v3270_v11  ;;  %v5386_v20 = vpack.i.bf16 %v9096_v56, %v8526_v5  ;;  %vm10641_vm4 = vmmov %vm10640_vm2 }
 0x542   : > { %v5148_v50 = vpop.permute.xlu1 %5147  ;;  %5377 = vrot.lane.b32.xlu0 %v5376_v52, %s5561_s17  ;;  %5372 = vrot.lane.b32.xlu1 %v8700_v46, %s5561_s17  ;;  %v3012_v39 = vsel %vm2381_vm7, %v5144_v4, %v5145_v30 }
 0x543   : > { %v5150_v23 = vunpack.i.h.bf16 %v5148_v50  ;;  %v5149_v36 = vunpack.i.l.bf16 %v5148_v50  ;;  %v5153_v42 = vpop.permute.xlu0 %5152  ;;  %v3520_v9 = vpack.c.bf16 %v3012_v39, %v2980_v6 }
 0x544   : > { %v5155_v14 = vunpack.i.h.bf16 %v5153_v42  ;;  %v5154_v7 = vunpack.i.l.bf16 %v5153_v42 }
 0x545   : > { %3638 = vmatprep.subr.bf16.mxu1 %v3520_v9  ;;  %v2978_v37 = vsel %vm2179_vm6, %v5149_v36, %v5150_v23  ;;  %v2979_v25 = vsel %vm2179_vm6, %v5150_v23, %v5139_v32 }
 0x546   : > { %v9106_v52 = vpop.permute.xlu1 %5157  ;;  %5387 = vrot.lane.b32.xlu0 %v5386_v20, %s5561_s17  ;;  %5382 = vrot.lane.b32.xlu1 %v5381_v22, %s5561_s17  ;;  %v3010_v46 = vsel %vm2381_vm7, %v5154_v7, %v5155_v14  ;;  %v3011_v50 = vsel %vm2381_vm7, %v5155_v14, %v5144_v4 }
 0x547   : > { %v5159_v11 = vunpack.i.l.bf16 %v9106_v52  ;;  %v2990_v30 = vpop.permute.xlu0 %2989  ;;  %v3518_v19 = vpack.c.bf16 %v3010_v46, %v2978_v37  ;;  %v3519_v6 = vpack.c.bf16 %v3011_v50, %v2979_v25  ;;  %v5160_v37 = vunpack.i.h.bf16 %v9106_v52 }
 0x548   : > { %v3009_v39 = vsel %vm2381_vm7, %v2990_v30, %v5154_v7  ;;  %v10636_v46 = vpack.i.bf16 %v8490_v40, %v8728_v43  ;;  %v5426_v30 = vpack.i.bf16 %v8513_v13, %v8502_v63 }
 0x549   : > { %3587 = vmatprep.subr.bf16.mxu0 %v3518_v19  ;;  %3639 = vmatpush1.bf16.msra.mxu1 %v3519_v6  ;;  %v2977_v32 = vsel %vm2179_vm6, %v5159_v11, %v5149_v36 }
 0x54a   : > { %v5163_v23 = vpop.permute.xlu1 %5162  ;;  %5397 = vrot.lane.b32.xlu0 %v8643_v44, %s5562_s30  ;;  %5392 = vrot.lane.b32.xlu1 %v8631_v54, %s5562_s30  ;;  %v3517_v4 = vpack.c.bf16 %v3009_v39, %v2977_v32 }
 0x54b   : > { %v5168_v22 = vpop.permute.xlu0 %5167  ;;  %v5165_v42 = vunpack.i.h.bf16 %v5163_v23  ;;  %v5164_v7 = vunpack.i.l.bf16 %v5163_v23 }
 0x54c   : > { %3588 = vmatpush1.bf16.msra.mxu0 %v3517_v4  ;;  %v5170_v36 = vunpack.i.h.bf16 %v5168_v22  ;;  %v5169_v14 = vunpack.i.l.bf16 %v5168_v22 }
 0x54e   : > { %v9119_v9 = vpop.permute.xlu1 %5172  ;;  %5407 = vrot.lane.b32.xlu0 %v8600_v60, %s5563_s2  ;;  %5402 = vrot.lane.b32.xlu1 %v8577_v59, %s5563_s2  ;;  %v2937_v59 = vsel %vm10637_vm15, %v5164_v7, %v5165_v42  ;;  %v2941_v60 = vsel %vm10638_vm5, %v5169_v14, %v5170_v36  ;;  %vm10642_vm15 = vmmov %vm10640_vm2 }
 0x54f   : > { %v5174_v20 = vunpack.i.l.bf16 %v9119_v9  ;;  %v5178_v44 = vpop.permute.xlu0 %5177  ;;  %vm10645_vm5 = vmmov %vm10640_vm2 }
 0x550   : > { %v5180_v52 = vunpack.i.h.bf16 %v5178_v44  ;;  %v5179_v19 = vunpack.i.l.bf16 %v5178_v44 }
 0x551   : > { %v2976_v54 = vsel %vm2179_vm6, %v5160_v37, %v5174_v20  ;;  %v5175_v20 = vunpack.i.h.bf16 %v9119_v9  ;;  %v10643_v9 = vpack.i.bf16 %v8650_v47, %v8660_v26 }
 0x552   : > { %v5183_v25 = vpop.permute.xlu1 %5182  ;;  %5417 = vrot.lane.b32.xlu0 %v8625_v21, %s5563_s2  ;;  %5412 = vrot.lane.b32.xlu1 %v10636_v46, %s5562_s30  ;;  %v3168_v32 = vsel %vm2682_vm10, %v2941_v60, %v2976_v54  ;;  %v2899_v44 = vsel %vm2894_vm1, %v5179_v19, %v5180_v52 }
 0x553   : > { %v5184_v50 = vunpack.i.l.bf16 %v5183_v25  ;;  %v5188_v11 = vpop.permute.xlu0 %5187  ;;  %v5185_v54 = vunpack.i.h.bf16 %v5183_v25  ;;  %v10644_v25 = vpack.i.bf16 %v8500_v10, %v8497_v12 }
 0x554   : > { %v5190_v6 = vunpack.i.h.bf16 %v5188_v11  ;;  %v5189_v39 = vunpack.i.l.bf16 %v5188_v11 }
 0x555   : > { %v3164_v21 = vsel %vm2639_vm8, %v5184_v50, %v2937_v59  ;;  %v2900_v4 = vsel %vm2894_vm1, %v5180_v52, %v5184_v50  ;;  %v2898_v47 = vsel %vm2894_vm1, %v5185_v54, %v5179_v19 }
 0x556   : > { %v2935_v40 = vsel %vm10639_vm3, %v5189_v39, %v5190_v6  ;;  %v5193_v43 = vpop.permute.xlu1 %5192  ;;  %5427 = vrot.lane.b32.xlu0 %v5426_v30, %s5555_s14  ;;  %5422 = vrot.lane.b32.xlu1 %v8635_v28, %s5563_s2  ;;  %v3516_v23 = vpack.c.bf16 %v3168_v32, %v3164_v21  ;;  %v2936_v13 = vsel %vm10640_vm2, %v5190_v6, %v5164_v7  ;;  %vm10646_vm3 = vmmov %vm10640_vm2  ;;  %vm10691_vm2 = vcmask 1014784  }
 0x557   : > { %v5195_v22 = vunpack.i.h.bf16 %v5193_v43  ;;  %v5194_v42 = vunpack.i.l.bf16 %v5193_v43  ;;  %v5198_v36 = vpop.permute.xlu0 %5197  ;;  %v3162_v11 = vsel %vm2639_vm8, %v2899_v44, %v2935_v40 }
 0x558   : > { %v5199_v46 = vunpack.i.l.bf16 %v5198_v36  ;;  %3640 = vmatprep.subr.bf16.mxu1 %v3516_v23  ;;  %v5200_v28 = vunpack.i.h.bf16 %v5198_v36 }
 0x559   : > { %v2939_v59 = vsel %vm10641_vm4, %v5194_v42, %v5195_v22  ;;  %v2940_v60 = vsel %vm10642_vm15, %v5195_v22, %v5169_v14  ;;  %v3163_v14 = vsel %vm2639_vm8, %v2900_v4, %v2936_v13  ;;  %vm10693_vm4 = vmmov %vm10691_vm2  ;;  %vm3574_vm15 = vcmask 1044480  }
 0x55a   : > { %v2974_v50 = vsel %vm2179_vm6, %v5175_v20, %v5199_v46  ;;  %v2975_v7 = vsel %vm2179_vm6, %v5199_v46, %v5160_v37  ;;  %v5203_v30 = vpop.permute.xlu1 %5202  ;;  %5437 = vrot.lane.b32.xlu0 %v10643_v9, %s5564_s18  ;;  %5432 = vrot.lane.b32.xlu1 %v10644_v25, %s5564_s18  ;;  %v2973_v26 = vsel %vm2179_vm6, %v5200_v28, %v5175_v20  ;;  %v10647_v28 = vld [vmem:[#allocation8_spill] sm:$0xff]  ;;  %vm2742_vm6 = vcmask 982016  }
 0x55b   : > { %v5205_v52 = vunpack.i.h.bf16 %v5203_v30  ;;  %v5204_v6 = vunpack.i.l.bf16 %v5203_v30  ;;  %v5208_v21 = vpop.permute.xlu0 %5207  ;;  %v3166_v32 = vsel %vm2682_vm10, %v2939_v59, %v2974_v50  ;;  %v3167_v37 = vsel %vm2682_vm10, %v2940_v60, %v2975_v7 }
 0x55c   : > { %v5210_v40 = vunpack.i.h.bf16 %v5208_v21  ;;  %v5209_v43 = vunpack.i.l.bf16 %v5208_v21  ;;  %v3514_v23 = vpack.c.bf16 %v3166_v32, %v3162_v11  ;;  %v3515_v22 = vpack.c.bf16 %v3167_v37, %v3163_v14  ;;  %v10648_v11 = vld [vmem:[#allocation7_spill] sm:$0xff] }
 0x55d   : > { %v2934_v12 = vsel %vm10645_vm5, %v5204_v6, %v5189_v39  ;;  %v2938_v10 = vsel %vm10646_vm3, %v5205_v52, %v5194_v42  ;;  %v4678_v50 = vcombine.high %v10648_v11, %v10647_v28  ;;  %v10650_v14 = vunpack.i.l.bf16 %v8817_v57 }
 0x55e   : > { %v2896_v4 = vsel %vm2894_vm1, %v5209_v43, %v5210_v40  ;;  %v5213_v13 = vpop.permute.xlu1 %5212  ;;  %3589 = vmatprep.subr.bf16.mxu0 %v3514_v23  ;;  %3641 = vmatpush1.bf16.msra.mxu1 %v3515_v22  ;;  %v3161_v36 = vsel %vm2639_vm8, %v2898_v47, %v2934_v12  ;;  %v3165_v44 = vsel %vm2682_vm10, %v2938_v10, %v2973_v26  ;;  %v10651_v57 = vunpack.i.h.bf16 %v8855_v55 }
 0x55f   : > { %v5215_v46 = vunpack.i.h.bf16 %v5213_v13  ;;  %v5214_v59 = vunpack.i.l.bf16 %v5213_v13  ;;  %5447 = vrot.lane.b32.xlu0 %v8552_v24, %s5555_s14  ;;  %5442 = vrot.lane.b32.xlu1 %v8669_v1, %s5562_s30  ;;  %v5218_v19 = vpop.permute.xlu0 %5217  ;;  %v3513_v39 = vpack.c.bf16 %v3165_v44, %v3161_v36  ;;  %v3158_v42 = vsel %vm2596_vm12, %v8847_v8, %v2896_v4  ;;  %v10658_v13 = vld [vmem:[#allocation111_spill] sm:$0xff] }
 0x560   : > { %v5220_v20 = vunpack.i.h.bf16 %v5218_v19  ;;  %v5219_v54 = vunpack.i.l.bf16 %v5218_v19  ;;  %v3510_v60 = vpack.c.bf16 %v3158_v42, %v8832_v48  ;;  %v10649_v1 = vunpack.i.l.bf16 %v8834_v18  ;;  %4685 = vmatprep.mubr.msk.bf16.mxu1 %vm2711_vm14, %v4678_v50  ;;  %4682 = vmatprep.mubr.msk.bf16.mxu0 %vm2711_vm14, %v4678_v50  ;;  %v10665_v50 = vld [vmem:[#allocation112_spill] sm:$0xff] }
 0x561   : > { %v2895_v7 = vsel %vm2894_vm1, %v5215_v46, %v5209_v43  ;;  %v2897_v30 = vsel %vm2894_vm1, %v5210_v40, %v5214_v59  ;;  %3590 = vmatpush1.bf16.msra.mxu0 %v3513_v39  ;;  %v3160_v24 = vsel %vm2596_vm12, %v8811_v27, %v5214_v59  ;;  %v10653_v43 = vpack.c.bf16 %v8876_v16, %v8858_v2  ;;  %v10657_v16 = vld [vmem:[#allocation108_spill] sm:$0xff]  ;;  %v10660_v46 = vld [vmem:[#allocation119_spill] sm:$0xff]  ;;  %v10661_v59 = vld [vmem:[#allocation106_spill] sm:$0xff] }
 0x562   : > { %v2867_v9 = vsel %vm2863_vm0, %v5219_v54, %v10649_v1  ;;  %v5223_v8 = vpop.permute.xlu1 %5222  ;;  %3591 = vmatprep.subr.bf16.mxu0 %v3510_v60  ;;  %v3512_v25 = vpack.c.bf16 %v3160_v24, %v8808_v58  ;;  %v3159_v48 = vsel %vm2596_vm12, %v8842_v0, %v2897_v30  ;;  %v2864_v52 = vsel %vm2863_vm0, %v5220_v20, %v10650_v14  ;;  %v10664_v54 = vld [vmem:[#allocation125_spill] sm:$0xff]  ;;  %v10666_v1 = vld [vmem:[#allocation104_spill] sm:$0xff] }
 0x563   : > { %v5224_v6 = vunpack.i.l.bf16 %v5223_v8  ;;  %5457 = vrot.lane.b32.xlu0 %v8672_v29, %s5564_s18  ;;  %5452 = vrot.lane.b32.xlu1 %v8675_v62, %s5564_s18  ;;  %v5228_v27 = vpop.permute.xlu0 %5227  ;;  %v3511_v18 = vpack.c.bf16 %v3159_v48, %v8827_v53  ;;  %v3157_v21 = vsel %vm2596_vm12, %v2867_v9, %v2895_v7  ;;  %v5225_v29 = vunpack.i.h.bf16 %v5223_v8  ;;  %v10667_v8 = vld [vmem:[#allocation110_spill] sm:$0xff] }
 0x564   : > { %v5230_v58 = vunpack.i.h.bf16 %v5228_v27  ;;  %v5229_v32 = vunpack.i.l.bf16 %v5228_v27  ;;  %3642 = vmatprep.subr.bf16.mxu1 %v3512_v25  ;;  %v3509_v0 = vpack.c.bf16 %v3157_v21, %v2864_v52  ;;  %v10652_v62 = vunpack.i.h.bf16 %v8864_v33  ;;  %v10655_v33 = vld [vmem:[#allocation117_spill] sm:$0xff]  ;;  %v10669_v27 = vld [vmem:[#allocation123_spill] sm:$0xff] }
 0x565   : > { %v2806_v37 = vsel %vm1236_vm11, %v5224_v6, %v10651_v57  ;;  %3643 = vmatpush1.bf16.msra.mxu1 %v3511_v18  ;;  %v10654_v23 = vunpack.i.h.bf16 %v8878_v15  ;;  %v10656_v26 = vpack.i.bf16 %v8653_v51, %v10655_v33  ;;  %v10659_v15 = vpack.c.bf16 %v10657_v16, %v10658_v13  ;;  %v10668_v25 = vld [vmem:[#allocation121_spill] sm:$0xff]  ;;  %v10670_v21 = vld [vmem:[#allocation115_spill] sm:$0xff] }
 0x566   : > { %v2833_v53 = vsel %vm1418_vm13, %v5229_v32, %v10652_v62  ;;  %v5233_v40 = vpop.permute.xlu1 %5232  ;;  %3592 = vmatpush1.bf16.msra.mxu0 %v3509_v0  ;;  %3644 = vmatprep.subr.bf16.mxu1 %v10653_v43  ;;  %v10662_v19 = vpack.c.bf16 %v10660_v46, %v10661_v59  ;;  %v10663_v39 = vunpack.i.h.bf16 %v8934_v49  ;;  %v10672_v0 = vunpack.i.h.bf16 %v10670_v21  ;;  %v10674_v33 = vld [vmem:[#allocation129_spill] sm:$0xff] }
 0x567   : > { %v2836_v55 = vsel %vm1418_vm13, %v5230_v58, %v10654_v23  ;;  %v5235_v22 = vunpack.i.h.bf16 %v5233_v40  ;;  %v5234_v47 = vunpack.i.l.bf16 %v5233_v40  ;;  %2999 = vrot.lane.b32.xlu0 %v8710_v31, %s5555_s14  ;;  %5462 = vrot.lane.b32.xlu1 %v10656_v26, %s5562_s30  ;;  %v5238_v12 = vpop.permute.xlu0 %5237  ;;  %v3153_v10 = vsel %vm2682_vm10, %v2806_v37, %v2833_v53  ;;  %v10673_v37 = vld [vmem:[#allocation107_spill] sm:$0xff] }
 0x568   : > { %v5240_v4 = vunpack.i.h.bf16 %v5238_v12  ;;  %v5239_v2 = vunpack.i.l.bf16 %v5238_v12  ;;  %3593 = vmatprep.subr.bf16.mxu0 %v10659_v15  ;;  %v3505_v36 = vpack.c.bf16 %v2836_v55, %v3153_v10  ;;  %v2803_v51 = vsel %vm1236_vm11, %v5225_v29, %v10663_v39  ;;  %v10676_v15 = vld [vmem:[#allocation133_spill] sm:$0xff] }
 0x569   : > { %v2747_v44 = vsel %vm2742_vm6, %v5234_v47, %v5235_v22  ;;  %3645 = vmatpush1.bf16.msra.mxu1 %v10662_v19  ;;  %v10671_v58 = vunpack.i.l.bf16 %v10670_v21  ;;  %v3144_v10 = vsel %vm2682_vm10, %v9001_v61, %v9003_v41  ;;  %v10678_v19 = vld [vmem:[#allocation113_spill] sm:$0xff]  ;;  %v3136_v41 = vsel %vm2596_vm12, %v8502_v63, %v9060_v17  ;;  %v10683_v17 = vld [vmem:[#allocation100_spill] sm:$0xff] }
 0x56a   : > { %v2748_v42 = vsel %vm2742_vm6, %v5235_v22, %v5239_v2  ;;  %v5243_v20 = vpop.permute.xlu1 %5242  ;;  %3594 = vmatpush1.bf16.msra.mxu0 %v3505_v36  ;;  %v3146_v60 = vsel %vm2596_vm12, %v2747_v44, %v10664_v54  ;;  %v3148_v7 = vsel %vm2596_vm12, %v5239_v2, %v10665_v50  ;;  %v2746_v14 = vsel %vm2742_vm6, %v5240_v4, %v5234_v47  ;;  %v10675_v4 = vld [vmem:[#allocation120_spill] sm:$0xff]  ;;  %v10677_v36 = vld [vmem:[#allocation131_spill] sm:$0xff] }
 0x56b   : > { %v5245_v30 = vunpack.i.h.bf16 %v5243_v20  ;;  %v5244_v24 = vunpack.i.l.bf16 %v5243_v20  ;;  %5467 = vrot.lane.b32.xlu1 %v10666_v1, %s5564_s18  ;;  %v5248_v9 = vpop.permute.xlu0 %5247  ;;  %v3502_v49 = vpack.c.bf16 %v10667_v8, %v3146_v60  ;;  %v3504_v48 = vpack.c.bf16 %v10668_v25, %v3148_v7  ;;  %v10684_v25 = vld [vmem:[#allocation114_spill] sm:$0xff] }
 0x56c   : > { %v5250_v52 = vunpack.i.h.bf16 %v5248_v9  ;;  %v5249_v6 = vunpack.i.l.bf16 %v5248_v9  ;;  %v3147_v18 = vsel %vm2596_vm12, %v2748_v42, %v10669_v27  ;;  %v3140_v44 = vsel %vm2639_vm8, %v10677_v36, %v10676_v15 }
 0x56d   : > { %v2773_v32 = vsel %vm1054_vm9, %v5244_v24, %v10671_v58  ;;  %v2776_v57 = vsel %vm1054_vm9, %v5245_v30, %v10672_v0  ;;  %3595 = vmatprep.subr.bf16.mxu0 %v3502_v49  ;;  %3646 = vmatprep.subr.bf16.mxu1 %v3504_v48  ;;  %v3503_v29 = vpack.c.bf16 %v10673_v37, %v3147_v18  ;;  %v10681_v9 = vunpack.i.h.bf16 %v9010_v3 }
 0x56e   : > { %v5253_v62 = vpop.permute.xlu1 %5252  ;;  %v3145_v53 = vsel %vm2596_vm12, %v2746_v14, %v2773_v32  ;;  %v3149_v40 = vsel %vm2639_vm8, %v2776_v57, %v2803_v51  ;;  %v2744_v43 = vsel %vm2742_vm6, %v5249_v6, %v5250_v52  ;;  %v10679_v51 = vld [vmem:[#allocation127_spill] sm:$0xff]  ;;  %v3496_v7 = vpack.c.bf16 %v3144_v10, %v3140_v44 }
 0x56f   : > { %v5255_v23 = vunpack.i.h.bf16 %v5253_v62  ;;  %v5254_v55 = vunpack.i.l.bf16 %v5253_v62  ;;  %3647 = vmatpush1.bf16.msra.mxu1 %v3503_v29  ;;  %v5258_v22 = vpop.permute.xlu0 %5257  ;;  %v3501_v47 = vpack.c.bf16 %v3149_v40, %v3145_v53  ;;  %v3498_v26 = vpack.c.bf16 %v2744_v43, %v10674_v33 }
 0x570   : > { %v5259_v12 = vunpack.i.l.bf16 %v5258_v22  ;;  %v5260_v46 = vunpack.i.h.bf16 %v5258_v22  ;;  %v10680_v42 = vunpack.i.h.bf16 %v10679_v51  ;;  %v3494_v1 = vpack.c.bf16 %v9068_v45, %v9065_v35  ;;  %v10689_v45 = vld [vmem:[#allocation135_spill] sm:$0xff]  ;;  %v10694_v22 = vld [vmem:[#allocation105_spill] sm:$0xff] }
 0x571   : > { %v3500_v2 = vpack.c.bf16 %v5254_v55, %v10675_v4  ;;  %3596 = vmatpush1.bf16.msra.mxu0 %v3501_v47  ;;  %v2745_v16 = vsel %vm2742_vm6, %v5250_v52, %v5254_v55  ;;  %v2743_v13 = vsel %vm2742_vm6, %v5255_v23, %v5249_v6  ;;  %vm10682_vm11 = vcmask 1031168   ;;  %v10686_v52 = vld [vmem:[#allocation137_spill] sm:$0xff]  ;;  %v10695_v47 = vld [vmem:[#allocation118_spill] sm:$0xff] }
 0x572   : > { %v5263_v59 = vpop.permute.xlu1 %5262  ;;  %3597 = vmatprep.subr.bf16.mxu0 %v3498_v26  ;;  %v3499_v39 = vpack.c.bf16 %v2745_v16, %v10678_v19  ;;  %v2715_v61 = vsel %vm2711_vm14, %v5259_v12, %v10680_v42  ;;  %v3495_v63 = vpack.c.bf16 %v9029_v38, %v9020_v34  ;;  %v3492_v49 = vpack.c.bf16 %v3136_v41, %v10683_v17  ;;  %vm10688_vm0 = vmmov %vm10682_vm11 }
 0x573   : > { %v5265_v20 = vunpack.i.h.bf16 %v5263_v59  ;;  %v5264_v54 = vunpack.i.l.bf16 %v5263_v59  ;;  %v5268_v60 = vpop.permute.xlu0 %5267  ;;  %3648 = vmatprep.subr.bf16.mxu1 %v3500_v2  ;;  %v3497_v50 = vpack.c.bf16 %v2743_v13, %v2715_v61  ;;  %vm3404_vm13 = vcmask 703488  }
 0x574   : > { %v5270_v30 = vunpack.i.h.bf16 %v5268_v60  ;;  %v5269_v24 = vunpack.i.l.bf16 %v5268_v60  ;;  %3649 = vmatpush1.bf16.msra.mxu1 %v3499_v39  ;;  %v10685_v48 = vunpack.i.h.bf16 %v10684_v25  ;;  %v10687_v6 = vunpack.i.h.bf16 %v10686_v52 }
 0x575   : > { %v2628_v8 = vsel %vm10682_vm11, %v5264_v54, %v10681_v9  ;;  %3598 = vmatpush1.bf16.msra.mxu0 %v3497_v50  ;;  %3650 = vmatprep.subr.bf16.mxu1 %v3496_v7  ;;  %v10690_v3 = vunpack.i.l.bf16 %v10689_v45  ;;  %v10692_v18 = vunpack.i.h.bf16 %v10689_v45  ;;  %v3490_v53 = vpack.c.bf16 %v9096_v56, %v8526_v5  ;;  %vm10730_vm11 = vmmov %vm10688_vm0 }
 0x576   : > { %v2712_v14 = vsel %vm2711_vm14, %v5260_v46, %v10685_v48  ;;  %v2625_v35 = vsel %vm10688_vm0, %v5265_v20, %v10687_v6  ;;  %3599 = vmatprep.subr.bf16.mxu0 %v3494_v1  ;;  %v5273_v38 = vpop.permute.xlu1 %5272  ;;  %v3491_v33 = vpack.c.bf16 %v10695_v47, %v10694_v22  ;;  %vm3118_vm5 = vcmask 719872  }
 0x577   : > { %v2668_v27 = vsel %vm10691_vm2, %v5269_v24, %v10690_v3  ;;  %v2671_v21 = vsel %vm10693_vm4, %v5270_v30, %v10692_v18  ;;  %v5275_v34 = vunpack.i.h.bf16 %v5273_v38  ;;  %v5274_v58 = vunpack.i.l.bf16 %v5273_v38  ;;  %v5278_v32 = vpop.permute.xlu0 %5277  ;;  %vm10746_vm2 = vmmov %vm10688_vm0 }
 0x578   : > { %v3137_v0 = vsel %vm2639_vm8, %v2628_v8, %v2668_v27  ;;  %v3141_v57 = vsel %vm2682_vm10, %v2671_v21, %v2712_v14  ;;  %v5280_v37 = vunpack.i.h.bf16 %v5278_v32  ;;  %v5279_v29 = vunpack.i.l.bf16 %v5278_v32  ;;  %3651 = vmatpush1.bf16.msra.mxu1 %v3495_v63  ;;  %vm10749_vm4 = vmmov %vm10688_vm0 }
 0x579   : > { %v3493_v62 = vpack.c.bf16 %v3141_v57, %v3137_v0  ;;  %3652 = vmatprep.subr.bf16.mxu1 %v3492_v49  ;;  %v3133_v40 = vsel %vm2596_vm12, %v8710_v31, %v2625_v35  ;;  %v3437_v43 = vsel %vm3404_vm13, %v5274_v58, %v5275_v34  ;;  %v10696_v31 = vld [vmem:[#allocation103_spill] sm:$0xff]  ;;  %vm3085_vm3 = vcmask 64512  }
 0x57a   : > { %v3552_v23 = vpack.c.bf16 %v5280_v37, %v5275_v34  ;;  %v5283_v55 = vpop.permute.xlu1 %5282  ;;  %v3440_v26 = vsel %vm3404_vm13, %v5279_v29, %v5280_v37  ;;  %v3489_v16 = vpack.c.bf16 %v3133_v40, %v10696_v31  ;;  %vm3048_vm6 = vcmask 80896  }
 0x57b   : > { %3600 = vmatpush1.bf16.msra.mxu0 %v3493_v62  ;;  %v5285_v12 = vunpack.i.h.bf16 %v5283_v55  ;;  %v5284_v10 = vunpack.i.l.bf16 %v5283_v55  ;;  %v5288_v4 = vpop.permute.xlu0 %5287  ;;  %v3551_v2 = vpack.c.bf16 %v3440_v26, %v3437_v43 }
 0x57c   : > { %3601 = vmatprep.subr.bf16.mxu0 %v3490_v53  ;;  %v5290_v5 = vunpack.i.h.bf16 %v5288_v4  ;;  %v5289_v56 = vunpack.i.l.bf16 %v5288_v4  ;;  %3653 = vmatpush1.bf16.msra.mxu1 %v3491_v33 }
 0x57d   : > { %v3436_v13 = vsel %vm3404_vm13, %v5285_v12, %v5274_v58  ;;  %4684 = vmatprep.subr.msk.bf16.mxu1 %vm3574_vm15, %v3552_v23  ;;  %v3435_v15 = vsel %vm3404_vm13, %v5284_v10, %v5285_v12  ;;  %v3582_v59 = vsel %vm3574_vm15, %v3551_v2, 0 }
 0x57e   : > { %v3439_v36 = vsel %vm3404_vm13, %v5290_v5, %v5279_v29  ;;  %v3438_v44 = vsel %vm3404_vm13, %v5289_v56, %v5290_v5 }
 0x57f   : > { %3602 = vmatpush1.bf16.msra.mxu0 %v3489_v16  ;;  %v3550_v46 = vpack.c.bf16 %v3439_v36, %v3436_v13  ;;  %v3549_v19 = vpack.c.bf16 %v3438_v44, %v3435_v15 }
 0x580   : > { %3655 = vmatpush2.bf16.msra.mxu1 %v3582_v59 }
 0x581   : > { %4681 = vmatprep.subr.msk.bf16.mxu0 %vm3574_vm15, %v3550_v46  ;;  %v3576_v39 = vsel %vm3574_vm15, %v3549_v19, 0  ;;  %vm10752_vm15 = vmmov %vm10688_vm0 }
 0x583   : > { %3604 = vmatpush2.bf16.msra.mxu0 %v3576_v39 }
 0x584   : > { %v5293_v51 = vpop.permute.xlu1 %5292 }
 0x585   : > { %v5295_v42 = vunpack.i.h.bf16 %v5293_v51  ;;  %v5294_v61 = vunpack.i.l.bf16 %v5293_v51 }
 0x586   : > { %v5298_v41 = vpop.permute.xlu0 %5297 }
 0x587   : > { %v5299_v20 = vunpack.i.l.bf16 %v5298_v41  ;;  %v5300_v60 = vunpack.i.h.bf16 %v5298_v41  ;;  %v3430_v24 = vsel %vm3404_vm13, %v5294_v61, %v5295_v42 }
 0x588   : > { %v5303_v54 = vpop.permute.xlu1 %5302 }
 0x589   : > { %v5305_v50 = vunpack.i.h.bf16 %v5303_v54  ;;  %v5304_v7 = vunpack.i.l.bf16 %v5303_v54  ;;  %v3431_v49 = vsel %vm3404_vm13, %v5295_v42, %v5299_v20 }
 0x58a   : > { %v5308_v30 = vpop.permute.xlu0 %5307 }
 0x58b   : > { %v3548_v1 = vpack.c.bf16 %v5305_v50, %v5299_v20  ;;  %v5310_v9 = vunpack.i.h.bf16 %v5308_v30  ;;  %v5309_v8 = vunpack.i.l.bf16 %v5308_v30  ;;  %v3433_v63 = vsel %vm3404_vm13, %v5300_v60, %v5304_v7 }
 0x58c   : > { %v3546_v17 = vpack.c.bf16 %v3433_v63, %v3430_v24  ;;  %v3434_v25 = vsel %vm3404_vm13, %v5304_v7, %v5305_v50 }
 0x58d   : > { %3656 = vmatprep.subr.bf16.mxu1 %v3548_v1  ;;  %v3547_v48 = vpack.c.bf16 %v3434_v25, %v3431_v49  ;;  %v3429_v14 = vsel %vm3404_vm13, %v5309_v8, %v5294_v61  ;;  %v3432_v52 = vsel %vm3404_vm13, %v5310_v9, %v5300_v60 }
 0x58e   : > { %3605 = vmatprep.subr.bf16.mxu0 %v3546_v17  ;;  %v3545_v6 = vpack.c.bf16 %v3432_v52, %v3429_v14 }
 0x58f   : > { %3657 = vmatpush2.bf16.msra.mxu1 %v3547_v48 }
 0x590   : > { %3606 = vmatpush2.bf16.msra.mxu0 %v3545_v6 }
 0x593   : > { %v5318_v35 = vpop.permute.xlu0 %5317 }
 0x594   : > { %v5313_v45 = vpop.permute.xlu1 %5312  ;;  %v5319_v3 = vunpack.i.l.bf16 %v5318_v35  ;;  %v5320_v21 = vunpack.i.h.bf16 %v5318_v35 }
 0x595   : > { %v5315_v27 = vunpack.i.h.bf16 %v5313_v45  ;;  %v5314_v18 = vunpack.i.l.bf16 %v5313_v45 }
 0x597   : > { %v3424_v37 = vsel %vm3404_vm13, %v5314_v18, %v5315_v27  ;;  %v3425_v29 = vsel %vm3404_vm13, %v5315_v27, %v5319_v3 }
 0x598   : > { %v5328_v38 = vpop.permute.xlu0 %5327  ;;  %v5323_v34 = vpop.permute.xlu1 %5322 }
 0x599   : > { %v5330_v58 = vunpack.i.h.bf16 %v5328_v38  ;;  %v5329_v32 = vunpack.i.l.bf16 %v5328_v38  ;;  %v5325_v0 = vunpack.i.h.bf16 %v5323_v34  ;;  %v5324_v57 = vunpack.i.l.bf16 %v5323_v34 }
 0x59b   : > { %v3544_v62 = vpack.c.bf16 %v5325_v0, %v5319_v3  ;;  %v3427_v53 = vsel %vm3404_vm13, %v5320_v21, %v5324_v57  ;;  %v3428_v40 = vsel %vm3404_vm13, %v5324_v57, %v5325_v0  ;;  %v3423_v43 = vsel %vm3404_vm13, %v5329_v32, %v5314_v18 }
 0x59c   : > { %v5333_v23 = vpop.permute.xlu1 %5332  ;;  %v3542_v55 = vpack.c.bf16 %v3427_v53, %v3424_v37  ;;  %v3543_v22 = vpack.c.bf16 %v3428_v40, %v3425_v29  ;;  %v3426_v47 = vsel %vm3404_vm13, %v5330_v58, %v5320_v21 }
 0x59d   : > { %3658 = vmatprep.subr.bf16.mxu1 %v3544_v62  ;;  %v3541_v33 = vpack.c.bf16 %v3426_v47, %v3423_v43  ;;  %v5335_v26 = vunpack.i.h.bf16 %v5333_v23  ;;  %v5334_v12 = vunpack.i.l.bf16 %v5333_v23 }
 0x59e   : > { %v5338_v10 = vpop.permute.xlu0 %5337  ;;  %3607 = vmatprep.subr.bf16.mxu0 %v3542_v55  ;;  %3659 = vmatpush2.bf16.msra.mxu1 %v3543_v22 }
 0x59f   : > { %3608 = vmatpush2.bf16.msra.mxu0 %v3541_v33  ;;  %v5339_v4 = vunpack.i.l.bf16 %v5338_v10  ;;  %v5340_v5 = vunpack.i.h.bf16 %v5338_v10  ;;  %v3418_v13 = vsel %vm3404_vm13, %v5334_v12, %v5335_v26 }
 0x5a0   : > { %v5343_v2 = vpop.permute.xlu1 %5342 }
 0x5a1   : > { %v5345_v56 = vunpack.i.h.bf16 %v5343_v2  ;;  %v5344_v31 = vunpack.i.l.bf16 %v5343_v2  ;;  %v3419_v19 = vsel %vm3404_vm13, %v5335_v26, %v5339_v4 }
 0x5a2   : > { %v5348_v16 = vpop.permute.xlu0 %5347 }
 0x5a3   : > { %v3540_v15 = vpack.c.bf16 %v5345_v56, %v5339_v4  ;;  %v5350_v36 = vunpack.i.h.bf16 %v5348_v16  ;;  %v5349_v44 = vunpack.i.l.bf16 %v5348_v16  ;;  %v3421_v46 = vsel %vm3404_vm13, %v5340_v5, %v5344_v31 }
 0x5a4   : > { %v3538_v59 = vpack.c.bf16 %v3421_v46, %v3418_v13  ;;  %v3422_v39 = vsel %vm3404_vm13, %v5344_v31, %v5345_v56 }
 0x5a5   : > { %3660 = vmatprep.subr.bf16.mxu1 %v3540_v15  ;;  %v3539_v51 = vpack.c.bf16 %v3422_v39, %v3419_v19  ;;  %v3417_v42 = vsel %vm3404_vm13, %v5349_v44, %v5334_v12  ;;  %v3420_v61 = vsel %vm3404_vm13, %v5350_v36, %v5340_v5 }
 0x5a6   : > { %3609 = vmatprep.subr.bf16.mxu0 %v3538_v59  ;;  %v3537_v41 = vpack.c.bf16 %v3420_v61, %v3417_v42 }
 0x5a7   : > { %3661 = vmatpush2.bf16.msra.mxu1 %v3539_v51 }
 0x5a8   : > { %3610 = vmatpush2.bf16.msra.mxu0 %v3537_v41 }
 0x5ab   : > { %v5358_v20 = vpop.permute.xlu0 %5357 }
 0x5ac   : > { %v5353_v54 = vpop.permute.xlu1 %5352  ;;  %v5359_v60 = vunpack.i.l.bf16 %v5358_v20  ;;  %v5360_v30 = vunpack.i.h.bf16 %v5358_v20 }
 0x5ad   : > { %v5355_v50 = vunpack.i.h.bf16 %v5353_v54  ;;  %v5354_v7 = vunpack.i.l.bf16 %v5353_v54 }
 0x5af   : > { %v3412_v49 = vsel %vm3404_vm13, %v5354_v7, %v5355_v50  ;;  %v3413_v25 = vsel %vm3404_vm13, %v5355_v50, %v5359_v60 }
 0x5b0   : > { %v5368_v24 = vpop.permute.xlu0 %5367  ;;  %v5363_v1 = vpop.permute.xlu1 %5362 }
 0x5b1   : > { %v5370_v9 = vunpack.i.h.bf16 %v5368_v24  ;;  %v5369_v8 = vunpack.i.l.bf16 %v5368_v24  ;;  %v5365_v63 = vunpack.i.h.bf16 %v5363_v1  ;;  %v5364_v17 = vunpack.i.l.bf16 %v5363_v1 }
 0x5b3   : > { %v3536_v48 = vpack.c.bf16 %v5365_v63, %v5359_v60  ;;  %v3415_v14 = vsel %vm3404_vm13, %v5360_v30, %v5364_v17  ;;  %v3416_v52 = vsel %vm3404_vm13, %v5364_v17, %v5365_v63  ;;  %v3411_v6 = vsel %vm3404_vm13, %v5369_v8, %v5354_v7 }
 0x5b4   : > { %v5378_v35 = vpop.permute.xlu0 %5377  ;;  %v5373_v45 = vpop.permute.xlu1 %5372  ;;  %v3534_v3 = vpack.c.bf16 %v3415_v14, %v3412_v49  ;;  %v3535_v27 = vpack.c.bf16 %v3416_v52, %v3413_v25  ;;  %v3414_v18 = vsel %vm3404_vm13, %v5370_v9, %v5360_v30 }
 0x5b5   : > { %3662 = vmatprep.subr.bf16.mxu1 %v3536_v48  ;;  %v5379_v21 = vunpack.i.l.bf16 %v5378_v35  ;;  %v5375_v38 = vunpack.i.h.bf16 %v5373_v45  ;;  %v5374_v34 = vunpack.i.l.bf16 %v5373_v45  ;;  %v3533_v58 = vpack.c.bf16 %v3414_v18, %v3411_v6 }
 0x5b6   : > { %3611 = vmatprep.subr.bf16.mxu0 %v3534_v3  ;;  %3663 = vmatpush2.bf16.msra.mxu1 %v3535_v27  ;;  %v5380_v32 = vunpack.i.h.bf16 %v5378_v35 }
 0x5b7   : > { %3612 = vmatpush2.bf16.msra.mxu0 %v3533_v58  ;;  %v3406_v40 = vsel %vm3404_vm13, %v5374_v34, %v5375_v38  ;;  %v3407_v43 = vsel %vm3404_vm13, %v5375_v38, %v5379_v21 }
 0x5b8   : > { %v5388_v0 = vpop.permute.xlu0 %5387  ;;  %v5383_v57 = vpop.permute.xlu1 %5382 }
 0x5b9   : > { %v5390_v37 = vunpack.i.h.bf16 %v5388_v0  ;;  %v5389_v29 = vunpack.i.l.bf16 %v5388_v0  ;;  %v5385_v62 = vunpack.i.h.bf16 %v5383_v57  ;;  %v5384_v53 = vunpack.i.l.bf16 %v5383_v57 }
 0x5bb   : > { %v3532_v23 = vpack.c.bf16 %v5385_v62, %v5379_v21  ;;  %v3409_v55 = vsel %vm3404_vm13, %v5380_v32, %v5384_v53  ;;  %v3410_v22 = vsel %vm3404_vm13, %v5384_v53, %v5385_v62  ;;  %v3405_v47 = vsel %vm3404_vm13, %v5389_v29, %v5374_v34 }
 0x5bc   : > { %v5398_v33 = vpop.permute.xlu0 %5397  ;;  %v5393_v26 = vpop.permute.xlu1 %5392  ;;  %v3530_v12 = vpack.c.bf16 %v3409_v55, %v3406_v40  ;;  %v3531_v10 = vpack.c.bf16 %v3410_v22, %v3407_v43  ;;  %v3408_v4 = vsel %vm3404_vm13, %v5390_v37, %v5380_v32  ;;  %vm10735_vm13 = vmmov %vm10688_vm0 }
 0x5bd   : > { %3664 = vmatprep.subr.bf16.mxu1 %v3532_v23  ;;  %v3529_v2 = vpack.c.bf16 %v3408_v4, %v3405_v47  ;;  %v5400_v13 = vunpack.i.h.bf16 %v5398_v33  ;;  %v5399_v15 = vunpack.i.l.bf16 %v5398_v33  ;;  %v5395_v44 = vunpack.i.h.bf16 %v5393_v26 }
 0x5be   : > { %3613 = vmatprep.subr.bf16.mxu0 %v3530_v12  ;;  %3665 = vmatpush2.bf16.msra.mxu1 %v3531_v10  ;;  %v5394_v39 = vunpack.i.l.bf16 %v5393_v26 }
 0x5bf   : > { %3614 = vmatpush2.bf16.msra.mxu0 %v3529_v2  ;;  %v3091_v41 = vsel %vm3085_vm3, %v5399_v15, %v5400_v13 }
 0x5c0   : > { %v5408_v5 = vpop.permute.xlu0 %5407  ;;  %v5403_v56 = vpop.permute.xlu1 %5402  ;;  %v3092_v9 = vsel %vm3085_vm3, %v5400_v13, %v5394_v39  ;;  %v3093_v8 = vsel %vm3085_vm3, %v5394_v39, %v5395_v44 }
 0x5c1   : > { %v5405_v31 = vunpack.i.h.bf16 %v5403_v56  ;;  %v5404_v16 = vunpack.i.l.bf16 %v5403_v56  ;;  %v5409_v36 = vunpack.i.l.bf16 %v5408_v5  ;;  %v5410_v20 = vunpack.i.h.bf16 %v5408_v5 }
 0x5c3   : > { %v3120_v46 = vsel %vm3118_vm5, %v5404_v16, %v5405_v31  ;;  %v3121_v54 = vsel %vm3118_vm5, %v5405_v31, %v5409_v36  ;;  %v3119_v49 = vsel %vm3118_vm5, %v5410_v20, %v5404_v16  ;;  %v3180_v25 = vsel %vm2682_vm10, %v3093_v8, %v5409_v36 }
 0x5c4   : > { %v5418_v59 = vpop.permute.xlu0 %5417  ;;  %v9335_v19 = vpop.permute.xlu1 %5412  ;;  %v3178_v50 = vsel %vm2682_vm10, %v3091_v41, %v3120_v46  ;;  %v3179_v48 = vsel %vm2682_vm10, %v3092_v9, %v3121_v54  ;;  %v4677_v8 = vcombine.low %v10648_v11, %v10647_v28  ;;  %v5474_v28 = vld [vmem:[%s9694_s8 + $0x30] sm:$0xff] (%p111_p0)   ;;  %v5475_v11 = vld [vmem:[%s9694_s8 + $0x68] sm:$0xff] (%p111_p0)  }
 0x5c5   : > { %v5420_v51 = vunpack.i.h.bf16 %v5418_v59  ;;  %v5419_v42 = vunpack.i.l.bf16 %v5418_v59  ;;  %v5414_v61 = vunpack.i.l.bf16 %v9335_v19  ;;  %v5415_v29 = vunpack.i.h.bf16 %v9335_v19 }
 0x5c7   : > { %v3123_v60 = vsel %vm3118_vm5, %v5419_v42, %v5420_v51  ;;  %v3090_v7 = vsel %vm3085_vm3, %v5414_v61, %v5399_v15 }
 0x5c8   : > { %v5428_v30 = vpop.permute.xlu0 %5427  ;;  %v5423_v24 = vpop.permute.xlu1 %5422  ;;  %v3526_v1 = vpack.c.bf16 %v3123_v60, %v3178_v50  ;;  %v3177_v6 = vsel %vm2682_vm10, %v3090_v7, %v3119_v49 }
 0x5c9   : > { %v5425_v63 = vunpack.i.h.bf16 %v5423_v24  ;;  %v5424_v17 = vunpack.i.l.bf16 %v5423_v24  ;;  %v5430_v32 = vunpack.i.h.bf16 %v5428_v30  ;;  %v5429_v0 = vunpack.i.l.bf16 %v5428_v30 }
 0x5ca   : > { %3615 = vmatprep.subr.bf16.mxu0 %v3526_v1 }
 0x5cb   : > { %v3528_v14 = vpack.c.bf16 %v5424_v17, %v3180_v25  ;;  %v3122_v52 = vsel %vm3118_vm5, %v5425_v63, %v5419_v42  ;;  %v3124_v35 = vsel %vm3118_vm5, %v5420_v51, %v5424_v17  ;;  %v3016_v23 = vsel %vm2381_vm7, %v5429_v0, %v5430_v32  ;;  %v10697_v63 = vld [vmem:[#allocation9_spill] sm:$0xff] }
 0x5cc   : > { %v5438_v45 = vpop.permute.xlu0 %5437  ;;  %v5433_v3 = vpop.permute.xlu1 %5432  ;;  %v3525_v27 = vpack.c.bf16 %v3122_v52, %v3177_v6  ;;  %v3527_v18 = vpack.c.bf16 %v3124_v35, %v3179_v48  ;;  %v4680_v17 = vcombine.high %v10697_v63, %v10697_v63  ;;  %v4679_v35 = vcombine.low %v10697_v63, %v10697_v63  ;;  %v5476_v63 = vld [vmem:[%s9694_s8 + $0x28] sm:$0xff] (%p111_p0)  }
 0x5cd   : > { %3666 = vmatprep.subr.bf16.mxu1 %v3528_v14  ;;  %v5435_v21 = vunpack.i.h.bf16 %v5433_v3  ;;  %v5434_v38 = vunpack.i.l.bf16 %v5433_v3  ;;  %v5440_v34 = vunpack.i.h.bf16 %v5438_v45  ;;  %v5439_v58 = vunpack.i.l.bf16 %v5438_v45 }
 0x5ce   : > { %3616 = vmatpush2.bf16.msra.mxu0 %v3525_v27  ;;  %3667 = vmatpush2.bf16.msra.mxu1 %v3527_v18  ;;  %vm3997_vm5 = vcmask 760832  }
 0x5cf   : > { %v3052_v53 = vsel %vm3048_vm6, %v5434_v38, %v5435_v21  ;;  %v3056_v40 = vsel %vm3048_vm6, %v5439_v58, %v5440_v34 }
 0x5d0   : > { %v3172_v10 = vsel %vm2596_vm12, %v3016_v23, %v3052_v53  ;;  %v10699_v23 = vld [vmem:[#allocation44_spill] sm:$0xff] }
 0x5d1   : > { %v5448_v57 = vpop.permute.xlu0 %5447  ;;  %v5443_v37 = vpop.permute.xlu1 %5442 }
 0x5d2   : > { %v5444_v62 = vunpack.i.l.bf16 %v5443_v37  ;;  %v5450_v33 = vunpack.i.h.bf16 %v5448_v57  ;;  %v5449_v4 = vunpack.i.l.bf16 %v5448_v57  ;;  %v5445_v16 = vunpack.i.h.bf16 %v5443_v37 }
 0x5d4   : > { %v3089_v43 = vsel %vm3085_vm3, %v5415_v29, %v5444_v62  ;;  %v3014_v44 = vsel %vm2381_vm7, %v5449_v4, %v5450_v33  ;;  %v3015_v46 = vsel %vm2381_vm7, %v5450_v33, %v5429_v0  ;;  %v10702_v33 = vld [vmem:[#allocation27_spill] sm:$0xff] }
 0x5d5   : > { %v5458_v55 = vpop.permute.xlu0 %5457  ;;  %v5453_v22 = vpop.permute.xlu1 %5452  ;;  %v3176_v47 = vsel %vm2639_vm8, %v3056_v40, %v3089_v43  ;;  %v10698_v43 = vld [vmem:[#allocation11_spill] sm:$0xff] }
 0x5d6   : > { %v5455_v26 = vunpack.i.h.bf16 %v5453_v22  ;;  %v5454_v12 = vunpack.i.l.bf16 %v5453_v22  ;;  %v5460_v2 = vunpack.i.h.bf16 %v5458_v55  ;;  %v5459_v5 = vunpack.i.l.bf16 %v5458_v55  ;;  %v10700_v55 = vld [vmem:[#allocation43_spill] sm:$0xff] }
 0x5d7   : > { %v3524_v56 = vpack.c.bf16 %v3176_v47, %v3172_v10  ;;  %v4702_v22 = vcombine.low %v10700_v55, %v10699_v23  ;;  %v10701_v47 = vld [vmem:[#allocation28_spill] sm:$0xff]  ;;  %v10704_v10 = vld [vmem:[#allocation41_spill] sm:$0xff]  ;;  %v10726_v23 = vld [vmem:[#allocation19_spill] sm:$0xff] }
 0x5d8   : > { %v3050_v13 = vsel %vm3048_vm6, %v5454_v12, %v5455_v26  ;;  %v3051_v15 = vsel %vm3048_vm6, %v5455_v26, %v5434_v38  ;;  %v3054_v59 = vsel %vm3048_vm6, %v5459_v5, %v5460_v2  ;;  %v3055_v19 = vsel %vm3048_vm6, %v5460_v2, %v5439_v58  ;;  %v10705_v2 = vld [vmem:[#allocation10_spill] sm:$0xff] }
 0x5d9   : > { %3668 = vmatprep.subr.bf16.mxu1 %v3524_v56  ;;  %v5463_v31 = vpop.permute.xlu1 %5462  ;;  %v3000_v39 = vpop.permute.xlu0 %2999  ;;  %v3170_v20 = vsel %vm2596_vm12, %v3014_v44, %v3050_v13  ;;  %v3171_v60 = vsel %vm2596_vm12, %v3015_v46, %v3051_v15  ;;  %v4694_v26 = vcombine.low %v10702_v33, %v10701_v47  ;;  %v10707_v56 = vld [vmem:[#allocation25_spill] sm:$0xff]  ;;  %v10709_v13 = vld [vmem:[#allocation40_spill] sm:$0xff]  ;;  %v10710_v15 = vld [vmem:[#allocation39_spill] sm:$0xff] }
 0x5da   : > { %v5464_v36 = vunpack.i.l.bf16 %v5463_v31  ;;  %v5465_v51 = vunpack.i.h.bf16 %v5463_v31  ;;  %v3013_v9 = vsel %vm2381_vm7, %v3000_v39, %v5449_v4  ;;  %v10711_v44 = vld [vmem:[#allocation24_spill] sm:$0xff]  ;;  %v10712_v46 = vld [vmem:[#allocation23_spill] sm:$0xff]  ;;  %vm4004_vm7 = vcmask 1046528  }
 0x5dc   : > { %v3087_v42 = vsel %vm3085_vm3, %v5445_v16, %v5464_v36  ;;  %v3088_v61 = vsel %vm3085_vm3, %v5464_v36, %v5415_v29  ;;  %v3086_v49 = vsel %vm3085_vm3, %v5465_v51, %v5445_v16  ;;  %v10708_v16 = vld [vmem:[#allocation12_spill] sm:$0xff]  ;;  %v4700_v36 = vcombine.low %v10710_v15, %v10709_v13  ;;  %v10734_v13 = vld [vmem:[#allocation17_spill] sm:$0xff] }
 0x5dd   : > { %v5468_v41 = vpop.permute.xlu1 %5467  ;;  %v3174_v54 = vsel %vm2639_vm8, %v3054_v59, %v3087_v42  ;;  %v3175_v50 = vsel %vm2639_vm8, %v3055_v19, %v3088_v61  ;;  %v4692_v59 = vcombine.low %v10712_v46, %v10711_v44 }
 0x5de   : > { %v5470_v7 = vunpack.i.h.bf16 %v5468_v41  ;;  %v5469_v30 = vunpack.i.l.bf16 %v5468_v41  ;;  %v3522_v24 = vpack.c.bf16 %v3174_v54, %v3170_v20  ;;  %v3523_v1 = vpack.c.bf16 %v3175_v50, %v3171_v60  ;;  %v10713_v41 = vld [vmem:[#allocation38_spill] sm:$0xff]  ;;  %v10714_v20 = vld [vmem:[#allocation37_spill] sm:$0xff]  ;;  %v10715_v60 = vld [vmem:[#allocation56_spill] sm:$0xff] }
 0x5df   : > { %v4699_v54 = vcombine.low %v10714_v20, %v10713_v41  ;;  %v10716_v50 = vld [vmem:[#allocation55_spill] sm:$0xff]  ;;  %v10738_v41 = vld [vmem:[#allocation50_spill] sm:$0xff]  ;;  %v10739_v20 = vld [vmem:[#allocation49_spill] sm:$0xff] }
 0x5e0   : > { %v3053_v25 = vsel %vm3048_vm6, %v5470_v7, %v5459_v5  ;;  %v3049_v48 = vsel %vm3048_vm6, %v5469_v30, %v5454_v12  ;;  %3617 = vmatprep.subr.bf16.mxu0 %v3522_v24  ;;  %3669 = vmatpush2.bf16.msra.mxu1 %v3523_v1  ;;  %v10703_v12 = vld [vmem:[#allocation42_spill] sm:$0xff]  ;;  %v4708_v7 = vcombine.low %v10716_v50, %v10715_v60  ;;  %v5565_v24 = vmov 65535  }
 0x5e1   : > { %v3169_v14 = vsel %vm2596_vm12, %v3013_v9, %v3049_v48  ;;  %v3173_v52 = vsel %vm2639_vm8, %v3053_v25, %v3086_v49  ;;  %v4701_v4 = vcombine.low %v10704_v10, %v10703_v12  ;;  %v10706_v5 = vld [vmem:[#allocation26_spill] sm:$0xff]  ;;  %vm10717_vm12 = vmmov %vm10688_vm0  ;;  %v4005_v1 = vsel %vm2682_vm10, 4294967295, %v5565_v24  ;;  %v10729_v10 = vld [vmem:[#allocation33_spill] sm:$0xff] }
 0x5e2   : > { %v3521_v6 = vpack.c.bf16 %v3173_v52, %v3169_v14  ;;  %v4693_v31 = vcombine.low %v10707_v56, %v10706_v5  ;;  %v10718_v9 = vld [vmem:[#allocation22_spill] sm:$0xff]  ;;  %v4006_v25 = vsel %vm4004_vm7, %v4005_v1, 0  ;;  %v10721_v52 = vld [vmem:[#allocation36_spill] sm:$0xff]  ;;  %vm10727_vm10 = vmmov %vm10688_vm0 }
 0x5e3   : > { %3671 = vmatmul.mubr.bf16.vlgmr.msra.gmra.mxu1 %v4677_v8  ;;  %v4008_v14 = vand.u32 %v4708_v7, %v4006_v25  ;;  %v10728_v12 = vld [vmem:[#allocation34_spill] sm:$0xff]  ;;  %v10731_v5 = vld [vmem:[#allocation52_spill] sm:$0xff]  ;;  %v10732_v56 = vld [vmem:[#allocation51_spill] sm:$0xff] }
 0x5e4   : > { %3618 = vmatpush2.bf16.msra.mxu0 %v3521_v6  ;;  %4686 = vmatprep.mubr.msk.bf16.mxu1 %vm2711_vm14, %v4680_v17  ;;  %v10722_v6 = vld [vmem:[#allocation35_spill] sm:$0xff]  ;;  %v10740_v7 = vld [vmem:[#allocation16_spill] sm:$0xff] }
 0x5e5   : > { %4747 = vmatprep.subr.bf16.mxu0 %v4702_v22  ;;  %4818 = vmatprep.subr.bf16.mxu1 %v4008_v14 }
 0x5e6   : > { %4819 = vmatpush3.bf16.msra.mxu1 %v4008_v14 }
 0x5e7   : > { %3620 = vmatmul.mubr.bf16.vlgmr.msra.gmra.mxu0 %v4677_v8  ;;  %v10719_v8 = vld [vmem:[#allocation21_spill] sm:$0xff] }
 0x5e8   : > { %4683 = vmatprep.mubr.msk.bf16.mxu0 %vm2711_vm14, %v4680_v17  ;;  %4748 = vmatpush3.bf16.msra.mxu0 %v4694_v26  ;;  %v4691_v17 = vcombine.low %v10719_v8, %v10718_v9  ;;  %vm10720_vm14 = vmmov %vm10688_vm0 }
 0x5e9   : > { %4749 = vmatprep.subr.bf16.mxu0 %v4701_v4 }
 0x5eb   : > { %3681 = vmatmul.mubr.bf16.gmra.mxu1 %v4679_v35 }
 0x5ec   : > { %4750 = vmatpush3.bf16.msra.mxu0 %v4693_v31  ;;  %v4706_v31 = vcombine.low %v10732_v56, %v10731_v5 }
 0x5ed   : > { %4751 = vmatprep.subr.bf16.mxu0 %v4700_v36 }
 0x5ef   : > { %3630 = vmatmul.mubr.bf16.gmra.mxu0 %v4679_v35  ;;  %v4698_v35 = vcombine.low %v10722_v6, %v10721_v52 }
 0x5f0   : > { %4752 = vmatpush3.bf16.msra.mxu0 %v4692_v59  ;;  %v10736_v59 = vld [vmem:[#allocation32_spill] sm:$0xff] }
 0x5f1   : > { %4753 = vmatprep.subr.bf16.mxu0 %v4699_v54  ;;  %v4705_v54 = vcombine.low %v10739_v20, %v10738_v41 }
 0x5f4   : > { %4754 = vmatpush3.bf16.msra.mxu0 %v4691_v17  ;;  %v10742_v17 = vld [vmem:[#allocation30_spill] sm:$0xff] }
 0x5f5   : > { %4755 = vmatprep.subr.bf16.mxu0 %v4698_v35  ;;  %v10747_v35 = vld [vmem:[#allocation14_spill] sm:$0xff] }
 0x6a3   : > { %v9384_v45 = vpop.f32.mrf.mxu1 }
 0x6a4   : > { %3702 = vrot.lane.b32.xlu1 %v9384_v45, %s5520_s28 }
 0x6a5   : > { %v9388_v3 = vpop.f32.mrf.mxu1 }
 0x6a7   : > { %v9390_v27 = vpop.f32.mrf.mxu0  ;;  %v9392_v18 = vpop.f32.mrf.mxu1 }
 0x6a8   : > { %3708 = vrot.lane.b32.xlu1 %v9392_v18, %s5520_s28  ;;  %3698 = vrot.lane.b32.xlu0 %v9390_v27, %s5520_s28 }
 0x6a9   : > { %v3623_v21 = vpop.f32.mrf.mxu0  ;;  %v9398_v38 = vpop.f32.mrf.mxu1 }
 0x6ab   : > { %v9400_v34 = vpop.f32.mrf.mxu0  ;;  %v9402_v58 = vpop.f32.mrf.mxu1 }
 0x6ac   : > { %3700 = vrot.lane.b32.xlu0 %v3623_v21, %s5520_s28  ;;  %3704 = vrot.lane.b32.xlu1 %v9400_v34, %s5520_s28 }
 0x6ad   : > { %v9407_v32 = vpop.f32.mrf.mxu0  ;;  %v9409_v0 = vpop.f32.mrf.mxu1 }
 0x6af   : > { %v9411_v57 = vpop.f32.mrf.mxu0  ;;  %v3686_v37 = vpop.f32.mrf.mxu1 }
 0x6b0   : > { %3743 = vrot.lane.b32.xlu0 %v9388_v3, %s5520_s28  ;;  %3745 = vrot.lane.b32.xlu1 %v9398_v38, %s5520_s28  ;;  %v10723_v37 = vld [vmem:[#allocation54_spill] sm:$0xff] }
 0x6b1   : > { %v9417_v29 = vpop.f32.mrf.mxu0  ;;  %v3687_v62 = vpop.f32.mrf.mxu1 }
 0x6b2   : > { %v10724_v62 = vld [vmem:[#allocation53_spill] sm:$0xff] }
 0x6b3   : > { %v3635_v53 = vpop.f32.mrf.mxu0 }
 0x6b4   : > { %3747 = vrot.lane.b32.xlu1 %v9409_v0, %s5520_s28  ;;  %3706 = vrot.lane.b32.xlu0 %v9407_v32, %s5520_s28  ;;  %v4707_v53 = vcombine.low %v10724_v62, %v10723_v37  ;;  %v10748_v37 = vld [vmem:[#allocation13_spill] sm:$0xff] }
 0x6b5   : > { %v3636_v40 = vpop.f32.mrf.mxu0  ;;  %v4687_v62 = vcombine.low %v10748_v37, %v10747_v35 }
 0x6b6   : > { %4820 = vmatprep.subr.bf16.mxu1 %v4707_v53 }
 0x6b7   : > { %4821 = vmatpush3.bf16.msra.mxu1 %v4707_v53 }
 0x6b8   : > { %3714 = vrot.lane.b32.xlu0 %v9402_v58, %s5520_s28  ;;  %3710 = vrot.lane.b32.xlu1 %v9411_v57, %s5520_s28 }
 0x6b9   : > { %4822 = vmatprep.subr.bf16.mxu1 %v4706_v31 }
 0x6bb   : > { %4823 = vmatpush3.bf16.msra.mxu1 %v4706_v31 }
 0x6bc   : > { %3834 = vperm.xlu1 %4975, %v10698_v43   ;;  %3712 = vrot.lane.b32.xlu0 %v9417_v29, %s5520_s28  ;;  %v10725_v43 = vld [vmem:[#allocation20_spill] sm:$0xff]  ;;  %s4718_s28 = smul.u32 24, %s115_s7 }
 0x6bd   : > { %4824 = vmatprep.subr.bf16.mxu1 %v4705_v54 }
 0x6bf   : > { %4825 = vmatpush3.bf16.msra.mxu1 %v4705_v54 }
 0x6c0   : > { %3829 = vperm.xlu0 %4973, %v10705_v2  }
 0x6c4   : > { %3839 = vperm.xlu0 %4973, %v10708_v16   ;;  %v10733_v16 = vld [vmem:[#allocation18_spill] sm:$0xff] }
 0x6c5   : > { %v4689_v15 = vcombine.low %v10734_v13, %v10733_v16 }
 0x716   : > { %v9444_v19 = vpop.permute.xlu1 %3702 }
 0x71a   : > { %v9446_v39 = vpop.permute.xlu1 %3708  ;;  %v3699_v51 = vpop.permute.xlu0 %3698 }
 0x71b   : > { %v3736_v16 = vmax.f32 %v9392_v18, %v9446_v39 }
 0x71e   : > { %v3701_v42 = vpop.permute.xlu0 %3700  ;;  %v3705_v61 = vpop.permute.xlu1 %3704 }
 0x71f   : > { %v3717_v30 = vsel %vm10717_vm12, %v3701_v42, %v9444_v19  ;;  %v3716_v48 = vsel %vm10720_vm14, %v3699_v51, %v3701_v42  ;;  %v10737_v51 = vld [vmem:[#allocation31_spill] sm:$0xff]  ;;  %vm4259_vm14 = vcmask 519168  }
 0x720   : > { %v9457_v49 = vmax.f32 %v3623_v21, %v3717_v30  ;;  %v4690_v21 = vcombine.low %v10726_v23, %v10725_v43  ;;  %v9470_v22 = vmax.f32 %v9390_v27, %v3716_v48  ;;  %v4697_v27 = vcombine.low %v10729_v10, %v10728_v12  ;;  %v10741_v30 = vld [vmem:[#allocation15_spill] sm:$0xff] }
 0x721   : > { %v4696_v42 = vcombine.low %v10737_v51, %v10736_v59  ;;  %v4688_v24 = vcombine.low %v10741_v30, %v10740_v7  ;;  %v10745_v48 = vld [vmem:[#allocation47_spill] sm:$0xff]  ;;  %v3733_v10 = vmax.f32 %v9384_v45, %v9444_v19 }
 0x722   : > { %v3744_v40 = vpop.permute.xlu0 %3743  ;;  %3778 = vrot.lane.b32.xlu0 %v9457_v49, %s5541_s16  ;;  %v3746_v33 = vpop.permute.xlu1 %3745  ;;  %4756 = vmatpush3.bf16.msra.mxu0 %v4690_v21 }
 0x723   : > { %v3759_v55 = vmax.f32 %v9388_v3, %v3744_v40  ;;  %v3749_v47 = vsel %vm10727_vm10, %v9444_v19, %v3744_v40  ;;  %v3750_v4 = vsel %vm10730_vm11, %v9446_v39, %v3746_v33  ;;  %v3761_v2 = vmax.f32 %v9398_v38, %v3746_v33  ;;  %4757 = vmatprep.subr.bf16.mxu0 %v4697_v27  ;;  %v10751_v40 = vld [vmem:[#allocation45_spill] sm:$0xff] }
 0x724   : > { %v3758_v3 = vmax.f32 %v9384_v45, %v3749_v47  ;;  %v3760_v38 = vmax.f32 %v9392_v18, %v3750_v4  ;;  %vm5568_vm10 = vmmov (%p111_p0), 0   ;;  %vm4603_vm11 = vcmask (%p111_p0), 1040384  }
 0x725   : > { %3782 = vrot.lane.b32.xlu1 %v3759_v55, %s5541_s16 }
 0x726   : > { %v3707_v26 = vpop.permute.xlu0 %3706  ;;  %3776 = vrot.lane.b32.xlu0 %v9470_v22, %s5541_s16  ;;  %v3748_v44 = vpop.permute.xlu1 %3747  ;;  %4758 = vmatpush3.bf16.msra.mxu0 %v4689_v15 }
 0x727   : > { %v3719_v36 = vsel %vm10735_vm13, %v3707_v26, %v9446_v39  ;;  %v3718_v60 = vsel %vm10688_vm0, %v3705_v61, %v3707_v26  ;;  %4759 = vmatprep.subr.bf16.mxu0 %v4696_v42  ;;  %v10743_v61 = vld [vmem:[#allocation29_spill] sm:$0xff]  ;;  %v3763_v52 = vmax.f32 %v9409_v0, %v3748_v44 }
 0x728   : > { %v3735_v50 = vmax.f32 %v9407_v32, %v3719_v36  ;;  %v9505_v8 = vmax.f32 %v9400_v34, %v3718_v60  ;;  %v4695_v25 = vcombine.low %v10743_v61, %v10742_v17  ;;  %v10744_v32 = vld [vmem:[#allocation48_spill] sm:$0xff]  ;;  %v10750_v34 = vld [vmem:[#allocation46_spill] sm:$0xff] }
 0x729   : > { %3780 = vrot.lane.b32.xlu1 %v3758_v3, %s5541_s16  ;;  %v4704_v14 = vcombine.low %v10745_v48, %v10744_v32  ;;  %v4703_v43 = vcombine.low %v10751_v40, %v10750_v34 }
 0x72a   : > { %v9490_v46 = vpop.permute.xlu0 %3714  ;;  %3790 = vrot.lane.b32.xlu0 %v3761_v2, %s5541_s16  ;;  %v3711_v1 = vpop.permute.xlu1 %3710  ;;  %4760 = vmatpush3.bf16.msra.mxu0 %v4688_v24 }
 0x72b   : > { %v3751_v6 = vsel %vm10746_vm2, %v9490_v46, %v3748_v44  ;;  %4761 = vmatprep.subr.bf16.mxu0 %v4695_v25  ;;  %4826 = vmatprep.subr.bf16.mxu1 %v4704_v14 }
 0x72c   : > { %v3762_v0 = vmax.f32 %v9402_v58, %v3751_v6  ;;  %4827 = vmatpush3.bf16.msra.mxu1 %v4704_v14 }
 0x72d   : > { %3788 = vrot.lane.b32.xlu1 %v3760_v38, %s5541_s16  ;;  %4828 = vmatprep.subr.bf16.mxu1 %v4703_v43 }
 0x72e   : > { %3786 = vrot.lane.b32.xlu0 %v3735_v50, %s5541_s16  ;;  %v3713_v9 = vpop.permute.xlu0 %3712  ;;  %4762 = vmatpush3.bf16.msra.mxu0 %v4687_v62 }
 0x72f   : > { %v3720_v53 = vsel %vm10749_vm4, %v3711_v1, %v3713_v9  ;;  %v3721_v23 = vsel %vm10752_vm15, %v3713_v9, %v9490_v46 }
 0x730   : > { %v9526_v21 = vmax.f32 %v9411_v57, %v3720_v53  ;;  %v9532_v55 = vmax.f32 %v9417_v29, %v3721_v23  ;;  %4829 = vmatpush3.bf16.msra.mxu1 %v4703_v43  ;;  %v10753_v23 = vmov 0  }
 0x731   : > { %3784 = vrot.lane.b32.xlu1 %v9505_v8, %s5541_s16 }
 0x732   : > { %3798 = vrot.lane.b32.xlu0 %v3763_v52, %s5541_s16 }
 0x735   : > { %3796 = vrot.lane.b32.xlu1 %v3762_v0, %s5541_s16 }
 0x736   : > { %3792 = vrot.lane.b32.xlu0 %v9526_v21, %s5541_s16 }
 0x737   : > { %v3835_v26 = vpop.permute.xlu1 %3834 }
 0x739   : > { %3794 = vrot.lane.b32.xlu1 %v9532_v55, %s5541_s16  ;;  %s4301_s16 = sadd.s32 %s4718_s28, %s118_s24 }
 0x73a   : > { %s4302_s19 = scalar_lea.vmem [#allocation2], %s4301_s16 }
 0x73b   : > { %v3830_v47 = vpop.permute.xlu0 %3829 }
 0x73f   : > { %v3840_v33 = vpop.permute.xlu0 %3839 }
 0x794   : > { %v3779_v3 = vpop.permute.xlu0 %3778 }
 0x797   : > { %v3783_v57 = vpop.permute.xlu1 %3782 }
 0x798   : > { %v3777_v12 = vpop.permute.xlu0 %3776 }
 0x799   : > { %v3800_v56 = vsel %vm1054_vm9, %v3777_v12, %v3779_v3 }
 0x79a   : > { %v3818_v45 = vmax.f32 %v9470_v22, %v3800_v56  ;;  %v3739_v22 = vmax.f32 %v9402_v58, %v9490_v46 }
 0x79b   : > { %v3781_v27 = vpop.permute.xlu1 %3780 }
 0x79c   : > { %v3801_v4 = vsel %vm1054_vm9, %v3779_v3, %v3781_v27  ;;  %v3802_v2 = vsel %vm1054_vm9, %v3781_v27, %v3783_v57  ;;  %v3791_v29 = vpop.permute.xlu0 %3790  ;;  %v3842_v54 = vadd.f32 %v3830_v47, %v3818_v45  ;;  %v10754_v3 = vld [vmem:[#allocation60_spill] sm:$0xff]  ;;  %v10755_v57 = vld [vmem:[#allocation58_spill] sm:$0xff] }
 0x79d   : > { %v3820_v5 = vmax.f32 %v3733_v10, %v3802_v2  ;;  %v3819_v31 = vmax.f32 %v9457_v49, %v3801_v4  ;;  %v4713_v12 = vcombine.low %v10755_v57, %v10754_v3 }
 0x79e   : > { %v3851_v25 = vmax.f32 %v3842_v54, 0.0 }
 0x79f   : > { %v3789_v13 = vpop.permute.xlu1 %3788  ;;  %v3844_v19 = vadd.f32 %v3830_v47, %v3820_v5  ;;  %v3843_v59 = vadd.f32 %v3830_v47, %v3819_v31  ;;  %4834 = vmatprep.subr.bf16.mxu0 %v4713_v12 }
 0x7a0   : > { %v3805_v15 = vsel %vm1054_vm9, %v3789_v13, %v3791_v29  ;;  %v3787_v36 = vpop.permute.xlu0 %3786 }
 0x7a1   : > { %v3823_v44 = vmax.f32 %v3736_v16, %v3805_v15  ;;  %v3804_v38 = vsel %vm1054_vm9, %v3787_v36, %v3789_v13  ;;  %v3853_v60 = vmax.f32 %v3844_v19, 0.0  ;;  %v3852_v30 = vmax.f32 %v3843_v59, 0.0 }
 0x7a2   : > { %v3822_v51 = vmax.f32 %v3735_v50, %v3804_v38 }
 0x7a3   : > { %v3847_v42 = vadd.f32 %v3835_v26, %v3823_v44  ;;  %v3785_v41 = vpop.permute.xlu1 %3784 }
 0x7a4   : > { %v3846_v20 = vadd.f32 %v3835_v26, %v3822_v51  ;;  %v3803_v49 = vsel %vm1054_vm9, %v3785_v41, %v3787_v36  ;;  %v3799_v7 = vpop.permute.xlu0 %3798 }
 0x7a5   : > { %v3856_v18 = vmax.f32 %v3847_v42, 0.0  ;;  %v3821_v39 = vmax.f32 %v9505_v8, %v3803_v49 }
 0x7a6   : > { %v3855_v24 = vmax.f32 %v3846_v20, 0.0 }
 0x7a7   : > { %v3862_v1 = vpack.c.bf16 %v3856_v18, %v3853_v60  ;;  %v3845_v9 = vadd.f32 %v3835_v26, %v3821_v39  ;;  %v3797_v50 = vpop.permute.xlu1 %3796 }
 0x7a8   : > { %v3808_v17 = vsel %vm1054_vm9, %v3797_v50, %v3799_v7  ;;  %v3861_v61 = vpack.c.bf16 %v3855_v24, %v3852_v30  ;;  %v3793_v52 = vpop.permute.xlu0 %3792  ;;  %v10762_v7 = vld [vmem:[#allocation64_spill] sm:$0xff] }
 0x7a9   : > { %v3854_v32 = vmax.f32 %v3845_v9, 0.0  ;;  %v3826_v48 = vmax.f32 %v3739_v22, %v3808_v17  ;;  %4830 = vmatprep.mubr.msk.bf16.mxu1 %vm3997_vm5, %v3862_v1  ;;  %v10763_v1 = vld [vmem:[#allocation61_spill] sm:$0xff] }
 0x7aa   : > { %4042 = vmatprep.mubr.bf16.mxu0 %v3861_v61  ;;  %v10765_v61 = vld [vmem:[#allocation65_spill] sm:$0xff] }
 0x7ab   : > { %v3860_v8 = vpack.c.bf16 %v3854_v32, %v3851_v25  ;;  %v3850_v14 = vadd.f32 %v3840_v33, %v3826_v48  ;;  %v3795_v6 = vpop.permute.xlu1 %3794  ;;  %v10766_v48 = vld [vmem:[#allocation67_spill] sm:$0xff] }
 0x7ac   : > { %v3806_v35 = vsel %vm1054_vm9, %v3793_v52, %v3795_v6  ;;  %v3807_v58 = vsel %vm1054_vm9, %v3795_v6, %v3797_v50  ;;  %vm10758_vm9 = vcmask 130048   ;;  %v10764_v50 = vld [vmem:[#allocation63_spill] sm:$0xff]  ;;  %v10767_v52 = vld [vmem:[#allocation62_spill] sm:$0xff] }
 0x7ad   : > { %v3859_v46 = vmax.f32 %v3850_v14, 0.0  ;;  %v3824_v37 = vmax.f32 %v9526_v21, %v3806_v35  ;;  %v3825_v62 = vmax.f32 %v9532_v55, %v3807_v58  ;;  %4043 = vmatmul.mubr.bf16.vlgmr.msra.gmra.mxu0 %v3860_v8  ;;  %v10756_v21 = vld [vmem:[#allocation59_spill] sm:$0xff]  ;;  %v10757_v55 = vld [vmem:[#allocation57_spill] sm:$0xff]  ;;  %vm10759_vm3 = vmmov %vm10758_vm9 }
 0x7ae   : > { %4835 = vmatpush3.bf16.msra.mxu0 %v4713_v12  ;;  %v4712_v10 = vcombine.high %v10757_v55, %v10756_v21  ;;  %vm10760_vm7 = vmmov %vm10759_vm3  ;;  %v10768_v35 = vld [vmem:[#allocation69_spill] sm:$0xff] }
 0x7af   : > { %v3865_v53 = vpack.c.bf16 %v3859_v46, %v3859_v46  ;;  %v3848_v34 = vadd.f32 %v3840_v33, %v3824_v37  ;;  %v3849_v40 = vadd.f32 %v3840_v33, %v3825_v62  ;;  %v4711_v33 = vcombine.low %v10757_v55, %v10756_v21  ;;  %vm10761_vm12 = vmmov %vm10759_vm3  ;;  %v10769_v37 = vld [vmem:[#allocation66_spill] sm:$0xff]  ;;  %v5477_v21 = vld [vmem:[%s9694_s8 + $0x60] sm:$0xff] (%p111_p0)  }
 0x7b0   : > { %4144 = vmatprep.subr.bf16.mxu1 %v4712_v10  ;;  %v5481_v55 = vld [vmem:[%s9694_s8 + $0x98] sm:$0xff] (%p111_p0)  }
 0x7b1   : > { %4831 = vmatmul.mubr.msk.bf16.vlgmr.msra.gmra.mxu1 %vm3997_vm5, %v3865_v53  ;;  %v3858_v43 = vmax.f32 %v3849_v40, 0.0  ;;  %v3857_v0 = vmax.f32 %v3848_v34, 0.0  ;;  %v10770_v40 = vld [vmem:[#allocation68_spill] sm:$0xff] }
 0x7b2   : > { %4162 = vmatprep.mubr.bf16.mxu1 %v10753_v23  ;;  %4145 = vmatpush1.bf16.msra.mxu1 %v4711_v33 }
 0x7b3   : > { %v3864_v47 = vpack.c.bf16 %v3858_v43, %v3858_v43  ;;  %v3863_v26 = vpack.c.bf16 %v3857_v0, %v3857_v0 }
 0x7b5   : > { %4050 = vmatprep.mubr.bf16.mxu0 %v3864_v47 }
 0x7b6   : > { %4051 = vmatmul.mubr.bf16.gmra.mxu0 %v3863_v26 }
 0x86d   : > { %v4763_v27 = vpop.f32.mrf.mxu0 }
 0x86f   : > { %v4764_v4 = vpop.f32.mrf.mxu0 }
 0x870   : > { %v4765_v16 = vadd.f32 %v4764_v4, %v4763_v27 }
 0x871   : > { %v4766_v2 = vpop.f32.mrf.mxu0  ;;  %v4832_v29 = vpop.f32.mrf.mxu1 }
 0x873   : > { %v4767_v5 = vpop.f32.mrf.mxu0  ;;  %v4092_v56 = vpop.f32.mrf.mxu1 }
 0x874   : > { %v4768_v13 = vadd.f32 %v4767_v5, %v4766_v2  ;;  %v4093_v45 = vadd.f32 %v4765_v16, %v4092_v56 }
 0x875   : > { %v4833_v31 = vpop.f32.mrf.mxu1 }
 0x876   : > { %v4769_v15 = vpop.f32.mrf.mxu0  ;;  %v5566_v31 = vmov 1966171168  }
 0x877   : > { %v4095_v36 = vpop.f32.mrf.mxu1  ;;  %v4273_v16 = vunpack.c.l.s4 %v5566_v31 }
 0x878   : > { %v4096_v19 = vadd.f32 %v4768_v13, %v4095_v36  ;;  %v4770_v44 = vpop.f32.mrf.mxu0 }
 0x879   : > { %v4771_v38 = vadd.f32 %v4770_v44, %v4769_v15 }
 0x87a   : > { %v4106_v59 = vpack.c.bf16 %v4096_v19, %v4093_v45  ;;  %v4772_v51 = vpop.f32.mrf.mxu0 }
 0x87b   : > { %v4101_v42 = vadd.f32 %v4832_v29, %v4771_v38  ;;  %v4274_v38 = vunpack.c.0.s8 %v4273_v16 }
 0x87c   : > { %v4773_v41 = vpop.f32.mrf.mxu0  ;;  %4714 = vmatmul.mubr.msk.bf16.vlgmr.msra.gmra.mxu1 %vm10758_vm9, %v4106_v59  ;;  %4836 = vmatprep.mubr.msk.bf16.mxu0 %vm10759_vm3, %v4106_v59 }
 0x87d   : > { %v4107_v20 = vpack.c.bf16 %v4101_v42, %v4101_v42  ;;  %4172 = vmatprep.mubr.bf16.mxu1 %v10753_v23 }
 0x87f   : > { %4837 = vmatmul.mubr.msk.bf16.vlgmr.msra.gmra.mxu0 %vm10760_vm7, %v4107_v20 }
 0x884   : > { %4715 = vmatmul.mubr.msk.bf16.gmra.mxu1 %vm10761_vm12, %v4107_v20 }
 0x93c   : > { %v4164_v49 = vpop.f32.mrf.mxu1 }
 0x93d   : > { %v4229_v9 = vmul.f32 %v4164_v49, %v10763_v1  ;;  %v10771_v49 = vld [vmem:[#allocation70_spill] sm:$0xff]  ;;  %v10772_v1 = vlaneseq }
 0x93e   : > { %v4166_v54 = vpop.f32.mrf.mxu1 }
 0x93f   : > { %v4838_v60 = vpop.f32.mrf.mxu0  ;;  %v4230_v6 = vmul.f32 %v4166_v54, %v10767_v52  ;;  %v4277_v54 = vsub.s32 %v4274_v38, %v10771_v49  ;;  %v5482_v52 = vld [vmem:[%s9694_s8 + $0x50] sm:$0xff] (%p111_p0)  }
 0x940   : > { %v4168_v18 = vpop.f32.mrf.mxu1  ;;  %v4237_v58 = vmul.f32 %v4838_v60, %v10768_v35  ;;  %v5483_v35 = vld [vmem:[%s9694_s8 + $0x10] sm:$0xff] (%p111_p0)  }
 0x941   : > { %v4215_v39 = vpop.f32.mrf.mxu0  ;;  %v4232_v30 = vmul.f32 %v4168_v18, %v10762_v7 }
 0x942   : > { %v4170_v24 = vpop.f32.mrf.mxu1  ;;  %v4231_v17 = vmul.f32 %v4215_v39, %v10764_v50  ;;  %v4260_v10 = vsel %vm4259_vm14, %v4237_v58, 0.0  ;;  %v5471_v50 = vld [vmem:[%s9694_s8 + $0x78] sm:$0xff] (%p111_p0)   ;;  %v5485_v58 = vld [vmem:[%s9694_s8 + $0x48] sm:$0xff] (%p111_p0)  }
 0x943   : > { %v4839_v22 = vpop.f32.mrf.mxu0  ;;  %v4233_v25 = vmul.f32 %v4170_v24, %v10765_v61  ;;  %v4238_v46 = vadd.f32 %v4232_v30, %v4229_v9  ;;  %v5567_v61 = vmov (%p111_p0), 0.0   ;;  %4786 = vmatprep.subr.bf16.mxu0 (%p111_p0), %v5471_v50 }
 0x944   : > { %v4174_v32 = vpop.f32.mrf.mxu1  ;;  %v4256_v0 = vsel %vm2894_vm1, %v4231_v17, 0.0  ;;  %v5472_v17 = vld [vmem:[%s9694_s8 + $0x38] sm:$0xff] (%p111_p0)   ;;  %4840 = vmatprep.subr.bf16.mxu1 (%p111_p0), %v5567_v61  ;;  %4848 = vmatprep.mubr.msk.bf16.mxu1 (%p111_p0), %vm5568_vm10, %v5567_v61 }
 0x945   : > { %v4235_v8 = vmul.f32 %v4174_v32, %v10766_v48  ;;  %v4218_v14 = vpop.f32.mrf.mxu0  ;;  %v4247_v23 = vadd.f32 %v4233_v25, %v4230_v6  ;;  %v5473_v25 = vld [vmem:[%s9694_s8 + $0x70] sm:$0xff] (%p111_p0)   ;;  %4787 = vmatpush3.bf16.msra.mxu0 (%p111_p0), %v5472_v17  ;;  %v5478_v32 = vld [vmem:[%s9694_s8 + $0x20] sm:$0xff] (%p111_p0)   ;;  %v5479_v48 = vld [vmem:[%s9694_s8 + $0x58] sm:$0xff] (%p111_p0)   ;;  %4841 = vmatpush3.bf16.msra.mxu1 (%p111_p0), %v5481_v55 }
 0x946   : > { %v4234_v62 = vmul.f32 %v4218_v14, %v10769_v37  ;;  %v4176_v53 = vpop.f32.mrf.mxu1  ;;  %4788 = vmatprep.subr.bf16.mxu0 (%p111_p0), %v5473_v25  ;;  %4842 = vmatprep.subr.bf16.mxu1 (%p111_p0), %v5567_v61  ;;  %v5480_v14 = vld [vmem:[%s9694_s8 + $0x18] sm:$0xff] (%p111_p0)   ;;  %v5487_v6 = vld [vmem:[%s9694_s8 + $0x88] sm:$0xff] (%p111_p0)  }
 0x947   : > { %v4239_v34 = vsel %vm2639_vm8, %v4235_v8, 0.0  ;;  %v4236_v43 = vmul.f32 %v4176_v53, %v10770_v40  ;;  %v5484_v8 = vld [vmem:[%s9694_s8 + $0x90] sm:$0xff] (%p111_p0)   ;;  %v5486_v40 = vld [vmem:[%s9694_s8 + $0x8] sm:$0xff] (%p111_p0)  }
 0x948   : > { %v4240_v47 = vadd.f32 %v4239_v34, %v4238_v46  ;;  %v4257_v26 = vsel %vm2894_vm1, %v4234_v62, 0.0  ;;  %v4178_v3 = vpop.f32.mrf.mxu1  ;;  %v5490_v46 = vld [vmem:[%s9694_s8 + $0x80] sm:$0xff] (%p111_p0)   ;;  %v5491_v34 = vld [vmem:[%s9696_s10 + $0x18] ss:$0 sps:$4 sm:$0x11] (%p111_p0)  }
 0x949   : > { %v4258_v57 = vadd.f32 %v4257_v26, %v4256_v0  ;;  %v4248_v12 = vsel %vm2639_vm8, %v4236_v43, 0.0  ;;  %vm4297_vm8 = vcmp.lt.s32.totalorder %v10772_v1, 320  ;;  %4789 = vmatpush3.bf16.msra.mxu0 (%p111_p0), %v5474_v28  ;;  %4843 = vmatpush3.bf16.msra.mxu1 (%p111_p0), %v5484_v8  ;;  %v5488_v0 = vld [vmem:[%s9694_s8 + $0x40] sm:$0xff] (%p111_p0)  }
 0x94a   : > { %v4241_v33 = vrot.slane %v4240_v47, 4  ;;  %v4249_v27 = vadd.f32 %v4248_v12, %v4247_v23  ;;  %v4179_v4 = vpop.f32.mrf.mxu1  ;;  %4790 = vmatprep.subr.bf16.mxu0 (%p111_p0), %v5475_v11  ;;  %4844 = vmatprep.subr.bf16.mxu1 (%p111_p0), %v5567_v61  ;;  %v4605_v23 = vsel (%p111_p0), %vm4603_vm11, %v5491_v34, 0  ;;  %v5493_v12 = vld [vmem:[%s9696_s10 + $0x8] sm:$0xff] (%p111_p0)  }
 0x94b   : > { %v4261_v2 = vadd.f32 %v4260_v10, %v4258_v57  ;;  %v5492_v57 = vld [vmem:[%s9696_s10 + $0x10] sm:$0xff] (%p111_p0)   ;;  %v5494_v10 = vld [vmem:[%s9696_s10] sm:$0xff] (%p111_p0)  }
 0x94c   : > { %v4242_v29 = vadd.f32 %v4241_v33, %v4240_v47  ;;  %v4250_v5 = vrot.slane %v4249_v27, 4  ;;  %v5489_v47 = vld [vmem:[%s9694_s8] sm:$0xff] (%p111_p0)  }
 0x94d   : > { %v4262_v56 = vrot.slane %v4261_v2, 4  ;;  %4791 = vmatpush3.bf16.msra.mxu0 (%p111_p0), %v5476_v63  ;;  %4845 = vmatpush3.bf16.msra.mxu1 (%p111_p0), %v5487_v6 }
 0x94e   : > { %v4243_v13 = vrot.slane %v4242_v29, 2  ;;  %v4251_v15 = vadd.f32 %v4250_v5, %v4249_v27  ;;  %4792 = vmatprep.subr.bf16.mxu0 (%p111_p0), %v5477_v21  ;;  %4846 = vmatprep.subr.bf16.mxu1 (%p111_p0), %v5567_v61  ;;  %v4719_v5 = vld [vmem:[%s9695_s9] ss:$0 sm:$0xff] (%p111_p0) }
 0x94f   : > { %v4263_v36 = vadd.f32 %v4262_v56, %v4261_v2 }
 0x950   : > { %v4244_v45 = vadd.f32 %v4243_v13, %v4242_v29  ;;  %v4252_v19 = vrot.slane %v4251_v15, 2 }
 0x951   : > { %v4264_v44 = vrot.slane %v4263_v36, 2  ;;  %4793 = vmatpush3.bf16.msra.mxu0 (%p111_p0), %v5478_v32  ;;  %4847 = vmatpush3.bf16.msra.mxu1 (%p111_p0), %v5490_v46 }
 0x952   : > { %v4245_v59 = vrot.slane %v4244_v45, 1  ;;  %v4253_v51 = vadd.f32 %v4252_v19, %v4251_v15  ;;  %4794 = vmatprep.subr.bf16.mxu0 (%p111_p0), %v5479_v48  ;;  %4852 = vmatprep.subr.bf16.mxu1 (%p111_p0), %v5567_v61 }
 0x953   : > { %v4265_v42 = vadd.f32 %v4264_v44, %v4263_v36  ;;  %v4741_v44 = vld [vmem:[%s9697_s11] ss:$0 sm:$0xff] (%p111_p0) }
 0x954   : > { %v4254_v41 = vrot.slane %v4253_v51, 1  ;;  %v4246_v60 = vadd.f32 %v4245_v59, %v4244_v45 }
 0x955   : > { %v4266_v20 = vrot.slane %v4265_v42, 1  ;;  %4795 = vmatpush3.bf16.msra.mxu0 (%p111_p0), %v5480_v14 }
 0x956   : > { %v4255_v18 = vadd.f32 %v4254_v41, %v4253_v51  ;;  %4796 = vmatprep.subr.bf16.mxu0 (%p111_p0), %v5482_v52 }
 0x957   : > { %v4267_v39 = vadd.f32 %v4266_v20, %v4265_v42 }
 0x958   : > { %v4271_v7 = vcombine.low %v4246_v60, %v4255_v18 }
 0x959   : > { %v4285_v30 = vrot.slane %v4267_v39, %v4277_v54  ;;  %4797 = vmatpush3.bf16.msra.mxu0 (%p111_p0), %v5483_v35 }
 0x95a   : > { %v4278_v24 = vrot.slane %v4271_v7, %v4277_v54  ;;  %4798 = vmatprep.subr.bf16.mxu0 (%p111_p0), %v5485_v58 }
 0x95c   : > { %v4286_v22 = vcombine.low %v4278_v24, %v4285_v30  ;;  %113 = sbr.rel (!%p111_p0) target bundleno = 36 (0x24), region = 77 }
 0x95d   :  { %4799 = vmatpush3.bf16.msra.mxu0 (%p111_p0), %v5486_v40 }
 0x95e   : > { %v4293_v9 = vrot.slane %v4286_v22, %v4277_v54  ;;  %4800 = vmatprep.subr.bf16.mxu0 (%p111_p0), %v5488_v0 }
 0x960   : > { %4303 = vst.msk [vmem:[%s4302_s19] ss:$8 sm:$0x7] %vm4297_vm8, %v4293_v9 }
 0x961   :  { %4801 = vmatpush3.bf16.msra.mxu0 %v5489_v47 }
 0x967   :  { %v4306_v37 = vld [vmem:[#allocation2 + $0x8] sm:$0xff]  ;;  %v4307_v62 = vld [vmem:[#allocation2 + $0x10] sm:$0xff]  ;;  %v4305_v26 = vld [vmem:[#allocation2] sm:$0xff] }
 0x968   :  { %v4309_v53 = vpack.c.bf16 %v4306_v37, %v4306_v37  ;;  %v4310_v43 = vpack.c.bf16 %v4307_v62, %v4307_v62  ;;  %v4308_v3 = vpack.c.bf16 %v4305_v26, %v4305_v26 }
 0x96a   :  { %4514 = vmatprep.mubr.bf16.mxu0 %v4309_v53  ;;  %4849 = vmatmul.mubr.msk.bf16.vlgmr.msra.gmra.mxu1 %vm2894_vm1, %v4310_v43  ;;  %vm4599_vm1 = vcmask 408576  }
 0x96b   :  { %4853 = vmatpush3.bf16.msra.mxu1 %v4605_v23  ;;  %4860 = vmatprep.mubr.msk.bf16.mxu1 %vm5568_vm10, %v5567_v61 }
 0x96c   :  { %4854 = vmatprep.subr.bf16.mxu1 %v5567_v61  ;;  %4515 = vmatmul.mubr.bf16.vlgmr.msra.gmra.mxu0 %v4308_v3 }
 0x96f   :  { %4855 = vmatpush3.bf16.msra.mxu1 %v5492_v57 }
 0x970   :  { %4856 = vmatprep.subr.bf16.mxu1 %v5567_v61 }
 0x973   :  { %4857 = vmatpush3.bf16.msra.mxu1 %v5493_v12 }
 0x974   :  { %4858 = vmatprep.subr.bf16.mxu1 %v5567_v61 }
 0x977   :  { %4859 = vmatpush3.bf16.msra.mxu1 %v5494_v10 }
 0xa2a   :  { %v4556_v33 = vpop.f32.mrf.mxu1 }
 0xa2c   :  { %v4850_v27 = vpop.f32.mrf.mxu1  ;;  %v4802_v29 = vpop.f32.mrf.mxu0 }
 0xa2e   :  { %v4559_v4 = vpop.f32.mrf.mxu1  ;;  %v4803_v56 = vpop.f32.mrf.mxu0 }
 0xa2f   :  { %v4804_v31 = vadd.f32 %v4803_v56, %v4802_v29 }
 0xa30   :  { %v4851_v2 = vpop.f32.mrf.mxu1  ;;  %v4805_v16 = vpop.f32.mrf.mxu0 }
 0xa31   :  { %v4517_v13 = vadd.f32 %v4804_v31, %v4719_v5 }
 0xa32   :  { %v4806_v15 = vpop.f32.mrf.mxu0 }
 0xa33   :  { %v4557_v36 = vadd.f32 %v4556_v33, %v4517_v13 }
 0xa35   :  { %v4562_v45 = vmax.f32 %v4557_v36, 0.0 }
 0xa37   :  { %v4563_v19 = vpack.c.bf16 %v4562_v45, %v4562_v45 }
 0xa39   :  { %4861 = vmatmul.mubr.msk.bf16.vlgmr.msra.gmra.mxu1 %vm4599_vm1, %v4563_v19 }
 0xaf9   :  { %v4641_v38 = vpop.f32.mrf.mxu1 }
 0xafa   :  { %v4642_v59 = vadd.f32 %v4741_v44, %v4641_v38 }
 0xafb   :  { %v4862_v51 = vpop.f32.mrf.mxu1 }
 0xafc   :  { %v4648_v42 = vsel %vm3048_vm6, %v4642_v59, -inf }
 0xafd   :  { %4649 = vmax.xlane.f32.xlu0 %v4648_v42  ;;  %v4644_v41 = vpop.f32.mrf.mxu1 }
 0xaff   :  { %v4863_v20 = vpop.f32.mrf.mxu1 }
 0xb86   :  { %v4650_v49 = vpop.xlane.xlu0 %4649 }
 0xb87   :  { %v4651_v54 = vsub.f32 %v4642_v59, %v4650_v49 }
 0xb89   :  { %v4652_v60 = vmul.f32 1.442695, %v4651_v54 }
 0xb8b   :  { %5495 = vpow2.f32 %v4652_v60 }
 0xb98   :  { %v5496_v18 = vpop.eup %5495 }
 0xb99   :  { %v4654_v39 = vsel %vm3048_vm6, %v5496_v18, 0.0 }
 0xb9a   :  { %4655 = vadd.xlane.f32.xlu0 %v4654_v39 }
 0xc23   :  { %v4656_v7 = vpop.xlane.xlu0 %4655 }
 0xc24   :  { %5497 = vlog2.f32 %v4656_v7 }
 0xc31   :  { %v5498_v30 = vpop.eup %5497 }
 0xc32   :  { %v4658_v24 = vmul.f32 0.6931472, %v5498_v30 }
 0xc34   :  { %v4659_v22 = vsub.f32 %v4651_v54, %v4658_v24 }
 0xc36   :  { %4660 = vst.msk [vmem:[%s9698_s12] sm:$0xff] %vm3048_vm6, %v4659_v22 }

</bundles_post_ra>
